<compile_context>
chip_gen: v6e
topology: v6e:2x2x1
jax: 0.10.0
libtpu: 0.0.40
codegen_flags: <defaults>
</compile_context>

<pallas_src>
import math

import jax
import jax.numpy as jnp
from jax.experimental import pallas as pl
from jax.experimental.pallas import tpu as pltpu

# ---------------- problem sizes (consistent with the module) ----------------
INPUT_DIM = 4        # D
NUM_FREQ = 8         # F  -> per-dim feature width = 2F + 1 = 17
HIDDEN = 32          # H  -> fused hidden width D*H = 128 (one full vreg of lanes)
TILE_N = 1024        # rows (tokens) per grid step (large -> amortize per-step overhead)

_EPS = 1e-5
_TWO_PI = 2.0 * math.pi


def _round_up(x, m):
    return ((x + m - 1) // m) * m


# ---------------------------------------------------------------------------
# Kernel
# ---------------------------------------------------------------------------
def fourier_embedding_kernel(
    x_ref,      # (TN, D)           raw continuous inputs
    fsbd_ref,   # (D, D*F)          block-diagonal freqs * 2*pi
    w1c_ref,    # (D*F, D*H)        block-diagonal first-linear (cos part)
    w1s_ref,    # (D*F, D*H)        block-diagonal first-linear (sin part)
    w1x_ref,    # (D, D*H)          block-diagonal first-linear (identity part)
    aff1_ref,   # (3, D*H)          rows: [b1 | ln_gamma | ln_beta] (flattened per-dim)
    g_ref,      # (D*H, D*H)        block-diagonal 1/H group-mean matrix
    w2_ref,     # (D*H, H)          stacked second linears (sum over dims fused)
    vec_ref,    # (4, H)            rows: [sum_d b2_d | out_ln_gamma | out_ln_beta | out_bias]
    wo_ref,     # (H, H)            to_out linear weight
    out_ref,    # (TN, H)
):
    x = x_ref[...]                                              # (TN, D)

    # Angles for every (dim, freq) pair via one tiny MXU matmul -> lane-dense
    # (TN, D*F) slab, then ONE cos and ONE sin EUP stream each.
    ang = jnp.dot(x, fsbd_ref[...], preferred_element_type=jnp.float32)   # (TN, D*F)
    c = jnp.cos(ang)
    s = jnp.sin(ang)

    # Fused first linear for all D per-dim MLPs: three block-diagonal matmuls
    # (no feature concatenate, everything lane-dense / 128-wide output).
    h = (jnp.dot(c, w1c_ref[...], preferred_element_type=jnp.float32)
         + jnp.dot(s, w1s_ref[...], preferred_element_type=jnp.float32)
         + jnp.dot(x, w1x_ref[...], preferred_element_type=jnp.float32)
         + aff1_ref[0:1, :])                                    # (TN, D*H)

    # Per-dim LayerNorm: group statistics on the MXU (two-pass form).
    # h @ G broadcasts each 32-lane group mean across its lanes.
    gm = g_ref[...]
    mu = jnp.dot(h, gm, preferred_element_type=jnp.float32)     # (TN, D*H) group means
    cen = h - mu
    var = jnp.dot(cen * cen, gm, preferred_element_type=jnp.float32)
    h = cen * jax.lax.rsqrt(var + _EPS) * aff1_ref[1:2, :] + aff1_ref[2:3, :]
    h = jnp.maximum(h, 0.0)

    # Fused second linears + sum over input dims (biases pre-summed).
    acc = jnp.dot(h, w2_ref[...], preferred_element_type=jnp.float32)
    acc = acc + vec_ref[0:1, :]                                 # (TN, H)

    # to_out: LayerNorm -> ReLU -> Linear (single H=32 group; exact f32 stats).
    mu2 = jnp.mean(acc, axis=-1, keepdims=True)
    var2 = jnp.mean((acc - mu2) ** 2, axis=-1, keepdims=True)
    y = (acc - mu2) * jax.lax.rsqrt(var2 + _EPS) * vec_ref[1:2, :] + vec_ref[2:3, :]
    y = jnp.maximum(y, 0.0)
    y = jnp.dot(y, wo_ref[...], preferred_element_type=jnp.float32) + vec_ref[3:4, :]

    out_ref[...] = y.astype(out_ref.dtype)


# ---------------------------------------------------------------------------
# Wrapper
# ---------------------------------------------------------------------------
def fourier_embedding(continuous_inputs, packed, *, tile_n=TILE_N):
    """continuous_inputs: (..., D) float. Returns (..., HIDDEN) float32."""
    x = jnp.asarray(continuous_inputs, jnp.float32)
    lead = x.shape[:-1]
    assert x.shape[-1] == INPUT_DIM
    n = math.prod(lead) if lead else 1
    if n == 0:                                    # empty input guard
        return jnp.zeros((*lead, HIDDEN), jnp.float32)
    x2 = x.reshape(n, INPUT_DIM)

    # Tile choice: big tiles amortize per-grid-step overhead; whenever n > 8
    # make sure there are at least 2 row tiles so v7x's two TensorCores both
    # get work (grid axis is "parallel"); VMEM is never the constraint here.
    if n <= 8:
        tn = 8
    else:
        tn = min(tile_n, _round_up(pl.cdiv(n, 2), 8))
    n_pad = _round_up(n, tn)
    if n_pad != n:
        x2 = jnp.pad(x2, ((0, n_pad - n), (0, 0)))

    def full(arr):
        return pl.BlockSpec(arr.shape, lambda i: (0,) * arr.ndim)

    grid_spec = pltpu.PrefetchScalarGridSpec(
        num_scalar_prefetch=0,
        grid=(n_pad // tn,),
        in_specs=[
            pl.BlockSpec((tn, INPUT_DIM), lambda i: (i, 0)),    # x (blocked rows)
            full(packed["fs_bd"]),
            full(packed["w1c"]),
            full(packed["w1s"]),
            full(packed["w1x"]),
            full(packed["aff1"]),
            full(packed["gmat"]),
            full(packed["w2_flat"]),
            full(packed["vec_out"]),
            full(packed["wo"]),
        ],
        out_specs=pl.BlockSpec((tn, HIDDEN), lambda i: (i, 0)),
    )

    out = pl.pallas_call(
        fourier_embedding_kernel,
        out_shape=jax.ShapeDtypeStruct((n_pad, HIDDEN), jnp.float32),
        grid_spec=grid_spec,
        compiler_params=pltpu.CompilerParams(
            dimension_semantics=("parallel",)),   # independent row tiles (v7x megacore)
    )(x2, packed["fs_bd"], packed["w1c"], packed["w1s"], packed["w1x"],
      packed["aff1"], packed["gmat"], packed["w2_flat"], packed["vec_out"],
      packed["wo"])

    return out[:n].reshape(*lead, HIDDEN)


# ---------------------------------------------------------------------------
# Parameters (natural / PyTorch-like layout) and wrapper-side packing
# ---------------------------------------------------------------------------
def init_params(key):
    d, f, h = INPUT_DIM, NUM_FREQ, HIDDEN
    ks = jax.random.split(key, 8)
    s1 = 1.0 / math.sqrt(2 * f + 1)
    s2 = 1.0 / math.sqrt(h)
    return {
        "freqs": jax.random.normal(ks[0], (d, f), jnp.float32),              # Embedding(d, f)
        "w1": jax.random.uniform(ks[1], (d, 2 * f + 1, h), jnp.float32, -s1, s1),  # (in,out)
        "b1": jax.random.uniform(ks[2], (d, h), jnp.float32, -s1, s1),
        "g1": jnp.ones((d, h), jnp.float32),
        "be1": jnp.zeros((d, h), jnp.float32),
        "w2": jax.random.uniform(ks[3], (d, h, h), jnp.float32, -s2, s2),    # (in,out)
        "b2": jax.random.uniform(ks[4], (d, h), jnp.float32, -s2, s2),
        "go": jnp.ones((h,), jnp.float32),
        "bo": jnp.zeros((h,), jnp.float32),
        "wo": jax.random.uniform(ks[5], (h, h), jnp.float32, -s2, s2),       # (in,out)
        "boo": jax.random.uniform(ks[6], (h,), jnp.float32, -s2, s2),
    }


def pack_params(p):
    """Repack per-dim MLP params into the fused, lane-dense kernel layout."""
    d, f, h = INPUT_DIM, NUM_FREQ, HIDDEN
    fs = p["freqs"] * _TWO_PI                                   # (D, F), 2*pi folded in

    # Block-diagonal frequency matrix: ang = x @ fs_bd, ang[:, d*F:(d+1)*F] = x[:,d]*fs[d].
    fs_bd = jnp.zeros((d, d * f), jnp.float32)
    for i in range(d):
        fs_bd = fs_bd.at[i, i * f:(i + 1) * f].set(fs[i])

    # Split block-diagonal first linear: h = cos@w1c + sin@w1s + x@w1x + b1.
    w1c = jnp.zeros((d * f, d * h), jnp.float32)
    w1s = jnp.zeros((d * f, d * h), jnp.float32)
    w1x = jnp.zeros((d, d * h), jnp.float32)
    for i in range(d):
        w1c = w1c.at[i * f:(i + 1) * f, i * h:(i + 1) * h].set(p["w1"][i, :f, :])
        w1s = w1s.at[i * f:(i + 1) * f, i * h:(i + 1) * h].set(p["w1"][i, f:2 * f, :])
        w1x = w1x.at[i, i * h:(i + 1) * h].set(p["w1"][i, 2 * f, :])

    aff1 = jnp.stack(
        [p["b1"].reshape(-1), p["g1"].reshape(-1), p["be1"].reshape(-1)], axis=0)  # (3, D*H)

    # Block-diagonal group-mean matrix for MXU LayerNorm stats.
    gmat = jnp.kron(jnp.eye(d, dtype=jnp.float32),
                    jnp.full((h, h), 1.0 / h, jnp.float32))      # (D*H, D*H)

    w2_flat = p["w2"].reshape(d * h, h)                          # (D*H, H) -> fused sum over dims
    vec_out = jnp.stack(
        [p["b2"].sum(axis=0), p["go"], p["bo"], p["boo"]], axis=0)               # (4, H)

    return {"fs_bd": fs_bd, "w1c": w1c, "w1s": w1s, "w1x": w1x, "aff1": aff1,
            "gmat": gmat, "w2_flat": w2_flat, "vec_out": vec_out, "wo": p["wo"]}


# ---------------------------------------------------------------------------
# Pure-JAX reference matching the PyTorch forward semantics
# ---------------------------------------------------------------------------
def _ln(h, gamma, beta):
    mu = jnp.mean(h, axis=-1, keepdims=True)
    var = jnp.mean((h - mu) ** 2, axis=-1, keepdims=True)
    return (h - mu) * jax.lax.rsqrt(var + _EPS) * gamma + beta


def reference(x, p):
    lead = x.shape[:-1]
    xf = x.reshape(-1, INPUT_DIM)
    ang = xf[..., None] * p["freqs"] * _TWO_PI                   # (N, D, F)
    feat = jnp.concatenate([jnp.cos(ang), jnp.sin(ang), xf[..., None]], axis=-1)
    acc = jnp.zeros((xf.shape[0], HIDDEN), jnp.float32)
    for i in range(INPUT_DIM):
        hi = feat[:, i, :] @ p["w1"][i] + p["b1"][i]
        hi = _ln(hi, p["g1"][i], p["be1"][i])
        hi = jnp.maximum(hi, 0.0)
        hi = hi @ p["w2"][i] + p["b2"][i]
        acc = acc + hi
    y = _ln(acc, p["go"], p["bo"])
    y = jnp.maximum(y, 0.0)
    y = y @ p["wo"] + p["boo"]
    return y.reshape(*lead, HIDDEN)


if __name__ == "__main__":
    key = jax.random.PRNGKey(0)
    kx, kp = jax.random.split(key)

    batch, num_agents = 2, 256                       # (2, 256, 4) continuous inputs
    x = jax.random.normal(kx, (batch, num_agents, INPUT_DIM), jnp.float32)

    params = init_params(kp)
    packed = pack_params(params)

    out = fourier_embedding(x, packed)
    out = jax.block_until_ready(out)

    ref = reference(x, params)
    assert out.shape == (batch, num_agents, HIDDEN)
    assert jnp.allclose(out, ref, atol=2e-4, rtol=2e-4), "mismatch vs reference"
    print("KERNEL_OK")
</pallas_src>

<mosaic_0001>
module attributes {stable_mosaic.version = 11 : i64} {
  func.func @fourier_embedding_kernel(%arg0: i32, %arg1: memref<256x4xf32, #tpu.memory_space<vmem>>, %arg2: memref<4x32xf32, #tpu.memory_space<vmem>>, %arg3: memref<32x128xf32, #tpu.memory_space<vmem>>, %arg4: memref<32x128xf32, #tpu.memory_space<vmem>>, %arg5: memref<4x128xf32, #tpu.memory_space<vmem>>, %arg6: memref<3x128xf32, #tpu.memory_space<vmem>>, %arg7: memref<128x128xf32, #tpu.memory_space<vmem>>, %arg8: memref<128x32xf32, #tpu.memory_space<vmem>>, %arg9: memref<4x32xf32, #tpu.memory_space<vmem>>, %arg10: memref<32x32xf32, #tpu.memory_space<vmem>>, %arg11: memref<256x32xf32, #tpu.memory_space<vmem>>) attributes {dimension_semantics = [#tpu.dimension_semantics<parallel>], iteration_bounds = array<i64: 2>, scalar_prefetch = 0 : i64, scratch_operands = 0 : i64, tpu.core_type = #tpu.core_type<tc>, window_params = [{transform_indices = @transform_0, window_bounds = array<i64: 256, 4>}, {pipeline_mode = #tpu.pipeline_mode<synchronous>, transform_indices = @transform_1, window_bounds = array<i64: 4, 32>}, {pipeline_mode = #tpu.pipeline_mode<synchronous>, transform_indices = @transform_2, window_bounds = array<i64: 32, 128>}, {pipeline_mode = #tpu.pipeline_mode<synchronous>, transform_indices = @transform_3, window_bounds = array<i64: 32, 128>}, {pipeline_mode = #tpu.pipeline_mode<synchronous>, transform_indices = @transform_4, window_bounds = array<i64: 4, 128>}, {pipeline_mode = #tpu.pipeline_mode<synchronous>, transform_indices = @transform_5, window_bounds = array<i64: 3, 128>}, {pipeline_mode = #tpu.pipeline_mode<synchronous>, transform_indices = @transform_6, window_bounds = array<i64: 128, 128>}, {pipeline_mode = #tpu.pipeline_mode<synchronous>, transform_indices = @transform_7, window_bounds = array<i64: 128, 32>}, {pipeline_mode = #tpu.pipeline_mode<synchronous>, transform_indices = @transform_8, window_bounds = array<i64: 4, 32>}, {pipeline_mode = #tpu.pipeline_mode<synchronous>, transform_indices = @transform_9, window_bounds = array<i64: 32, 32>}, {transform_indices = @transform_10, window_bounds = array<i64: 256, 32>}]} {
    %c0 = arith.constant 0 : index
    %c0_0 = arith.constant 0 : index
    %0 = vector.load %arg1[%c0, %c0_0] : memref<256x4xf32, #tpu.memory_space<vmem>>, vector<256x4xf32>
    %c0_1 = arith.constant 0 : index
    %c0_2 = arith.constant 0 : index
    %1 = vector.load %arg2[%c0_1, %c0_2] : memref<4x32xf32, #tpu.memory_space<vmem>>, vector<4x32xf32>
    %cst = arith.constant dense<0.000000e+00> : vector<256x32xf32>
    %2 = tpu.matmul %0, %1, %cst {dimension_numbers = #tpu.dot_dimension_numbers<[1], [0], [0], [1], [0, 0, 1, 1], [], []>} : vector<256x4xf32>, vector<4x32xf32>, vector<256x32xf32> -> vector<256x32xf32>
    %3 = math.cos %2 : vector<256x32xf32>
    %4 = math.sin %2 : vector<256x32xf32>
    %c0_3 = arith.constant 0 : index
    %c0_4 = arith.constant 0 : index
    %5 = vector.load %arg3[%c0_3, %c0_4] : memref<32x128xf32, #tpu.memory_space<vmem>>, vector<32x128xf32>
    %cst_5 = arith.constant dense<0.000000e+00> : vector<256x128xf32>
    %6 = tpu.matmul %3, %5, %cst_5 {dimension_numbers = #tpu.dot_dimension_numbers<[1], [0], [0], [1], [0, 0, 1, 1], [], []>} : vector<256x32xf32>, vector<32x128xf32>, vector<256x128xf32> -> vector<256x128xf32>
    %c0_6 = arith.constant 0 : index
    %c0_7 = arith.constant 0 : index
    %7 = vector.load %arg4[%c0_6, %c0_7] : memref<32x128xf32, #tpu.memory_space<vmem>>, vector<32x128xf32>
    %cst_8 = arith.constant dense<0.000000e+00> : vector<256x128xf32>
    %8 = tpu.matmul %4, %7, %cst_8 {dimension_numbers = #tpu.dot_dimension_numbers<[1], [0], [0], [1], [0, 0, 1, 1], [], []>} : vector<256x32xf32>, vector<32x128xf32>, vector<256x128xf32> -> vector<256x128xf32>
    %9 = arith.addf %6, %8 : vector<256x128xf32>
    %c0_9 = arith.constant 0 : index
    %c0_10 = arith.constant 0 : index
    %10 = vector.load %arg5[%c0_9, %c0_10] : memref<4x128xf32, #tpu.memory_space<vmem>>, vector<4x128xf32>
    %cst_11 = arith.constant dense<0.000000e+00> : vector<256x128xf32>
    %11 = tpu.matmul %0, %10, %cst_11 {dimension_numbers = #tpu.dot_dimension_numbers<[1], [0], [0], [1], [0, 0, 1, 1], [], []>} : vector<256x4xf32>, vector<4x128xf32>, vector<256x128xf32> -> vector<256x128xf32>
    %12 = arith.addf %9, %11 : vector<256x128xf32>
    %c0_12 = arith.constant 0 : index
    %c0_13 = arith.constant 0 : index
    %13 = vector.load %arg6[%c0_12, %c0_13] : memref<3x128xf32, #tpu.memory_space<vmem>>, vector<1x128xf32>
    %14 = vector.broadcast %13 : vector<1x128xf32> to vector<256x128xf32>
    %15 = arith.addf %12, %14 : vector<256x128xf32>
    %c0_14 = arith.constant 0 : index
    %c0_15 = arith.constant 0 : index
    %16 = vector.load %arg7[%c0_14, %c0_15] : memref<128x128xf32, #tpu.memory_space<vmem>>, vector<128x128xf32>
    %cst_16 = arith.constant dense<0.000000e+00> : vector<256x128xf32>
    %17 = tpu.matmul %15, %16, %cst_16 {dimension_numbers = #tpu.dot_dimension_numbers<[1], [0], [0], [1], [0, 0, 1, 1], [], []>} : vector<256x128xf32>, vector<128x128xf32>, vector<256x128xf32> -> vector<256x128xf32>
    %18 = arith.subf %15, %17 : vector<256x128xf32>
    %19 = arith.mulf %18, %18 : vector<256x128xf32>
    %cst_17 = arith.constant dense<0.000000e+00> : vector<256x128xf32>
    %20 = tpu.matmul %19, %16, %cst_17 {dimension_numbers = #tpu.dot_dimension_numbers<[1], [0], [0], [1], [0, 0, 1, 1], [], []>} : vector<256x128xf32>, vector<128x128xf32>, vector<256x128xf32> -> vector<256x128xf32>
    %cst_18 = arith.constant 9.99999974E-6 : f32
    %21 = vector.broadcast %cst_18 : f32 to vector<256x128xf32>
    %22 = arith.addf %20, %21 : vector<256x128xf32>
    %23 = math.rsqrt %22 : vector<256x128xf32>
    %24 = arith.mulf %18, %23 : vector<256x128xf32>
    %c1 = arith.constant 1 : index
    %c0_19 = arith.constant 0 : index
    %25 = vector.load %arg6[%c1, %c0_19] : memref<3x128xf32, #tpu.memory_space<vmem>>, vector<1x128xf32>
    %26 = vector.broadcast %25 : vector<1x128xf32> to vector<256x128xf32>
    %27 = arith.mulf %24, %26 : vector<256x128xf32>
    %c2 = arith.constant 2 : index
    %c0_20 = arith.constant 0 : index
    %28 = vector.load %arg6[%c2, %c0_20] : memref<3x128xf32, #tpu.memory_space<vmem>>, vector<1x128xf32>
    %29 = vector.broadcast %28 : vector<1x128xf32> to vector<256x128xf32>
    %30 = arith.addf %27, %29 : vector<256x128xf32>
    %cst_21 = arith.constant 0.000000e+00 : f32
    %31 = vector.broadcast %cst_21 : f32 to vector<256x128xf32>
    %32 = arith.maximumf %30, %31 : vector<256x128xf32>
    %c0_22 = arith.constant 0 : index
    %c0_23 = arith.constant 0 : index
    %33 = vector.load %arg8[%c0_22, %c0_23] : memref<128x32xf32, #tpu.memory_space<vmem>>, vector<128x32xf32>
    %cst_24 = arith.constant dense<0.000000e+00> : vector<256x32xf32>
    %34 = tpu.matmul %32, %33, %cst_24 {dimension_numbers = #tpu.dot_dimension_numbers<[1], [0], [0], [1], [0, 0, 1, 1], [], []>} : vector<256x128xf32>, vector<128x32xf32>, vector<256x32xf32> -> vector<256x32xf32>
    %c0_25 = arith.constant 0 : index
    %c0_26 = arith.constant 0 : index
    %35 = vector.load %arg9[%c0_25, %c0_26] : memref<4x32xf32, #tpu.memory_space<vmem>>, vector<1x32xf32>
    %36 = vector.broadcast %35 : vector<1x32xf32> to vector<256x32xf32>
    %37 = arith.addf %34, %36 : vector<256x32xf32>
    %cst_27 = arith.constant dense<0.000000e+00> : vector<256xf32>
    %38 = vector.multi_reduction <add>, %37, %cst_27 [1] : vector<256x32xf32> to vector<256xf32>
    %39 = vector.shape_cast %38 : vector<256xf32> to vector<256x1xf32>
    %cst_28 = arith.constant 3.200000e+01 : f32
    %40 = vector.broadcast %cst_28 : f32 to vector<256x1xf32>
    %41 = arith.divf %39, %40 : vector<256x1xf32>
    %42 = vector.broadcast %41 : vector<256x1xf32> to vector<256x32xf32>
    %43 = arith.subf %37, %42 : vector<256x32xf32>
    %44 = arith.mulf %43, %43 : vector<256x32xf32>
    %cst_29 = arith.constant dense<0.000000e+00> : vector<256xf32>
    %45 = vector.multi_reduction <add>, %44, %cst_29 [1] : vector<256x32xf32> to vector<256xf32>
    %46 = vector.shape_cast %45 : vector<256xf32> to vector<256x1xf32>
    %cst_30 = arith.constant 3.200000e+01 : f32
    %47 = vector.broadcast %cst_30 : f32 to vector<256x1xf32>
    %48 = arith.divf %46, %47 : vector<256x1xf32>
    %49 = vector.broadcast %41 : vector<256x1xf32> to vector<256x32xf32>
    %50 = arith.subf %37, %49 : vector<256x32xf32>
    %cst_31 = arith.constant 9.99999974E-6 : f32
    %51 = vector.broadcast %cst_31 : f32 to vector<256x1xf32>
    %52 = arith.addf %48, %51 : vector<256x1xf32>
    %53 = math.rsqrt %52 : vector<256x1xf32>
    %54 = vector.broadcast %53 : vector<256x1xf32> to vector<256x32xf32>
    %55 = arith.mulf %50, %54 : vector<256x32xf32>
    %c1_32 = arith.constant 1 : index
    %c0_33 = arith.constant 0 : index
    %56 = vector.load %arg9[%c1_32, %c0_33] : memref<4x32xf32, #tpu.memory_space<vmem>>, vector<1x32xf32>
    %57 = vector.broadcast %56 : vector<1x32xf32> to vector<256x32xf32>
    %58 = arith.mulf %55, %57 : vector<256x32xf32>
    %c2_34 = arith.constant 2 : index
    %c0_35 = arith.constant 0 : index
    %59 = vector.load %arg9[%c2_34, %c0_35] : memref<4x32xf32, #tpu.memory_space<vmem>>, vector<1x32xf32>
    %60 = vector.broadcast %59 : vector<1x32xf32> to vector<256x32xf32>
    %61 = arith.addf %58, %60 : vector<256x32xf32>
    %cst_36 = arith.constant 0.000000e+00 : f32
    %62 = vector.broadcast %cst_36 : f32 to vector<256x32xf32>
    %63 = arith.maximumf %61, %62 : vector<256x32xf32>
    %c0_37 = arith.constant 0 : index
    %c0_38 = arith.constant 0 : index
    %64 = vector.load %arg10[%c0_37, %c0_38] : memref<32x32xf32, #tpu.memory_space<vmem>>, vector<32x32xf32>
    %cst_39 = arith.constant dense<0.000000e+00> : vector<256x32xf32>
    %65 = tpu.matmul %63, %64, %cst_39 {dimension_numbers = #tpu.dot_dimension_numbers<[1], [0], [0], [1], [0, 0, 1, 1], [], []>} : vector<256x32xf32>, vector<32x32xf32>, vector<256x32xf32> -> vector<256x32xf32>
    %c3 = arith.constant 3 : index
    %c0_40 = arith.constant 0 : index
    %66 = vector.load %arg9[%c3, %c0_40] : memref<4x32xf32, #tpu.memory_space<vmem>>, vector<1x32xf32>
    %67 = vector.broadcast %66 : vector<1x32xf32> to vector<256x32xf32>
    %68 = arith.addf %65, %67 : vector<256x32xf32>
    %c0_41 = arith.constant 0 : index
    %c0_42 = arith.constant 0 : index
    %69 = vector.load %arg11[%c0_41, %c0_42] : memref<256x32xf32, #tpu.memory_space<vmem>>, vector<256x32xf32>
    tpu.vector_store %arg11[%c0_41, %c0_42], %68 {strides = array<i32>} : memref<256x32xf32, #tpu.memory_space<vmem>>, vector<256x32xf32>,
    return
  }
  func.func @transform_0(%arg0: i32) -> (i32, i32) {
    %c0_i32 = arith.constant 0 : i32
    %c0_i32_0 = arith.constant 0 : i32
    return %arg0, %c0_i32 : i32, i32
  }
  func.func @transform_1(%arg0: i32) -> (i32, i32) {
    %c0_i32 = arith.constant 0 : i32
    %c0_i32_0 = arith.constant 0 : i32
    %c0_i32_1 = arith.constant 0 : i32
    return %c0_i32, %c0_i32_0 : i32, i32
  }
  func.func @transform_2(%arg0: i32) -> (i32, i32) {
    %c0_i32 = arith.constant 0 : i32
    %c0_i32_0 = arith.constant 0 : i32
    %c0_i32_1 = arith.constant 0 : i32
    return %c0_i32, %c0_i32_0 : i32, i32
  }
  func.func @transform_3(%arg0: i32) -> (i32, i32) {
    %c0_i32 = arith.constant 0 : i32
    %c0_i32_0 = arith.constant 0 : i32
    %c0_i32_1 = arith.constant 0 : i32
    return %c0_i32, %c0_i32_0 : i32, i32
  }
  func.func @transform_4(%arg0: i32) -> (i32, i32) {
    %c0_i32 = arith.constant 0 : i32
    %c0_i32_0 = arith.constant 0 : i32
    %c0_i32_1 = arith.constant 0 : i32
    return %c0_i32, %c0_i32_0 : i32, i32
  }
  func.func @transform_5(%arg0: i32) -> (i32, i32) {
    %c0_i32 = arith.constant 0 : i32
    %c0_i32_0 = arith.constant 0 : i32
    %c0_i32_1 = arith.constant 0 : i32
    return %c0_i32, %c0_i32_0 : i32, i32
  }
  func.func @transform_6(%arg0: i32) -> (i32, i32) {
    %c0_i32 = arith.constant 0 : i32
    %c0_i32_0 = arith.constant 0 : i32
    %c0_i32_1 = arith.constant 0 : i32
    return %c0_i32, %c0_i32_0 : i32, i32
  }
  func.func @transform_7(%arg0: i32) -> (i32, i32) {
    %c0_i32 = arith.constant 0 : i32
    %c0_i32_0 = arith.constant 0 : i32
    %c0_i32_1 = arith.constant 0 : i32
    return %c0_i32, %c0_i32_0 : i32, i32
  }
  func.func @transform_8(%arg0: i32) -> (i32, i32) {
    %c0_i32 = arith.constant 0 : i32
    %c0_i32_0 = arith.constant 0 : i32
    %c0_i32_1 = arith.constant 0 : i32
    return %c0_i32, %c0_i32_0 : i32, i32
  }
  func.func @transform_9(%arg0: i32) -> (i32, i32) {
    %c0_i32 = arith.constant 0 : i32
    %c0_i32_0 = arith.constant 0 : i32
    %c0_i32_1 = arith.constant 0 : i32
    return %c0_i32, %c0_i32_0 : i32, i32
  }
  func.func @transform_10(%arg0: i32) -> (i32, i32) {
    %c0_i32 = arith.constant 0 : i32
    %c0_i32_0 = arith.constant 0 : i32
    return %arg0, %c0_i32 : i32, i32
  }
}

</mosaic_0001>

<bundles_post_ra>
// kernel: tpu_custom_call.1
= control target key start
LH: loop header
LB: loop body
LE: loop exit
PB: predicated region body
PF: predicated region fallthrough
CT: control target
= control target key end

     0   :  { %s11943_s13 = smov 0   ;;  %s16697_s0 = inlined_call_operand.vmem [shape: f32[512,4], index: 0, kind: input, shape index: {}]   ;;  %s16698_s1 = inlined_call_operand.vmem [shape: f32[4,32], index: 1, kind: input, shape index: {}]   ;;  %s16699_s2 = inlined_call_operand.vmem [shape: f32[32,128], index: 2, kind: input, shape index: {}]   ;;  %s16700_s3 = inlined_call_operand.vmem [shape: f32[32,128], index: 3, kind: input, shape index: {}]   ;;  %s16701_s4 = inlined_call_operand.vmem [shape: f32[4,128], index: 4, kind: input, shape index: {}]   ;;  %s16702_s5 = inlined_call_operand.vmem [shape: f32[3,128], index: 5, kind: input, shape index: {}]   ;;  %s16703_s6 = inlined_call_operand.vmem [shape: f32[128,128], index: 6, kind: input, shape index: {}]   ;;  %s16704_s7 = inlined_call_operand.vmem [shape: f32[128,32], index: 7, kind: input, shape index: {}]   ;;  %s16705_s8 = inlined_call_operand.vmem [shape: f32[4,32], index: 8, kind: input, shape index: {}]   ;;  %s16706_s9 = inlined_call_operand.vmem [shape: f32[32,32], index: 9, kind: input, shape index: {}]   ;;  %s16707_s10 = inlined_call_operand.vmem [shape: f32[512,32], index: 10, kind: output, shape index: {}]  }
   0x1 LB: > { %s10182_s14 = sadd.s32 4294967295, %s11880_s13   ;;  %p10186_p0 = scmp.ge.s32.totalorder %s11880_s13, 1  ;;  %s11880_s13 = sphi %s11943_s13, %s20_s13  }
   0x2   : > { %p313_p1 = scmp.lt.s32.totalorder %s11880_s13, 3 }
   0x4   : > { %p314_p2 = pnand %p10186_p0, %p313_p1 }
   0x6   : > { %317 = sbr.rel (%p314_p2) target bundleno = 2477 (0x9ad), region = 60 }
   0xb   : > { %v395_v0 = vld [vmem:[%s16698_s1] sm:$0xf]  ;;  %vm16818_vm0 = vcmask 1043456   ;;  %s10187_s17 = sshll.u32 %s10182_s14, 5  ;;  %vm16766_vm1 = vcmask 31744  }
   0xc   : > { %10936 = vmatprep.subr.msk.mxu0 %vm16818_vm0, %v395_v0  ;;  %p352_p3 = scmp.lt.s32.totalorder %s10187_s17, 63  ;;  %v16720_v57 = vmov 683565275   ;;  %v16718_v60 = vmov 2475754826  }
   0xd   : > { %10937 = vmatpush3.msk.msra.mxu0 %vm16818_vm0, %v395_v0  ;;  %v16722_v62 = vmov 2131351028   ;;  %v16726_v0 = vmov 2102212464  }
   0xe   : > { %s17432_s17 = smov (!%p352_p3, %s10187_s17), 63 }
   0xf   : > { %s10188_s18 = sshll.u32 %s17432_s17, 3 }
  0x10   : > { %s11964_s21 = scalar_lea.vmem %s16697_s0, %s10188_s18  ;;  %s16596_s28 = scalar_lea.vmem %s16707_s10, %s10188_s18 }
  0x11   : > { %v363_v1 = vld [vmem:[%s11964_s21] sm:$0xff]  ;;  %v364_v2 = vld [vmem:[%s11964_s21 + $0x8] sm:$0xff]  ;;  %v365_v3 = vld [vmem:[%s11964_s21 + $0x10] sm:$0xff] }
  0x12   : > { %10938 = vmatprep.mubr.msk.f32.mxu0 %vm16766_vm1, %v363_v1  ;;  %v366_v4 = vld [vmem:[%s11964_s21 + $0x18] sm:$0xff]  ;;  %v367_v5 = vld [vmem:[%s11964_s21 + $0x20] sm:$0xff]  ;;  %v368_v6 = vld [vmem:[%s11964_s21 + $0x28] sm:$0xff] }
  0x13   : > { %10939 = vmatmul.mubr.msk.f32.vlgmr.msra.gmra.mxu0 %vm16766_vm1, %v364_v2  ;;  %v369_v7 = vld [vmem:[%s11964_s21 + $0x30] sm:$0xff]  ;;  %v370_v8 = vld [vmem:[%s11964_s21 + $0x38] sm:$0xff]  ;;  %v371_v9 = vld [vmem:[%s11964_s21 + $0x40] sm:$0xff]  ;;  %v16724_v2 = vmov 920167782  }
  0x14   : > { %10941 = vmatprep.mubr.msk.f32.mxu0 %vm16766_vm1, %v365_v3  ;;  %v372_v10 = vld [vmem:[%s11964_s21 + $0x48] sm:$0xff]  ;;  %v373_v11 = vld [vmem:[%s11964_s21 + $0x50] sm:$0xff]  ;;  %v374_v12 = vld [vmem:[%s11964_s21 + $0x58] sm:$0xff] }
  0x15   : > { %v375_v13 = vld [vmem:[%s11964_s21 + $0x60] sm:$0xff]  ;;  %v376_v14 = vld [vmem:[%s11964_s21 + $0x68] sm:$0xff]  ;;  %v377_v15 = vld [vmem:[%s11964_s21 + $0x70] sm:$0xff] }
  0x16   : > { %v378_v16 = vld [vmem:[%s11964_s21 + $0x78] sm:$0xff]  ;;  %v379_v17 = vld [vmem:[%s11964_s21 + $0x80] sm:$0xff]  ;;  %v380_v18 = vld [vmem:[%s11964_s21 + $0x88] sm:$0xff] }
  0x17   : > { %10942 = vmatmul.mubr.msk.f32.gmra.mxu0 %vm16766_vm1, %v366_v4  ;;  %v381_v19 = vld [vmem:[%s11964_s21 + $0x90] sm:$0xff]  ;;  %v382_v20 = vld [vmem:[%s11964_s21 + $0x98] sm:$0xff]  ;;  %v383_v21 = vld [vmem:[%s11964_s21 + $0xa0] sm:$0xff] }
  0x18   : > { %10944 = vmatprep.mubr.msk.f32.mxu0 %vm16766_vm1, %v367_v5  ;;  %v384_v22 = vld [vmem:[%s11964_s21 + $0xa8] sm:$0xff]  ;;  %v385_v23 = vld [vmem:[%s11964_s21 + $0xb0] sm:$0xff]  ;;  %v386_v24 = vld [vmem:[%s11964_s21 + $0xb8] sm:$0xff] }
  0x19   : > { %v387_v25 = vld [vmem:[%s11964_s21 + $0xc0] sm:$0xff]  ;;  %v388_v26 = vld [vmem:[%s11964_s21 + $0xc8] sm:$0xff]  ;;  %v389_v27 = vld [vmem:[%s11964_s21 + $0xd0] sm:$0xff] }
  0x1a   : > { %v390_v28 = vld [vmem:[%s11964_s21 + $0xd8] sm:$0xff]  ;;  %v391_v29 = vld [vmem:[%s11964_s21 + $0xe0] sm:$0xff]  ;;  %v392_v30 = vld [vmem:[%s11964_s21 + $0xe8] sm:$0xff] }
  0x1b   : > { %10945 = vmatmul.mubr.msk.f32.gmra.mxu0 %vm16766_vm1, %v368_v6  ;;  %v393_v31 = vld [vmem:[%s11964_s21 + $0xf0] sm:$0xff]  ;;  %v394_v32 = vld [vmem:[%s11964_s21 + $0xf8] sm:$0xff] }
  0x1c   : > { %10947 = vmatprep.mubr.msk.f32.mxu0 %vm16766_vm1, %v369_v7 }
  0x1f   : > { %10948 = vmatmul.mubr.msk.f32.gmra.mxu0 %vm16766_vm1, %v370_v8 }
  0x20   : > { %10950 = vmatprep.mubr.msk.f32.mxu0 %vm16766_vm1, %v371_v9  ;;  %v16715_v9 = vmov 1326507024  }
  0x23   : > { %10951 = vmatmul.mubr.msk.f32.gmra.mxu0 %vm16766_vm1, %v372_v10 }
  0x24   : > { %10953 = vmatprep.mubr.msk.f32.mxu0 %vm16766_vm1, %v373_v11 }
  0x27   : > { %10954 = vmatmul.mubr.msk.f32.gmra.mxu0 %vm16766_vm1, %v374_v12 }
  0x28   : > { %10956 = vmatprep.mubr.msk.f32.mxu0 %vm16766_vm1, %v375_v13 }
  0x2b   : > { %10957 = vmatmul.mubr.msk.f32.gmra.mxu0 %vm16766_vm1, %v376_v14 }
  0x2c   : > { %10959 = vmatprep.mubr.msk.f32.mxu0 %vm16766_vm1, %v377_v15 }
  0x2f   : > { %10960 = vmatmul.mubr.msk.f32.gmra.mxu0 %vm16766_vm1, %v378_v16 }
  0x30   : > { %10962 = vmatprep.mubr.msk.f32.mxu0 %vm16766_vm1, %v379_v17 }
  0x33   : > { %10963 = vmatmul.mubr.msk.f32.gmra.mxu0 %vm16766_vm1, %v380_v18 }
  0x34   : > { %10965 = vmatprep.mubr.msk.f32.mxu0 %vm16766_vm1, %v381_v19 }
  0x37   : > { %10966 = vmatmul.mubr.msk.f32.gmra.mxu0 %vm16766_vm1, %v382_v20 }
  0x38   : > { %10968 = vmatprep.mubr.msk.f32.mxu0 %vm16766_vm1, %v383_v21 }
  0x3b   : > { %10969 = vmatmul.mubr.msk.f32.gmra.mxu0 %vm16766_vm1, %v384_v22 }
  0x3c   : > { %10971 = vmatprep.mubr.msk.f32.mxu0 %vm16766_vm1, %v385_v23 }
  0x3f   : > { %10972 = vmatmul.mubr.msk.f32.gmra.mxu0 %vm16766_vm1, %v386_v24 }
  0x40   : > { %10974 = vmatprep.mubr.msk.f32.mxu0 %vm16766_vm1, %v387_v25 }
  0x43   : > { %10975 = vmatmul.mubr.msk.f32.gmra.mxu0 %vm16766_vm1, %v388_v26 }
  0x44   : > { %10977 = vmatprep.mubr.msk.f32.mxu0 %vm16766_vm1, %v389_v27 }
  0x47   : > { %10978 = vmatmul.mubr.msk.f32.gmra.mxu0 %vm16766_vm1, %v390_v28 }
  0x48   : > { %10980 = vmatprep.mubr.msk.f32.mxu0 %vm16766_vm1, %v391_v29 }
  0x4b   : > { %10981 = vmatmul.mubr.msk.f32.gmra.mxu0 %vm16766_vm1, %v392_v30 }
  0x4c   : > { %10983 = vmatprep.mubr.msk.f32.mxu0 %vm16766_vm1, %v393_v31 }
  0x4f   : > { %10984 = vmatmul.mubr.msk.f32.gmra.mxu0 %vm16766_vm1, %v394_v32 }
  0xd3   : > { %v12030_v33 = vpop.f32.mrf.mxu0 }
  0xd4   : > { %16884 = vst [vmem:[#allocation2_spill] sm:$0xff] %v12030_v33  ;;  %v825_v34 = vand.u32 2147483647, %v12030_v33  ;;  %v828_v35 = vand.u32 2139095040, %v12030_v33 }
  0xd5   : > { %v12034_v36 = vpop.f32.mrf.mxu0 }
  0xd6   : > { %v829_v37 = vshrl.u32 %v828_v35, 23  ;;  %v832_v38 = vand.u32 8388607, %v825_v34  ;;  %v16708_v39 = vand.u32 2147483647, %v12034_v36  ;;  %v725_v40 = vand.u32 2139095040, %v12034_v36 }
  0xd7   : > { %v12040_v43 = vpop.f32.mrf.mxu0 }
  0xd8   : > { %v10228_v41 = vadd.s32 4294967169, %v829_v37  ;;  %v726_v42 = vshrl.u32 %v725_v40, 23  ;;  %16885 = vst [vmem:[#allocation3_spill] sm:$0xff] %v12040_v43  ;;  %v833_v45 = vor.u32 8388608, %v832_v38  ;;  %v12044_v47 = vand.u32 8388607, %v16708_v39 }
  0xd9   : > { %v1034_v48 = vand.u32 2139095040, %v12040_v43  ;;  %v16712_v55 = vand.u32 2147483647, %v12040_v43 }
  0xda   : > { %v835_v44 = vadd.s32 1, %v10228_v41  ;;  %v10224_v46 = vadd.s32 4294967169, %v726_v42  ;;  %v12047_v53 = vshll.u32 %v833_v45, 8  ;;  %v730_v54 = vor.u32 8388608, %v12044_v47 }
  0xdb   : > { %v1035_v59 = vshrl.u32 %v1034_v48, 23 }
  0xdc   : > { %vm836_vm2 = vcmp.gt.s32.totalorder %v835_v44, 0  ;;  %v732_v50 = vadd.s32 1, %v10224_v46 }
  0xdd   : > { %v837_v49 = vsel %vm836_vm2, %v835_v44, 0  ;;  %v10236_v28 = vadd.s32 4294967169, %v1035_v59 }
  0xde   : > { %v838_v51 = vshrl.u32 %v837_v49, 5  ;;  %v839_v52 = vand.u32 31, %v837_v49  ;;  %vm733_vm3 = vcmp.gt.s32.totalorder %v732_v50, 0 }
  0xdf   : > { %v734_v14 = vsel %vm733_vm3, %v732_v50, 0 }
  0xe0   : > { %v840_v56 = vsub.s32 32, %v839_v52  ;;  %v842_v58 = vshll.u32 %v16720_v57, %v839_v52  ;;  %v845_v61 = vshll.u32 %v16718_v60, %v839_v52  ;;  %v848_v63 = vshll.u32 %v16722_v62, %v839_v52 }
  0xe1   : > { %v851_v1 = vshll.u32 %v16726_v0, %v839_v52  ;;  %v854_v3 = vshll.u32 %v16724_v2, %v839_v52  ;;  %vm857_vm4 = vcmp.lt.s32.totalorder %v838_v51, 1  ;;  %vm859_vm5 = vcmp.lt.s32.totalorder %v838_v51, 3 }
  0xe2   : > { %v843_v4 = vshrl.u32 %v16718_v60, %v840_v56  ;;  %v846_v5 = vshrl.u32 %v16722_v62, %v840_v56  ;;  %v849_v6 = vshrl.u32 %v16726_v0, %v840_v56  ;;  %v841_v7 = vshrl.u32 %v16720_v57, %v840_v56 }
  0xe3   : > { %v852_v8 = vshrl.u32 %v16724_v2, %v840_v56  ;;  %v855_v10 = vshrl.u32 %v16715_v9, %v840_v56  ;;  %vm860_vm6 = vcmp.lt.s32.totalorder %v838_v51, 4  ;;  %v736_v17 = vand.u32 31, %v734_v14 }
  0xe4   : > { %v844_v11 = vor.u32 %v843_v4, %v842_v58  ;;  %v847_v12 = vor.u32 %v846_v5, %v845_v61  ;;  %v850_v13 = vor.u32 %v849_v6, %v848_v63  ;;  %vm858_vm7 = vcmp.lt.s32.totalorder %v838_v51, 2 }
  0xe5   : > { %v853_v15 = vor.u32 %v852_v8, %v851_v1  ;;  %v856_v16 = vor.u32 %v855_v10, %v854_v3  ;;  %v737_v25 = vsub.s32 32, %v736_v17  ;;  %v735_v32 = vshrl.u32 %v734_v14, 5 }
  0xe6   : > { %v861_v18 = vsel %vm857_vm4, %v841_v7, %v844_v11  ;;  %v862_v19 = vsel %vm860_vm6, %v850_v13, 2102212464  ;;  %v865_v20 = vsel %vm857_vm4, %v844_v11, %v847_v12  ;;  %v869_v21 = vsel %vm857_vm4, %v847_v12, %v850_v13 }
  0xe7   : > { %v863_v22 = vsel %vm859_vm5, %v847_v12, %v862_v19  ;;  %v866_v23 = vsel %vm860_vm6, %v853_v15, 920167782  ;;  %v870_v24 = vsel %vm860_vm6, %v856_v16, 1326507024  ;;  %v739_v41 = vshll.u32 %v16720_v57, %v736_v17 }
  0xe8   : > { %v867_v26 = vsel %vm859_vm5, %v850_v13, %v866_v23  ;;  %v871_v27 = vsel %vm859_vm5, %v853_v15, %v870_v24  ;;  %v864_v29 = vsel %vm858_vm7, %v861_v18, %v863_v22  ;;  %v740_v42 = vshrl.u32 %v16718_v60, %v737_v25 }
  0xe9   : > { %v868_v30 = vsel %vm858_vm7, %v865_v20, %v867_v26  ;;  %v872_v31 = vsel %vm858_vm7, %v869_v21, %v871_v27  ;;  %v742_v44 = vshll.u32 %v16718_v60, %v736_v17  ;;  %v743_v45 = vshrl.u32 %v16722_v62, %v737_v25 }
  0xea   : > { %v12070_v35 = vmul.u32.u64.low %v12047_v53, %v872_v31  ;;  %v12071_v37 = vmul.u32.u64.high %v12047_v53, %v872_v31, %v12070_v35  ;;  %v12074_v38 = vmul.u32.u64.low %v12047_v53, %v868_v30  ;;  %v12075_v40 = vmul.u32.u64.high %v12047_v53, %v868_v30, %v12074_v38 }
  0xeb   : > { %v745_v46 = vshll.u32 %v16722_v62, %v736_v17  ;;  %v746_v48 = vshrl.u32 %v16726_v0, %v737_v25  ;;  %v748_v49 = vshll.u32 %v16726_v0, %v736_v17  ;;  %v749_v50 = vshrl.u32 %v16724_v2, %v737_v25 }
  0xec   : > { %v741_v51 = vor.u32 %v740_v42, %v739_v41  ;;  %v744_v52 = vor.u32 %v743_v45, %v742_v44  ;;  %v751_v56 = vshll.u32 %v16724_v2, %v736_v17  ;;  %v752_v58 = vshrl.u32 %v16715_v9, %v737_v25 }
  0xed   : > { %vm882_vm8 = vc.u32 %v12071_v37, %v12074_v38  ;;  %v883_v59 = vadd.s32 1, %v12075_v40  ;;  %v747_v61 = vor.u32 %v746_v48, %v745_v46  ;;  %v1041_v63 = vadd.s32 1, %v10236_v28 }
  0xee   : > { %v880_v1 = vmul.u32 %v12047_v53, %v864_v29  ;;  %v750_v3 = vor.u32 %v749_v50, %v748_v49  ;;  %v753_v4 = vor.u32 %v752_v58, %v751_v56  ;;  %vm754_vm9 = vcmp.lt.s32.totalorder %v735_v32, 1 }
  0xef   : > { %v884_v5 = vsel %vm882_vm8, %v883_v59, %v12075_v40  ;;  %vm757_vm10 = vcmp.lt.s32.totalorder %v735_v32, 4  ;;  %v762_v6 = vsel %vm754_vm9, %v741_v51, %v744_v52  ;;  %v12096_v7 = vshll.u32 %v730_v54, 8  ;;  %v12105_v54 = vpop.f32.mrf.mxu0 }
  0xf0   : > { %v885_v8 = vadd.s32 %v884_v5, %v880_v1  ;;  %vm756_vm11 = vcmp.lt.s32.totalorder %v735_v32, 3  ;;  %v763_v10 = vsel %vm757_vm10, %v750_v3, 920167782  ;;  %v766_v11 = vsel %vm754_vm9, %v744_v52, %v747_v61  ;;  %16886 = vst [vmem:[#allocation4_spill] sm:$0xff] %v12105_v54 }
  0xf1   : > { %vm755_vm12 = vcmp.lt.s32.totalorder %v735_v32, 2  ;;  %v764_v53 = vsel %vm756_vm11, %v747_v61, %v763_v10  ;;  %v767_v12 = vsel %vm757_vm10, %v753_v4, 1326507024  ;;  %vm1042_vm13 = vcmp.gt.s32.totalorder %v1041_v63, 0 }
  0xf2   : > { %v886_v13 = vadd.s32 536870912, %v885_v8  ;;  %v738_v14 = vshrl.u32 %v16720_v57, %v737_v25  ;;  %v765_v15 = vsel %vm755_vm12, %v762_v6, %v764_v53  ;;  %v768_v47 = vsel %vm756_vm11, %v750_v3, %v767_v12 }
  0xf3   : > { %v759_v16 = vsel %vm757_vm10, %v747_v61, 2102212464  ;;  %v769_v17 = vsel %vm755_vm12, %v766_v11, %v768_v47  ;;  %v12110_v18 = vmul.u32.u64.low %v12096_v7, %v765_v15  ;;  %v12111_v19 = vmul.u32.u64.high %v12096_v7, %v765_v15, %v12110_v18 }
  0xf4   : > { %v12114_v20 = vshrl.u32 %v886_v13, 30  ;;  %v12117_v21 = vmul.u32.u64.low %v12096_v7, %v769_v17  ;;  %v12118_v22 = vmul.u32.u64.high %v12096_v7, %v769_v17, %v12117_v21  ;;  %v1043_v23 = vsel %vm1042_vm13, %v1041_v63, 0 }
  0xf5   : > { %v1045_v24 = vand.u32 31, %v1043_v23  ;;  %v931_v25 = vand.u32 2139095040, %v12105_v54  ;;  %v758_v26 = vsel %vm754_vm9, %v738_v14, %v741_v51  ;;  %v760_v27 = vsel %vm756_vm11, %v744_v52, %v759_v16 }
  0xf6   : > { %v888_v28 = vshll.u32 %v12114_v20, 30  ;;  %v1038_v30 = vand.u32 8388607, %v16712_v55  ;;  %v761_v31 = vsel %vm755_vm12, %v758_v26, %v760_v27  ;;  %v1044_v35 = vshrl.u32 %v1043_v23, 5 }
  0xf7   : > { %v1046_v29 = vsub.s32 32, %v1045_v24  ;;  %v932_v41 = vshrl.u32 %v931_v25, 23  ;;  %v780_v42 = vadd.s32 1, %v12111_v19  ;;  %v1048_v44 = vshll.u32 %v16720_v57, %v1045_v24 }
  0xf8   : > { %v1051_v45 = vshll.u32 %v16718_v60, %v1045_v24  ;;  %v12132_v48 = vsub.s32 %v885_v8, %v888_v28  ;;  %vm779_vm14 = vc.u32 %v12118_v22, %v12110_v18  ;;  %v1054_v32 = vshll.u32 %v16722_v62, %v1045_v24 }
  0xf9   : > { %v1049_v40 = vshrl.u32 %v16718_v60, %v1046_v29  ;;  %v1052_v46 = vshrl.u32 %v16722_v62, %v1046_v29  ;;  %v1055_v49 = vshrl.u32 %v16726_v0, %v1046_v29  ;;  %v1057_v52 = vshll.u32 %v16726_v0, %v1045_v24 }
  0xfa   : > { %v1058_v56 = vshrl.u32 %v16724_v2, %v1046_v29  ;;  %v1060_v59 = vshll.u32 %v16724_v2, %v1045_v24  ;;  %v1061_v61 = vshrl.u32 %v16715_v9, %v1046_v29  ;;  %v777_v63 = vmul.u32 %v12096_v7, %v761_v31 }
  0xfb   : > { %v1050_v50 = vor.u32 %v1049_v40, %v1048_v44  ;;  %v1053_v51 = vor.u32 %v1052_v46, %v1051_v45  ;;  %v1056_v58 = vor.u32 %v1055_v49, %v1054_v32  ;;  %v1039_v1 = vor.u32 8388608, %v1038_v30 }
  0xfc   : > { %v1059_v3 = vor.u32 %v1058_v56, %v1057_v52  ;;  %v891_v4 = vsub.s32 0, %v12132_v48  ;;  %v781_v5 = vsel %vm779_vm14, %v780_v42, %v12111_v19  ;;  %v1062_v6 = vor.u32 %v1061_v61, %v1060_v59 }
  0xfd   : > { %vm1063_vm15 = vcmp.lt.s32.totalorder %v1044_v35, 1  ;;  %vm1065_vm2 = vcmp.lt.s32.totalorder %v1044_v35, 3  ;;  %vm1066_vm3 = vcmp.lt.s32.totalorder %v1044_v35, 4  ;;  %v10232_v10 = vadd.s32 4294967169, %v932_v41 }
  0xfe   : > { %v1071_v8 = vsel %vm1063_vm15, %v1050_v50, %v1053_v51  ;;  %v1047_v11 = vshrl.u32 %v16720_v57, %v1046_v29  ;;  %v1068_v53 = vsel %vm1066_vm3, %v1056_v58, 2102212464  ;;  %v1072_v12 = vsel %vm1066_vm3, %v1059_v3, 920167782 }
  0xff   : > { %v1076_v13 = vsel %vm1066_vm3, %v1062_v6, 1326507024  ;;  %v782_v14 = vadd.s32 %v781_v5, %v777_v63  ;;  %vm1064_vm4 = vcmp.lt.s32.totalorder %v1044_v35, 2  ;;  %v1073_v7 = vsel %vm1065_vm2, %v1056_v58, %v1072_v12 }
 0x100   : > { %v1075_v15 = vsel %vm1063_vm15, %v1053_v51, %v1056_v58  ;;  %v10229_v47 = vmin.u32 %v891_v4, %v12132_v48  ;;  %v1074_v16 = vsel %vm1064_vm4, %v1071_v8, %v1073_v7  ;;  %v1077_v17 = vsel %vm1065_vm2, %v1059_v3, %v1076_v13 }
 0x101   : > { %v1079_v19 = vshll.u32 %v1039_v1, 8  ;;  %v1067_v21 = vsel %vm1063_vm15, %v1047_v11, %v1050_v50  ;;  %v1069_v23 = vsel %vm1065_vm2, %v1053_v51, %v1068_v53  ;;  %v1078_v24 = vsel %vm1064_vm4, %v1075_v15, %v1077_v17 }
 0x102   : > { %v938_v27 = vadd.s32 1, %v10232_v10  ;;  %v783_v28 = vadd.s32 536870912, %v782_v14  ;;  %v893_v29 = vclz %v10229_v47  ;;  %v1070_v40 = vsel %vm1064_vm4, %v1067_v21, %v1069_v23 }
 0x103   : > { %v12155_v25 = vmul.u32.u64.low %v1079_v19, %v1074_v16  ;;  %v12156_v26 = vmul.u32.u64.high %v1079_v19, %v1074_v16, %v12155_v25  ;;  %v12159_v30 = vmul.u32.u64.low %v1079_v19, %v1078_v24  ;;  %v12160_v31 = vmul.u32.u64.high %v1079_v19, %v1078_v24, %v12159_v30  ;;  %v12189_v16 = vpop.f32.mrf.mxu0 }
 0x104   : > { %vm939_vm5 = vcmp.gt.s32.totalorder %v938_v27, 0  ;;  %v12164_v45 = vshrl.u32 %v783_v28, 30  ;;  %v10230_v46 = vadd.s32 4294967294, %v893_v29  ;;  %v1086_v32 = vmul.u32 %v1079_v19, %v1070_v40  ;;  %16887 = vst [vmem:[#allocation5_spill] sm:$0xff] %v12189_v16 }
 0x105   : > { %v940_v41 = vsel %vm939_vm5, %v938_v27, 0  ;;  %v1089_v42 = vadd.s32 1, %v12156_v26  ;;  %vm1088_vm6 = vc.u32 %v12160_v31, %v12155_v25  ;;  %v16711_v52 = vand.u32 2147483647, %v12105_v54 }
 0x106   : > { %v942_v44 = vand.u32 31, %v940_v41  ;;  %v785_v35 = vshll.u32 %v12164_v45, 30  ;;  %vm10231_vm7 = vcmp.lt.s32.totalorder %v10230_v46, 0  ;;  %v941_v10 = vshrl.u32 %v940_v41, 5 }
 0x107   : > { %v1090_v49 = vsel %vm1088_vm6, %v1089_v42, %v12156_v26  ;;  %v935_v61 = vand.u32 8388607, %v16711_v52  ;;  %v12177_v3 = vsel %vm10231_vm7, 0, %v10230_v46  ;;  %v1240_v28 = vand.u32 2139095040, %v12189_v16 }
 0x108   : > { %v943_v50 = vsub.s32 32, %v942_v44  ;;  %v1091_v51 = vadd.s32 %v1090_v49, %v1086_v32  ;;  %v12179_v4 = vsub.s32 %v782_v14, %v785_v35  ;;  %v945_v5 = vshll.u32 %v16720_v57, %v942_v44 }
 0x109   : > { %v948_v6 = vshll.u32 %v16718_v60, %v942_v44  ;;  %v951_v11 = vshll.u32 %v16722_v62, %v942_v44  ;;  %v954_v53 = vshll.u32 %v16726_v0, %v942_v44  ;;  %v957_v47 = vshll.u32 %v16724_v2, %v942_v44 }
 0x10a   : > { %v1092_v56 = vadd.s32 536870912, %v1091_v51  ;;  %v946_v58 = vshrl.u32 %v16718_v60, %v943_v50  ;;  %v949_v59 = vshrl.u32 %v16722_v62, %v943_v50  ;;  %v952_v63 = vshrl.u32 %v16726_v0, %v943_v50 }
 0x10b   : > { %v955_v1 = vshrl.u32 %v16724_v2, %v943_v50  ;;  %v958_v14 = vshrl.u32 %v16715_v9, %v943_v50  ;;  %v901_v17 = vsub.s32 4294967266, %v12177_v3  ;;  %v936_v19 = vor.u32 8388608, %v935_v61 }
 0x10c   : > { %v12183_v8 = vshrl.u32 %v1092_v56, 30  ;;  %v947_v12 = vor.u32 %v946_v58, %v945_v5  ;;  %v950_v13 = vor.u32 %v949_v59, %v948_v6  ;;  %v953_v7 = vor.u32 %v952_v63, %v951_v11  ;;  %v12208_v6 = vpop.f32.mrf.mxu0 }
 0x10d   : > { %v956_v15 = vor.u32 %v955_v1, %v954_v53  ;;  %v788_v21 = vsub.s32 0, %v12179_v4  ;;  %v959_v24 = vor.u32 %v958_v14, %v957_v47  ;;  %vm960_vm8 = vcmp.lt.s32.totalorder %v941_v10, 1  ;;  %16888 = vst [vmem:[#allocation6_spill] sm:$0xff] %v12208_v6 }
 0x10e   : > { %v1094_v23 = vshll.u32 %v12183_v8, 30  ;;  %v944_v26 = vshrl.u32 %v16720_v57, %v943_v50  ;;  %vm963_vm9 = vcmp.lt.s32.totalorder %v941_v10, 4  ;;  %v968_v27 = vsel %vm960_vm8, %v947_v12, %v950_v13 }
 0x10f   : > { %vm962_vm10 = vcmp.lt.s32.totalorder %v941_v10, 3  ;;  %v965_v29 = vsel %vm963_vm9, %v953_v7, 2102212464  ;;  %v969_v30 = vsel %vm963_vm9, %v956_v15, 920167782  ;;  %v972_v40 = vsel %vm960_vm8, %v950_v13, %v953_v7 }
 0x110   : > { %vm961_vm11 = vcmp.lt.s32.totalorder %v941_v10, 2  ;;  %v970_v41 = vsel %vm962_vm10, %v953_v7, %v969_v30  ;;  %v973_v42 = vsel %vm963_vm9, %v959_v24, 1326507024  ;;  %v976_v44 = vshll.u32 %v936_v19, 8 }
 0x111   : > { %v12196_v46 = vsub.s32 %v1091_v51, %v1094_v23  ;;  %v964_v32 = vsel %vm960_vm8, %v944_v26, %v947_v12  ;;  %v971_v49 = vsel %vm961_vm11, %v968_v27, %v970_v41  ;;  %v974_v35 = vsel %vm962_vm10, %v956_v15, %v973_v42 }
 0x112   : > { %v966_v56 = vsel %vm962_vm10, %v950_v13, %v965_v29  ;;  %v975_v50 = vsel %vm961_vm11, %v972_v40, %v974_v35  ;;  %v12200_v58 = vmul.u32.u64.low %v976_v44, %v971_v49  ;;  %v12201_v59 = vmul.u32.u64.high %v976_v44, %v971_v49, %v12200_v58 }
 0x113   : > { %v12204_v61 = vmul.u32.u64.low %v976_v44, %v975_v50  ;;  %v12205_v63 = vmul.u32.u64.high %v976_v44, %v975_v50, %v12204_v61  ;;  %v1241_v1 = vshrl.u32 %v1240_v28, 23  ;;  %v897_v5 = vsub.s32 32, %v12177_v3 }
 0x114   : > { %v902_v51 = vadd.s32 127, %v901_v17  ;;  %v10225_v11 = vmin.u32 %v788_v21, %v12179_v4  ;;  %v967_v53 = vsel %vm961_vm11, %v964_v32, %v966_v56  ;;  %v1097_v13 = vsub.s32 0, %v12196_v46 }
 0x115   : > { %v10244_v12 = vadd.s32 4294967169, %v1241_v1  ;;  %v986_v7 = vadd.s32 1, %v12201_v59  ;;  %v16710_v15 = vand.u32 2147483647, %v12189_v16  ;;  %v881_v47 = vadd.s32 %v12074_v38, %v12071_v37 }
 0x116   : > { %v1137_v14 = vand.u32 2139095040, %v12208_v6  ;;  %v911_v19 = vsub.s32 4, %v12114_v20  ;;  %v983_v23 = vmul.u32 %v976_v44, %v967_v53  ;;  %vm985_vm12 = vc.u32 %v12205_v63, %v12200_v58 }
 0x117   : > { %v1247_v10 = vadd.s32 1, %v10244_v12  ;;  %v899_v17 = vshrl.u32 %v881_v47, %v897_v5  ;;  %v903_v21 = vshll.u32 %v902_v51, 23  ;;  %v790_v24 = vclz %v10225_v11 }
 0x118   : > { %v987_v26 = vsel %vm985_vm12, %v986_v7, %v12201_v59  ;;  %v10237_v27 = vmin.u32 %v1097_v13, %v12196_v46  ;;  %v1244_v37 = vand.u32 8388607, %v16710_v15  ;;  %v898_v38 = vshll.u32 %v12132_v48, %v12177_v3 }
 0x119   : > { %v988_v28 = vadd.s32 %v987_v26, %v983_v23  ;;  %vm1248_vm13 = vcmp.gt.s32.totalorder %v1247_v10, 0  ;;  %v1138_v30 = vshrl.u32 %v1137_v14, 23  ;;  %vm827_vm14 = vcmp.lt.s32.totalorder %v12030_v33, 0 }
 0x11a   : > { %v1249_v29 = vsel %vm1248_vm13, %v1247_v10, 0  ;;  %v900_v42 = vor.u32 %v899_v17, %v898_v38  ;;  %v904_v44 = vor.u32 4788187, %v903_v21  ;;  %v12231_v32 = vsel %vm827_vm14, %v911_v19, %v12114_v20 }
 0x11b   : > { %v989_v40 = vadd.s32 536870912, %v988_v28  ;;  %v1251_v41 = vand.u32 31, %v1249_v29  ;;  %v10226_v49 = vadd.s32 4294967294, %v790_v24  ;;  %v1099_v35 = vclz %v10237_v27 }
 0x11c   : > { %v1245_v50 = vor.u32 8388608, %v1244_v37  ;;  %v1250_v48 = vshrl.u32 %v1249_v29, 5  ;;  %v10240_v1 = vadd.s32 4294967169, %v1138_v30  ;;  %v907_v47 = vcvt.s32.f32 %v900_v42  ;;  %v12248_v37 = vpop.f32.mrf.mxu0 }
 0x11d   : > { %v12233_v56 = vshrl.u32 %v989_v40, 30  ;;  %v1252_v59 = vsub.s32 32, %v1251_v41  ;;  %v1254_v3 = vshll.u32 %v16720_v57, %v1251_v41  ;;  %v1257_v61 = vshll.u32 %v16718_v60, %v1251_v41  ;;  %16890 = vst [vmem:[#allocation8_spill] sm:$0xff] %v12248_v37 }
 0x11e   : > { %v1260_v20 = vshll.u32 %v16722_v62, %v1251_v41  ;;  %v1263_v12 = vshll.u32 %v16726_v0, %v1251_v41  ;;  %v1266_v23 = vshll.u32 %v16724_v2, %v1251_v41  ;;  %v905_v10 = vand.u32 2147483647, %v904_v44 }
 0x11f   : > { %16889 = vst [vmem:[#allocation7_spill] sm:$0xff] %v12233_v56  ;;  %v991_v5 = vshll.u32 %v12233_v56, 30  ;;  %v1255_v51 = vshrl.u32 %v16718_v60, %v1252_v59  ;;  %v1258_v11 = vshrl.u32 %v16722_v62, %v1252_v59  ;;  %v1261_v53 = vshrl.u32 %v16726_v0, %v1252_v59 }
 0x120   : > { %v1264_v13 = vshrl.u32 %v16724_v2, %v1252_v59  ;;  %v1267_v7 = vshrl.u32 %v16715_v9, %v1252_v59  ;;  %vm10227_vm15 = vcmp.lt.s32.totalorder %v10226_v49, 0  ;;  %v10238_v24 = vadd.s32 4294967294, %v1099_v35 }
 0x121   : > { %v1256_v14 = vor.u32 %v1255_v51, %v1254_v3  ;;  %v1259_v19 = vor.u32 %v1258_v11, %v1257_v61  ;;  %v1262_v17 = vor.u32 %v1261_v53, %v1260_v20  ;;  %v12246_v26 = vsub.s32 %v988_v28, %v991_v5 }
 0x122   : > { %v1265_v21 = vor.u32 %v1264_v13, %v1263_v12  ;;  %v1268_v27 = vor.u32 %v1267_v7, %v1266_v23  ;;  %vm1269_vm2 = vcmp.lt.s32.totalorder %v1250_v48, 1  ;;  %vm12252_vm3 = vcmp.le.f32.partialorder %v825_v34, 0.7853982 }
 0x123   : > { %vm1272_vm4 = vcmp.lt.s32.totalorder %v1250_v48, 4  ;;  %v1277_v29 = vsel %vm1269_vm2, %v1256_v14, %v1259_v19  ;;  %v1285_v30 = vshll.u32 %v1245_v50, 8  ;;  %v1144_v40 = vadd.s32 1, %v10240_v1 }
 0x124   : > { %v1253_v41 = vshrl.u32 %v16720_v57, %v1252_v59  ;;  %vm1271_vm5 = vcmp.lt.s32.totalorder %v1250_v48, 3  ;;  %v1274_v28 = vsel %vm1272_vm4, %v1262_v17, 2102212464  ;;  %v1278_v42 = vsel %vm1272_vm4, %v1265_v21, 920167782 }
 0x125   : > { %vm1270_vm6 = vcmp.lt.s32.totalorder %v1250_v48, 2  ;;  %v1279_v44 = vsel %vm1271_vm5, %v1262_v17, %v1278_v42  ;;  %v1281_v35 = vsel %vm1269_vm2, %v1259_v19, %v1262_v17  ;;  %v1446_v3 = vand.u32 2139095040, %v12248_v37 }
 0x126   : > { %v994_v34 = vsub.s32 0, %v12246_v26  ;;  %v1273_v61 = vsel %vm1269_vm2, %v1253_v41, %v1256_v14  ;;  %v1280_v5 = vsel %vm1270_vm6, %v1277_v29, %v1279_v44  ;;  %v1282_v51 = vsel %vm1272_vm4, %v1268_v27, 1326507024 }
 0x127   : > { %v1275_v50 = vsel %vm1271_vm5, %v1259_v19, %v1274_v28  ;;  %v1283_v1 = vsel %vm1271_vm5, %v1265_v21, %v1282_v51  ;;  %v12263_v11 = vmul.u32.u64.low %v1285_v30, %v1280_v5  ;;  %v12264_v59 = vmul.u32.u64.high %v1285_v30, %v1280_v5, %v12263_v11 }
 0x128   : > { %v12268_v20 = vsel %vm10227_vm15, 0, %v10226_v49  ;;  %vm10239_vm7 = vcmp.lt.s32.totalorder %v10238_v24, 0  ;;  %v1284_v53 = vsel %vm1270_vm6, %v1281_v35, %v1283_v1  ;;  %vm1145_vm8 = vcmp.gt.s32.totalorder %v1144_v40, 0 }
 0x129   : > { %v12271_v12 = vmul.f32 %v907_v47, %v905_v10  ;;  %v12273_v13 = vmul.u32.u64.low %v1285_v30, %v1284_v53  ;;  %v12274_v7 = vmul.u32.u64.high %v1285_v30, %v1284_v53, %v12273_v13  ;;  %v1146_v14 = vsel %vm1145_vm8, %v1144_v40, 0 }
 0x12a   : > { %v10233_v19 = vmin.u32 %v994_v34, %v12246_v26  ;;  %v1276_v23 = vsel %vm1270_vm6, %v1273_v61, %v1275_v50  ;;  %v16709_v17 = vand.u32 2147483647, %v12208_v6  ;;  %v1148_v21 = vand.u32 31, %v1146_v14 }
 0x12b   : > { %v778_v49 = vadd.s32 %v12110_v18, %v12118_v22  ;;  %v12281_v27 = vsel %vm10239_vm7, 0, %v10238_v24  ;;  %v1295_v29 = vadd.s32 1, %v12264_v59  ;;  %v1447_v47 = vshrl.u32 %v1446_v3, 23 }
 0x12c   : > { %v12287_v10 = vsel %vm12252_vm3, 0, %v12231_v32  ;;  %v794_v40 = vsub.s32 32, %v12268_v20  ;;  %v1087_v48 = vadd.s32 %v12155_v25, %v12160_v31  ;;  %v1149_v41 = vsub.s32 32, %v1148_v21 }
 0x12d   : > { %16893 = vst [vmem:[#allocation9_spill] sm:$0xff] %v12287_v10  ;;  %v909_v28 = vxor.u32 2147483648, %v12271_v12  ;;  %v798_v18 = vsub.s32 4294967266, %v12268_v20  ;;  %v1292_v22 = vmul.u32 %v1285_v30, %v1276_v23  ;;  %vm1294_vm9 = vc.u32 %v12274_v7, %v12263_v11 }
 0x12e   : > { %v1107_v24 = vsub.s32 4294967266, %v12281_v27  ;;  %v996_v42 = vclz %v10233_v19  ;;  %v1296_v32 = vsel %vm1294_vm9, %v1295_v29, %v12264_v59  ;;  %v1141_v44 = vand.u32 8388607, %v16709_v17 }
 0x12f   : > { %v1297_v35 = vadd.s32 %v1296_v32, %v1292_v22  ;;  %v1152_v25 = vshrl.u32 %v16718_v60, %v1149_v41  ;;  %v1155_v31 = vshrl.u32 %v16722_v62, %v1149_v41  ;;  %v10252_v3 = vadd.s32 4294967169, %v1447_v47 }
 0x130   : > { %v1151_v34 = vshll.u32 %v16720_v57, %v1148_v21  ;;  %v1154_v30 = vshll.u32 %v16718_v60, %v1148_v21  ;;  %v1157_v61 = vshll.u32 %v16722_v62, %v1148_v21  ;;  %v1158_v5 = vshrl.u32 %v16726_v0, %v1149_v41 }
 0x131   : > { %v1298_v51 = vadd.s32 536870912, %v1297_v35  ;;  %v1147_v50 = vshrl.u32 %v1146_v14, 5  ;;  %v1160_v1 = vshll.u32 %v16726_v0, %v1148_v21  ;;  %v1161_v59 = vshrl.u32 %v16724_v2, %v1149_v41 }
 0x132   : > { %v796_v53 = vshrl.u32 %v778_v49, %v794_v40  ;;  %v1153_v13 = vor.u32 %v1152_v25, %v1151_v34  ;;  %v1156_v19 = vor.u32 %v1155_v31, %v1154_v30  ;;  %v1159_v23 = vor.u32 %v1158_v5, %v1157_v61 }
 0x133   : > { %v12308_v29 = vshrl.u32 %v1298_v51, 30  ;;  %v1162_v47 = vor.u32 %v1161_v59, %v1160_v1  ;;  %v1163_v22 = vshll.u32 %v16724_v2, %v1148_v21  ;;  %v1164_v32 = vshrl.u32 %v16715_v9, %v1149_v41 }
 0x134   : > { %v1103_v39 = vsub.s32 32, %v12281_v27  ;;  %v1108_v17 = vadd.s32 127, %v1107_v24  ;;  %v10234_v15 = vadd.s32 4294967294, %v996_v42  ;;  %v1142_v14 = vor.u32 8388608, %v1141_v44 }
 0x135   : > { %v1165_v52 = vor.u32 %v1164_v32, %v1163_v22  ;;  %vm1166_vm10 = vcmp.lt.s32.totalorder %v1147_v50, 1  ;;  %vm1169_vm11 = vcmp.lt.s32.totalorder %v1147_v50, 4  ;;  %v1453_v55 = vadd.s32 1, %v10252_v3 }
 0x136   : > { %v1150_v49 = vshrl.u32 %v16720_v57, %v1149_v41  ;;  %vm1168_vm12 = vcmp.lt.s32.totalorder %v1147_v50, 3  ;;  %v1174_v40 = vsel %vm1166_vm10, %v1153_v13, %v1156_v19  ;;  %v1175_v25 = vsel %vm1169_vm11, %v1162_v47, 920167782 }
 0x137   : > { %v1300_v21 = vshll.u32 %v12308_v29, 30  ;;  %vm1167_vm13 = vcmp.lt.s32.totalorder %v1147_v50, 2  ;;  %v1171_v31 = vsel %vm1169_vm11, %v1159_v23, 2102212464  ;;  %v1176_v24 = vsel %vm1168_vm12, %v1159_v23, %v1175_v25 }
 0x138   : > { %v1109_v42 = vshll.u32 %v1108_v17, 23  ;;  %v1177_v44 = vsel %vm1167_vm13, %v1174_v40, %v1176_v24  ;;  %v1182_v34 = vshll.u32 %v1142_v14, 8  ;;  %v16714_v3 = vand.u32 2147483647, %v12248_v37 }
 0x139   : > { %v1105_v30 = vshrl.u32 %v1087_v48, %v1103_v39  ;;  %v1170_v41 = vsel %vm1166_vm10, %v1150_v49, %v1153_v13  ;;  %v1178_v61 = vsel %vm1166_vm10, %v1156_v19, %v1159_v23  ;;  %v1179_v5 = vsel %vm1169_vm11, %v1165_v52, 1326507024 }
 0x13a   : > { %v1172_v51 = vsel %vm1168_vm12, %v1156_v19, %v1171_v31  ;;  %v1180_v1 = vsel %vm1168_vm12, %v1162_v47, %v1179_v5  ;;  %v12326_v59 = vmul.u32.u64.low %v1182_v34, %v1177_v44  ;;  %v12327_v22 = vmul.u32.u64.high %v1182_v34, %v1177_v44, %v12326_v59 }
 0x13b   : > { %vm10235_vm15 = vcmp.lt.s32.totalorder %v10234_v15, 0  ;;  %v12330_v17 = vsub.s32 %v1297_v35, %v1300_v21  ;;  %v1181_v32 = vsel %vm1167_vm13, %v1178_v61, %v1180_v1  ;;  %vm1454_vm2 = vcmp.gt.s32.totalorder %v1453_v55, 0 }
 0x13c   : > { %v1110_v39 = vor.u32 4788187, %v1109_v42  ;;  %v12333_v48 = vmul.u32.u64.low %v1182_v34, %v1181_v32  ;;  %v12334_v13 = vmul.u32.u64.high %v1182_v34, %v1181_v32, %v12333_v48  ;;  %v1455_v23 = vsel %vm1454_vm2, %v1453_v55, 0 }
 0x13d   : > { %v795_v52 = vshll.u32 %v12179_v4, %v12268_v20  ;;  %v1104_v19 = vshll.u32 %v12196_v46, %v12281_v27  ;;  %v1173_v47 = vsel %vm1167_vm13, %v1170_v41, %v1172_v51  ;;  %v1457_v14 = vand.u32 31, %v1455_v23 }
 0x13e   : > { %v12346_v35 = vsel %vm827_vm14, %v909_v28, %v12271_v12  ;;  %v12350_v49 = vadd.s32 127, %v798_v18  ;;  %v12352_v55 = vsel %vm10235_vm15, 0, %v10234_v15  ;;  %v1192_v4 = vadd.s32 1, %v12327_v22 }
 0x13f   : > { %v12355_v40 = vor.u32 %v796_v53, %v795_v52  ;;  %v1106_v46 = vor.u32 %v1105_v30, %v1104_v19  ;;  %v1303_v27 = vsub.s32 0, %v12330_v17  ;;  %v1458_v50 = vsub.s32 32, %v1457_v14 }
 0x140   : > { %v1111_v25 = vand.u32 2147483647, %v1110_v39  ;;  %v1189_v21 = vmul.u32 %v1182_v34, %v1173_v47  ;;  %vm1191_vm14 = vc.u32 %v12334_v13, %v12326_v59  ;;  %v1450_v20 = vand.u32 8388607, %v16714_v3 }
 0x141   : > { %v1004_v12 = vsub.s32 4294967266, %v12352_v55  ;;  %v1193_v15 = vsel %vm1191_vm14, %v1192_v4, %v12327_v22  ;;  %v1460_v28 = vshll.u32 %v16720_v57, %v1457_v14  ;;  %v1461_v18 = vshrl.u32 %v16718_v60, %v1458_v50 }
 0x142   : > { %v1194_v53 = vadd.s32 %v1193_v15, %v1189_v21  ;;  %v1463_v31 = vshll.u32 %v16718_v60, %v1457_v14  ;;  %v1464_v24 = vshrl.u32 %v16722_v62, %v1458_v50  ;;  %v1467_v42 = vshrl.u32 %v16726_v0, %v1458_v50 }
 0x143   : > { %v10245_v44 = vmin.u32 %v1303_v27, %v12330_v17  ;;  %v1456_v34 = vshrl.u32 %v1455_v23, 5  ;;  %v1466_v30 = vshll.u32 %v16722_v62, %v1457_v14  ;;  %v1469_v41 = vshll.u32 %v16726_v0, %v1457_v14 }
 0x144   : > { %v1195_v61 = vadd.s32 536870912, %v1194_v53  ;;  %v1462_v5 = vor.u32 %v1461_v18, %v1460_v28  ;;  %v1465_v51 = vor.u32 %v1464_v24, %v1463_v31  ;;  %v1470_v1 = vshrl.u32 %v16724_v2, %v1458_v50  ;;  %v12383_v31 = vpop.f32.mrf.mxu0 }
 0x145   : > { %v1113_v22 = vcvt.s32.f32 %v1106_v46  ;;  %v1468_v32 = vor.u32 %v1467_v42, %v1466_v30  ;;  %v1472_v39 = vshll.u32 %v16724_v2, %v1457_v14  ;;  %v1473_v48 = vshrl.u32 %v16715_v9, %v1458_v50  ;;  %16895 = vst [vmem:[#allocation11_spill] sm:$0xff] %v12383_v31 }
 0x146   : > { %v800_v52 = vshll.u32 %v12350_v49, 23  ;;  %v12376_v19 = vshrl.u32 %v1195_v61, 30  ;;  %v1451_v23 = vor.u32 8388608, %v1450_v20  ;;  %v1471_v47 = vor.u32 %v1470_v1, %v1469_v41 }
 0x147   : > { %v1114_v4 = vmul.f32 %v1113_v22, %v1111_v25  ;;  %v1005_v27 = vadd.s32 127, %v1004_v12  ;;  %v1474_v21 = vor.u32 %v1473_v48, %v1472_v39  ;;  %vm1475_vm4 = vcmp.lt.s32.totalorder %v1456_v34, 1 }
 0x148   : > { %16894 = vst [vmem:[#allocation10_spill] sm:$0xff] %v12376_v19  ;;  %v1305_v15 = vclz %v10245_v44  ;;  %v1197_v28 = vshll.u32 %v12376_v19, 30  ;;  %vm1478_vm5 = vcmp.lt.s32.totalorder %v1456_v34, 4  ;;  %v1483_v46 = vsel %vm1475_vm4, %v1462_v5, %v1465_v51 }
 0x149   : > { %vm1033_vm6 = vcmp.lt.s32.totalorder %v12040_v43, 0  ;;  %v1459_v14 = vshrl.u32 %v16720_v57, %v1458_v50  ;;  %vm1477_vm7 = vcmp.lt.s32.totalorder %v1456_v34, 3  ;;  %v1480_v49 = vsel %vm1478_vm5, %v1468_v32, 2102212464 }
 0x14a   : > { %v1484_v18 = vsel %vm1478_vm5, %v1471_v47, 920167782  ;;  %vm1476_vm8 = vcmp.lt.s32.totalorder %v1456_v34, 2  ;;  %v1487_v25 = vsel %vm1475_vm4, %v1465_v51, %v1468_v32  ;;  %v1491_v12 = vshll.u32 %v1451_v23, 8 }
 0x14b   : > { %v1485_v20 = vsel %vm1477_vm7, %v1468_v32, %v1484_v18  ;;  %v12385_v24 = vsub.s32 %v1194_v53, %v1197_v28  ;;  %v1479_v42 = vsel %vm1475_vm4, %v1459_v14, %v1462_v5  ;;  %v1488_v30 = vsel %vm1478_vm5, %v1474_v21, 1326507024 }
 0x14c   : > { %v1486_v44 = vsel %vm1476_vm8, %v1483_v46, %v1485_v20  ;;  %v1481_v41 = vsel %vm1477_vm7, %v1465_v51, %v1480_v49  ;;  %v1489_v61 = vsel %vm1477_vm7, %v1471_v47, %v1488_v30  ;;  %v1000_v22 = vsub.s32 32, %v12352_v55 }
 0x14d   : > { %v12389_v50 = vmul.u32.u64.low %v1491_v12, %v1486_v44  ;;  %v12390_v1 = vmul.u32.u64.high %v1491_v12, %v1486_v44, %v12389_v50  ;;  %v10246_v39 = vadd.s32 4294967294, %v1305_v15  ;;  %v1490_v32 = vsel %vm1476_vm8, %v1487_v25, %v1489_v61 }
 0x14e   : > { %v1343_v48 = vand.u32 2139095040, %v12383_v31  ;;  %v801_v53 = vor.u32 4788187, %v800_v52  ;;  %v1115_v23 = vxor.u32 2147483648, %v1114_v4  ;;  %v984_v51 = vadd.s32 %v12200_v58, %v12205_v63  ;;  %v12410_v63 = vpop.f32.mrf.mxu0 }
 0x14f   : > { %v12396_v28 = vmul.u32.u64.low %v1491_v12, %v1490_v32  ;;  %v12397_v5 = vmul.u32.u64.high %v1491_v12, %v1490_v32, %v12396_v28  ;;  %v1006_v47 = vshll.u32 %v1005_v27, 23  ;;  %v1482_v21 = vsel %vm1476_vm8, %v1479_v42, %v1481_v41  ;;  %16896 = vst [vmem:[#allocation12_spill] sm:$0xff] %v12410_v63 }
 0x150   : > { %v1344_v46 = vshrl.u32 %v1343_v48, 23  ;;  %v913_v15 = vsel %vm12252_vm3, %v12030_v33, %v12346_v35  ;;  %v1117_v14 = vsub.s32 4, %v12183_v8  ;;  %v1200_v52 = vsub.s32 0, %v12385_v24 }
 0x151   : > { %v1501_v49 = vadd.s32 1, %v12390_v1  ;;  %v804_v18 = vcvt.s32.f32 %v12355_v40  ;;  %v1002_v20 = vshrl.u32 %v984_v51, %v1000_v22  ;;  %vm10247_vm9 = vcmp.lt.s32.totalorder %v10246_v39, 0 }
 0x152   : > { %v10248_v58 = vadd.s32 4294967169, %v1344_v46  ;;  %v802_v34 = vand.u32 2147483647, %v801_v53  ;;  %v1116_v27 = vsel %vm1033_vm6, %v1115_v23, %v1114_v4  ;;  %v1498_v25 = vmul.u32 %v1491_v12, %v1482_v21 }
 0x153   : > { %vm1500_vm3 = vc.u32 %v12397_v5, %v12389_v50  ;;  %v1001_v38 = vshll.u32 %v12246_v26, %v12352_v55  ;;  %v1007_v35 = vor.u32 4788187, %v1006_v47  ;;  %v12419_v44 = vsel %vm10247_vm9, 0, %v10246_v39 }
 0x154   : > { %v1502_v42 = vsel %vm1500_vm3, %v1501_v49, %v12390_v1  ;;  %v1350_v40 = vadd.s32 1, %v10248_v58  ;;  %v10241_v30 = vmin.u32 %v1200_v52, %v12385_v24  ;;  %v1652_v61 = vand.u32 2139095040, %v12410_v63 }
 0x155   : > { %v1503_v41 = vadd.s32 %v1502_v42, %v1498_v25  ;;  %v12424_v4 = vand.u32 3, %v12287_v10  ;;  %v16897_v12 = vand.u32 2147483647, %v12040_v43  ;;  %v1003_v26 = vor.u32 %v1002_v20, %v1001_v38 }
 0x156   : > { %vm1351_vm11 = vcmp.gt.s32.totalorder %v1350_v40, 0  ;;  %11586 = vcosq.f32 %v913_v15  ;;  %v12432_v55 = vmul.f32 %v804_v18, %v802_v34  ;;  %v1118_v1 = vsel %vm1033_vm6, %v1117_v14, %v12183_v8 }
 0x157   : > { %vm12428_vm10 = vcmp.le.f32.partialorder %v16897_v12, 0.7853982  ;;  %v1504_v39 = vadd.s32 536870912, %v1503_v41  ;;  %v1008_v48 = vand.u32 2147483647, %v1007_v35  ;;  %v1313_v53 = vsub.s32 4294967266, %v12419_v44 }
 0x158   : > { %v12440_v32 = vsel %vm12428_vm10, %v12040_v43, %v1116_v27  ;;  %v1352_v23 = vsel %vm1351_vm11, %v1350_v40, 0  ;;  %v1202_v28 = vclz %v10241_v30  ;;  %v16713_v47 = vand.u32 2147483647, %v12383_v31 }
 0x159   : > { %v12443_v51 = vshrl.u32 %v1504_v39, 30  ;;  %v1653_v21 = vshrl.u32 %v1652_v61, 23  ;;  %11588 = vsinq.f32 %v913_v15  ;;  %v12448_v8 = vsel %vm12428_vm10, 0, %v1118_v1 }
 0x15a   : > { %16900 = vst [vmem:[#allocation13_spill] sm:$0xff] %v12448_v8  ;;  %v1010_v46 = vcvt.s32.f32 %v1003_v26  ;;  %v1354_v14 = vand.u32 31, %v1352_v23  ;;  %11590 = vcosq.f32 %v12440_v32  ;;  %v1293_v49 = vadd.s32 %v12263_v11, %v12274_v7 }
 0x15b   : > { %v1506_v18 = vshll.u32 %v12443_v51, 30  ;;  %v1309_v58 = vsub.s32 32, %v12419_v44  ;;  %v12458_v15 = vadd.s32 127, %v1313_v53  ;;  %v10242_v27 = vadd.s32 4294967294, %v1202_v28 }
 0x15c   : > { %v12455_v20 = vmul.f32 %v1010_v46, %v1008_v48  ;;  %v1355_v34 = vsub.s32 32, %v1354_v14  ;;  %v1347_v38 = vand.u32 8388607, %v16713_v47  ;;  %v10260_v35 = vadd.s32 4294967169, %v1653_v21 }
 0x15d   : > { %v12460_v25 = vsub.s32 %v1503_v41, %v1506_v18  ;;  %v1357_v42 = vshll.u32 %v16720_v57, %v1354_v14  ;;  %v1360_v7 = vshll.u32 %v16718_v60, %v1354_v14  ;;  %v1353_v61 = vshrl.u32 %v1352_v23, 5 }
 0x15e   : > { %v1358_v11 = vshrl.u32 %v16718_v60, %v1355_v34  ;;  %v1361_v40 = vshrl.u32 %v16722_v62, %v1355_v34  ;;  %v1363_v12 = vshll.u32 %v16722_v62, %v1354_v14  ;;  %v1364_v41 = vshrl.u32 %v16726_v0, %v1355_v34 }
 0x15f   : > { %v1509_v30 = vsub.s32 0, %v12460_v25  ;;  %v1366_v1 = vshll.u32 %v16726_v0, %v1354_v14  ;;  %v1367_v39 = vshrl.u32 %v16724_v2, %v1355_v34  ;;  %v1369_v28 = vshll.u32 %v16724_v2, %v1354_v14 }
 0x160   : > { %v1359_v22 = vor.u32 %v1358_v11, %v1357_v42  ;;  %v1362_v26 = vor.u32 %v1361_v40, %v1360_v7  ;;  %v1365_v53 = vor.u32 %v1364_v41, %v1363_v12  ;;  %v1370_v21 = vshrl.u32 %v16715_v9, %v1355_v34 }
 0x161   : > { %v10253_v48 = vmin.u32 %v1509_v30, %v12460_v25  ;;  %vm16791_vm12 = vcmp.lt.s32.totalorder %v12105_v54, 0  ;;  %vm10243_vm13 = vcmp.lt.s32.totalorder %v10242_v27, 0  ;;  %v1348_v23 = vor.u32 8388608, %v1347_v38 }
 0x162   : > { %v1368_v46 = vor.u32 %v1367_v39, %v1366_v1  ;;  %v16717_v18 = vand.u32 2147483647, %v12410_v63  ;;  %v1371_v42 = vor.u32 %v1370_v21, %v1369_v28  ;;  %vm1372_vm15 = vcmp.lt.s32.totalorder %v1353_v61, 1 }
 0x163   : > { %vm1375_vm2 = vcmp.lt.s32.totalorder %v1353_v61, 4  ;;  %v1659_v11 = vadd.s32 1, %v10260_v35  ;;  %v12478_v7 = vpop.eup %11586  ;;  %v1511_v40 = vclz %v10253_v48  ;;  %vm1374_vm14 = vcmp.lt.s32.totalorder %v1353_v61, 3 }
 0x164   : > { %16901 = vst [vmem:[#allocation14_spill] sm:$0xff] %v12478_v7  ;;  %v1380_v30 = vsel %vm1372_vm15, %v1359_v22, %v1362_v26  ;;  %v1381_v14 = vsel %vm1375_vm2, %v1368_v46, 920167782  ;;  %v1012_v12 = vxor.u32 2147483648, %v12455_v20  ;;  %v1311_v41 = vshrl.u32 %v1293_v49, %v1309_v58 }
 0x165   : > { %v1315_v38 = vshll.u32 %v12458_v15, 23  ;;  %v1382_v1 = vsel %vm1374_vm14, %v1365_v53, %v1381_v14  ;;  %v12486_v39 = vsel %vm10243_vm13, 0, %v10242_v27  ;;  %vm1373_vm4 = vcmp.lt.s32.totalorder %v1353_v61, 2 }
 0x166   : > { %v1377_v35 = vsel %vm1375_vm2, %v1365_v53, 2102212464  ;;  %v1384_v48 = vsel %vm1372_vm15, %v1362_v26, %v1365_v53  ;;  %v12490_v28 = vpop.eup %11588  ;;  %v1356_v21 = vshrl.u32 %v16720_v57, %v1355_v34  ;;  %v1383_v47 = vsel %vm1373_vm4, %v1380_v30, %v1382_v1 }
 0x167   : > { %v1385_v49 = vsel %vm1375_vm2, %v1371_v42, 1326507024  ;;  %v1656_v58 = vand.u32 8388607, %v16717_v18  ;;  %v12497_v15 = vpop.eup %11590  ;;  %v10254_v27 = vadd.s32 4294967294, %v1511_v40  ;;  %v1388_v3 = vshll.u32 %v1348_v23, 8 }
 0x168   : > { %16902 = vst [vmem:[#allocation15_spill] sm:$0xff] %v12497_v15  ;;  %v1386_v14 = vsel %vm1374_vm14, %v1368_v46, %v1385_v49  ;;  %vm1660_vm5 = vcmp.gt.s32.totalorder %v1659_v11, 0  ;;  %v1210_v53 = vsub.s32 4294967266, %v12486_v39  ;;  %v1376_v52 = vsel %vm1372_vm15, %v1356_v21, %v1359_v22 }
 0x169   : > { %v1378_v34 = vsel %vm1374_vm14, %v1362_v26, %v1377_v35  ;;  %v1387_v30 = vsel %vm1373_vm4, %v1384_v48, %v1386_v14  ;;  %v12507_v9 = vmul.u32.u64.low %v1388_v3, %v1383_v47  ;;  %v12508_v18 = vmul.u32.u64.high %v1388_v3, %v1383_v47, %v12507_v9  ;;  %v12522_v35 = vpop.f32.mrf.mxu0 }
 0x16a   : > { %v12504_v1 = vmul.u32.u64.low %v1388_v3, %v1387_v30  ;;  %v12505_v42 = vmul.u32.u64.high %v1388_v3, %v1387_v30, %v12504_v1  ;;  %11592 = vsinq.f32 %v12440_v32  ;;  %v12515_v23 = vsel %vm16791_vm12, %v1012_v12, %v12455_v20 }
 0x16b   : > { %v1310_v22 = vshll.u32 %v12330_v17, %v12419_v44  ;;  %v1661_v26 = vsel %vm1660_vm5, %v1659_v11, 0  ;;  %v1190_v46 = vadd.s32 %v12326_v59, %v12334_v13  ;;  %vm10255_vm6 = vcmp.lt.s32.totalorder %v10254_v27, 0 }
 0x16c   : > { %v1379_v40 = vsel %vm1373_vm4, %v1376_v52, %v1378_v34  ;;  %v1663_v47 = vand.u32 31, %v1661_v26  ;;  %v12526_v32 = vor.u32 4788187, %v1315_v38  ;;  %v1206_v20 = vsub.s32 32, %v12486_v39 }
 0x16d   : > { %v12524_v48 = vor.u32 %v1311_v41, %v1310_v22  ;;  %v1657_v12 = vor.u32 8388608, %v1656_v58  ;;  %v12529_v21 = vadd.s32 127, %v1210_v53  ;;  %vm1397_vm7 = vc.u32 %v12505_v42, %v12507_v9 }
 0x16e   : > { %v1398_v59 = vadd.s32 1, %v12508_v18  ;;  %v1664_v17 = vsub.s32 32, %v1663_v47  ;;  %v12534_v13 = vsel %vm10255_vm6, 0, %v10254_v27  ;;  %v1395_v44 = vmul.u32 %v1388_v3, %v1379_v40 }
 0x16f   : > { %v1666_v52 = vshll.u32 %v16720_v57, %v1663_v47  ;;  %v1549_v61 = vand.u32 2139095040, %v12522_v35  ;;  %v1669_v38 = vshll.u32 %v16718_v60, %v1663_v47  ;;  %v1662_v14 = vshrl.u32 %v1661_v26, 5 }
 0x170   : > { %v1399_v11 = vsel %vm1397_vm7, %v1398_v59, %v12508_v18  ;;  %v1667_v41 = vshrl.u32 %v16718_v60, %v1664_v17  ;;  %v1670_v49 = vshrl.u32 %v16722_v62, %v1664_v17  ;;  %v1672_v53 = vshll.u32 %v16722_v62, %v1663_v47 }
 0x171   : > { %v1400_v58 = vadd.s32 %v1399_v11, %v1395_v44  ;;  %v1673_v27 = vshrl.u32 %v16726_v0, %v1664_v17  ;;  %v1675_v30 = vshll.u32 %v16726_v0, %v1663_v47  ;;  %v1676_v1 = vshrl.u32 %v16724_v2, %v1664_v17 }
 0x172   : > { %v1668_v34 = vor.u32 %v1667_v41, %v1666_v52  ;;  %v1671_v3 = vor.u32 %v1670_v49, %v1669_v38  ;;  %v1208_v22 = vshrl.u32 %v1190_v46, %v1206_v20  ;;  %v12546_v59 = vshll.u32 %v1657_v12, 8 }
 0x173   : > { %v1401_v18 = vadd.s32 536870912, %v1400_v58  ;;  %v1674_v40 = vor.u32 %v1673_v27, %v1672_v53  ;;  %v1677_v60 = vor.u32 %v1676_v1, %v1675_v30  ;;  %v1678_v57 = vshll.u32 %v16724_v2, %v1663_v47 }
 0x174   : > { %v16903_v44 = vmov 1326507024   ;;  %v1550_v11 = vshrl.u32 %v1549_v61, 23  ;;  %v1212_v62 = vshll.u32 %v12529_v21, 23  ;;  %v1519_v52 = vsub.s32 4294967266, %v12534_v13 }
 0x175   : > { %v1679_v26 = vshrl.u32 %v16903_v44, %v1664_v17  ;;  %v12552_v41 = vshrl.u32 %v1401_v18, 30  ;;  %vm1681_vm8 = vcmp.lt.s32.totalorder %v1662_v14, 1  ;;  %v16905_v38 = vmov 683565275  }
 0x176   : > { %v1665_v49 = vshrl.u32 %v16905_v38, %v1664_v17  ;;  %vm1684_vm9 = vcmp.lt.s32.totalorder %v1662_v14, 4  ;;  %v1689_v20 = vsel %vm1681_vm8, %v1668_v34, %v1671_v3  ;;  %vm1683_vm3 = vcmp.lt.s32.totalorder %v1662_v14, 3 }
 0x177   : > { %16904 = vst [vmem:[#allocation16_spill] sm:$0xff] %v12552_v41  ;;  %v1680_v46 = vor.u32 %v1679_v26, %v1678_v57  ;;  %v1403_v12 = vshll.u32 %v12552_v41, 30  ;;  %v1686_v47 = vsel %vm1684_vm9, %v1674_v40, 2102212464  ;;  %v1690_v53 = vsel %vm1684_vm9, %v1677_v60, 920167782  ;;  %v12557_v27 = vpop.eup %11592 }
 0x178   : > { %16906 = vst [vmem:[#allocation17_spill] sm:$0xff] %v12557_v27  ;;  %v16907_v21 = vand.u32 2147483647, %v12105_v54  ;;  %v16908_v61 = vmov 0  ;;  %vm1682_vm11 = vcmp.lt.s32.totalorder %v1662_v14, 2  ;;  %v1691_v30 = vsel %vm1683_vm3, %v1674_v40, %v1690_v53 }
 0x179   : > { %v1693_v57 = vsel %vm1681_vm8, %v1671_v3, %v1674_v40  ;;  %v10256_v17 = vadd.s32 4294967169, %v1550_v11  ;;  %v12566_v1 = vsub.s32 %v1400_v58, %v1403_v12  ;;  %v1685_v18 = vsel %vm1681_vm8, %v1665_v49, %v1668_v34 }
 0x17a   : > { %vm12561_vm10 = vcmp.le.f32.partialorder %v16907_v21, 0.7853982  ;;  %v1692_v26 = vsel %vm1682_vm11, %v1689_v20, %v1691_v30  ;;  %v1694_v2 = vsel %vm1684_vm9, %v1680_v46, 1326507024  ;;  %v1687_v0 = vsel %vm1683_vm3, %v1671_v3, %v1686_v47  ;;  %v12589_v47 = vpop.f32.mrf.mxu0 }
 0x17b   : > { %v16909_v61 = vsel %vm12561_vm10, 4294967295, %v16908_v61  ;;  %v1695_v41 = vsel %vm1683_vm3, %v1677_v60, %v1694_v2  ;;  %v12571_v19 = vmul.u32.u64.low %v12546_v59, %v1692_v26  ;;  %v12572_v21 = vmul.u32.u64.high %v12546_v59, %v1692_v26, %v12571_v19  ;;  %16911 = vst [vmem:[#allocation19_spill] sm:$0xff] %v12589_v47 }
 0x17c   : > { %16910 = vst [vmem:[#allocation18_spill] sm:$0xff] %v16909_v61  ;;  %v1207_v53 = vshll.u32 %v12385_v24, %v12486_v39  ;;  %v1406_v40 = vsub.s32 0, %v12566_v1  ;;  %v1696_v58 = vsel %vm1682_vm11, %v1693_v57, %v1695_v41  ;;  %v16732_v11 = vand.u32 2147483647, %v12522_v35 }
 0x17d   : > { %v1520_v34 = vadd.s32 127, %v1519_v52  ;;  %v12581_v49 = vmul.u32.u64.low %v12546_v59, %v1696_v58  ;;  %v12582_v46 = vmul.u32.u64.high %v12546_v59, %v1696_v58, %v12581_v49  ;;  %v1556_v60 = vadd.s32 1, %v10256_v17 }
 0x17e   : > { %v1317_v2 = vand.u32 2147483647, %v12526_v32  ;;  %v1319_v3 = vcvt.s32.f32 %v12524_v48  ;;  %v10249_v20 = vmin.u32 %v1406_v40, %v12566_v1  ;;  %v1688_v24 = vsel %vm1682_vm11, %v1685_v18, %v1687_v0 }
 0x17f   : > { %v1209_v39 = vor.u32 %v1208_v22, %v1207_v53  ;;  %v1213_v12 = vor.u32 4788187, %v1212_v62  ;;  %v1707_v41 = vadd.s32 1, %v12572_v21  ;;  %vm1557_vm13 = vcmp.gt.s32.totalorder %v1556_v60, 0 }
 0x180   : > { %v1515_v52 = vsub.s32 32, %v12534_v13  ;;  %v1408_v30 = vclz %v10249_v20  ;;  %v1553_v57 = vand.u32 8388607, %v16732_v11  ;;  %v1558_v32 = vsel %vm1557_vm13, %v1556_v60, 0 }
 0x181   : > { %v1521_v17 = vshll.u32 %v1520_v34, 23  ;;  %v1704_v48 = vmul.u32 %v12546_v59, %v1688_v24  ;;  %vm1706_vm15 = vc.u32 %v12582_v46, %v12571_v19  ;;  %v1560_v0 = vand.u32 31, %v1558_v32 }
 0x182   : > { %v12601_v62 = vsel %vm12561_vm10, %v12105_v54, %v12515_v23  ;;  %v1499_v14 = vadd.s32 %v12389_v50, %v12397_v5  ;;  %v1708_v22 = vsel %vm1706_vm15, %v1707_v41, %v12572_v21  ;;  %v1858_v18 = vand.u32 2139095040, %v12589_v47 }
 0x183   : > { %v12607_v26 = vmul.f32 %v1319_v3, %v1317_v2  ;;  %v1216_v59 = vcvt.s32.f32 %v1209_v39  ;;  %v1709_v53 = vadd.s32 %v1708_v22, %v1704_v48  ;;  %v1561_v40 = vsub.s32 32, %v1560_v0 }
 0x184   : > { %v1214_v58 = vand.u32 2147483647, %v1213_v12  ;;  %v1516_v34 = vshll.u32 %v12460_v25, %v12534_v13  ;;  %v1517_v49 = vshrl.u32 %v1499_v14, %v1515_v52  ;;  %v10250_v60 = vadd.s32 4294967294, %v1408_v30 }
 0x185   : > { %v12611_v23 = vor.u32 4788187, %v1521_v17  ;;  %v1710_v20 = vadd.s32 536870912, %v1709_v53  ;;  %v1554_v24 = vor.u32 8388608, %v1553_v57  ;;  %v16912_v50 = vmov 2475754826  }
 0x186   : > { %v1564_v5 = vshrl.u32 %v16912_v50, %v1561_v40  ;;  %v1559_v21 = vshrl.u32 %v1558_v32, 5  ;;  %v1563_v41 = vshll.u32 %v16905_v38, %v1560_v0  ;;  %v16913_v2 = vmov 2131351028  }
 0x187   : > { %v1567_v3 = vshrl.u32 %v16913_v2, %v1561_v40  ;;  %v1859_v39 = vshrl.u32 %v1858_v18, 23  ;;  %v12616_v48 = vshrl.u32 %v1710_v20, 30  ;;  %v1566_v12 = vshll.u32 %v16912_v50, %v1560_v0 }
 0x188   : > { %v16914_v22 = vmov 2102212464   ;;  %v16915_v13 = vmov 920167782   ;;  %vm10251_vm2 = vcmp.lt.s32.totalorder %v10250_v60, 0  ;;  %v1569_v30 = vshll.u32 %v16913_v2, %v1560_v0 }
 0x189   : > { %v1570_v25 = vshrl.u32 %v16914_v22, %v1561_v40  ;;  %v1573_v52 = vshrl.u32 %v16915_v13, %v1561_v40  ;;  %v1572_v57 = vshll.u32 %v16914_v22, %v1560_v0  ;;  %v1576_v32 = vshrl.u32 %v16903_v44, %v1561_v40 }
 0x18a   : > { %v1712_v17 = vshll.u32 %v12616_v48, 30  ;;  %v1565_v14 = vor.u32 %v1564_v5, %v1563_v41  ;;  %v1568_v11 = vor.u32 %v1567_v3, %v1566_v12  ;;  %v1575_v18 = vshll.u32 %v16915_v13, %v1560_v0 }
 0x18b   : > { %vm16817_vm14 = vcmp.lt.s32.totalorder %v12034_v36, 0  ;;  %v1321_v20 = vxor.u32 2147483648, %v12607_v26  ;;  %v1217_v8 = vmul.f32 %v1216_v59, %v1214_v58  ;;  %v1571_v15 = vor.u32 %v1570_v25, %v1569_v30 }
 0x18c   : > { %v1574_v43 = vor.u32 %v1573_v52, %v1572_v57  ;;  %vm1239_vm4 = vcmp.lt.s32.totalorder %v12189_v16, 0  ;;  %v1518_v27 = vor.u32 %v1517_v49, %v1516_v34  ;;  %v1523_v61 = vand.u32 2147483647, %v12611_v23 }
 0x18d   : > { %v1577_v54 = vor.u32 %v1576_v32, %v1575_v18  ;;  %v16743_v33 = vand.u32 2147483647, %v12589_v47  ;;  %v12632_v5 = vsel %vm10251_vm2, 0, %v10250_v60  ;;  %vm1578_vm5 = vcmp.lt.s32.totalorder %v1559_v21, 1 }
 0x18e   : > { %v1594_v0 = vshll.u32 %v1554_v24, 8  ;;  %v10268_v41 = vadd.s32 4294967169, %v1859_v39  ;;  %v12634_v3 = vsub.s32 %v1709_v53, %v1712_v17  ;;  %v1562_v59 = vshrl.u32 %v16905_v38, %v1561_v40 }
 0x18f   : > { %vm1581_vm6 = vcmp.lt.s32.totalorder %v1559_v21, 4  ;;  %v1586_v58 = vsel %vm1578_vm5, %v1565_v14, %v1568_v11  ;;  %v16916_v34 = vand.u32 2147483647, %v12189_v16  ;;  %vm1580_vm8 = vcmp.lt.s32.totalorder %v1559_v21, 3 }
 0x190   : > { %v1583_v23 = vsel %vm1581_vm6, %v1571_v15, 2102212464  ;;  %v1587_v60 = vsel %vm1581_vm6, %v1574_v43, 920167782  ;;  %v1590_v12 = vsel %vm1578_vm5, %v1568_v11, %v1571_v15  ;;  %vm1579_vm9 = vcmp.lt.s32.totalorder %v1559_v21, 2 }
 0x191   : > { %vm12640_vm7 = vcmp.le.f32.partialorder %v16916_v34, 0.7853982  ;;  %v1588_v24 = vsel %vm1580_vm8, %v1571_v15, %v1587_v60  ;;  %v1591_v53 = vsel %vm1581_vm6, %v1577_v54, 1326507024  ;;  %v1862_v40 = vand.u32 8388607, %v16743_v33 }
 0x192   : > { %v1416_v39 = vsub.s32 4294967266, %v12632_v5  ;;  %v1582_v25 = vsel %vm1578_vm5, %v1562_v59, %v1565_v14  ;;  %v1589_v52 = vsel %vm1579_vm9, %v1586_v58, %v1588_v24  ;;  %v1592_v30 = vsel %vm1580_vm8, %v1574_v43, %v1591_v53 }
 0x193   : > { %v1584_v57 = vsel %vm1580_vm8, %v1568_v11, %v1583_v23  ;;  %v1593_v32 = vsel %vm1579_vm9, %v1590_v12, %v1592_v30  ;;  %v12651_v17 = vmul.u32.u64.low %v1594_v0, %v1589_v52  ;;  %v12652_v18 = vmul.u32.u64.high %v1594_v0, %v1589_v52, %v12651_v17 }
 0x194   : > { %v1715_v15 = vsub.s32 0, %v12634_v3  ;;  %v12656_v54 = vmul.u32.u64.low %v1594_v0, %v1593_v32  ;;  %v12657_v34 = vmul.u32.u64.high %v1594_v0, %v1593_v32, %v12656_v54  ;;  %v1865_v60 = vadd.s32 1, %v10268_v41 }
 0x195   : > { %v16919_v33 = vxor.u32 2147483648, %v12432_v55  ;;  %11594 = vcosq.f32 %v12601_v62  ;;  %vm16790_vm3 = vcmp.lt.s32.totalorder %v12208_v6, 0  ;;  %v1525_v43 = vcvt.s32.f32 %v1518_v27 }
 0x196   : > { %v1322_v11 = vsel %vm1239_vm4, %v1321_v20, %v12607_v26  ;;  %v1218_v59 = vxor.u32 2147483648, %v1217_v8  ;;  %v1585_v58 = vsel %vm1579_vm9, %v1582_v25, %v1584_v57  ;;  %vm1866_vm11 = vcmp.gt.s32.totalorder %v1865_v60, 0  ;;  %v12693_v25 = vpop.f32.mrf.mxu0 }
 0x197   : > { %v12664_v14 = vsel %vm16817_vm14, %v16919_v33, %v12432_v55  ;;  %v12672_v41 = vmul.f32 %v1525_v43, %v1523_v61  ;;  %v1604_v23 = vadd.s32 1, %v12652_v18  ;;  %v1863_v12 = vor.u32 8388608, %v1862_v40 }
 0x198   : > { %v1867_v33 = vsel %vm1866_vm11, %v1865_v60, 0  ;;  %v1412_v55 = vsub.s32 32, %v12632_v5  ;;  %v1417_v24 = vadd.s32 127, %v1416_v39  ;;  %v10261_v53 = vmin.u32 %v1715_v15, %v12634_v3 }
 0x199   : > { %vm1603_vm13 = vc.u32 %v12657_v34, %v12651_v17  ;;  %11596 = vsinq.f32 %v12601_v62  ;;  %v12684_v61 = vsel %vm12640_vm7, %v12189_v16, %v1322_v11  ;;  %v1601_v26 = vmul.u32 %v1594_v0, %v1585_v58 }
 0x19a   : > { %v12688_v21 = vsel %vm16790_vm3, %v1218_v59, %v1217_v8  ;;  %v1396_v20 = vadd.s32 %v12507_v9, %v12505_v42  ;;  %v1605_v40 = vsel %vm1603_vm13, %v1604_v23, %v12652_v18  ;;  %v1869_v39 = vand.u32 31, %v1867_v33 }
 0x19b   : > { %v1413_v52 = vshll.u32 %v12566_v1, %v12632_v5  ;;  %v1606_v30 = vadd.s32 %v1605_v40, %v1601_v26  ;;  %v12698_v57 = vshll.u32 %v1863_v12, 8  ;;  %v1418_v32 = vshll.u32 %v1417_v24, 23 }
 0x19c   : > { %v1414_v0 = vshrl.u32 %v1396_v20, %v1412_v55  ;;  %v1717_v8 = vclz %v10261_v53  ;;  %v1870_v15 = vsub.s32 32, %v1869_v39  ;;  %v1872_v9 = vshll.u32 %v16905_v38, %v1869_v39 }
 0x19d   : > { %v1607_v54 = vadd.s32 536870912, %v1606_v30  ;;  %v1875_v42 = vshll.u32 %v16912_v50, %v1869_v39  ;;  %v1755_v18 = vand.u32 2139095040, %v12693_v25  ;;  %v1878_v1 = vshll.u32 %v16913_v2, %v1869_v39 }
 0x19e   : > { %v1873_v60 = vshrl.u32 %v16912_v50, %v1870_v15  ;;  %v1876_v43 = vshrl.u32 %v16913_v2, %v1870_v15  ;;  %v1879_v5 = vshrl.u32 %v16914_v22, %v1870_v15  ;;  %v1868_v59 = vshrl.u32 %v1867_v33, 5 }
 0x19f   : > { %v12707_v11 = vshrl.u32 %v1607_v54, 30  ;;  %v1881_v58 = vshll.u32 %v16914_v22, %v1869_v39  ;;  %v1882_v23 = vshrl.u32 %v16915_v13, %v1870_v15  ;;  %v1415_v12 = vor.u32 %v1414_v0, %v1413_v52 }
 0x1a0   : > { %v1874_v55 = vor.u32 %v1873_v60, %v1872_v9  ;;  %v1877_v24 = vor.u32 %v1876_v43, %v1875_v42  ;;  %v1880_v53 = vor.u32 %v1879_v5, %v1878_v1  ;;  %v1884_v40 = vshll.u32 %v16915_v13, %v1869_v39 }
 0x1a1   : > { %16920 = vst [vmem:[#allocation20_spill] sm:$0xff] %v12707_v11  ;;  %v1609_v26 = vshll.u32 %v12707_v11, 30  ;;  %v1883_v20 = vor.u32 %v1882_v23, %v1881_v58  ;;  %v1885_v62 = vshrl.u32 %v16903_v44, %v1870_v15  ;;  %v16922_v54 = vand.u32 2147483647, %v12208_v6 }
 0x1a2   : > { %v12714_v27 = vpop.eup %11594  ;;  %v16923_v33 = vmov 0  ;;  %vm1445_vm2 = vcmp.lt.s32.totalorder %v12248_v37, 0  ;;  %v1419_v52 = vor.u32 4788187, %v1418_v32  ;;  %v10262_v0 = vadd.s32 4294967294, %v1717_v8 }
 0x1a3   : > { %16921 = vst [vmem:[#allocation21_spill] sm:$0xff] %v12714_v27  ;;  %vm12718_vm15 = vcmp.le.f32.partialorder %v16922_v54, 0.7853982  ;;  %v1871_v9 = vshrl.u32 %v16905_v38, %v1870_v15  ;;  %v1756_v42 = vshrl.u32 %v1755_v18, 23  ;;  %v12724_v60 = vsub.s32 %v1606_v30, %v1609_v26 }
 0x1a4   : > { %v16924_v33 = vsel %vm12718_vm15, 4294967295, %v16923_v33  ;;  %v1886_v39 = vor.u32 %v1885_v62, %v1884_v40  ;;  %vm1887_vm5 = vcmp.lt.s32.totalorder %v1868_v59, 1  ;;  %vm1890_vm6 = vcmp.lt.s32.totalorder %v1868_v59, 4 }
 0x1a5   : > { %16925 = vst [vmem:[#allocation22_spill] sm:$0xff] %v16924_v33  ;;  %vm1889_vm8 = vcmp.lt.s32.totalorder %v1868_v59, 3  ;;  %v1892_v43 = vsel %vm1890_vm6, %v1880_v53, 2102212464  ;;  %v1895_v1 = vsel %vm1887_vm5, %v1874_v55, %v1877_v24  ;;  %v1896_v5 = vsel %vm1890_vm6, %v1883_v20, 920167782 }
 0x1a6   : > { %v1612_v58 = vsub.s32 0, %v12724_v60  ;;  %vm1888_vm9 = vcmp.lt.s32.totalorder %v1868_v59, 2  ;;  %v1897_v23 = vsel %vm1889_vm8, %v1880_v53, %v1896_v5  ;;  %v1899_v32 = vsel %vm1887_vm5, %v1877_v24, %v1880_v53  ;;  %v12730_v8 = vpop.eup %11596 }
 0x1a7   : > { %16926 = vst [vmem:[#allocation23_spill] sm:$0xff] %v12730_v8  ;;  %vm10263_vm11 = vcmp.lt.s32.totalorder %v10262_v0, 0  ;;  %v1898_v30 = vsel %vm1888_vm9, %v1895_v1, %v1897_v23  ;;  %v1900_v62 = vsel %vm1890_vm6, %v1886_v39, 1326507024  ;;  %v10264_v15 = vadd.s32 4294967169, %v1756_v42 }
 0x1a8   : > { %v16927_v18 = vand.u32 2147483647, %v12248_v37  ;;  %v10257_v40 = vmin.u32 %v1612_v58, %v12724_v60  ;;  %v1891_v54 = vsel %vm1887_vm5, %v1871_v9, %v1874_v55  ;;  %v1893_v5 = vsel %vm1889_vm8, %v1877_v24, %v1892_v43 }
 0x1a9   : > { %v1901_v53 = vsel %vm1889_vm8, %v1883_v20, %v1900_v62  ;;  %v1420_v11 = vand.u32 2147483647, %v1419_v52  ;;  %v12745_v39 = vmul.u32.u64.low %v12698_v57, %v1898_v30  ;;  %v12746_v42 = vmul.u32.u64.high %v12698_v57, %v1898_v30, %v12745_v39 }
 0x1aa   : > { %vm12735_vm13 = vcmp.le.f32.partialorder %v16927_v18, 0.7853982  ;;  %v1902_v27 = vsel %vm1888_vm9, %v1899_v32, %v1901_v53  ;;  %11598 = vcosq.f32 %v12684_v61  ;;  %v1422_v1 = vcvt.s32.f32 %v1415_v12 }
 0x1ab   : > { %v12751_v23 = vmul.u32.u64.low %v12698_v57, %v1902_v27  ;;  %v12752_v58 = vmul.u32.u64.high %v12698_v57, %v1902_v27, %v12751_v23  ;;  %v12754_v55 = vsel %vm10263_vm11, 0, %v10262_v0  ;;  %v1614_v24 = vclz %v10257_v40 }
 0x1ac   : > { %v1894_v20 = vsel %vm1888_vm9, %v1891_v54, %v1893_v5  ;;  %v1762_v52 = vadd.s32 1, %v10264_v15  ;;  %v16930_v9 = vsub.s32 4, %v12308_v29  ;;  %11600 = vsinq.f32 %v12684_v61 }
 0x1ad   : > { %v1222_v27 = vsel %vm12718_vm15, %v12208_v6, %v12688_v21  ;;  %v16931_v12 = vxor.u32 2147483648, %v12672_v41  ;;  %v12772_v0 = vmul.f32 %v1422_v1, %v1420_v11  ;;  %v1913_v32 = vadd.s32 1, %v12746_v42 }
 0x1ae   : > { %v1324_v43 = vsel %vm1239_vm4, %v16930_v9, %v12308_v29  ;;  %v16747_v30 = vand.u32 2147483647, %v12693_v25  ;;  %vm1763_vm4 = vcmp.gt.s32.totalorder %v1762_v52, 0  ;;  %v1725_v29 = vsub.s32 4294967266, %v12754_v55 }
 0x1af   : > { %v1528_v59 = vsel %vm1445_vm2, %v16931_v12, %v12672_v41  ;;  %v1910_v61 = vmul.u32 %v12698_v57, %v1894_v20  ;;  %vm1912_vm5 = vc.u32 %v12752_v58, %v12745_v39  ;;  %v1764_v21 = vsel %vm1763_vm4, %v1762_v52, 0 }
 0x1b0   : > { %11602 = vcosq.f32 %v1222_v27  ;;  %v10258_v62 = vadd.s32 4294967294, %v1614_v24  ;;  %v1914_v15 = vsel %vm1912_vm5, %v1913_v32, %v12746_v42  ;;  %v1766_v41 = vand.u32 31, %v1764_v21 }
 0x1b1   : > { %v12783_v11 = vsel %vm12640_vm7, 0, %v1324_v43  ;;  %11604 = vsinq.f32 %v1222_v27  ;;  %v1915_v40 = vadd.s32 %v1914_v15, %v1910_v61  ;;  %v12789_v57 = vsel %vm12735_vm13, %v12248_v37, %v1528_v59 }
 0x1b2   : > { %16932 = vst [vmem:[#allocation24_spill] sm:$0xff] %v12783_v11  ;;  %v1705_v5 = vadd.s32 %v12571_v19, %v12582_v46  ;;  %v1767_v53 = vsub.s32 32, %v1766_v41  ;;  %v1721_v42 = vsub.s32 32, %v12754_v55  ;;  %v1726_v49 = vadd.s32 127, %v1725_v29 }
 0x1b3   : > { %v1916_v1 = vadd.s32 536870912, %v1915_v40  ;;  %v1759_v23 = vand.u32 8388607, %v16747_v30  ;;  %vm10259_vm7 = vcmp.lt.s32.totalorder %v10258_v62, 0  ;;  %v1769_v43 = vshll.u32 %v16905_v38, %v1766_v41  ;;  %v12814_v30 = vpop.f32.mrf.mxu0 }
 0x1b4   : > { %v1770_v24 = vshrl.u32 %v16912_v50, %v1767_v53  ;;  %v1773_v20 = vshrl.u32 %v16913_v2, %v1767_v53  ;;  %v1776_v52 = vshrl.u32 %v16914_v22, %v1767_v53  ;;  %v1772_v19 = vshll.u32 %v16912_v50, %v1766_v41  ;;  %16933 = vst [vmem:[#allocation25_spill] sm:$0xff] %v12814_v30 }
 0x1b5   : > { %v12800_v9 = vshrl.u32 %v1916_v1, 30  ;;  %v1779_v46 = vshrl.u32 %v16915_v13, %v1767_v53  ;;  %v1722_v27 = vshll.u32 %v12634_v3, %v12754_v55  ;;  %v12807_v12 = vshrl.u32 %v1764_v21, 5 }
 0x1b6   : > { %v1775_v59 = vshll.u32 %v16913_v2, %v1766_v41  ;;  %v1778_v32 = vshll.u32 %v16914_v22, %v1766_v41  ;;  %v12811_v29 = vsel %vm10259_vm7, 0, %v10258_v62  ;;  %v1771_v15 = vor.u32 %v1770_v24, %v1769_v43 }
 0x1b7   : > { %v1918_v61 = vshll.u32 %v12800_v9, 30  ;;  %v1774_v1 = vor.u32 %v1773_v20, %v1772_v19  ;;  %v12816_v54 = vpop.eup %11598  ;;  %v1781_v3 = vshll.u32 %v16915_v13, %v1766_v41  ;;  %v1782_v55 = vshrl.u32 %v16903_v44, %v1767_v53 }
 0x1b8   : > { %16934 = vst [vmem:[#allocation26_spill] sm:$0xff] %v12816_v54  ;;  %v1777_v18 = vor.u32 %v1776_v52, %v1775_v59  ;;  %v1780_v16 = vor.u32 %v1779_v46, %v1778_v32  ;;  %v1723_v21 = vshrl.u32 %v1705_v5, %v1721_v42  ;;  %v1727_v11 = vshll.u32 %v1726_v49, 23 }
 0x1b9   : > { %v12820_v33 = vsub.s32 %v1915_v40, %v1918_v61  ;;  %v1760_v62 = vor.u32 8388608, %v1759_v23  ;;  %v12822_v6 = vpop.eup %11600  ;;  %vm16789_vm6 = vcmp.lt.s32.totalorder %v12383_v31, 0  ;;  %v1622_v24 = vsub.s32 4294967266, %v12811_v29 }
 0x1ba   : > { %16935 = vst [vmem:[#allocation27_spill] sm:$0xff] %v12822_v6  ;;  %v1783_v20 = vor.u32 %v1782_v55, %v1781_v3  ;;  %vm1784_vm8 = vcmp.lt.s32.totalorder %v12807_v12, 1  ;;  %v2064_v52 = vand.u32 2139095040, %v12814_v30  ;;  %vm1786_vm9 = vcmp.lt.s32.totalorder %v12807_v12, 3 }
 0x1bb   : > { %v1921_v41 = vsub.s32 0, %v12820_v33  ;;  %vm1787_vm11 = vcmp.lt.s32.totalorder %v12807_v12, 4  ;;  %v1792_v40 = vsel %vm1784_vm8, %v1771_v15, %v1774_v1  ;;  %v1796_v49 = vsel %vm1784_vm8, %v1774_v1, %v1777_v18 }
 0x1bc   : > { %v1789_v5 = vsel %vm1787_vm11, %v1777_v18, 2102212464  ;;  %v1793_v42 = vsel %vm1787_vm11, %v1780_v16, 920167782  ;;  %v1797_v23 = vsel %vm1787_vm11, %v1783_v20, 1326507024  ;;  %v1768_v46 = vshrl.u32 %v16905_v38, %v1767_v53 }
 0x1bd   : > { %v12835_v43 = vpop.eup %11602  ;;  %v10269_v19 = vmin.u32 %v1921_v41, %v12820_v33  ;;  %vm1785_vm4 = vcmp.lt.s32.totalorder %v12807_v12, 2  ;;  %v1794_v59 = vsel %vm1786_vm9, %v1777_v18, %v1793_v42  ;;  %v16938_v61 = vand.u32 2147483647, %v12383_v31 }
 0x1be   : > { %16936 = vst [vmem:[#allocation28_spill] sm:$0xff] %v12835_v43  ;;  %v12842_v32 = vpop.eup %11604  ;;  %v16939_v3 = vmov 0  ;;  %vm1651_vm7 = vcmp.lt.s32.totalorder %v12410_v63, 0  ;;  %v1795_v55 = vsel %vm1785_vm4, %v1792_v40, %v1794_v59  ;;  %v1798_v53 = vsel %vm1786_vm9, %v1780_v16, %v1797_v23 }
 0x1bf   : > { %16937 = vst [vmem:[#allocation29_spill] sm:$0xff] %v12842_v32  ;;  %vm12846_vm5 = vcmp.le.f32.partialorder %v16938_v61, 0.7853982  ;;  %v1800_v20 = vshll.u32 %v1760_v62, 8  ;;  %v2065_v41 = vshrl.u32 %v2064_v52, 23  ;;  %v1788_v18 = vsel %vm1784_vm8, %v1768_v46, %v1771_v15 }
 0x1c0   : > { %v16940_v3 = vsel %vm12846_vm5, 4294967295, %v16939_v3  ;;  %v1728_v54 = vor.u32 4788187, %v1727_v11  ;;  %v1790_v42 = vsel %vm1786_vm9, %v1774_v1, %v1789_v5  ;;  %v1799_v61 = vsel %vm1785_vm4, %v1796_v49, %v1798_v53 }
 0x1c1   : > { %16941 = vst [vmem:[#allocation30_spill] sm:$0xff] %v16940_v3  ;;  %v1923_v6 = vclz %v10269_v19  ;;  %v12861_v43 = vmul.u32.u64.low %v1800_v20, %v1799_v61  ;;  %v12862_v32 = vmul.u32.u64.high %v1800_v20, %v1799_v61, %v12861_v43  ;;  %v10276_v40 = vadd.s32 4294967169, %v2065_v41 }
 0x1c2   : > { %v1724_v59 = vor.u32 %v1723_v21, %v1722_v27  ;;  %v1623_v8 = vadd.s32 127, %v1622_v24  ;;  %v12864_v16 = vmul.u32.u64.low %v1800_v20, %v1795_v55  ;;  %v12865_v62 = vmul.u32.u64.high %v1800_v20, %v1795_v55, %v12864_v16 }
 0x1c3   : > { %v16942_v11 = vsub.s32 4, %v12443_v51  ;;  %11606 = vcosq.f32 %v12789_v57  ;;  %v16759_v1 = vand.u32 2147483647, %v12814_v30  ;;  %v2071_v52 = vadd.s32 1, %v10276_v40 }
 0x1c4   : > { %11608 = vsinq.f32 %v12789_v57  ;;  %v16943_v27 = vxor.u32 2147483648, %v12772_v0  ;;  %v1735_v24 = vsub.s32 4, %v12616_v48  ;;  %v1791_v5 = vsel %vm1785_vm4, %v1788_v18, %v1790_v42 }
 0x1c5   : > { %v12873_v15 = vsel %vm1445_vm2, %v16942_v11, %v12443_v51  ;;  %v12886_v51 = vpop.f32.mrf.mxu0  ;;  %v1729_v49 = vand.u32 2147483647, %v1728_v54  ;;  %v10270_v23 = vadd.s32 4294967294, %v1923_v6  ;;  %vm1809_vm2 = vc.u32 %v12862_v32, %v12864_v16 }
 0x1c6   : > { %v1425_v21 = vsel %vm16789_vm6, %v16943_v27, %v12772_v0  ;;  %16944 = vst [vmem:[#allocation31_spill] sm:$0xff] %v12886_v51  ;;  %vm2072_vm8 = vcmp.gt.s32.totalorder %v2071_v52, 0  ;;  %v1731_v57 = vcvt.s32.f32 %v1724_v59  ;;  %v1618_v43 = vsub.s32 32, %v12811_v29 }
 0x1c7   : > { %v1624_v19 = vshll.u32 %v1623_v8, 23  ;;  %v1810_v46 = vadd.s32 1, %v12865_v62  ;;  %v1807_v0 = vmul.u32 %v1800_v20, %v1791_v5  ;;  %v2068_v55 = vand.u32 8388607, %v16759_v1 }
 0x1c8   : > { %v2073_v12 = vsel %vm2072_vm8, %v2071_v52, 0  ;;  %v1961_v53 = vand.u32 2139095040, %v12886_v51  ;;  %v12898_v6 = vsel %vm12846_vm5, %v12383_v31, %v1425_v21  ;;  %v12903_v54 = vsel %vm1651_vm7, %v1735_v24, %v12616_v48 }
 0x1c9   : > { %v1602_v8 = vadd.s32 %v12651_v17, %v12657_v34  ;;  %v1811_v20 = vsel %vm1809_vm2, %v1810_v46, %v12865_v62  ;;  %v12908_v41 = vmul.f32 %v1731_v57, %v1729_v49  ;;  %vm10271_vm9 = vcmp.lt.s32.totalorder %v10270_v23, 0 }
 0x1ca   : > { %v1812_v18 = vadd.s32 %v1811_v20, %v1807_v0  ;;  %v2075_v42 = vand.u32 31, %v2073_v12  ;;  %v1619_v61 = vshll.u32 %v12724_v60, %v12811_v29  ;;  %v12912_v59 = vor.u32 4788187, %v1624_v19 }
 0x1cb   : > { %v1620_v40 = vshrl.u32 %v1602_v8, %v1618_v43  ;;  %v2069_v52 = vor.u32 8388608, %v2068_v55  ;;  %v1962_v21 = vshrl.u32 %v1961_v53, 23  ;;  %v12915_v17 = vsel %vm10271_vm9, 0, %v10270_v23 }
 0x1cc   : > { %v1813_v48 = vadd.s32 536870912, %v1812_v18  ;;  %v2076_v27 = vsub.s32 32, %v2075_v42  ;;  %v2074_v34 = vshrl.u32 %v2073_v12, 5  ;;  %v2078_v62 = vshll.u32 %v16905_v38, %v2075_v42 }
 0x1cd   : > { %v2081_v24 = vshll.u32 %v16912_v50, %v2075_v42  ;;  %v2084_v49 = vshll.u32 %v16913_v2, %v2075_v42  ;;  %v2087_v43 = vshll.u32 %v16914_v22, %v2075_v42  ;;  %v2090_v19 = vshll.u32 %v16915_v13, %v2075_v42 }
 0x1ce   : > { %v12919_v5 = vshrl.u32 %v1813_v48, 30  ;;  %v2079_v60 = vshrl.u32 %v16912_v50, %v2076_v27  ;;  %v2082_v29 = vshrl.u32 %v16913_v2, %v2076_v27  ;;  %v2085_v57 = vshrl.u32 %v16914_v22, %v2076_v27 }
 0x1cf   : > { %v2088_v23 = vshrl.u32 %v16915_v13, %v2076_v27  ;;  %v2091_v12 = vshrl.u32 %v16903_v44, %v2076_v27  ;;  %vm2093_vm11 = vcmp.lt.s32.totalorder %v2074_v34, 1  ;;  %v10272_v48 = vadd.s32 4294967169, %v1962_v21 }
 0x1d0   : > { %16945 = vst [vmem:[#allocation32_spill] sm:$0xff] %v12919_v5  ;;  %v1815_v46 = vshll.u32 %v12919_v5, 30  ;;  %v2080_v0 = vor.u32 %v2079_v60, %v2078_v62  ;;  %v2083_v55 = vor.u32 %v2082_v29, %v2081_v24  ;;  %v12930_v53 = vpop.eup %11606  ;;  %v2086_v8 = vor.u32 %v2085_v57, %v2084_v49 }
 0x1d1   : > { %16946 = vst [vmem:[#allocation33_spill] sm:$0xff] %v12930_v53  ;;  %v2089_v20 = vor.u32 %v2088_v23, %v2087_v43  ;;  %v12932_v1 = vpop.eup %11608  ;;  %v2092_v37 = vor.u32 %v2091_v12, %v2090_v19  ;;  %vm2094_vm4 = vcmp.lt.s32.totalorder %v2074_v34, 2  ;;  %vm2096_vm2 = vcmp.lt.s32.totalorder %v2074_v34, 4 }
 0x1d2   : > { %16947 = vst [vmem:[#allocation34_spill] sm:$0xff] %v12932_v1  ;;  %v12934_v11 = vsub.s32 %v1812_v18, %v1815_v46  ;;  %vm2095_vm8 = vcmp.lt.s32.totalorder %v2074_v34, 3  ;;  %v2098_v42 = vsel %vm2096_vm2, %v2086_v8, 2102212464  ;;  %v2101_v62 = vsel %vm2093_vm11, %v2080_v0, %v2083_v55 }
 0x1d3   : > { %v2102_v24 = vsel %vm2096_vm2, %v2089_v20, 920167782  ;;  %v2077_v29 = vshrl.u32 %v16905_v38, %v2076_v27  ;;  %v2105_v57 = vsel %vm2093_vm11, %v2083_v55, %v2086_v8  ;;  %v2106_v43 = vsel %vm2096_vm2, %v2092_v37, 1326507024 }
 0x1d4   : > { %v1818_v60 = vsub.s32 0, %v12934_v11  ;;  %v2103_v49 = vsel %vm2095_vm8, %v2086_v8, %v2102_v24  ;;  %v2109_v18 = vshll.u32 %v2069_v52, 8  ;;  %v1968_v23 = vadd.s32 1, %v10272_v48 }
 0x1d5   : > { %v2104_v21 = vsel %vm2094_vm4, %v2101_v62, %v2103_v49  ;;  %v2097_v46 = vsel %vm2093_vm11, %v2077_v29, %v2080_v0  ;;  %v2099_v12 = vsel %vm2095_vm8, %v2083_v55, %v2098_v42  ;;  %v2107_v5 = vsel %vm2095_vm8, %v2089_v20, %v2106_v43 }
 0x1d6   : > { %v10265_v19 = vmin.u32 %v1818_v60, %v12934_v11  ;;  %v1931_v53 = vsub.s32 4294967266, %v12915_v17  ;;  %v2108_v1 = vsel %vm2094_vm4, %v2105_v57, %v2107_v5  ;;  %v1733_v8 = vxor.u32 2147483648, %v12908_v41  ;;  %v12971_v57 = vpop.f32.mrf.mxu0 }
 0x1d7   : > { %v12945_v3 = vmul.u32.u64.low %v2109_v18, %v2104_v21  ;;  %v12946_v27 = vmul.u32.u64.high %v2109_v18, %v2104_v21, %v12945_v3  ;;  %v1621_v62 = vor.u32 %v1620_v40, %v1619_v61  ;;  %11610 = vcosq.f32 %v12898_v6  ;;  %16949 = vst [vmem:[#allocation35_spill] sm:$0xff] %v12971_v57 }
 0x1d8   : > { %v12950_v37 = vmul.u32.u64.low %v2109_v18, %v2108_v1  ;;  %v12951_v52 = vmul.u32.u64.high %v2109_v18, %v2108_v1, %v12950_v37  ;;  %v1820_v48 = vclz %v10265_v19  ;;  %v2100_v0 = vsel %vm2094_vm4, %v2097_v46, %v2099_v12 }
 0x1d9   : > { %vm1969_vm9 = vcmp.gt.s32.totalorder %v1968_v23, 0  ;;  %11612 = vsinq.f32 %v12898_v6  ;;  %v1626_v5 = vand.u32 2147483647, %v12912_v59  ;;  %v16948_v55 = vand.u32 2147483647, %v12886_v51 }
 0x1da   : > { %v1970_v42 = vsel %vm1969_vm9, %v1968_v23, 0  ;;  %v1927_v24 = vsub.s32 32, %v12915_v17  ;;  %v1932_v61 = vadd.s32 127, %v1931_v53  ;;  %v2119_v1 = vadd.s32 1, %v12946_v27 }
 0x1db   : > { %v1965_v20 = vand.u32 8388607, %v16948_v55  ;;  %v1972_v40 = vand.u32 31, %v1970_v42  ;;  %v12964_v34 = vsel %vm1651_vm7, %v1733_v8, %v12908_v41  ;;  %v1628_v60 = vcvt.s32.f32 %v1621_v62 }
 0x1dc   : > { %v2116_v29 = vmul.u32 %v2109_v18, %v2100_v0  ;;  %vm2118_vm11 = vc.u32 %v12951_v52, %v12945_v3  ;;  %v1911_v6 = vadd.s32 %v12745_v39, %v12752_v58  ;;  %v10266_v59 = vadd.s32 4294967294, %v1820_v48 }
 0x1dd   : > { %v2120_v49 = vsel %vm2118_vm11, %v2119_v1, %v12946_v27  ;;  %v1973_v53 = vsub.s32 32, %v1972_v40  ;;  %v12973_v21 = vmul.f32 %v1628_v60, %v1626_v5  ;;  %v1928_v41 = vshll.u32 %v12820_v33, %v12915_v17 }
 0x1de   : > { %v2121_v43 = vadd.s32 %v2120_v49, %v2116_v29  ;;  %v1966_v23 = vor.u32 8388608, %v1965_v20  ;;  %v1929_v18 = vshrl.u32 %v1911_v6, %v1927_v24  ;;  %v1933_v19 = vshll.u32 %v1932_v61, 23 }
 0x1df   : > { %v1976_v46 = vshrl.u32 %v16912_v50, %v1973_v53  ;;  %v1979_v12 = vshrl.u32 %v16913_v2, %v1973_v53  ;;  %v1975_v58 = vshll.u32 %v16905_v38, %v1972_v40  ;;  %v1978_v27 = vshll.u32 %v16912_v50, %v1972_v40 }
 0x1e0   : > { %v2122_v39 = vadd.s32 536870912, %v2121_v43  ;;  %v2270_v8 = vand.u32 2139095040, %v12971_v57  ;;  %vm10267_vm7 = vcmp.lt.s32.totalorder %v10266_v59, 0  ;;  %v1971_v62 = vshrl.u32 %v1970_v42, 5 }
 0x1e1   : > { %v1981_v37 = vshll.u32 %v16913_v2, %v1972_v40  ;;  %v1982_v33 = vshrl.u32 %v16914_v22, %v1973_v53  ;;  %v1977_v48 = vor.u32 %v1976_v46, %v1975_v58  ;;  %v1980_v0 = vor.u32 %v1979_v12, %v1978_v27 }
 0x1e2   : > { %v12984_v17 = vshrl.u32 %v2122_v39, 30  ;;  %v1985_v5 = vshrl.u32 %v16915_v13, %v1973_v53  ;;  %v16950_v55 = vand.u32 2147483647, %v12410_v63  ;;  %v1984_v61 = vshll.u32 %v16914_v22, %v1972_v40 }
 0x1e3   : > { %v1983_v24 = vor.u32 %v1982_v33, %v1981_v37  ;;  %v1987_v42 = vshll.u32 %v16915_v13, %v1972_v40  ;;  %v1988_v1 = vshrl.u32 %v16903_v44, %v1973_v53  ;;  %vm16779_vm2 = vcmp.lt.s32.totalorder %v12522_v35, 0 }
 0x1e4   : > { %vm12989_vm4 = vcmp.le.f32.partialorder %v16950_v55, 0.7853982  ;;  %v1630_v60 = vxor.u32 2147483648, %v12973_v21  ;;  %v12998_v29 = vsel %vm10267_vm7, 0, %v10266_v59  ;;  %v2124_v6 = vshll.u32 %v12984_v17, 30  ;;  %v13001_v27 = vpop.eup %11610 }
 0x1e5   : > { %v2006_v49 = vshll.u32 %v1966_v23, 8  ;;  %v1930_v46 = vor.u32 %v1929_v18, %v1928_v41  ;;  %v1934_v12 = vor.u32 4788187, %v1933_v19  ;;  %v1986_v39 = vor.u32 %v1985_v5, %v1984_v61  ;;  %16953 = vst [vmem:[#allocation36_spill] sm:$0xff] %v13001_v27 }
 0x1e6   : > { %v1989_v58 = vor.u32 %v1988_v1, %v1987_v42  ;;  %v13003_v37 = vsub.s32 %v2121_v43, %v2124_v6  ;;  %vm1990_vm8 = vcmp.lt.s32.totalorder %v1971_v62, 1  ;;  %vm1993_vm9 = vcmp.lt.s32.totalorder %v1971_v62, 4  ;;  %v13005_v33 = vpop.eup %11612 }
 0x1e7   : > { %v2271_v40 = vshrl.u32 %v2270_v8, 23  ;;  %16954 = vst [vmem:[#allocation37_spill] sm:$0xff] %v13005_v33  ;;  %v16955_v55 = vand.u32 2147483647, %v12522_v35  ;;  %v16956_v59 = vmov 0  ;;  %v1824_v41 = vsub.s32 32, %v12998_v29 }
 0x1e8   : > { %v1828_v23 = vsub.s32 4294967266, %v12998_v29  ;;  %v1995_v18 = vsel %vm1993_vm9, %v1983_v24, 2102212464  ;;  %v1998_v19 = vsel %vm1990_vm8, %v1977_v48, %v1980_v0  ;;  %v2127_v43 = vsub.s32 0, %v13003_v37 }
 0x1e9   : > { %vm13009_vm11 = vcmp.le.f32.partialorder %v16955_v55, 0.7853982  ;;  %v1974_v5 = vshrl.u32 %v16905_v38, %v1973_v53  ;;  %vm1992_vm7 = vcmp.lt.s32.totalorder %v1971_v62, 3  ;;  %v1999_v8 = vsel %vm1993_vm9, %v1986_v39, 920167782 }
 0x1ea   : > { %v16957_v59 = vsel %vm13009_vm11, 4294967295, %v16956_v59  ;;  %vm1991_vm1 = vcmp.lt.s32.totalorder %v1971_v62, 2  ;;  %v2000_v61 = vsel %vm1992_vm7, %v1983_v24, %v1999_v8  ;;  %v2002_v42 = vsel %vm1990_vm8, %v1980_v0, %v1983_v24 }
 0x1eb   : > { %16958 = vst [vmem:[#allocation38_spill] sm:$0xff] %v16957_v59  ;;  %v2003_v1 = vsel %vm1993_vm9, %v1989_v58, 1326507024  ;;  %v1994_v6 = vsel %vm1990_vm8, %v1974_v5, %v1977_v48  ;;  %v1996_v55 = vsel %vm1992_vm7, %v1980_v0, %v1995_v18  ;;  %v2001_v27 = vsel %vm1991_vm1, %v1998_v19, %v2000_v61 }
 0x1ec   : > { %v2004_v33 = vsel %vm1992_vm7, %v1986_v39, %v2003_v1  ;;  %v10277_v31 = vmin.u32 %v2127_v43, %v13003_v37  ;;  %v13023_v10 = vmul.u32.u64.low %v2006_v49, %v2001_v27  ;;  %v13024_v7 = vmul.u32.u64.high %v2006_v49, %v2001_v27, %v13023_v10  ;;  %v13036_v39 = vpop.f32.mrf.mxu0 }
 0x1ed   : > { %v2005_v56 = vsel %vm1991_vm1, %v2002_v42, %v2004_v33  ;;  %v1737_v53 = vsel %vm12989_vm4, %v12410_v63, %v12964_v34  ;;  %v1808_v48 = vadd.s32 %v12864_v16, %v12862_v32  ;;  %16959 = vst [vmem:[#allocation39_spill] sm:$0xff] %v13036_v39  ;;  %v1631_v58 = vsel %vm16779_vm2, %v1630_v60, %v12973_v21 }
 0x1ee   : > { %v13033_v0 = vmul.u32.u64.low %v2006_v49, %v2005_v56  ;;  %v13034_v24 = vmul.u32.u64.high %v2006_v49, %v2005_v56, %v13033_v0  ;;  %v1935_v27 = vand.u32 2147483647, %v1934_v12  ;;  %v1997_v33 = vsel %vm1991_vm1, %v1994_v6, %v1996_v55 }
 0x1ef   : > { %v10284_v18 = vadd.s32 4294967169, %v2271_v40  ;;  %v1937_v19 = vcvt.s32.f32 %v1930_v46  ;;  %v1826_v43 = vshrl.u32 %v1808_v48, %v1824_v41  ;;  %v1829_v5 = vadd.s32 127, %v1828_v23 }
 0x1f0   : > { %v16776_v34 = vand.u32 2147483647, %v12971_v57  ;;  %v2129_v8 = vclz %v10277_v31  ;;  %v2016_v32 = vadd.s32 1, %v13024_v7  ;;  %v2167_v16 = vand.u32 2139095040, %v13036_v39 }
 0x1f1   : > { %v2277_v56 = vadd.s32 1, %v10284_v18  ;;  %11614 = vcosq.f32 %v1737_v53  ;;  %v1634_v21 = vsel %vm13009_vm11, %v12522_v35, %v1631_v58  ;;  %v2013_v60 = vmul.u32 %v2006_v49, %v1997_v33 }
 0x1f2   : > { %vm2015_vm1 = vc.u32 %v13034_v24, %v13023_v10  ;;  %v13050_v62 = vmul.f32 %v1937_v19, %v1935_v27  ;;  %v1825_v46 = vshll.u32 %v12934_v11, %v12998_v29  ;;  %11616 = vsinq.f32 %v1737_v53 }
 0x1f3   : > { %v2017_v31 = vsel %vm2015_vm1, %v2016_v32, %v13024_v7  ;;  %vm2278_vm8 = vcmp.gt.s32.totalorder %v2277_v56, 0  ;;  %v1830_v12 = vshll.u32 %v1829_v5, 23  ;;  %v13057_v41 = vand.u32 8388607, %v16776_v34 }
 0x1f4   : > { %v2018_v40 = vadd.s32 %v2017_v31, %v2013_v60  ;;  %v13059_v23 = vor.u32 %v1826_v43, %v1825_v46  ;;  %v10278_v49 = vadd.s32 4294967294, %v2129_v8  ;;  %v2279_v61 = vsel %vm2278_vm8, %v2277_v56, 0 }
 0x1f5   : > { %v2168_v42 = vshrl.u32 %v2167_v16, 23  ;;  %v13064_v1 = vsel %vm12735_vm13, 0, %v12873_v15  ;;  %v13069_v7 = vsel %vm12989_vm4, 0, %v12903_v54  ;;  %11618 = vcosq.f32 %v1634_v21 }
 0x1f6   : > { %16960 = vst [vmem:[#allocation40_spill] sm:$0xff] %v13069_v7  ;;  %v2019_v11 = vadd.s32 536870912, %v2018_v40  ;;  %11620 = vsinq.f32 %v1634_v21  ;;  %v2281_v55 = vand.u32 31, %v2279_v61  ;;  %v13073_v53 = vor.u32 4788187, %v1830_v12 }
 0x1f7   : > { %v2275_v26 = vor.u32 8388608, %v13057_v41  ;;  %v16775_v15 = vand.u32 2147483647, %v13036_v39  ;;  %vm10279_vm13 = vcmp.lt.s32.totalorder %v10278_v49, 0  ;;  %v10280_v0 = vadd.s32 4294967169, %v2168_v42 }
 0x1f8   : > { %v13075_v48 = vshrl.u32 %v2019_v11, 30  ;;  %v2282_v54 = vsub.s32 32, %v2281_v55  ;;  %v13081_v27 = vshrl.u32 %v2279_v61, 5  ;;  %v2284_v33 = vshll.u32 %v16905_v38, %v2281_v55 }
 0x1f9   : > { %v2287_v18 = vshll.u32 %v16912_v50, %v2281_v55  ;;  %v2290_v5 = vshll.u32 %v16913_v2, %v2281_v55  ;;  %v2293_v56 = vshll.u32 %v16914_v22, %v2281_v55  ;;  %v2296_v21 = vshll.u32 %v16915_v13, %v2281_v55 }
 0x1fa   : > { %16961 = vst [vmem:[#allocation41_spill] sm:$0xff] %v13075_v48  ;;  %v2021_v58 = vshll.u32 %v13075_v48, 30  ;;  %v2285_v19 = vshrl.u32 %v16912_v50, %v2282_v54  ;;  %v2288_v43 = vshrl.u32 %v16913_v2, %v2282_v54  ;;  %v2291_v8 = vshrl.u32 %v16914_v22, %v2282_v54 }
 0x1fb   : > { %v2294_v16 = vshrl.u32 %v16915_v13, %v2282_v54  ;;  %v2297_v12 = vshrl.u32 %v16903_v44, %v2282_v54  ;;  %vm1857_vm4 = vcmp.lt.s32.totalorder %v12589_v47, 0  ;;  %v1832_v41 = vand.u32 2147483647, %v13073_v53 }
 0x1fc   : > { %v13089_v32 = vsub.s32 %v2018_v40, %v2021_v58  ;;  %v2286_v60 = vor.u32 %v2285_v19, %v2284_v33  ;;  %v2289_v46 = vor.u32 %v2288_v43, %v2287_v18  ;;  %v2292_v31 = vor.u32 %v2291_v8, %v2290_v5 }
 0x1fd   : > { %v2295_v42 = vor.u32 %v2294_v16, %v2293_v56  ;;  %v2171_v40 = vand.u32 8388607, %v16775_v15  ;;  %v13103_v58 = vsel %vm10279_vm13, 0, %v10278_v49  ;;  %v2298_v55 = vor.u32 %v2297_v12, %v2296_v21 }
 0x1fe   : > { %v2024_v61 = vsub.s32 0, %v13089_v32  ;;  %v13100_v11 = vpop.eup %11614  ;;  %vm2299_vm9 = vcmp.lt.s32.totalorder %v13081_v27, 1  ;;  %v2174_v33 = vadd.s32 1, %v10280_v0  ;;  %v2283_v19 = vshrl.u32 %v16905_v38, %v2282_v54 }
 0x1ff   : > { %16962 = vst [vmem:[#allocation42_spill] sm:$0xff] %v13100_v11  ;;  %vm2302_vm7 = vcmp.lt.s32.totalorder %v13081_v27, 4  ;;  %v2307_v53 = vsel %vm2299_vm9, %v2286_v60, %v2289_v46  ;;  %v13111_v43 = vpop.eup %11616  ;;  %vm2301_vm1 = vcmp.lt.s32.totalorder %v13081_v27, 3  ;;  %v2311_v49 = vsel %vm2299_vm9, %v2289_v46, %v2292_v31 }
 0x200   : > { %v10273_v18 = vmin.u32 %v2024_v61, %v13089_v32  ;;  %16963 = vst [vmem:[#allocation43_spill] sm:$0xff] %v13111_v43  ;;  %v2308_v5 = vsel %vm2302_vm7, %v2295_v42, 920167782  ;;  %v2312_v8 = vsel %vm2302_vm7, %v2298_v55, 1326507024  ;;  %vm2300_vm8 = vcmp.lt.s32.totalorder %v13081_v27, 2 }
 0x201   : > { %v2304_v0 = vsel %vm2302_vm7, %v2292_v31, 2102212464  ;;  %v2309_v54 = vsel %vm2301_vm1, %v2292_v31, %v2308_v5  ;;  %v2137_v21 = vsub.s32 4294967266, %v13103_v58  ;;  %v2313_v61 = vsel %vm2301_vm1, %v2295_v42, %v2312_v8 }
 0x202   : > { %v2026_v56 = vclz %v10273_v18  ;;  %v13119_v16 = vpop.eup %11618  ;;  %v2310_v12 = vsel %vm2300_vm8, %v2307_v53, %v2309_v54  ;;  %v2315_v15 = vshll.u32 %v2275_v26, 8  ;;  %v2303_v55 = vsel %vm2299_vm9, %v2283_v19, %v2286_v60  ;;  %v13137_v54 = vpop.f32.mrf.mxu0 }
 0x203   : > { %16964 = vst [vmem:[#allocation44_spill] sm:$0xff] %v13119_v16  ;;  %v13126_v34 = vpop.eup %11620  ;;  %v2314_v18 = vsel %vm2300_vm8, %v2311_v49, %v2313_v61  ;;  %v2172_v31 = vor.u32 8388608, %v2171_v40  ;;  %vm2175_vm13 = vcmp.gt.s32.totalorder %v2174_v33, 0  ;;  %v2305_v5 = vsel %vm2301_vm1, %v2289_v46, %v2304_v0  ;;  %16966 = vst [vmem:[#allocation46_spill] sm:$0xff] %v13137_v54 }
 0x204   : > { %16965 = vst [vmem:[#allocation45_spill] sm:$0xff] %v13126_v34  ;;  %v13134_v6 = vmul.u32.u64.low %v2315_v15, %v2314_v18  ;;  %v13135_v20 = vmul.u32.u64.high %v2315_v15, %v2314_v18, %v13134_v6  ;;  %v2176_v53 = vsel %vm2175_vm13, %v2174_v33, 0  ;;  %v2133_v26 = vsub.s32 32, %v13103_v58 }
 0x205   : > { %v10274_v42 = vadd.s32 4294967294, %v2026_v56  ;;  %v13140_v8 = vmul.u32.u64.low %v2315_v15, %v2310_v12  ;;  %v13141_v29 = vmul.u32.u64.high %v2315_v15, %v2310_v12, %v13140_v8  ;;  %v16967_v60 = vxor.u32 2147483648, %v13050_v62 }
 0x206   : > { %v2117_v6 = vadd.s32 %v12945_v3, %v12951_v52  ;;  %v2138_v46 = vadd.s32 127, %v2137_v21  ;;  %v2178_v33 = vand.u32 31, %v2176_v53  ;;  %v16968_v19 = vcvt.s32.f32 %v13059_v23 }
 0x207   : > { %v13149_v40 = vsel %vm1857_vm4, %v16967_v60, %v13050_v62  ;;  %v13159_v56 = vadd.s32 %v13023_v10, %v13034_v24  ;;  %v2306_v0 = vsel %vm2300_vm8, %v2303_v55, %v2305_v5  ;;  %v2134_v62 = vshll.u32 %v13003_v37, %v13103_v58 }
 0x208   : > { %v13155_v49 = vmul.f32 %v16968_v19, %v1832_v41  ;;  %vm2324_vm9 = vc.u32 %v13135_v20, %v13140_v8  ;;  %v2179_v3 = vsub.s32 32, %v2178_v33  ;;  %v13168_v52 = vshll.u32 %v2172_v31, 8 }
 0x209   : > { %v2135_v23 = vshrl.u32 %v2117_v6, %v2133_v26  ;;  %vm10275_vm7 = vcmp.lt.s32.totalorder %v10274_v42, 0  ;;  %v2325_v41 = vadd.s32 1, %v13141_v29  ;;  %v2476_v10 = vand.u32 2139095040, %v13137_v54 }
 0x20a   : > { %v2139_v24 = vshll.u32 %v2138_v46, 23  ;;  %v2322_v27 = vmul.u32 %v2315_v15, %v2306_v0  ;;  %v2182_v21 = vshrl.u32 %v16912_v50, %v2179_v3  ;;  %v2185_v61 = vshrl.u32 %v16913_v2, %v2179_v3 }
 0x20b   : > { %v2326_v37 = vsel %vm2324_vm9, %v2325_v41, %v13141_v29  ;;  %v2181_v58 = vshll.u32 %v16905_v38, %v2178_v33  ;;  %v2184_v55 = vshll.u32 %v16912_v50, %v2178_v33  ;;  %v2188_v18 = vshrl.u32 %v16914_v22, %v2179_v3 }
 0x20c   : > { %v13178_v31 = vsel %vm10275_vm7, 0, %v10274_v42  ;;  %v2327_v5 = vadd.s32 %v2326_v37, %v2322_v27  ;;  %v2177_v26 = vshrl.u32 %v2176_v53, 5  ;;  %v2187_v60 = vshll.u32 %v16913_v2, %v2178_v33 }
 0x20d   : > { %v2183_v6 = vor.u32 %v2182_v21, %v2181_v58  ;;  %v2186_v15 = vor.u32 %v2185_v61, %v2184_v55  ;;  %v2190_v46 = vshll.u32 %v16914_v22, %v2178_v33  ;;  %v2191_v19 = vshrl.u32 %v16915_v13, %v2179_v3 }
 0x20e   : > { %v2328_v0 = vadd.s32 536870912, %v2327_v5  ;;  %v2189_v29 = vor.u32 %v2188_v18, %v2187_v60  ;;  %v2193_v41 = vshll.u32 %v16915_v13, %v2178_v33  ;;  %v2194_v12 = vshrl.u32 %v16903_v44, %v2179_v3 }
 0x20f   : > { %v16969_v48 = vand.u32 2147483647, %v12589_v47  ;;  %v2136_v53 = vor.u32 %v2135_v23, %v2134_v62  ;;  %v2140_v27 = vor.u32 4788187, %v2139_v24  ;;  %v2192_v21 = vor.u32 %v2191_v19, %v2190_v46 }
 0x210   : > { %v2477_v61 = vshrl.u32 %v2476_v10, 23  ;;  %v13191_v37 = vshrl.u32 %v2328_v0, 30  ;;  %v2195_v58 = vor.u32 %v2194_v12, %v2193_v41  ;;  %vm2196_vm8 = vcmp.lt.s32.totalorder %v2177_v26, 1 }
 0x211   : > { %vm13187_vm1 = vcmp.le.f32.partialorder %v16969_v48, 0.7853982  ;;  %vm2199_vm13 = vcmp.lt.s32.totalorder %v2177_v26, 4  ;;  %v2034_v55 = vsub.s32 4294967266, %v13178_v31  ;;  %vm2198_vm9 = vcmp.lt.s32.totalorder %v2177_v26, 3 }
 0x212   : > { %v2204_v33 = vsel %vm2196_vm8, %v2183_v6, %v2186_v15  ;;  %v2205_v18 = vsel %vm2199_vm13, %v2192_v21, 920167782  ;;  %v2030_v48 = vsub.s32 32, %v13178_v31  ;;  %v2330_v60 = vshll.u32 %v13191_v37, 30 }
 0x213   : > { %v2180_v62 = vshrl.u32 %v16905_v38, %v2179_v3  ;;  %v2206_v23 = vsel %vm2198_vm9, %v2189_v29, %v2205_v18  ;;  %vm2197_vm7 = vcmp.lt.s32.totalorder %v2177_v26, 2  ;;  %v2201_v10 = vsel %vm2199_vm13, %v2189_v29, 2102212464 }
 0x214   : > { %v2208_v12 = vsel %vm2196_vm8, %v2186_v15, %v2189_v29  ;;  %v2209_v24 = vsel %vm2199_vm13, %v2195_v58, 1326507024  ;;  %vm16788_vm2 = vcmp.lt.s32.totalorder %v12693_v25, 0  ;;  %v2141_v46 = vand.u32 2147483647, %v2140_v27 }
 0x215   : > { %v13201_v19 = vsub.s32 %v2327_v5, %v2330_v60  ;;  %v2207_v0 = vsel %vm2197_vm7, %v2204_v33, %v2206_v23  ;;  %v2210_v41 = vsel %vm2198_vm9, %v2192_v21, %v2209_v24  ;;  %v2035_v7 = vadd.s32 127, %v2034_v55  ;;  %v13227_v60 = vpop.f32.mrf.mxu0 }
 0x216   : > { %v2200_v11 = vsel %vm2196_vm8, %v2180_v62, %v2183_v6  ;;  %v2211_v3 = vsel %vm2197_vm7, %v2208_v12, %v2210_v41  ;;  %v10292_v18 = vadd.s32 4294967169, %v2477_v61  ;;  %v2202_v29 = vsel %vm2198_vm9, %v2186_v15, %v2201_v10  ;;  %16972 = vst [vmem:[#allocation47_spill] sm:$0xff] %v13227_v60 }
 0x217   : > { %v2333_v63 = vsub.s32 0, %v13201_v19  ;;  %v13210_v58 = vmul.u32.u64.low %v13168_v52, %v2211_v3  ;;  %v13211_v43 = vmul.u32.u64.high %v13168_v52, %v2211_v3, %v13210_v58  ;;  %v2143_v5 = vcvt.s32.f32 %v2136_v53 }
 0x218   : > { %v2032_v27 = vshrl.u32 %v13159_v56, %v2030_v48  ;;  %v13215_v33 = vmul.u32.u64.low %v13168_v52, %v2207_v0  ;;  %v13216_v21 = vmul.u32.u64.high %v13168_v52, %v2207_v0, %v13215_v33  ;;  %v13223_v6 = vsel %vm13187_vm1, %v12589_v47, %v13149_v40 }
 0x219   : > { %v1836_v15 = vxor.u32 2147483648, %v13155_v49  ;;  %v10285_v61 = vmin.u32 %v2333_v63, %v13201_v19  ;;  %v2483_v55 = vadd.s32 1, %v10292_v18  ;;  %v13229_v53 = vmul.f32 %v2143_v5, %v2141_v46 }
 0x21a   : > { %v2031_v56 = vshll.u32 %v13089_v32, %v13178_v31  ;;  %v2203_v48 = vsel %vm2197_vm7, %v2200_v11, %v2202_v29  ;;  %v16973_v62 = vand.u32 2147483647, %v13137_v54  ;;  %v2036_v10 = vshll.u32 %v2035_v7, 23 }
 0x21b   : > { %v2335_v40 = vclz %v10285_v61  ;;  %vm2221_vm8 = vc.u32 %v13211_v43, %v13215_v33  ;;  %vm2484_vm13 = vcmp.gt.s32.totalorder %v2483_v55, 0  ;;  %v2222_v12 = vadd.s32 1, %v13216_v21 }
 0x21c   : > { %v2480_v23 = vand.u32 8388607, %v16973_v62  ;;  %v13238_v63 = vor.u32 %v2032_v27, %v2031_v56  ;;  %v2485_v24 = vsel %vm2484_vm13, %v2483_v55, 0  ;;  %v2373_v46 = vand.u32 2139095040, %v13227_v60 }
 0x21d   : > { %v10286_v31 = vadd.s32 4294967294, %v2335_v40  ;;  %v2219_v11 = vmul.u32 %v13168_v52, %v2203_v48  ;;  %v2487_v26 = vand.u32 31, %v2485_v24  ;;  %v13247_v7 = vsel %vm16788_vm2, %v1836_v15, %v13155_v49 }
 0x21e   : > { %v2323_v41 = vadd.s32 %v13140_v8, %v13135_v20  ;;  %v2223_v3 = vsel %vm2221_vm8, %v2222_v12, %v13216_v21  ;;  %v2037_v18 = vor.u32 4788187, %v2036_v10  ;;  %v2040_v5 = vcvt.s32.f32 %v13238_v63 }
 0x21f   : > { %vm10287_vm9 = vcmp.lt.s32.totalorder %v10286_v31, 0  ;;  %v2224_v29 = vadd.s32 %v2223_v3, %v2219_v11  ;;  %v2488_v58 = vsub.s32 32, %v2487_v26  ;;  %v2481_v27 = vor.u32 8388608, %v2480_v23 }
 0x220   : > { %v13254_v52 = vsel %vm10287_vm9, 0, %v10286_v31  ;;  %v2374_v61 = vshrl.u32 %v2373_v46, 23  ;;  %v2490_v55 = vshll.u32 %v16905_v38, %v2487_v26  ;;  %v2493_v56 = vshll.u32 %v16912_v50, %v2487_v26 }
 0x221   : > { %v2343_v49 = vsub.s32 4294967266, %v13254_v52  ;;  %v2225_v15 = vadd.s32 536870912, %v2224_v29  ;;  %v2491_v20 = vshrl.u32 %v16912_v50, %v2488_v58  ;;  %v2494_v8 = vshrl.u32 %v16913_v2, %v2488_v58 }
 0x222   : > { %v2496_v21 = vshll.u32 %v16913_v2, %v2487_v26  ;;  %v2497_v48 = vshrl.u32 %v16914_v22, %v2488_v58  ;;  %v2486_v10 = vshrl.u32 %v2485_v24, 5  ;;  %v2499_v23 = vshll.u32 %v16914_v22, %v2487_v26 }
 0x223   : > { %v13263_v62 = vshrl.u32 %v2225_v15, 30  ;;  %v2500_v40 = vshrl.u32 %v16915_v13, %v2488_v58  ;;  %v2344_v63 = vadd.s32 127, %v2343_v49  ;;  %v2492_v12 = vor.u32 %v2491_v20, %v2490_v55 }
 0x224   : > { %v2495_v46 = vor.u32 %v2494_v8, %v2493_v56  ;;  %v2498_v31 = vor.u32 %v2497_v48, %v2496_v21  ;;  %v2038_v11 = vand.u32 2147483647, %v2037_v18  ;;  %v2521_v32 = vshll.u32 %v2481_v27, 8 }
 0x225   : > { %16974 = vst [vmem:[#allocation48_spill] sm:$0xff] %v13263_v62  ;;  %v2227_v3 = vshll.u32 %v13263_v62, 30  ;;  %v2501_v0 = vor.u32 %v2500_v40, %v2499_v23  ;;  %vm2063_vm7 = vcmp.lt.s32.totalorder %v12814_v30, 0  ;;  %v2339_v16 = vsub.s32 32, %v13254_v52 }
 0x226   : > { %v2502_v15 = vshll.u32 %v16915_v13, %v2487_v26  ;;  %v2503_v24 = vshrl.u32 %v16903_v44, %v2488_v58  ;;  %v10288_v34 = vadd.s32 4294967169, %v2374_v61  ;;  %v16975_v59 = vand.u32 2147483647, %v12693_v25 }
 0x227   : > { %v13278_v18 = vsub.s32 %v2224_v29, %v2227_v3  ;;  %v2489_v55 = vshrl.u32 %v16905_v38, %v2488_v58  ;;  %vm2505_vm13 = vcmp.lt.s32.totalorder %v2486_v10, 1  ;;  %vm2508_vm9 = vcmp.lt.s32.totalorder %v2486_v10, 4 }
 0x228   : > { %vm13274_vm8 = vcmp.le.f32.partialorder %v16975_v59, 0.7853982  ;;  %v2345_v27 = vshll.u32 %v2344_v63, 23  ;;  %v2504_v56 = vor.u32 %v2503_v24, %v2502_v15  ;;  %v2510_v20 = vsel %vm2508_vm9, %v2498_v31, 2102212464 }
 0x229   : > { %v2513_v8 = vsel %vm2505_vm13, %v2492_v12, %v2495_v46  ;;  %v2230_v26 = vsub.s32 0, %v13278_v18  ;;  %vm2506_vm2 = vcmp.lt.s32.totalorder %v2486_v10, 2  ;;  %vm2507_vm6 = vcmp.lt.s32.totalorder %v2486_v10, 3 }
 0x22a   : > { %v2514_v61 = vsel %vm2508_vm9, %v2501_v0, 920167782  ;;  %v2509_v21 = vsel %vm2505_vm13, %v2489_v55, %v2492_v12  ;;  %v2517_v48 = vsel %vm2505_vm13, %v2495_v46, %v2498_v31  ;;  %v2518_v23 = vsel %vm2508_vm9, %v2504_v56, 1326507024 }
 0x22b   : > { %v2515_v59 = vsel %vm2507_vm6, %v2498_v31, %v2514_v61  ;;  %v16978_v29 = vand.u32 2147483647, %v12814_v30  ;;  %v10281_v58 = vmin.u32 %v2230_v26, %v13278_v18  ;;  %v2511_v63 = vsel %vm2507_vm6, %v2495_v46, %v2510_v20 }
 0x22c   : > { %v2516_v3 = vsel %vm2506_vm2, %v2513_v8, %v2515_v59  ;;  %v2519_v15 = vsel %vm2507_vm6, %v2501_v0, %v2518_v23  ;;  %vm16816_vm12 = vcmp.lt.s32.totalorder %v12886_v51, 0  ;;  %v2341_v24 = vshrl.u32 %v2323_v41, %v2339_v16 }
 0x22d   : > { %vm13284_vm3 = vcmp.le.f32.partialorder %v16978_v29, 0.7853982  ;;  %v2520_v12 = vsel %vm2506_vm2, %v2517_v48, %v2519_v15  ;;  %v13292_v55 = vmul.u32.u64.low %v2521_v32, %v2516_v3  ;;  %v13293_v31 = vmul.u32.u64.high %v2521_v32, %v2516_v3, %v13292_v55  ;;  %v13338_v15 = vpop.f32.mrf.mxu0 }
 0x22e   : > { %v2041_v56 = vmul.f32 %v2040_v5, %v2038_v11  ;;  %v2340_v61 = vshll.u32 %v13201_v19, %v13254_v52  ;;  %v13298_v29 = vmul.u32.u64.low %v2521_v32, %v2520_v12  ;;  %v13299_v62 = vmul.u32.u64.high %v2521_v32, %v2520_v12, %v13298_v29  ;;  %16986 = vst [vmem:[#allocation51_spill] sm:$0xff] %v13338_v15 }
 0x22f   : > { %v2346_v46 = vor.u32 4788187, %v2345_v27  ;;  %v2232_v20 = vclz %v10281_v58  ;;  %v2512_v0 = vsel %vm2506_vm2, %v2509_v21, %v2511_v63  ;;  %v2380_v8 = vadd.s32 1, %v10288_v34 }
 0x230   : > { %v16981_v16 = vsub.s32 4, %v12800_v9  ;;  %11622 = vcosq.f32 %v13223_v6  ;;  %v16982_v5 = vsub.s32 4, %v12984_v17  ;;  %v16794_v52 = vand.u32 2147483647, %v13227_v60 }
 0x231   : > { %v1840_v34 = vsel %vm13274_vm8, %v12693_v25, %v13247_v7  ;;  %v2342_v10 = vor.u32 %v2341_v24, %v2340_v61  ;;  %v2531_v11 = vadd.s32 1, %v13293_v31  ;;  %vm2381_vm6 = vcmp.gt.s32.totalorder %v2380_v8, 0 }
 0x232   : > { %v1942_v41 = vsel %vm1857_vm4, %v16981_v16, %v12800_v9  ;;  %v2148_v19 = vsel %vm2063_vm7, %v16982_v5, %v12984_v17  ;;  %v16983_v9 = vxor.u32 2147483648, %v13229_v53  ;;  %v2042_v26 = vxor.u32 2147483648, %v2041_v56 }
 0x233   : > { %v2528_v21 = vmul.u32 %v2521_v32, %v2512_v0  ;;  %vm2530_vm2 = vc.u32 %v13299_v62, %v13292_v55  ;;  %v2347_v17 = vand.u32 2147483647, %v2346_v46  ;;  %v10282_v59 = vadd.s32 4294967294, %v2232_v20 }
 0x234   : > { %v2146_v27 = vsel %vm2063_vm7, %v16983_v9, %v13229_v53  ;;  %v2532_v48 = vsel %vm2530_vm2, %v2531_v11, %v13293_v31  ;;  %v2382_v7 = vsel %vm2381_vm6, %v2380_v8, 0  ;;  %v13329_v23 = vsel %vm13187_vm1, 0, %v1942_v41 }
 0x235   : > { %16984 = vst [vmem:[#allocation49_spill] sm:$0xff] %v13329_v23  ;;  %11624 = vsinq.f32 %v13223_v6  ;;  %v2533_v58 = vadd.s32 %v2532_v48, %v2528_v21  ;;  %v2377_v53 = vand.u32 8388607, %v16794_v52  ;;  %v13336_v32 = vsel %vm13284_vm3, 0, %v2148_v19 }
 0x236   : > { %11626 = vcosq.f32 %v1840_v34  ;;  %16985 = vst [vmem:[#allocation50_spill] sm:$0xff] %v13336_v32  ;;  %v2349_v63 = vcvt.s32.f32 %v2342_v10  ;;  %v2384_v3 = vand.u32 31, %v2382_v7  ;;  %v13343_v42 = vsel %vm13284_vm3, %v12814_v30, %v2146_v27 }
 0x237   : > { %11628 = vsinq.f32 %v1840_v34  ;;  %v13347_v6 = vsel %vm16816_vm12, %v2042_v26, %v2041_v56  ;;  %v2534_v24 = vadd.s32 536870912, %v2533_v58  ;;  %v2220_v31 = vadd.s32 %v13215_v33, %v13211_v43 }
 0x238   : > { %v2350_v12 = vmul.f32 %v2349_v63, %v2347_v17  ;;  %vm10283_vm4 = vcmp.lt.s32.totalorder %v10282_v59, 0  ;;  %v2385_v61 = vsub.s32 32, %v2384_v3  ;;  %v2378_v46 = vor.u32 8388608, %v2377_v53 }
 0x239   : > { %v13351_v29 = vshrl.u32 %v2534_v24, 30  ;;  %v2387_v20 = vshll.u32 %v16905_v38, %v2384_v3  ;;  %v2682_v40 = vand.u32 2139095040, %v13338_v15  ;;  %v2390_v8 = vshll.u32 %v16912_v50, %v2384_v3 }
 0x23a   : > { %v2388_v0 = vshrl.u32 %v16912_v50, %v2385_v61  ;;  %v2391_v56 = vshrl.u32 %v16913_v2, %v2385_v61  ;;  %v2394_v16 = vshrl.u32 %v16914_v22, %v2385_v61  ;;  %v13359_v41 = vsel %vm10283_vm4, 0, %v10282_v59 }
 0x23b   : > { %v2536_v43 = vshll.u32 %v13351_v29, 30  ;;  %v2383_v33 = vshrl.u32 %v2382_v7, 5  ;;  %v2393_v5 = vshll.u32 %v16913_v2, %v2384_v3  ;;  %vm2269_vm3 = vcmp.lt.s32.totalorder %v12971_v57, 0 }
 0x23c   : > { %v2389_v19 = vor.u32 %v2388_v0, %v2387_v20  ;;  %v2392_v34 = vor.u32 %v2391_v56, %v2390_v8  ;;  %v2396_v10 = vshll.u32 %v16914_v22, %v2384_v3  ;;  %v2397_v11 = vshrl.u32 %v16915_v13, %v2385_v61 }
 0x23d   : > { %v2351_v9 = vxor.u32 2147483648, %v2350_v12  ;;  %v13366_v27 = vsub.s32 %v2533_v58, %v2536_v43  ;;  %v2395_v26 = vor.u32 %v2394_v16, %v2393_v5  ;;  %v13368_v21 = vshll.u32 %v2378_v46, 8  ;;  %v13370_v17 = vpop.eup %11622 }
 0x23e   : > { %16987 = vst [vmem:[#allocation52_spill] sm:$0xff] %v13370_v17  ;;  %v16988_v59 = vand.u32 2147483647, %v12886_v51  ;;  %v16989_v48 = vmov 0  ;;  %v2236_v7 = vsub.s32 32, %v13359_v41  ;;  %v2398_v53 = vor.u32 %v2397_v11, %v2396_v10 }
 0x23f   : > { %v2399_v63 = vshll.u32 %v16915_v13, %v2384_v3  ;;  %v2400_v24 = vshrl.u32 %v16903_v44, %v2385_v61  ;;  %v2240_v58 = vsub.s32 4294967266, %v13359_v41  ;;  %v2539_v46 = vsub.s32 0, %v13366_v27 }
 0x240   : > { %vm13374_vm1 = vcmp.le.f32.partialorder %v16988_v59, 0.7853982  ;;  %vm2402_vm7 = vcmp.lt.s32.totalorder %v2383_v33, 1  ;;  %v2683_v20 = vshrl.u32 %v2682_v40, 23  ;;  %v16992_v0 = vand.u32 2147483647, %v12971_v57 }
 0x241   : > { %v16990_v48 = vsel %vm13374_vm1, 4294967295, %v16989_v48  ;;  %v2386_v56 = vshrl.u32 %v16905_v38, %v2385_v61  ;;  %v2401_v16 = vor.u32 %v2400_v24, %v2399_v63  ;;  %vm2405_vm9 = vcmp.lt.s32.totalorder %v2383_v33, 4 }
 0x242   : > { %16991 = vst [vmem:[#allocation53_spill] sm:$0xff] %v16990_v48  ;;  %vm13385_vm13 = vcmp.le.f32.partialorder %v16992_v0, 0.7853982  ;;  %v2410_v3 = vsel %vm2402_vm7, %v2389_v19, %v2392_v34  ;;  %v10293_v43 = vmin.u32 %v2539_v46, %v13366_v27  ;;  %vm2404_vm6 = vcmp.lt.s32.totalorder %v2383_v33, 3  ;;  %v13392_v11 = vpop.eup %11624 }
 0x243   : > { %v2407_v5 = vsel %vm2405_vm9, %v2395_v26, 2102212464  ;;  %v2411_v10 = vsel %vm2405_vm9, %v2398_v53, 920167782  ;;  %16995 = vst [vmem:[#allocation54_spill] sm:$0xff] %v13392_v11  ;;  %vm2403_vm2 = vcmp.lt.s32.totalorder %v2383_v33, 2  ;;  %v2414_v59 = vsel %vm2402_vm7, %v2392_v34, %v2395_v26  ;;  %v13395_v52 = vpop.eup %11626 }
 0x244   : > { %v2412_v40 = vsel %vm2404_vm6, %v2395_v26, %v2411_v10  ;;  %v2415_v0 = vsel %vm2405_vm9, %v2401_v16, 1326507024  ;;  %v2241_v32 = vadd.s32 127, %v2240_v58  ;;  %v2406_v61 = vsel %vm2402_vm7, %v2386_v56, %v2389_v19  ;;  %v13399_v30 = vpop.eup %11628 }
 0x245   : > { %v2408_v63 = vsel %vm2404_vm6, %v2392_v34, %v2407_v5  ;;  %v2413_v24 = vsel %vm2403_vm2, %v2410_v3, %v2412_v40  ;;  %v2541_v46 = vclz %v10293_v43  ;;  %v2416_v47 = vsel %vm2404_vm6, %v2398_v53, %v2415_v0 }
 0x246   : > { %v13402_v23 = vmul.u32.u64.low %v13368_v21, %v2413_v24  ;;  %v13403_v17 = vmul.u32.u64.high %v13368_v21, %v2413_v24, %v13402_v23  ;;  %v2352_v26 = vsel %vm2269_vm3, %v2351_v9, %v2350_v12  ;;  %v2353_v16 = vsub.s32 4, %v13191_v37 }
 0x247   : > { %v2417_v58 = vsel %vm2403_vm2, %v2414_v59, %v2416_v47  ;;  %v16802_v19 = vand.u32 2147483647, %v13338_v15  ;;  %v2238_v34 = vshrl.u32 %v2220_v31, %v2236_v7  ;;  %v10300_v53 = vadd.s32 4294967169, %v2683_v20 }
 0x248   : > { %v13412_v56 = vmul.u32.u64.low %v13368_v21, %v2417_v58  ;;  %v13413_v3 = vmul.u32.u64.high %v13368_v21, %v2417_v58, %v13412_v56  ;;  %11630 = vcosq.f32 %v13343_v42  ;;  %v2046_v43 = vsel %vm13374_vm1, %v12886_v51, %v13347_v6 }
 0x249   : > { %v2242_v12 = vshll.u32 %v2241_v32, 23  ;;  %v2409_v9 = vsel %vm2403_vm2, %v2406_v61, %v2408_v63  ;;  %v2237_v47 = vshll.u32 %v13278_v18, %v13359_v41  ;;  %v10294_v5 = vadd.s32 4294967294, %v2541_v46 }
 0x24a   : > { %v2428_v31 = vadd.s32 1, %v13403_v17  ;;  %v2689_v7 = vadd.s32 1, %v10300_v53  ;;  %11632 = vsinq.f32 %v13343_v42  ;;  %v2354_v20 = vsel %vm2269_vm3, %v2353_v16, %v13191_v37  ;;  %v13438_v42 = vpop.f32.mrf.mxu0  ;;  %v17173_v49 = vld [vmem:[#allocation54_spill] sm:$0xff] }
 0x24b   : > { %v13431_v6 = vsel %vm13385_vm13, %v12971_v57, %v2352_v26  ;;  %v2686_v32 = vand.u32 8388607, %v16802_v19  ;;  %v2239_v33 = vor.u32 %v2238_v34, %v2237_v47  ;;  %v2425_v18 = vmul.u32 %v13368_v21, %v2409_v9  ;;  %16996 = vst [vmem:[#allocation55_spill] sm:$0xff] %v13438_v42 }
 0x24c   : > { %vm2427_vm4 = vc.u32 %v13413_v3, %v13402_v23  ;;  %vm2690_vm7 = vcmp.gt.s32.totalorder %v2689_v7, 0  ;;  %11634 = vcosq.f32 %v2046_v43  ;;  %v2243_v41 = vor.u32 4788187, %v2242_v12 }
 0x24d   : > { %v2429_v37 = vsel %vm2427_vm4, %v2428_v31, %v13403_v17  ;;  %v2691_v10 = vsel %vm2690_vm7, %v2689_v7, 0  ;;  %11636 = vsinq.f32 %v2046_v43  ;;  %vm10295_vm3 = vcmp.lt.s32.totalorder %v10294_v5, 0 }
 0x24e   : > { %v2430_v40 = vadd.s32 %v2429_v37, %v2425_v18  ;;  %v2693_v59 = vand.u32 31, %v2691_v10  ;;  %v13443_v0 = vsel %vm13385_vm13, 0, %v2354_v20  ;;  %11638 = vcosq.f32 %v13431_v6 }
 0x24f   : > { %16997 = vst [vmem:[#allocation56_spill] sm:$0xff] %v13443_v0  ;;  %v2687_v21 = vor.u32 8388608, %v2686_v32  ;;  %v2246_v63 = vcvt.s32.f32 %v2239_v33  ;;  %v2579_v26 = vand.u32 2139095040, %v13438_v42  ;;  %v2244_v17 = vand.u32 2147483647, %v2243_v41 }
 0x250   : > { %v2431_v24 = vadd.s32 536870912, %v2430_v40  ;;  %v2694_v46 = vsub.s32 32, %v2693_v59  ;;  %v13448_v16 = vsel %vm10295_vm3, 0, %v10294_v5  ;;  %v13450_v58 = vshrl.u32 %v2691_v10, 5 }
 0x251   : > { %v2696_v34 = vshll.u32 %v16905_v38, %v2693_v59  ;;  %v2699_v53 = vshll.u32 %v16912_v50, %v2693_v59  ;;  %v2702_v12 = vshll.u32 %v16913_v2, %v2693_v59  ;;  %v2705_v47 = vshll.u32 %v16914_v22, %v2693_v59 }
 0x252   : > { %v13453_v8 = vshrl.u32 %v2431_v24, 30  ;;  %v2697_v56 = vshrl.u32 %v16912_v50, %v2694_v46  ;;  %v2700_v43 = vshrl.u32 %v16913_v2, %v2694_v46  ;;  %v2703_v9 = vshrl.u32 %v16914_v22, %v2694_v46 }
 0x253   : > { %v2706_v5 = vshrl.u32 %v16915_v13, %v2694_v46  ;;  %v2580_v32 = vshrl.u32 %v2579_v26, 23  ;;  %v2708_v41 = vshll.u32 %v16915_v13, %v2693_v59  ;;  %v2709_v37 = vshrl.u32 %v16903_v44, %v2694_v46 }
 0x254   : > { %v2433_v31 = vshll.u32 %v13453_v8, 30  ;;  %v2698_v7 = vor.u32 %v2697_v56, %v2696_v34  ;;  %v2701_v20 = vor.u32 %v2700_v43, %v2699_v53  ;;  %v2704_v33 = vor.u32 %v2703_v9, %v2702_v12 }
 0x255   : > { %v2707_v18 = vor.u32 %v2706_v5, %v2705_v47  ;;  %v13465_v10 = vpop.eup %11630  ;;  %v2247_v24 = vmul.f32 %v2246_v63, %v2244_v17  ;;  %v2529_v19 = vadd.s32 %v13292_v55, %v13299_v62  ;;  %v13471_v0 = vshll.u32 %v2687_v21, 8 }
 0x256   : > { %16998 = vst [vmem:[#allocation57_spill] sm:$0xff] %v13465_v10  ;;  %v13469_v61 = vsub.s32 %v2430_v40, %v2433_v31  ;;  %v2549_v34 = vsub.s32 4294967266, %v13448_v16  ;;  %v2710_v56 = vor.u32 %v2709_v37, %v2708_v41  ;;  %vm2711_vm13 = vcmp.lt.s32.totalorder %v13450_v58, 1 }
 0x257   : > { %v16999_v26 = vand.u32 2147483647, %v13438_v42  ;;  %v13477_v53 = vpop.eup %11632  ;;  %vm2714_vm9 = vcmp.lt.s32.totalorder %v13450_v58, 4  ;;  %v2719_v62 = vsel %vm2711_vm13, %v2698_v7, %v2701_v20  ;;  %v10296_v55 = vadd.s32 4294967169, %v2580_v32 }
 0x258   : > { %17000 = vst [vmem:[#allocation58_spill] sm:$0xff] %v13477_v53  ;;  %v2436_v43 = vsub.s32 0, %v13469_v61  ;;  %vm16815_vm6 = vcmp.lt.s32.totalorder %v13036_v39, 0  ;;  %v2695_v40 = vshrl.u32 %v16905_v38, %v2694_v46  ;;  %vm2713_vm2 = vcmp.lt.s32.totalorder %v13450_v58, 3 }
 0x259   : > { %v2583_v59 = vand.u32 8388607, %v16999_v26  ;;  %v2716_v21 = vsel %vm2714_vm9, %v2704_v33, 2102212464  ;;  %v2720_v63 = vsel %vm2714_vm9, %v2707_v18, 920167782  ;;  %v13490_v17 = vpop.eup %11634  ;;  %v2723_v46 = vsel %vm2711_vm13, %v2701_v20, %v2704_v33 }
 0x25a   : > { %17001 = vst [vmem:[#allocation59_spill] sm:$0xff] %v13490_v17  ;;  %v10289_v12 = vmin.u32 %v2436_v43, %v13469_v61  ;;  %vm2712_vm4 = vcmp.lt.s32.totalorder %v13450_v58, 2  ;;  %v2721_v9 = vsel %vm2713_vm2, %v2704_v33, %v2720_v63  ;;  %v13498_v47 = vpop.eup %11636  ;;  %v2545_v5 = vsub.s32 32, %v13448_v16 }
 0x25b   : > { %17002 = vst [vmem:[#allocation60_spill] sm:$0xff] %v13498_v47  ;;  %v2550_v31 = vadd.s32 127, %v2549_v34  ;;  %v2722_v32 = vsel %vm2712_vm4, %v2719_v62, %v2721_v9  ;;  %v2724_v41 = vsel %vm2714_vm9, %v2710_v56, 1326507024  ;;  %v13505_v37 = vpop.eup %11638  ;;  %v2715_v43 = vsel %vm2711_vm13, %v2695_v40, %v2698_v7 }
 0x25c   : > { %17003 = vst [vmem:[#allocation61_spill] sm:$0xff] %v13505_v37  ;;  %v2438_v26 = vclz %v10289_v12  ;;  %v2717_v33 = vsel %vm2713_vm2, %v2701_v20, %v2716_v21  ;;  %v2725_v63 = vsel %vm2713_vm2, %v2707_v18, %v2724_v41  ;;  %v2586_v56 = vadd.s32 1, %v10296_v55  ;;  %v13525_v18 = vpop.f32.mrf.mxu0 }
 0x25d   : > { %v2726_v34 = vsel %vm2712_vm4, %v2723_v46, %v2725_v63  ;;  %v13516_v62 = vmul.u32.u64.low %v13471_v0, %v2722_v32  ;;  %v13517_v9 = vmul.u32.u64.high %v13471_v0, %v2722_v32, %v13516_v62  ;;  %v2248_v37 = vxor.u32 2147483648, %v2247_v24  ;;  %17004 = vst [vmem:[#allocation62_spill] sm:$0xff] %v13525_v18 }
 0x25e   : > { %v10290_v12 = vadd.s32 4294967294, %v2438_v26  ;;  %v13521_v57 = vmul.u32.u64.low %v13471_v0, %v2726_v34  ;;  %v13522_v7 = vmul.u32.u64.high %v13471_v0, %v2726_v34, %v13521_v57  ;;  %v2547_v40 = vshrl.u32 %v2529_v19, %v2545_v5 }
 0x25f   : > { %v2584_v21 = vor.u32 8388608, %v2583_v59  ;;  %vm2587_vm7 = vcmp.gt.s32.totalorder %v2586_v56, 0  ;;  %v2551_v46 = vshll.u32 %v2550_v31, 23  ;;  %v2718_v32 = vsel %vm2712_vm4, %v2715_v43, %v2717_v33 }
 0x260   : > { %vm10291_vm3 = vcmp.lt.s32.totalorder %v10290_v12, 0  ;;  %v2588_v41 = vsel %vm2587_vm7, %v2586_v56, 0  ;;  %v2546_v55 = vshll.u32 %v13366_v27, %v13448_v16  ;;  %v2737_v57 = vadd.s32 1, %v13517_v9 }
 0x261   : > { %v13531_v26 = vsel %vm10291_vm3, 0, %v10290_v12  ;;  %v2590_v19 = vand.u32 31, %v2588_v41  ;;  %v13536_v59 = vsel %vm16815_vm6, %v2248_v37, %v2247_v24  ;;  %v2426_v5 = vadd.s32 %v13402_v23, %v13413_v3 }
 0x262   : > { %v2446_v31 = vsub.s32 4294967266, %v13531_v26  ;;  %v13542_v43 = vor.u32 %v2547_v40, %v2546_v55  ;;  %v2734_v27 = vmul.u32 %v13471_v0, %v2718_v32  ;;  %vm2736_vm13 = vc.u32 %v13522_v7, %v13516_v62 }
 0x263   : > { %v2591_v16 = vsub.s32 32, %v2590_v19  ;;  %v2552_v33 = vor.u32 4788187, %v2551_v46  ;;  %v2442_v63 = vsub.s32 32, %v13531_v26  ;;  %v2738_v24 = vsel %vm2736_vm13, %v2737_v57, %v13517_v9 }
 0x264   : > { %v13549_v37 = vshll.u32 %v2584_v21, 8  ;;  %v2739_v23 = vadd.s32 %v2738_v24, %v2734_v27  ;;  %v2593_v3 = vshll.u32 %v16905_v38, %v2590_v19  ;;  %v2447_v12 = vadd.s32 127, %v2446_v31 }
 0x265   : > { %v2594_v34 = vshrl.u32 %v16912_v50, %v2591_v16  ;;  %v2597_v56 = vshrl.u32 %v16913_v2, %v2591_v16  ;;  %v2596_v0 = vshll.u32 %v16912_v50, %v2590_v19  ;;  %v2599_v40 = vshll.u32 %v16913_v2, %v2590_v19 }
 0x266   : > { %v2600_v46 = vshrl.u32 %v16914_v22, %v2591_v16  ;;  %v2740_v32 = vadd.s32 536870912, %v2739_v23  ;;  %v2589_v55 = vshrl.u32 %v2588_v41, 5  ;;  %v2602_v9 = vshll.u32 %v16914_v22, %v2590_v19 }
 0x267   : > { %v2603_v21 = vshrl.u32 %v16915_v13, %v2591_v16  ;;  %v2555_v57 = vcvt.s32.f32 %v13542_v43  ;;  %v2595_v27 = vor.u32 %v2594_v34, %v2593_v3  ;;  %v2598_v24 = vor.u32 %v2597_v56, %v2596_v0 }
 0x268   : > { %v2601_v58 = vor.u32 %v2600_v46, %v2599_v40  ;;  %v13560_v20 = vshrl.u32 %v2740_v32, 30  ;;  %v2605_v10 = vshll.u32 %v16915_v13, %v2590_v19  ;;  %v2606_v53 = vshrl.u32 %v16903_v44, %v2591_v16  ;;  %v13573_v19 = vpop.f32.mrf.mxu0 }
 0x269   : > { %v2604_v31 = vor.u32 %v2603_v21, %v2602_v9  ;;  %v2553_v17 = vand.u32 2147483647, %v2552_v33  ;;  %v2444_v47 = vshrl.u32 %v2426_v5, %v2442_v63  ;;  %v2448_v48 = vshll.u32 %v2447_v12, 23  ;;  %17009 = vst [vmem:[#allocation64_spill] sm:$0xff] %v13573_v19 }
 0x26a   : > { %v2888_v41 = vand.u32 2139095040, %v13525_v18  ;;  %v17005_v51 = vand.u32 2147483647, %v13036_v39  ;;  %v17006_v11 = vmov 0  ;;  %vm2475_vm2 = vcmp.lt.s32.totalorder %v13137_v54, 0 }
 0x26b   : > { %v2742_v43 = vshll.u32 %v13560_v20, 30  ;;  %v2607_v3 = vor.u32 %v2606_v53, %v2605_v10  ;;  %vm2608_vm4 = vcmp.lt.s32.totalorder %v2589_v55, 1  ;;  %vm2611_vm7 = vcmp.lt.s32.totalorder %v2589_v55, 4 }
 0x26c   : > { %vm13567_vm9 = vcmp.le.f32.partialorder %v17005_v51, 0.7853982  ;;  %v2592_v5 = vshrl.u32 %v16905_v38, %v2591_v16  ;;  %vm2610_vm3 = vcmp.lt.s32.totalorder %v2589_v55, 3  ;;  %v2616_v33 = vsel %vm2608_vm4, %v2595_v27, %v2598_v24 }
 0x26d   : > { %v17007_v11 = vsel %vm13567_vm9, 4294967295, %v17006_v11  ;;  %v2617_v63 = vsel %vm2611_vm7, %v2604_v31, 920167782  ;;  %v13578_v51 = vsub.s32 %v2739_v23, %v2742_v43  ;;  %vm2609_vm13 = vcmp.lt.s32.totalorder %v2589_v55, 2 }
 0x26e   : > { %17008 = vst [vmem:[#allocation63_spill] sm:$0xff] %v17007_v11  ;;  %v2613_v34 = vsel %vm2611_vm7, %v2601_v58, 2102212464  ;;  %v2618_v56 = vsel %vm2610_vm3, %v2601_v58, %v2617_v63  ;;  %v2443_v10 = vshll.u32 %v13469_v61, %v13531_v26  ;;  %v2449_v53 = vor.u32 4788187, %v2448_v48 }
 0x26f   : > { %v2619_v12 = vsel %vm2609_vm13, %v2616_v33, %v2618_v56  ;;  %v2785_v16 = vand.u32 2139095040, %v13573_v19  ;;  %v2745_v0 = vsub.s32 0, %v13578_v51  ;;  %v2612_v40 = vsel %vm2608_vm4, %v2592_v5, %v2595_v27 }
 0x270   : > { %v2620_v23 = vsel %vm2608_vm4, %v2598_v24, %v2601_v58  ;;  %v2621_v46 = vsel %vm2611_vm7, %v2607_v3, 1326507024  ;;  %v17010_v32 = vand.u32 2147483647, %v13137_v54  ;;  %v2614_v48 = vsel %vm2610_vm3, %v2598_v24, %v2613_v34 }
 0x271   : > { %v2622_v61 = vsel %vm2610_vm3, %v2604_v31, %v2621_v46  ;;  %v13599_v26 = vmul.u32.u64.low %v13549_v37, %v2619_v12  ;;  %v13600_v21 = vmul.u32.u64.high %v13549_v37, %v2619_v12, %v13599_v26  ;;  %vm2372_vm12 = vcmp.lt.s32.totalorder %v13227_v60, 0 }
 0x272   : > { %vm13592_vm6 = vcmp.le.f32.partialorder %v17010_v32, 0.7853982  ;;  %v2445_v58 = vor.u32 %v2444_v47, %v2443_v10  ;;  %v10301_v27 = vmin.u32 %v2745_v0, %v13578_v51  ;;  %v2623_v43 = vsel %vm2609_vm13, %v2620_v23, %v2622_v61 }
 0x273   : > { %v2889_v3 = vshrl.u32 %v2888_v41, 23  ;;  %11640 = vsinq.f32 %v13431_v6  ;;  %v2556_v5 = vmul.f32 %v2555_v57, %v2553_v17  ;;  %v2450_v31 = vand.u32 2147483647, %v2449_v53 }
 0x274   : > { %v13608_v24 = vmul.u32.u64.low %v13549_v37, %v2623_v43  ;;  %v13609_v33 = vmul.u32.u64.high %v13549_v37, %v2623_v43, %v13608_v24  ;;  %v2747_v63 = vclz %v10301_v27  ;;  %v2615_v34 = vsel %vm2609_vm13, %v2612_v40, %v2614_v48 }
 0x275   : > { %v10308_v56 = vadd.s32 4294967169, %v2889_v3  ;;  %v2252_v47 = vsel %vm13567_vm9, %v13036_v39, %v13536_v59  ;;  %v17013_v41 = vsub.s32 4, %v13351_v29  ;;  %v2634_v17 = vadd.s32 1, %v13600_v21 }
 0x276   : > { %v17014_v57 = vand.u32 2147483647, %v13525_v18  ;;  %v2452_v53 = vcvt.s32.f32 %v2445_v58  ;;  %v10302_v55 = vadd.s32 4294967294, %v2747_v63  ;;  %v2786_v0 = vshrl.u32 %v2785_v16, 23 }
 0x277   : > { %v2560_v6 = vsel %vm2475_vm2, %v17013_v41, %v13351_v29  ;;  %v2895_v12 = vadd.s32 1, %v10308_v56  ;;  %v2557_v40 = vxor.u32 2147483648, %v2556_v5  ;;  %v2456_v23 = vsub.s32 4, %v13453_v8 }
 0x278   : > { %v2892_v10 = vand.u32 8388607, %v17014_v57  ;;  %v2631_v59 = vmul.u32 %v13549_v37, %v2615_v34  ;;  %vm2633_vm4 = vc.u32 %v13609_v33, %v13599_v26  ;;  %v13628_v46 = vmul.f32 %v2452_v53, %v2450_v31 }
 0x279   : > { %vm10303_vm7 = vcmp.lt.s32.totalorder %v10302_v55, 0  ;;  %v2635_v29 = vsel %vm2633_vm4, %v2634_v17, %v13600_v21  ;;  %vm2896_vm3 = vcmp.gt.s32.totalorder %v2895_v12, 0  ;;  %11642 = vcosq.f32 %v2252_v47 }
 0x27a   : > { %v13631_v32 = vsel %vm10303_vm7, 0, %v10302_v55  ;;  %v2636_v48 = vadd.s32 %v2635_v29, %v2631_v59  ;;  %v2893_v61 = vor.u32 8388608, %v2892_v10  ;;  %v2897_v58 = vsel %vm2896_vm3, %v2895_v12, 0 }
 0x27b   : > { %v13635_v16 = vsel %vm13592_vm6, 0, %v2560_v6  ;;  %v2755_v37 = vsub.s32 4294967266, %v13631_v32  ;;  %v10304_v27 = vadd.s32 4294967169, %v2786_v0  ;;  %11644 = vsinq.f32 %v2252_v47 }
 0x27c   : > { %17015 = vst [vmem:[#allocation65_spill] sm:$0xff] %v13635_v16  ;;  %v13641_v43 = vsel %vm2372_vm12, %v2456_v23, %v13453_v8  ;;  %v2637_v21 = vadd.s32 536870912, %v2636_v48  ;;  %v2899_v3 = vand.u32 31, %v2897_v58  ;;  %v13645_v24 = vsel %vm2475_vm2, %v2557_v40, %v2556_v5 }
 0x27d   : > { %v2735_v31 = vadd.s32 %v13516_v62, %v13522_v7  ;;  %v13654_v8 = vshll.u32 %v2893_v61, 8  ;;  %v2751_v6 = vsub.s32 32, %v13631_v32  ;;  %v2752_v5 = vshll.u32 %v13578_v51, %v13631_v32 }
 0x27e   : > { %v13652_v47 = vshrl.u32 %v2637_v21, 30  ;;  %v2900_v41 = vsub.s32 32, %v2899_v3  ;;  %v2756_v17 = vadd.s32 127, %v2755_v37  ;;  %v2792_v57 = vadd.s32 1, %v10304_v27 }
 0x27f   : > { %v2898_v7 = vshrl.u32 %v2897_v58, 5  ;;  %v2902_v10 = vshll.u32 %v16905_v38, %v2899_v3  ;;  %v2905_v12 = vshll.u32 %v16912_v50, %v2899_v3  ;;  %v2908_v40 = vshll.u32 %v16913_v2, %v2899_v3 }
 0x280   : > { %v2639_v62 = vshll.u32 %v13652_v47, 30  ;;  %v2903_v53 = vshrl.u32 %v16912_v50, %v2900_v41  ;;  %v13662_v55 = vpop.eup %11640  ;;  %v2906_v0 = vshrl.u32 %v16913_v2, %v2900_v41  ;;  %v2909_v23 = vshrl.u32 %v16914_v22, %v2900_v41 }
 0x281   : > { %17016 = vst [vmem:[#allocation66_spill] sm:$0xff] %v13662_v55  ;;  %v17017_v51 = vand.u32 2147483647, %v13227_v60  ;;  %v2911_v61 = vshll.u32 %v16914_v22, %v2899_v3  ;;  %v2912_v58 = vshrl.u32 %v16915_v13, %v2900_v41  ;;  %v2757_v37 = vshll.u32 %v2756_v17, 23 }
 0x282   : > { %v13674_v29 = vsub.s32 %v2636_v48, %v2639_v62  ;;  %v2904_v32 = vor.u32 %v2903_v53, %v2902_v10  ;;  %v2907_v27 = vor.u32 %v2906_v0, %v2905_v12  ;;  %v2910_v21 = vor.u32 %v2909_v23, %v2908_v40 }
 0x283   : > { %vm13670_vm2 = vcmp.le.f32.partialorder %v17017_v51, 0.7853982  ;;  %vm2793_vm13 = vcmp.gt.s32.totalorder %v2792_v57, 0  ;;  %v2913_v56 = vor.u32 %v2912_v58, %v2911_v61  ;;  %v2914_v34 = vshll.u32 %v16915_v13, %v2899_v3 }
 0x284   : > { %v2642_v63 = vsub.s32 0, %v13674_v29  ;;  %v2915_v51 = vshrl.u32 %v16903_v44, %v2900_v41  ;;  %vm2681_vm4 = vcmp.lt.s32.totalorder %v13338_v15, 0  ;;  %v2753_v48 = vshrl.u32 %v2735_v31, %v2751_v6 }
 0x285   : > { %v2901_v62 = vshrl.u32 %v16905_v38, %v2900_v41  ;;  %vm2917_vm7 = vcmp.lt.s32.totalorder %v2898_v7, 1  ;;  %vm2918_vm3 = vcmp.lt.s32.totalorder %v2898_v7, 2  ;;  %vm2920_vm14 = vcmp.lt.s32.totalorder %v2898_v7, 4 }
 0x286   : > { %v10297_v10 = vmin.u32 %v2642_v63, %v13674_v29  ;;  %v2916_v17 = vor.u32 %v2915_v51, %v2914_v34  ;;  %v2925_v53 = vsel %vm2917_vm7, %v2904_v32, %v2907_v27  ;;  %vm2919_vm0 = vcmp.lt.s32.totalorder %v2898_v7, 3  ;;  %v13686_v40 = vpop.eup %11642 }
 0x287   : > { %v2922_v12 = vsel %vm2920_vm14, %v2910_v21, 2102212464  ;;  %v2926_v0 = vsel %vm2920_vm14, %v2913_v56, 920167782  ;;  %v2929_v3 = vsel %vm2917_vm7, %v2907_v27, %v2910_v21  ;;  %v2758_v23 = vor.u32 4788187, %v2757_v37 }
 0x288   : > { %v2644_v61 = vclz %v10297_v10  ;;  %v2927_v31 = vsel %vm2919_vm0, %v2910_v21, %v2926_v0  ;;  %v2930_v6 = vsel %vm2920_vm14, %v2916_v17, 1326507024  ;;  %v13688_v41 = vpop.eup %11644  ;;  %v2754_v58 = vor.u32 %v2753_v48, %v2752_v5 }
 0x289   : > { %v2921_v63 = vsel %vm2917_vm7, %v2901_v62, %v2904_v32  ;;  %v2928_v34 = vsel %vm2918_vm3, %v2925_v53, %v2927_v31  ;;  %v2931_v51 = vsel %vm2919_vm0, %v2913_v56, %v2930_v6  ;;  %v2923_v55 = vsel %vm2919_vm0, %v2907_v27, %v2922_v12 }
 0x28a   : > { %v10298_v16 = vadd.s32 4294967294, %v2644_v61  ;;  %v2932_v11 = vsel %vm2918_vm3, %v2929_v3, %v2931_v51  ;;  %v2794_v39 = vsel %vm2793_vm13, %v2792_v57, 0  ;;  %v13697_v37 = vsel %vm13670_vm2, 0, %v13641_v43 }
 0x28b   : > { %17020 = vst [vmem:[#allocation67_spill] sm:$0xff] %v13697_v37  ;;  %v13700_v21 = vmul.u32.u64.low %v13654_v8, %v2932_v11  ;;  %v13701_v10 = vmul.u32.u64.high %v13654_v8, %v2932_v11, %v13700_v21  ;;  %v17021_v5 = vand.u32 2147483647, %v13573_v19  ;;  %v2759_v48 = vand.u32 2147483647, %v2758_v23 }
 0x28c   : > { %vm10299_vm14 = vcmp.lt.s32.totalorder %v10298_v16, 0  ;;  %v13706_v56 = vmul.u32.u64.low %v13654_v8, %v2928_v34  ;;  %v13707_v27 = vmul.u32.u64.high %v13654_v8, %v2928_v34, %v13706_v56  ;;  %v13714_v43 = vsel %vm13592_vm6, %v13137_v54, %v13645_v24 }
 0x28d   : > { %v2789_v32 = vand.u32 8388607, %v17021_v5  ;;  %v13716_v57 = vsel %vm10299_vm14, 0, %v10298_v16  ;;  %v2924_v11 = vsel %vm2918_vm3, %v2921_v63, %v2923_v55  ;;  %v2796_v62 = vand.u32 31, %v2794_v39 }
 0x28e   : > { %v17022_v17 = vxor.u32 2147483648, %v13628_v46  ;;  %v2761_v12 = vcvt.s32.f32 %v2754_v58  ;;  %v17023_v0 = vsub.s32 4, %v13560_v20  ;;  %v2652_v16 = vsub.s32 4294967266, %v13716_v57 }
 0x28f   : > { %v2632_v24 = vadd.s32 %v13599_v26, %v13609_v33  ;;  %vm2942_vm0 = vc.u32 %v13701_v10, %v13706_v56  ;;  %v2790_v7 = vor.u32 8388608, %v2789_v32  ;;  %v2797_v55 = vsub.s32 32, %v2796_v62 }
 0x290   : > { %v13724_v53 = vsel %vm2372_vm12, %v17022_v17, %v13628_v46  ;;  %v13731_v9 = vsel %vm2681_vm4, %v17023_v0, %v13560_v20  ;;  %v13738_v46 = vmul.f32 %v2761_v12, %v2759_v48  ;;  %v2940_v3 = vmul.u32 %v13654_v8, %v2924_v11 }
 0x291   : > { %v2943_v23 = vadd.s32 1, %v13707_v27  ;;  %v13742_v61 = vshrl.u32 %v2794_v39, 5  ;;  %v2799_v20 = vshll.u32 %v16905_v38, %v2796_v62  ;;  %v2800_v31 = vshrl.u32 %v16912_v50, %v2797_v55 }
 0x292   : > { %v2802_v6 = vshll.u32 %v16912_v50, %v2796_v62  ;;  %v2803_v26 = vshrl.u32 %v16913_v2, %v2797_v55  ;;  %v2653_v33 = vadd.s32 127, %v2652_v16  ;;  %v2805_v63 = vshll.u32 %v16913_v2, %v2796_v62 }
 0x293   : > { %v2944_v58 = vsel %vm2942_vm0, %v2943_v23, %v13707_v27  ;;  %v2806_v34 = vshrl.u32 %v16914_v22, %v2797_v55  ;;  %v2801_v51 = vor.u32 %v2800_v31, %v2799_v20  ;;  %v13751_v39 = vshll.u32 %v2790_v7, 8 }
 0x294   : > { %v2945_v8 = vadd.s32 %v2944_v58, %v2940_v3  ;;  %v2804_v21 = vor.u32 %v2803_v26, %v2802_v6  ;;  %v2763_v5 = vxor.u32 2147483648, %v13738_v46  ;;  %v2808_v48 = vshll.u32 %v16914_v22, %v2796_v62  ;;  %v13777_v58 = vpop.f32.mrf.mxu0 }
 0x295   : > { %v2807_v32 = vor.u32 %v2806_v34, %v2805_v63  ;;  %v2809_v11 = vshrl.u32 %v16915_v13, %v2797_v55  ;;  %v17024_v17 = vand.u32 2147483647, %v13338_v15  ;;  %v2811_v0 = vshll.u32 %v16915_v13, %v2796_v62  ;;  %17027 = vst [vmem:[#allocation68_spill] sm:$0xff] %v13777_v58 }
 0x296   : > { %v2946_v12 = vadd.s32 536870912, %v2945_v8  ;;  %v2812_v16 = vshrl.u32 %v16903_v44, %v2797_v55  ;;  %vm2814_vm6 = vcmp.lt.s32.totalorder %v13742_v61, 1  ;;  %v2648_v7 = vsub.s32 32, %v13716_v57 }
 0x297   : > { %vm13758_vm12 = vcmp.le.f32.partialorder %v17024_v17, 0.7853982  ;;  %v2654_v3 = vshll.u32 %v2653_v33, 23  ;;  %v2810_v23 = vor.u32 %v2809_v11, %v2808_v48  ;;  %vm2815_vm13 = vcmp.lt.s32.totalorder %v13742_v61, 2 }
 0x298   : > { %v13767_v20 = vshrl.u32 %v2946_v12, 30  ;;  %v2813_v31 = vor.u32 %v2812_v16, %v2811_v0  ;;  %vm2817_vm7 = vcmp.lt.s32.totalorder %v13742_v61, 4  ;;  %v2822_v6 = vsel %vm2814_vm6, %v2801_v51, %v2804_v21 }
 0x299   : > { %v2649_v62 = vshll.u32 %v13674_v29, %v13716_v57  ;;  %vm2816_vm3 = vcmp.lt.s32.totalorder %v13742_v61, 3  ;;  %v2823_v26 = vsel %vm2817_vm7, %v2810_v23, 920167782  ;;  %v2826_v33 = vsel %vm2814_vm6, %v2804_v21, %v2807_v32 }
 0x29a   : > { %v2948_v63 = vshll.u32 %v13767_v20, 30  ;;  %v2819_v34 = vsel %vm2817_vm7, %v2807_v32, 2102212464  ;;  %v2824_v48 = vsel %vm2816_vm3, %v2807_v32, %v2823_v26  ;;  %v2827_v11 = vsel %vm2817_vm7, %v2813_v31, 1326507024  ;;  %v13800_v31 = vpop.f32.mrf.mxu0 }
 0x29b   : > { %v2650_v17 = vshrl.u32 %v2632_v24, %v2648_v7  ;;  %v2798_v12 = vshrl.u32 %v16905_v38, %v2797_v55  ;;  %v2825_v29 = vsel %vm2815_vm13, %v2822_v6, %v2824_v48  ;;  %v2828_v57 = vsel %vm2816_vm3, %v2810_v23, %v2827_v11  ;;  %17028 = vst [vmem:[#allocation69_spill] sm:$0xff] %v13800_v31 }
 0x29c   : > { %v2655_v0 = vor.u32 4788187, %v2654_v3  ;;  %v13787_v16 = vsub.s32 %v2945_v8, %v2948_v63  ;;  %v2829_v54 = vsel %vm2815_vm13, %v2826_v33, %v2828_v57  ;;  %v3094_v37 = vand.u32 2139095040, %v13777_v58 }
 0x29d   : > { %v2818_v32 = vsel %vm2814_vm6, %v2798_v12, %v2801_v51  ;;  %v2820_v24 = vsel %vm2816_vm3, %v2804_v21, %v2819_v34  ;;  %v13797_v55 = vmul.u32.u64.low %v13751_v39, %v2829_v54  ;;  %v13798_v7 = vmul.u32.u64.high %v13751_v39, %v2829_v54, %v13797_v55 }
 0x29e   : > { %11646 = vcosq.f32 %v13714_v43  ;;  %v2951_v8 = vsub.s32 0, %v13787_v16  ;;  %v13805_v3 = vmul.u32.u64.low %v13751_v39, %v2825_v29  ;;  %v13806_v23 = vmul.u32.u64.high %v13751_v39, %v2825_v29, %v13805_v3 }
 0x29f   : > { %11648 = vsinq.f32 %v13714_v43  ;;  %v13813_v51 = vsel %vm13758_vm12, 0, %v13731_v9  ;;  %vm2578_vm14 = vcmp.lt.s32.totalorder %v13438_v42, 0  ;;  %v2651_v54 = vor.u32 %v2650_v17, %v2649_v62 }
 0x2a0   : > { %17029 = vst [vmem:[#allocation70_spill] sm:$0xff] %v13813_v51  ;;  %v3095_v21 = vshrl.u32 %v3094_v37, 23  ;;  %v2458_v6 = vsel %vm13670_vm2, %v13227_v60, %v13724_v53  ;;  %v10309_v26 = vmin.u32 %v2951_v8, %v13787_v16  ;;  %v2821_v33 = vsel %vm2815_vm13, %v2818_v32, %v2820_v24 }
 0x2a1   : > { %v2991_v43 = vand.u32 2139095040, %v13800_v31  ;;  %v2764_v9 = vsel %vm2681_vm4, %v2763_v5, %v13738_v46  ;;  %v2656_v63 = vand.u32 2147483647, %v2655_v0  ;;  %vm2839_vm0 = vc.u32 %v13798_v7, %v13805_v3 }
 0x2a2   : > { %v10316_v37 = vadd.s32 4294967169, %v3095_v21  ;;  %v2953_v62 = vclz %v10309_v26  ;;  %v2840_v59 = vadd.s32 1, %v13806_v23  ;;  %v16826_v53 = vand.u32 2147483647, %v13777_v58 }
 0x2a3   : > { %v2992_v34 = vshrl.u32 %v2991_v43, 23  ;;  %11650 = vcosq.f32 %v2458_v6  ;;  %v2658_v61 = vcvt.s32.f32 %v2651_v54  ;;  %v2837_v48 = vmul.u32 %v13751_v39, %v2821_v33 }
 0x2a4   : > { %v3101_v11 = vadd.s32 1, %v10316_v37  ;;  %v2767_v46 = vsel %vm13758_vm12, %v13338_v15, %v2764_v9  ;;  %v2662_v5 = vsub.s32 4, %v13652_v47  ;;  %v10310_v17 = vadd.s32 4294967294, %v2953_v62 }
 0x2a5   : > { %v2841_v12 = vsel %vm2839_vm0, %v2840_v59, %v13806_v23  ;;  %11652 = vsinq.f32 %v2458_v6  ;;  %v13837_v29 = vmul.f32 %v2658_v61, %v2656_v63  ;;  %v3098_v0 = vand.u32 8388607, %v16826_v53 }
 0x2a6   : > { %v2842_v57 = vadd.s32 %v2841_v12, %v2837_v48  ;;  %vm3102_vm2 = vcmp.gt.s32.totalorder %v3101_v11, 0  ;;  %vm10311_vm4 = vcmp.lt.s32.totalorder %v10310_v17, 0  ;;  %v10312_v32 = vadd.s32 4294967169, %v2992_v34 }
 0x2a7   : > { %v3103_v39 = vsel %vm3102_vm2, %v3101_v11, 0  ;;  %11654 = vcosq.f32 %v2767_v46  ;;  %v13841_v24 = vsel %vm10311_vm4, 0, %v10310_v17  ;;  %v13846_v8 = vsel %vm2578_vm14, %v2662_v5, %v13652_v47 }
 0x2a8   : > { %v2843_v27 = vadd.s32 536870912, %v2842_v57  ;;  %v3105_v55 = vand.u32 31, %v3103_v39  ;;  %11656 = vsinq.f32 %v2767_v46  ;;  %v2941_v23 = vadd.s32 %v13706_v56, %v13701_v10 }
 0x2a9   : > { %v2961_v54 = vsub.s32 4294967266, %v13841_v24  ;;  %v2971_v6 = vsub.s32 4, %v13767_v20  ;;  %v3099_v9 = vor.u32 8388608, %v3098_v0  ;;  %v13856_v37 = vadd.s32 1, %v10312_v32 }
 0x2aa   : > { %v13853_v26 = vshrl.u32 %v2843_v27, 30  ;;  %v3106_v33 = vsub.s32 32, %v3105_v55  ;;  %v2957_v62 = vsub.s32 32, %v13841_v24  ;;  %v3104_v56 = vshrl.u32 %v3103_v39, 5 }
 0x2ab   : > { %v2962_v43 = vadd.s32 127, %v2961_v54  ;;  %v13858_v47 = vpop.eup %11646  ;;  %v3108_v61 = vshll.u32 %v16905_v38, %v3105_v55  ;;  %v3111_v48 = vshll.u32 %v16912_v50, %v3105_v55  ;;  %v3114_v17 = vshll.u32 %v16913_v2, %v3105_v55 }
 0x2ac   : > { %17030 = vst [vmem:[#allocation71_spill] sm:$0xff] %v13858_v47  ;;  %v2845_v10 = vshll.u32 %v13853_v26, 30  ;;  %v3109_v59 = vshrl.u32 %v16912_v50, %v3106_v33  ;;  %v13863_v34 = vpop.eup %11648  ;;  %v3112_v11 = vshrl.u32 %v16913_v2, %v3106_v33  ;;  %v3115_v46 = vshrl.u32 %v16914_v22, %v3106_v33 }
 0x2ad   : > { %17031 = vst [vmem:[#allocation72_spill] sm:$0xff] %v13863_v34  ;;  %v3117_v12 = vshll.u32 %v16914_v22, %v3105_v55  ;;  %v3118_v0 = vshrl.u32 %v16915_v13, %v3106_v33  ;;  %vm2887_vm12 = vcmp.lt.s32.totalorder %v13525_v18, 0  ;;  %v2963_v39 = vshll.u32 %v2962_v43, 23 }
 0x2ae   : > { %v13869_v5 = vsub.s32 %v2842_v57, %v2845_v10  ;;  %v3110_v32 = vor.u32 %v3109_v59, %v3108_v61  ;;  %v3113_v27 = vor.u32 %v3112_v11, %v3111_v48  ;;  %v13875_v54 = vshll.u32 %v3099_v9, 8 }
 0x2af   : > { %v2958_v53 = vshll.u32 %v13787_v16, %v13841_v24  ;;  %v3116_v57 = vor.u32 %v3115_v46, %v3114_v17  ;;  %v3119_v10 = vor.u32 %v3118_v0, %v3117_v12  ;;  %v2959_v51 = vshrl.u32 %v2941_v23, %v2957_v62 }
 0x2b0   : > { %v2848_v63 = vsub.s32 0, %v13869_v5  ;;  %v13880_v21 = vpop.eup %11650  ;;  %v3120_v15 = vshll.u32 %v16915_v13, %v3105_v55  ;;  %v3121_v47 = vshrl.u32 %v16903_v44, %v3106_v33  ;;  %vm2999_vm6 = vcmp.gt.s32.totalorder %v13856_v37, 0 }
 0x2b1   : > { %17032 = vst [vmem:[#allocation73_spill] sm:$0xff] %v13880_v21  ;;  %v3107_v9 = vshrl.u32 %v16905_v38, %v3106_v33  ;;  %vm3123_vm13 = vcmp.lt.s32.totalorder %v3104_v56, 1  ;;  %vm3126_vm7 = vcmp.lt.s32.totalorder %v3104_v56, 4  ;;  %v2964_v24 = vor.u32 4788187, %v2963_v39 }
 0x2b2   : > { %v10305_v43 = vmin.u32 %v2848_v63, %v13869_v5  ;;  %v13887_v16 = vpop.eup %11652  ;;  %v3122_v59 = vor.u32 %v3121_v47, %v3120_v15  ;;  %v3128_v61 = vsel %vm3126_vm7, %v3116_v57, 2102212464  ;;  %v3131_v48 = vsel %vm3123_vm13, %v3110_v32, %v3113_v27 }
 0x2b3   : > { %17033 = vst [vmem:[#allocation74_spill] sm:$0xff] %v13887_v16  ;;  %vm3125_vm3 = vcmp.lt.s32.totalorder %v3104_v56, 3  ;;  %v3132_v23 = vsel %vm3126_vm7, %v3119_v10, 920167782  ;;  %v3135_v55 = vsel %vm3123_vm13, %v3113_v27, %v3116_v57  ;;  %vm3124_vm0 = vcmp.lt.s32.totalorder %v3104_v56, 2 }
 0x2b4   : > { %v2850_v11 = vclz %v10305_v43  ;;  %v13889_v62 = vpop.eup %11654  ;;  %v3127_v46 = vsel %vm3123_vm13, %v3107_v9, %v3110_v32  ;;  %v3133_v17 = vsel %vm3125_vm3, %v3116_v57, %v3132_v23  ;;  %v3136_v63 = vsel %vm3126_vm7, %v3122_v59, 1326507024 }
 0x2b5   : > { %17034 = vst [vmem:[#allocation75_spill] sm:$0xff] %v13889_v62  ;;  %v13891_v12 = vpop.eup %11656  ;;  %v3129_v0 = vsel %vm3125_vm3, %v3113_v27, %v3128_v61  ;;  %v3134_v34 = vsel %vm3124_vm0, %v3131_v48, %v3133_v17  ;;  %v3137_v39 = vsel %vm3125_vm3, %v3119_v10, %v3136_v63  ;;  %v2960_v15 = vor.u32 %v2959_v51, %v2958_v53  ;;  %v13926_v48 = vpop.f32.mrf.mxu0 }
 0x2b6   : > { %17035 = vst [vmem:[#allocation76_spill] sm:$0xff] %v13891_v12  ;;  %v10306_v33 = vadd.s32 4294967294, %v2850_v11  ;;  %v3138_v47 = vsel %vm3124_vm0, %v3135_v55, %v3137_v39  ;;  %v13896_v43 = vmul.u32.u64.low %v13875_v54, %v3134_v34  ;;  %v13897_v60 = vmul.u32.u64.high %v13875_v54, %v3134_v34, %v13896_v43  ;;  %17040 = vst [vmem:[#allocation77_spill] sm:$0xff] %v13926_v48 }
 0x2b7   : > { %v13903_v32 = vsel %vm2887_vm12, %v2971_v6, %v13767_v20  ;;  %v13906_v57 = vmul.u32.u64.low %v13875_v54, %v3138_v47  ;;  %v13907_v27 = vmul.u32.u64.high %v13875_v54, %v3138_v47, %v13906_v57  ;;  %v2965_v9 = vand.u32 2147483647, %v2964_v24 }
 0x2b8   : > { %vm10307_vm2 = vcmp.lt.s32.totalorder %v10306_v33, 0  ;;  %v3130_v51 = vsel %vm3124_vm0, %v3127_v46, %v3129_v0  ;;  %v3000_v53 = vsel %vm2999_vm6, %v13856_v37, 0  ;;  %v17036_v34 = vand.u32 2147483647, %v13438_v42 }
 0x2b9   : > { %v2853_v10 = vsel %vm10307_vm2, 0, %v10306_v33  ;;  %v17039_v20 = vxor.u32 2147483648, %v13837_v29  ;;  %v2838_v56 = vadd.s32 %v13805_v3, %v13798_v7  ;;  %v2967_v37 = vcvt.s32.f32 %v2960_v15 }
 0x2ba   : > { %vm13915_vm4 = vcmp.le.f32.partialorder %v17036_v34, 0.7853982  ;;  %v2854_v24 = vsub.s32 32, %v2853_v10  ;;  %v2858_v61 = vsub.s32 4294967266, %v2853_v10  ;;  %v3149_v11 = vadd.s32 1, %v13897_v60 }
 0x2bb   : > { %v2661_v6 = vsel %vm2578_vm14, %v17039_v20, %v13837_v29  ;;  %v17041_v23 = vand.u32 2147483647, %v13800_v31  ;;  %v3002_v46 = vand.u32 31, %v3000_v53  ;;  %v3146_v33 = vmul.u32 %v13875_v54, %v3130_v51 }
 0x2bc   : > { %v2856_v17 = vshrl.u32 %v2838_v56, %v2854_v24  ;;  %v2859_v63 = vadd.s32 127, %v2858_v61  ;;  %vm3148_vm14 = vc.u32 %v13907_v27, %v13896_v43  ;;  %v13934_v29 = vmul.f32 %v2967_v37, %v2965_v9 }
 0x2bd   : > { %v2995_v55 = vand.u32 8388607, %v17041_v23  ;;  %v3150_v7 = vsel %vm3148_vm14, %v3149_v11, %v13897_v60  ;;  %v3003_v3 = vsub.s32 32, %v3002_v46  ;;  %v3300_v0 = vand.u32 2139095040, %v13926_v48 }
 0x2be   : > { %v2855_v39 = vshll.u32 %v13869_v5, %v2853_v10  ;;  %v2860_v15 = vshll.u32 %v2859_v63, 23  ;;  %v3151_v47 = vadd.s32 %v3150_v7, %v3146_v33  ;;  %v13939_v57 = vshrl.u32 %v3000_v53, 5 }
 0x2bf   : > { %v3005_v34 = vshll.u32 %v16905_v38, %v3002_v46  ;;  %v3006_v54 = vshrl.u32 %v16912_v50, %v3003_v3  ;;  %v3009_v51 = vshrl.u32 %v16913_v2, %v3003_v3  ;;  %v3012_v9 = vshrl.u32 %v16914_v22, %v3003_v3 }
 0x2c0   : > { %v2857_v20 = vor.u32 %v2856_v17, %v2855_v39  ;;  %v3152_v56 = vadd.s32 536870912, %v3151_v47  ;;  %v3008_v60 = vshll.u32 %v16912_v50, %v3002_v46  ;;  %v3011_v24 = vshll.u32 %v16913_v2, %v3002_v46 }
 0x2c1   : > { %v2861_v61 = vor.u32 4788187, %v2860_v15  ;;  %v3007_v5 = vor.u32 %v3006_v54, %v3005_v34  ;;  %v3014_v10 = vshll.u32 %v16914_v22, %v3002_v46  ;;  %v3015_v53 = vshrl.u32 %v16915_v13, %v3003_v3 }
 0x2c2   : > { %v13949_v37 = vshrl.u32 %v3152_v56, 30  ;;  %v3010_v11 = vor.u32 %v3009_v51, %v3008_v60  ;;  %v3017_v23 = vshll.u32 %v16915_v13, %v3002_v46  ;;  %v3018_v63 = vshrl.u32 %v16903_v44, %v3003_v3 }
 0x2c3   : > { %v2664_v17 = vsel %vm13915_vm4, %v13438_v42, %v2661_v6  ;;  %v3013_v33 = vor.u32 %v3012_v9, %v3011_v24  ;;  %v3016_v7 = vor.u32 %v3015_v53, %v3014_v10  ;;  %v17042_v15 = vand.u32 2147483647, %v13525_v18 }
 0x2c4   : > { %vm2784_vm13 = vcmp.lt.s32.totalorder %v13573_v19, 0  ;;  %v2868_v46 = vsub.s32 4, %v13853_v26  ;;  %v3154_v54 = vshll.u32 %v13949_v37, 30  ;;  %v2996_v51 = vor.u32 8388608, %v2995_v55 }
 0x2c5   : > { %vm13959_vm6 = vcmp.le.f32.partialorder %v17042_v15, 0.7853982  ;;  %v3019_v56 = vor.u32 %v3018_v63, %v3017_v23  ;;  %v2969_v6 = vxor.u32 2147483648, %v13934_v29  ;;  %v2864_v9 = vcvt.s32.f32 %v2857_v20 }
 0x2c6   : > { %vm3020_vm7 = vcmp.lt.s32.totalorder %v13939_v57, 1  ;;  %v3301_v60 = vshrl.u32 %v3300_v0, 23  ;;  %v2862_v24 = vand.u32 2147483647, %v2861_v61  ;;  %v13968_v10 = vsub.s32 %v3151_v47, %v3154_v54 }
 0x2c7   : > { %vm3023_vm3 = vcmp.lt.s32.totalorder %v13939_v57, 4  ;;  %v3028_v53 = vsel %vm3020_vm7, %v3007_v5, %v3010_v11  ;;  %vm3022_vm0 = vcmp.lt.s32.totalorder %v13939_v57, 3  ;;  %v3032_v55 = vsel %vm3020_vm7, %v3010_v11, %v3013_v33 }
 0x2c8   : > { %v3029_v15 = vsel %vm3023_vm3, %v3016_v7, 920167782  ;;  %v3033_v23 = vsel %vm3023_vm3, %v3019_v56, 1326507024  ;;  %v17045_v20 = vand.u32 2147483647, %v13573_v19  ;;  %v3004_v54 = vshrl.u32 %v16905_v38, %v3003_v3 }
 0x2c9   : > { %v3157_v0 = vsub.s32 0, %v13968_v10  ;;  %vm3021_vm14 = vcmp.lt.s32.totalorder %v13939_v57, 2  ;;  %v3025_v47 = vsel %vm3023_vm3, %v3013_v33, 2102212464  ;;  %v3030_v61 = vsel %vm3022_vm0, %v3013_v33, %v3029_v15 }
 0x2ca   : > { %vm13978_vm2 = vcmp.le.f32.partialorder %v17045_v20, 0.7853982  ;;  %v3031_v39 = vsel %vm3021_vm14, %v3028_v53, %v3030_v61  ;;  %v3034_v56 = vsel %vm3022_vm0, %v3016_v7, %v3033_v23  ;;  %v3036_v20 = vshll.u32 %v2996_v51, 8 }
 0x2cb   : > { %v2865_v62 = vmul.f32 %v2864_v9, %v2862_v24  ;;  %v10317_v12 = vmin.u32 %v3157_v0, %v13968_v10  ;;  %v3035_v42 = vsel %vm3021_vm14, %v3032_v55, %v3034_v56  ;;  %v10324_v21 = vadd.s32 4294967169, %v3301_v60 }
 0x2cc   : > { %v3024_v16 = vsel %vm3020_vm7, %v3004_v54, %v3007_v5  ;;  %v3026_v3 = vsel %vm3022_vm0, %v3010_v11, %v3025_v47  ;;  %v13998_v33 = vmul.u32.u64.low %v3036_v20, %v3035_v42  ;;  %v13999_v15 = vmul.u32.u64.high %v3036_v20, %v3035_v42, %v13998_v33 }
 0x2cd   : > { %v3159_v53 = vclz %v10317_v12  ;;  %v14001_v61 = vmul.u32.u64.low %v3036_v20, %v3031_v39  ;;  %v14002_v7 = vmul.u32.u64.high %v3036_v20, %v3031_v39, %v14001_v61  ;;  %v3307_v51 = vadd.s32 1, %v10324_v21 }
 0x2ce   : > { %v14008_v9 = vsel %vm13915_vm4, 0, %v13846_v8  ;;  %11658 = vcosq.f32 %v2664_v17  ;;  %v14013_v5 = vsel %vm13959_vm6, 0, %v13903_v32  ;;  %v2869_v42 = vsel %vm2784_vm13, %v2868_v46, %v13853_v26 }
 0x2cf   : > { %17048 = vst [vmem:[#allocation78_spill] sm:$0xff] %v14013_v5  ;;  %v2970_v12 = vsel %vm2887_vm12, %v2969_v6, %v13934_v29  ;;  %v10318_v21 = vadd.s32 4294967294, %v3159_v53  ;;  %v3027_v59 = vsel %vm3021_vm14, %v3024_v16, %v3026_v3  ;;  %vm3308_vm4 = vcmp.gt.s32.totalorder %v3307_v51, 0  ;;  %v14037_v6 = vpop.f32.mrf.mxu0 }
 0x2d0   : > { %11660 = vsinq.f32 %v2664_v17  ;;  %v2866_v8 = vxor.u32 2147483648, %v2865_v62  ;;  %vm3045_vm7 = vc.u32 %v13999_v15, %v14001_v61  ;;  %v3309_v32 = vsel %vm3308_vm4, %v3307_v51, 0  ;;  %17051 = vst [vmem:[#allocation80_spill] sm:$0xff] %v14037_v6 }
 0x2d1   : > { %vm10319_vm3 = vcmp.lt.s32.totalorder %v10318_v21, 0  ;;  %v3046_v11 = vadd.s32 1, %v14002_v7  ;;  %v17049_v26 = vand.u32 2147483647, %v13926_v48  ;;  %v3311_v46 = vand.u32 31, %v3309_v32 }
 0x2d2   : > { %v14031_v29 = vsel %vm13959_vm6, %v13525_v18, %v2970_v12  ;;  %v14035_v16 = vsel %vm13978_vm2, 0, %v2869_v42  ;;  %v3162_v57 = vsel %vm10319_vm3, 0, %v10318_v21  ;;  %v3043_v17 = vmul.u32 %v3036_v20, %v3027_v59 }
 0x2d3   : > { %v3304_v39 = vand.u32 8388607, %v17049_v26  ;;  %17050 = vst [vmem:[#allocation79_spill] sm:$0xff] %v14035_v16  ;;  %v3147_v60 = vadd.s32 %v13896_v43, %v13907_v27  ;;  %v3167_v24 = vsub.s32 4294967266, %v3162_v57  ;;  %v3047_v23 = vsel %vm3045_vm7, %v3046_v11, %v14002_v7 }
 0x2d4   : > { %v14045_v34 = vsel %vm2784_vm13, %v2866_v8, %v2865_v62  ;;  %v3163_v0 = vsub.s32 32, %v3162_v57  ;;  %v3048_v47 = vadd.s32 %v3047_v23, %v3043_v17  ;;  %v3312_v54 = vsub.s32 32, %v3311_v46 }
 0x2d5   : > { %v3168_v56 = vadd.s32 127, %v3167_v24  ;;  %v3305_v3 = vor.u32 8388608, %v3304_v39  ;;  %v3314_v20 = vshll.u32 %v16905_v38, %v3311_v46  ;;  %v3197_v33 = vand.u32 2139095040, %v14037_v6 }
 0x2d6   : > { %v3049_v53 = vadd.s32 536870912, %v3048_v47  ;;  %v3315_v43 = vshrl.u32 %v16912_v50, %v3312_v54  ;;  %v3317_v27 = vshll.u32 %v16912_v50, %v3311_v46  ;;  %v3318_v7 = vshrl.u32 %v16913_v2, %v3312_v54 }
 0x2d7   : > { %v3169_v51 = vshll.u32 %v3168_v56, 23  ;;  %v3320_v62 = vshll.u32 %v16913_v2, %v3311_v46  ;;  %v3321_v42 = vshrl.u32 %v16914_v22, %v3312_v54  ;;  %v3324_v12 = vshrl.u32 %v16915_v13, %v3312_v54 }
 0x2d8   : > { %v3165_v21 = vshrl.u32 %v3147_v60, %v3163_v0  ;;  %v14055_v59 = vshrl.u32 %v3049_v53, 30  ;;  %v3310_v8 = vshrl.u32 %v3309_v32, 5  ;;  %v3323_v11 = vshll.u32 %v16914_v22, %v3311_v46 }
 0x2d9   : > { %v3170_v26 = vor.u32 4788187, %v3169_v51  ;;  %v3316_v39 = vor.u32 %v3315_v43, %v3314_v20  ;;  %v3319_v17 = vor.u32 %v3318_v7, %v3317_v27  ;;  %v3322_v24 = vor.u32 %v3321_v42, %v3320_v62 }
 0x2da   : > { %v3051_v23 = vshll.u32 %v14055_v59, 30  ;;  %v3325_v55 = vor.u32 %v3324_v12, %v3323_v11  ;;  %v3326_v56 = vshll.u32 %v16915_v13, %v3311_v46  ;;  %v3327_v18 = vshrl.u32 %v16903_v44, %v3312_v54 }
 0x2db   : > { %v14061_v5 = vpop.eup %11658  ;;  %vm3093_vm12 = vcmp.lt.s32.totalorder %v13777_v58, 0  ;;  %v3164_v60 = vshll.u32 %v13968_v10, %v3162_v57  ;;  %v3313_v32 = vshrl.u32 %v16905_v38, %v3312_v54  ;;  %v3345_v0 = vshll.u32 %v3305_v3, 8 }
 0x2dc   : > { %v3198_v53 = vshrl.u32 %v3197_v33, 23  ;;  %v14066_v20 = vsub.s32 %v3048_v47, %v3051_v23  ;;  %v3328_v43 = vor.u32 %v3327_v18, %v3326_v56  ;;  %vm3329_vm6 = vcmp.lt.s32.totalorder %v3310_v8, 1 }
 0x2dd   : > { %vm3332_vm13 = vcmp.lt.s32.totalorder %v3310_v8, 4  ;;  %v14068_v27 = vpop.eup %11660  ;;  %v3166_v46 = vor.u32 %v3165_v21, %v3164_v60  ;;  %v3171_v7 = vand.u32 2147483647, %v3170_v26  ;;  %v3337_v62 = vsel %vm3329_vm6, %v3316_v39, %v3319_v17 }
 0x2de   : > { %v3334_v51 = vsel %vm3332_vm13, %v3322_v24, 2102212464  ;;  %vm2990_vm0 = vcmp.lt.s32.totalorder %v13800_v31, 0  ;;  %v3054_v42 = vsub.s32 0, %v14066_v20  ;;  %vm3331_vm14 = vcmp.lt.s32.totalorder %v3310_v8, 3 }
 0x2df   : > { %v3338_v10 = vsel %vm3332_vm13, %v3325_v55, 920167782  ;;  %v3341_v57 = vsel %vm3329_vm6, %v3319_v17, %v3322_v24  ;;  %vm3330_vm4 = vcmp.lt.s32.totalorder %v3310_v8, 2  ;;  %v3333_v54 = vsel %vm3329_vm6, %v3313_v32, %v3316_v39 }
 0x2e0   : > { %v3339_v47 = vsel %vm3331_vm14, %v3322_v24, %v3338_v10  ;;  %v3342_v3 = vsel %vm3332_vm13, %v3328_v43, 1326507024  ;;  %v17052_v18 = vand.u32 2147483647, %v13777_v58  ;;  %v10313_v12 = vmin.u32 %v3054_v42, %v14066_v20 }
 0x2e1   : > { %v3335_v21 = vsel %vm3331_vm14, %v3319_v17, %v3334_v51  ;;  %v3340_v11 = vsel %vm3330_vm4, %v3337_v62, %v3339_v47  ;;  %v3343_v26 = vsel %vm3331_vm14, %v3325_v55, %v3342_v3  ;;  %v16843_v39 = vand.u32 2147483647, %v14037_v6  ;;  %v14095_v55 = vpop.f32.mrf.mxu0 }
 0x2e2   : > { %vm14074_vm7 = vcmp.le.f32.partialorder %v17052_v18, 0.7853982  ;;  %v3344_v23 = vsel %vm3330_vm4, %v3341_v57, %v3343_v26  ;;  %v14081_v56 = vmul.u32.u64.low %v3345_v0, %v3340_v11  ;;  %v14082_v60 = vmul.u32.u64.high %v3345_v0, %v3340_v11, %v14081_v56  ;;  %17058 = vst [vmem:[#allocation81_spill] sm:$0xff] %v14095_v55 }
 0x2e3   : > { %v3173_v24 = vcvt.s32.f32 %v3166_v46  ;;  %v17055_v32 = vand.u32 2147483647, %v13800_v31  ;;  %v3056_v42 = vclz %v10313_v12  ;;  %11662 = vcosq.f32 %v14031_v29 }
 0x2e4   : > { %v14092_v17 = vmul.u32.u64.low %v3345_v0, %v3344_v23  ;;  %v14093_v51 = vmul.u32.u64.high %v3345_v0, %v3344_v23, %v14092_v17  ;;  %v3074_v62 = vsub.s32 4, %v14055_v59  ;;  %v3336_v10 = vsel %vm3330_vm4, %v3333_v54, %v3335_v21 }
 0x2e5   : > { %vm14088_vm3 = vcmp.le.f32.partialorder %v17055_v32, 0.7853982  ;;  %v10320_v57 = vadd.s32 4294967169, %v3198_v53  ;;  %v2870_v46 = vsel %vm13978_vm2, %v13573_v19, %v14045_v34  ;;  %v3174_v47 = vmul.f32 %v3173_v24, %v3171_v7 }
 0x2e6   : > { %v17059_v3 = vsub.s32 4, %v13949_v37  ;;  %v10314_v12 = vadd.s32 4294967294, %v3056_v42  ;;  %v3044_v11 = vadd.s32 %v14001_v61, %v13999_v15  ;;  %v3355_v8 = vadd.s32 1, %v14082_v60 }
 0x2e7   : > { %v3204_v54 = vadd.s32 1, %v10320_v57  ;;  %v3506_v53 = vand.u32 2139095040, %v14095_v55  ;;  %v3352_v21 = vmul.u32 %v3345_v0, %v3336_v10  ;;  %vm3354_vm2 = vc.u32 %v14093_v51, %v14081_v56 }
 0x2e8   : > { %v3178_v18 = vsel %vm3093_vm12, %v17059_v3, %v13949_v37  ;;  %vm10315_vm6 = vcmp.lt.s32.totalorder %v10314_v12, 0  ;;  %v3201_v63 = vand.u32 8388607, %v16843_v39  ;;  %v3075_v37 = vsel %vm2990_vm0, %v3074_v62, %v14055_v59 }
 0x2e9   : > { %v3059_v34 = vsel %vm10315_vm6, 0, %v10314_v12  ;;  %v3356_v15 = vsel %vm3354_vm2, %v3355_v8, %v14082_v60  ;;  %vm3205_vm13 = vcmp.gt.s32.totalorder %v3204_v54, 0  ;;  %v3175_v61 = vxor.u32 2147483648, %v3174_v47 }
 0x2ea   : > { %v3060_v7 = vsub.s32 32, %v3059_v34  ;;  %v3064_v26 = vsub.s32 4294967266, %v3059_v34  ;;  %v3357_v23 = vadd.s32 %v3356_v15, %v3352_v21  ;;  %11664 = vsinq.f32 %v14031_v29 }
 0x2eb   : > { %v14124_v0 = vsel %vm14074_vm7, 0, %v3178_v18  ;;  %v3206_v24 = vsel %vm3205_vm13, %v3204_v54, 0  ;;  %v3507_v32 = vshrl.u32 %v3506_v53, 23  ;;  %11666 = vcosq.f32 %v2870_v46 }
 0x2ec   : > { %17060 = vst [vmem:[#allocation82_spill] sm:$0xff] %v14124_v0  ;;  %v3062_v42 = vshrl.u32 %v3044_v11, %v3060_v7  ;;  %v3065_v17 = vadd.s32 127, %v3064_v26  ;;  %v3358_v10 = vadd.s32 536870912, %v3357_v23  ;;  %11668 = vsinq.f32 %v2870_v46 }
 0x2ed   : > { %v14128_v59 = vsel %vm14088_vm3, 0, %v3075_v37  ;;  %v3208_v60 = vand.u32 31, %v3206_v24  ;;  %v16844_v62 = vand.u32 2147483647, %v14095_v55  ;;  %v3176_v29 = vsel %vm3093_vm12, %v3175_v61, %v3174_v47 }
 0x2ee   : > { %17061 = vst [vmem:[#allocation83_spill] sm:$0xff] %v14128_v59  ;;  %v3061_v57 = vshll.u32 %v14066_v20, %v3059_v34  ;;  %v14134_v3 = vshrl.u32 %v3358_v10, 30  ;;  %v3202_v18 = vor.u32 8388608, %v3201_v63  ;;  %v3066_v12 = vshll.u32 %v3065_v17, 23 }
 0x2ef   : > { %v14136_v11 = vshrl.u32 %v3206_v24, 5  ;;  %v3209_v8 = vsub.s32 32, %v3208_v60  ;;  %v10332_v46 = vadd.s32 4294967169, %v3507_v32  ;;  %v3211_v21 = vshll.u32 %v16905_v38, %v3208_v60 }
 0x2f0   : > { %v3063_v54 = vor.u32 %v3062_v42, %v3061_v57  ;;  %v3360_v53 = vshll.u32 %v14134_v3, 30  ;;  %v3214_v37 = vshll.u32 %v16912_v50, %v3208_v60  ;;  %v3217_v20 = vshll.u32 %v16913_v2, %v3208_v60  ;;  %v14145_v34 = vpop.eup %11662 }
 0x2f1   : > { %v3212_v15 = vshrl.u32 %v16912_v50, %v3209_v8  ;;  %v3215_v47 = vshrl.u32 %v16913_v2, %v3209_v8  ;;  %v3218_v63 = vshrl.u32 %v16914_v22, %v3209_v8  ;;  %17062 = vst [vmem:[#allocation84_spill] sm:$0xff] %v14145_v34  ;;  %v14150_v61 = vsel %vm14074_vm7, %v13777_v58, %v3176_v29 }
 0x2f2   : > { %v14152_v7 = vsub.s32 %v3357_v23, %v3360_v53  ;;  %v14154_v26 = vshll.u32 %v3202_v18, 8  ;;  %v14158_v24 = vand.u32 8388607, %v16844_v62  ;;  %v3067_v32 = vor.u32 4788187, %v3066_v12  ;;  %v7348_v62 = vld [vmem:[%s16699_s2 + $0x10] sm:$0xff] }
 0x2f3   : > { %v3213_v42 = vor.u32 %v3212_v15, %v3211_v21  ;;  %v3216_v17 = vor.u32 %v3215_v47, %v3214_v37  ;;  %v3219_v10 = vor.u32 %v3218_v63, %v3217_v20  ;;  %v3220_v39 = vshll.u32 %v16914_v22, %v3208_v60  ;;  %v7349_v20 = vld [vmem:[%s16699_s2 + $0x18] sm:$0xff] }
 0x2f4   : > { %v3363_v57 = vsub.s32 0, %v14152_v7  ;;  %v3221_v33 = vshrl.u32 %v16915_v13, %v3209_v8  ;;  %v14163_v29 = vadd.s32 1, %v10332_v46  ;;  %v3070_v23 = vcvt.s32.f32 %v3063_v54  ;;  %11042 = vmatprep.subr.mxu0 %v7349_v20 }
 0x2f5   : > { %v3223_v18 = vshll.u32 %v16915_v13, %v3208_v60  ;;  %v3224_v53 = vshrl.u32 %v16903_v44, %v3209_v8  ;;  %vm3226_vm12 = vcmp.lt.s32.totalorder %v14136_v11, 1  ;;  %v3210_v21 = vshrl.u32 %v16905_v38, %v3209_v8  ;;  %v7353_v60 = vld [vmem:[%s16700_s3 + $0x18] sm:$0xff]  ;;  %11043 = vmatpush3.msra.mxu0 %v7349_v20 }
 0x2f6   : > { %v10325_v12 = vmin.u32 %v3363_v57, %v14152_v7  ;;  %v3222_v37 = vor.u32 %v3221_v33, %v3220_v39  ;;  %vm3229_vm14 = vcmp.lt.s32.totalorder %v14136_v11, 4  ;;  %v3068_v15 = vand.u32 2147483647, %v3067_v32  ;;  %10986 = vmatprep.subr.mxu1 %v7353_v60  ;;  %11044 = vmatprep.subr.mxu0 %v7348_v62 }
 0x2f7   : > { %v3225_v47 = vor.u32 %v3224_v53, %v3223_v18  ;;  %v3231_v46 = vsel %vm3229_vm14, %v3219_v10, 2102212464  ;;  %v3234_v54 = vsel %vm3226_vm12, %v3213_v42, %v3216_v17  ;;  %v14181_v8 = vpop.eup %11664  ;;  %vm3228_vm4 = vcmp.lt.s32.totalorder %v14136_v11, 3  ;;  %10987 = vmatpush3.msra.mxu1 %v7353_v60  ;;  %11045 = vmatpush3.msra.mxu0 %v7348_v62 }
 0x2f8   : > { %17063 = vst [vmem:[#allocation85_spill] sm:$0xff] %v14181_v8  ;;  %v3365_v39 = vclz %v10325_v12  ;;  %v3235_v63 = vsel %vm3229_vm14, %v3222_v37, 920167782  ;;  %v3238_v32 = vsel %vm3226_vm12, %v3216_v17, %v3219_v10  ;;  %v14188_v57 = vpop.eup %11666  ;;  %vm3227_vm7 = vcmp.lt.s32.totalorder %v14136_v11, 2  ;;  %v7352_v12 = vld [vmem:[%s16700_s3 + $0x10] sm:$0xff]  ;;  %v7346_v11 = vld [vmem:[%s16699_s2] sm:$0xff] }
 0x2f9   : > { %v3230_v33 = vsel %vm3226_vm12, %v3210_v21, %v3213_v42  ;;  %v3236_v18 = vsel %vm3228_vm4, %v3219_v10, %v3235_v63  ;;  %v3239_v53 = vsel %vm3229_vm14, %v3225_v47, 1326507024  ;;  %v14203_v58 = vpop.eup %11668  ;;  %v3232_v42 = vsel %vm3228_vm4, %v3216_v17, %v3231_v46  ;;  %v14211_v47 = vpop.f32.mrf.mxu0  ;;  %10988 = vmatprep.subr.mxu1 %v7352_v12  ;;  %v7351_v17 = vld [vmem:[%s16700_s3 + $0x8] sm:$0xff] }
 0x2fa   : > { %v10326_v0 = vadd.s32 4294967294, %v3365_v39  ;;  %v3237_v10 = vsel %vm3227_vm7, %v3234_v54, %v3236_v18  ;;  %v3240_v21 = vsel %vm3228_vm4, %v3222_v37, %v3239_v53  ;;  %17064 = vst [vmem:[#allocation86_spill] sm:$0xff] %v14211_v47  ;;  %v14213_v60 = vmul.f32 %v3070_v23, %v3068_v15  ;;  %10989 = vmatpush3.msra.mxu1 %v7352_v12  ;;  %v7347_v37 = vld [vmem:[%s16699_s2 + $0x8] sm:$0xff] }
 0x2fb   : > { %v3241_v20 = vsel %vm3227_vm7, %v3238_v32, %v3240_v21  ;;  %v14218_v39 = vmul.u32.u64.low %v14154_v26, %v3237_v10  ;;  %v14219_v63 = vmul.u32.u64.high %v14154_v26, %v3237_v10, %v14218_v39  ;;  %11670 = vcosq.f32 %v14150_v61  ;;  %10990 = vmatprep.subr.mxu1 %v7351_v17  ;;  %11046 = vmatprep.subr.mxu0 %v7347_v37  ;;  %v7350_v32 = vld [vmem:[%s16700_s3] sm:$0xff] }
 0x2fc   : > { %vm10327_vm6 = vcmp.lt.s32.totalorder %v10326_v0, 0  ;;  %v14230_v23 = vmul.u32.u64.low %v14154_v26, %v3241_v20  ;;  %v14231_v15 = vmul.u32.u64.high %v14154_v26, %v3241_v20, %v14230_v23  ;;  %v3233_v54 = vsel %vm3227_vm7, %v3230_v33, %v3232_v42  ;;  %10991 = vmatpush3.msra.mxu1 %v7351_v17  ;;  %11047 = vmatpush3.msra.mxu0 %v7347_v37 }
 0x2fd   : > { %v3368_v46 = vsel %vm10327_vm6, 0, %v10326_v0  ;;  %vm3514_vm2 = vcmp.gt.s32.totalorder %v14163_v29, 0  ;;  %v3403_v62 = vand.u32 2139095040, %v14211_v47  ;;  %v3353_v18 = vadd.s32 %v14081_v56, %v14093_v51  ;;  %10992 = vmatprep.subr.mxu1 %v7350_v32  ;;  %11048 = vmatprep.subr.mxu0 %v7346_v11 }
 0x2fe   : > { %v3369_v53 = vsub.s32 32, %v3368_v46  ;;  %v3373_v12 = vsub.s32 4294967266, %v3368_v46  ;;  %v3515_v0 = vsel %vm3514_vm2, %v14163_v29, 0  ;;  %v3072_v33 = vxor.u32 2147483648, %v14213_v60  ;;  %10993 = vmatpush3.msra.mxu1 %v7350_v32  ;;  %11049 = vmatpush3.msra.mxu0 %v7346_v11 }
 0x2ff   : > { %v3252_v42 = vadd.s32 1, %v14219_v63  ;;  %v3511_v10 = vor.u32 8388608, %v14158_v24  ;;  %v3517_v21 = vand.u32 31, %v3515_v0  ;;  %v3249_v51 = vmul.u32 %v14154_v26, %v3233_v54 }
 0x300   : > { %v3371_v20 = vshrl.u32 %v3353_v18, %v3369_v53  ;;  %v3374_v56 = vadd.s32 127, %v3373_v12  ;;  %vm3251_vm13 = vc.u32 %v14231_v15, %v14218_v39  ;;  %v3370_v29 = vshll.u32 %v14152_v7, %v3368_v46 }
 0x301   : > { %v3253_v17 = vsel %vm3251_vm13, %v3252_v42, %v14219_v63  ;;  %v3518_v37 = vsub.s32 32, %v3517_v21  ;;  %v3404_v23 = vshrl.u32 %v3403_v62, 23  ;;  %v3516_v24 = vshrl.u32 %v3515_v0, 5 }
 0x302   : > { %v3375_v59 = vshll.u32 %v3374_v56, 23  ;;  %v3254_v34 = vadd.s32 %v3253_v17, %v3249_v51  ;;  %v3520_v32 = vshll.u32 %v16905_v38, %v3517_v21  ;;  %v3523_v53 = vshll.u32 %v16912_v50, %v3517_v21 }
 0x303   : > { %v3521_v18 = vshrl.u32 %v16912_v50, %v3518_v37  ;;  %v3524_v26 = vshrl.u32 %v16913_v2, %v3518_v37  ;;  %v3527_v54 = vshrl.u32 %v16914_v22, %v3518_v37  ;;  %v3372_v12 = vor.u32 %v3371_v20, %v3370_v29 }
 0x304   : > { %v3376_v11 = vor.u32 4788187, %v3375_v59  ;;  %v3255_v7 = vadd.s32 536870912, %v3254_v34  ;;  %v3526_v63 = vshll.u32 %v16913_v2, %v3517_v21  ;;  %v3529_v42 = vshll.u32 %v16914_v22, %v3517_v21 }
 0x305   : > { %v3522_v46 = vor.u32 %v3521_v18, %v3520_v32  ;;  %v3525_v62 = vor.u32 %v3524_v26, %v3523_v53  ;;  %v3530_v0 = vshrl.u32 %v16915_v13, %v3518_v37  ;;  %v3532_v17 = vshll.u32 %v16915_v13, %v3517_v21 }
 0x306   : > { %v3377_v56 = vand.u32 2147483647, %v3376_v11  ;;  %v14262_v51 = vshrl.u32 %v3255_v7, 30  ;;  %v3533_v8 = vshrl.u32 %v16903_v44, %v3518_v37  ;;  %11672 = vsinq.f32 %v14150_v61 }
 0x307   : > { %v3528_v20 = vor.u32 %v3527_v54, %v3526_v63  ;;  %v3531_v59 = vor.u32 %v3530_v0, %v3529_v42  ;;  %vm3299_vm12 = vcmp.lt.s32.totalorder %v13926_v48, 0  ;;  %v3379_v32 = vcvt.s32.f32 %v3372_v12 }
 0x308   : > { %v3257_v18 = vshll.u32 %v14262_v51, 30  ;;  %v3534_v53 = vor.u32 %v3533_v8, %v3532_v17  ;;  %v3551_v26 = vshll.u32 %v3511_v10, 8  ;;  %v14270_v11 = vpop.eup %11670  ;;  %v3073_v21 = vsel %vm2990_vm0, %v3072_v33, %v14213_v60 }
 0x309   : > { %17065 = vst [vmem:[#allocation87_spill] sm:$0xff] %v14270_v11  ;;  %vm3535_vm14 = vcmp.lt.s32.totalorder %v3516_v24, 1  ;;  %vm3537_vm4 = vcmp.lt.s32.totalorder %v3516_v24, 3  ;;  %v10328_v61 = vadd.s32 4294967169, %v3404_v23  ;;  %v3380_v54 = vmul.f32 %v3379_v32, %v3377_v56 }
 0x30a   : > { %v14275_v7 = vsub.s32 %v3254_v34, %v3257_v18  ;;  %vm3538_vm7 = vcmp.lt.s32.totalorder %v3516_v24, 4  ;;  %v3543_v63 = vsel %vm3535_vm14, %v3522_v46, %v3525_v62  ;;  %v3547_v8 = vsel %vm3535_vm14, %v3525_v62, %v3528_v20 }
 0x30b   : > { %v3540_v12 = vsel %vm3538_vm7, %v3528_v20, 2102212464  ;;  %v3544_v42 = vsel %vm3538_vm7, %v3531_v59, 920167782  ;;  %v3548_v10 = vsel %vm3538_vm7, %v3534_v53, 1326507024  ;;  %v3519_v17 = vshrl.u32 %v16905_v38, %v3518_v37 }
 0x30c   : > { %v3260_v0 = vsub.s32 0, %v14275_v7  ;;  %vm3536_vm6 = vcmp.lt.s32.totalorder %v3516_v24, 2  ;;  %v3545_v60 = vsel %vm3537_vm4, %v3528_v20, %v3544_v42  ;;  %v3076_v34 = vsel %vm14088_vm3, %v13800_v31, %v3073_v21 }
 0x30d   : > { %v3383_v33 = vsub.s32 4, %v14134_v3  ;;  %v3546_v23 = vsel %vm3536_vm6, %v3543_v63, %v3545_v60  ;;  %v3549_v56 = vsel %vm3537_vm4, %v3531_v59, %v3548_v10  ;;  %v3539_v18 = vsel %vm3535_vm14, %v3519_v17, %v3522_v46  ;;  %v14309_v10 = vpop.f32.mrf.mxu0 }
 0x30e   : > { %v10321_v32 = vmin.u32 %v3260_v0, %v14275_v7  ;;  %v3541_v53 = vsel %vm3537_vm4, %v3525_v62, %v3540_v12  ;;  %v3550_v37 = vsel %vm3536_vm6, %v3547_v8, %v3549_v56  ;;  %v3381_v29 = vxor.u32 2147483648, %v3380_v54  ;;  %17067 = vst [vmem:[#allocation88_spill] sm:$0xff] %v14309_v10 }
 0x30f   : > { %v14292_v20 = vmul.u32.u64.low %v3551_v26, %v3550_v37  ;;  %v14293_v42 = vmul.u32.u64.high %v3551_v26, %v3550_v37, %v14292_v20  ;;  %v3410_v43 = vadd.s32 1, %v10328_v61  ;;  %v17066_v59 = vand.u32 2147483647, %v14211_v47 }
 0x310   : > { %v3262_v21 = vclz %v10321_v32  ;;  %v14295_v11 = vmul.u32.u64.low %v3551_v26, %v3546_v23  ;;  %v14296_v31 = vmul.u32.u64.high %v3551_v26, %v3546_v23, %v14295_v11  ;;  %11674 = vcosq.f32 %v3076_v34 }
 0x311   : > { %v3407_v63 = vand.u32 8388607, %v17066_v59  ;;  %v14304_v46 = vsel %vm3299_vm12, %v3383_v33, %v14134_v3  ;;  %v3542_v62 = vsel %vm3536_vm6, %v3539_v18, %v3541_v53  ;;  %vm3411_vm0 = vcmp.gt.s32.totalorder %v3410_v43, 0 }
 0x312   : > { %11676 = vsinq.f32 %v3076_v34  ;;  %v3250_v61 = vadd.s32 %v14218_v39, %v14231_v15  ;;  %v10322_v12 = vadd.s32 4294967294, %v3262_v21  ;;  %v3412_v8 = vsel %vm3411_vm0, %v3410_v43, 0 }
 0x313   : > { %v14313_v0 = vsel %vm3299_vm12, %v3381_v29, %v3380_v54  ;;  %vm3560_vm3 = vc.u32 %v14293_v42, %v14295_v11  ;;  %v3414_v3 = vand.u32 31, %v3412_v8  ;;  %v14318_v24 = vpop.eup %11672  ;;  %v3558_v60 = vmul.u32 %v3551_v26, %v3542_v62 }
 0x314   : > { %17068 = vst [vmem:[#allocation89_spill] sm:$0xff] %v14318_v24  ;;  %vm10323_vm2 = vcmp.lt.s32.totalorder %v10322_v12, 0  ;;  %v3561_v39 = vadd.s32 1, %v14296_v31  ;;  %v3408_v15 = vor.u32 8388608, %v3407_v63  ;;  %v14321_v33 = vshrl.u32 %v3412_v8, 5 }
 0x315   : > { %v3265_v34 = vsel %vm10323_vm2, 0, %v10322_v12  ;;  %v3415_v23 = vsub.s32 32, %v3414_v3  ;;  %v3712_v29 = vand.u32 2139095040, %v14309_v10  ;;  %v3417_v18 = vshll.u32 %v16905_v38, %v3414_v3 }
 0x316   : > { %v3266_v54 = vsub.s32 32, %v3265_v34  ;;  %v3270_v56 = vsub.s32 4294967266, %v3265_v34  ;;  %v3562_v32 = vsel %vm3560_vm3, %v3561_v39, %v14296_v31  ;;  %v3420_v26 = vshll.u32 %v16912_v50, %v3414_v3 }
 0x317   : > { %v3563_v53 = vadd.s32 %v3562_v32, %v3558_v60  ;;  %v3418_v37 = vshrl.u32 %v16912_v50, %v3415_v23  ;;  %v3421_v20 = vshrl.u32 %v16913_v2, %v3415_v23  ;;  %v3267_v43 = vshll.u32 %v14275_v7, %v3265_v34 }
 0x318   : > { %v3268_v21 = vshrl.u32 %v3250_v61, %v3266_v54  ;;  %v3271_v59 = vadd.s32 127, %v3270_v56  ;;  %v3424_v63 = vshrl.u32 %v16914_v22, %v3415_v23  ;;  %vm3196_vm13 = vcmp.lt.s32.totalorder %v14037_v6, 0 }
 0x319   : > { %v3564_v62 = vadd.s32 536870912, %v3563_v53  ;;  %v3419_v12 = vor.u32 %v3418_v37, %v3417_v18  ;;  %v3422_v31 = vor.u32 %v3421_v20, %v3420_v26  ;;  %v3423_v8 = vshll.u32 %v16913_v2, %v3414_v3 }
 0x31a   : > { %v17069_v60 = vand.u32 2147483647, %v13926_v48  ;;  %v3269_v32 = vor.u32 %v3268_v21, %v3267_v43  ;;  %v3272_v17 = vshll.u32 %v3271_v59, 23  ;;  %v3426_v7 = vshll.u32 %v16914_v22, %v3414_v3 }
 0x31b   : > { %v3427_v61 = vshrl.u32 %v16915_v13, %v3415_v23  ;;  %v3565_v34 = vshrl.u32 %v3564_v62, 30  ;;  %v3425_v54 = vor.u32 %v3424_v63, %v3423_v8  ;;  %v3430_v56 = vshrl.u32 %v16903_v44, %v3415_v23 }
 0x31c   : > { %vm14335_vm12 = vcmp.le.f32.partialorder %v17069_v60, 0.7853982  ;;  %v14342_v18 = vshll.u32 %v3408_v15, 8  ;;  %v3273_v37 = vor.u32 4788187, %v3272_v17  ;;  %v3429_v20 = vshll.u32 %v16915_v13, %v3414_v3 }
 0x31d   : > { %v3428_v26 = vor.u32 %v3427_v61, %v3426_v7  ;;  %v3713_v60 = vshrl.u32 %v3712_v29, 23  ;;  %v3276_v24 = vcvt.s32.f32 %v3269_v32  ;;  %v3566_v19 = vshll.u32 %v3565_v34, 30  ;;  %v14347_v21 = vpop.eup %11674 }
 0x31e   : > { %v3416_v43 = vshrl.u32 %v16905_v38, %v3415_v23  ;;  %vm3432_vm14 = vcmp.lt.s32.totalorder %v14321_v33, 1  ;;  %17072 = vst [vmem:[#allocation90_spill] sm:$0xff] %v14347_v21  ;;  %v17073_v59 = vand.u32 2147483647, %v14037_v6  ;;  %v3274_v15 = vand.u32 2147483647, %v3273_v37 }
 0x31f   : > { %v3431_v17 = vor.u32 %v3430_v56, %v3429_v20  ;;  %vm3435_vm7 = vcmp.lt.s32.totalorder %v14321_v33, 4  ;;  %v3440_v3 = vsel %vm3432_vm14, %v3419_v12, %v3422_v31  ;;  %v14358_v29 = vpop.eup %11676  ;;  %vm3505_vm6 = vcmp.lt.s32.totalorder %v14095_v55, 0 }
 0x320   : > { %vm14351_vm4 = vcmp.le.f32.partialorder %v17073_v59, 0.7853982  ;;  %17076 = vst [vmem:[#allocation91_spill] sm:$0xff] %v14358_v29  ;;  %v14361_v23 = vsub.s32 %v3563_v53, %v3566_v19  ;;  %vm3434_vm0 = vcmp.lt.s32.totalorder %v14321_v33, 3  ;;  %v3437_v62 = vsel %vm3435_vm7, %v3425_v54, 2102212464 }
 0x321   : > { %v3441_v8 = vsel %vm3435_vm7, %v3428_v26, 920167782  ;;  %v3277_v32 = vmul.f32 %v3276_v24, %v3274_v15  ;;  %vm3433_vm3 = vcmp.lt.s32.totalorder %v14321_v33, 2  ;;  %v3436_v7 = vsel %vm3432_vm14, %v3416_v43, %v3419_v12 }
 0x322   : > { %v3442_v61 = vsel %vm3434_vm0, %v3425_v54, %v3441_v8  ;;  %v3569_v19 = vsub.s32 0, %v14361_v23  ;;  %v3438_v53 = vsel %vm3434_vm0, %v3422_v31, %v3437_v62  ;;  %v3444_v37 = vsel %vm3432_vm14, %v3422_v31, %v3425_v54 }
 0x323   : > { %v3443_v56 = vsel %vm3433_vm3, %v3440_v3, %v3442_v61  ;;  %v17077_v24 = vsub.s32 4, %v14262_v51  ;;  %v17078_v20 = vand.u32 2147483647, %v14095_v55  ;;  %v3445_v59 = vsel %vm3435_vm7, %v3431_v17, 1326507024 }
 0x324   : > { %v14394_v15 = vmul.u32.u64.low %v14342_v18, %v3443_v56  ;;  %v14395_v3 = vmul.u32.u64.high %v14342_v18, %v3443_v56, %v14394_v15  ;;  %v3385_v31 = vsel %vm14335_vm12, %v13926_v48, %v14313_v0  ;;  %v3446_v54 = vsel %vm3434_vm0, %v3428_v26, %v3445_v59 }
 0x325   : > { %v3281_v12 = vsel %vm3196_vm13, %v17077_v24, %v14262_v51  ;;  %vm14387_vm2 = vcmp.le.f32.partialorder %v17078_v20, 0.7853982  ;;  %v10333_v51 = vmin.u32 %v3569_v19, %v14361_v23  ;;  %v10340_v62 = vadd.s32 4294967169, %v3713_v60  ;;  %v14410_v24 = vpop.f32.mrf.mxu0 }
 0x326   : > { %v3589_v8 = vsub.s32 4, %v3565_v34  ;;  %v3439_v17 = vsel %vm3433_vm3, %v3436_v7, %v3438_v53  ;;  %v3447_v61 = vsel %vm3433_vm3, %v3444_v37, %v3446_v54  ;;  %v16857_v56 = vand.u32 2147483647, %v14309_v10  ;;  %v14425_v7 = vld [vmem:[%s16701_s4] sm:$0xf] }
 0x327   : > { %v3278_v20 = vxor.u32 2147483648, %v3277_v32  ;;  %v3571_v21 = vclz %v10333_v51  ;;  %v14413_v0 = vmul.u32.u64.low %v14342_v18, %v3447_v61  ;;  %v14414_v19 = vmul.u32.u64.high %v14342_v18, %v3447_v61, %v14413_v0 }
 0x328   : > { %v14419_v26 = vsel %vm14335_vm12, 0, %v14304_v46  ;;  %11678 = vcosq.f32 %v3385_v31  ;;  %v3458_v60 = vadd.s32 1, %v14395_v3  ;;  %v3719_v33 = vadd.s32 1, %v10340_v62 }
 0x329   : > { %17081 = vst [vmem:[#allocation92_spill] sm:$0xff] %v14419_v26  ;;  %11680 = vsinq.f32 %v3385_v31  ;;  %v14429_v53 = vsel %vm14351_vm4, 0, %v3281_v12  ;;  %v10334_v37 = vadd.s32 4294967294, %v3571_v21  ;;  %vm17083_vm12 = vcmask 1043456  }
 0x32a   : > { %17082 = vst [vmem:[#allocation93_spill] sm:$0xff] %v14429_v53  ;;  %11098 = vmatprep.subr.msk.mxu1 %vm17083_vm12, %v14425_v7  ;;  %v3590_v46 = vsel %vm3505_vm6, %v3589_v8, %v3565_v34  ;;  %v3455_v39 = vmul.u32 %v14342_v18, %v3439_v17  ;;  %v14439_v51 = vand.u32 8388607, %v16857_v56  ;;  %vm3720_vm14 = vcmp.gt.s32.totalorder %v3719_v33, 0 }
 0x32b   : > { %v3279_v12 = vsel %vm3196_vm13, %v3278_v20, %v3277_v32  ;;  %vm10335_vm7 = vcmp.lt.s32.totalorder %v10334_v37, 0  ;;  %vm3457_vm0 = vc.u32 %v14414_v19, %v14394_v15  ;;  %v3721_v21 = vsel %vm3720_vm14, %v3719_v33, 0 }
 0x32c   : > { %v3559_v31 = vadd.s32 %v14295_v11, %v14293_v42  ;;  %v3574_v54 = vsel %vm10335_vm7, 0, %v10334_v37  ;;  %v3459_v34 = vsel %vm3457_vm0, %v3458_v60, %v14395_v3  ;;  %v3723_v18 = vand.u32 31, %v3721_v21 }
 0x32d   : > { %v3575_v62 = vsub.s32 32, %v3574_v54  ;;  %v3579_v8 = vsub.s32 4294967266, %v3574_v54  ;;  %v14450_v17 = vsel %vm14387_vm2, 0, %v3590_v46  ;;  %v3460_v61 = vadd.s32 %v3459_v34, %v3455_v39 }
 0x32e   : > { %17084 = vst [vmem:[#allocation94_spill] sm:$0xff] %v14450_v17  ;;  %v14455_v32 = vsel %vm14351_vm4, %v14037_v6, %v3279_v12  ;;  %v3576_v20 = vshll.u32 %v14361_v23, %v3574_v54  ;;  %v3717_v11 = vor.u32 8388608, %v14439_v51  ;;  %v3724_v42 = vsub.s32 32, %v3723_v18 }
 0x32f   : > { %v3577_v0 = vshrl.u32 %v3559_v31, %v3575_v62  ;;  %v3580_v3 = vadd.s32 127, %v3579_v8  ;;  %v3461_v60 = vadd.s32 536870912, %v3460_v61  ;;  %v3726_v33 = vshll.u32 %v16905_v38, %v3723_v18 }
 0x330   : > { %v3727_v37 = vshrl.u32 %v16912_v50, %v3724_v42  ;;  %v3729_v46 = vshll.u32 %v16912_v50, %v3723_v18  ;;  %v3730_v39 = vshrl.u32 %v16913_v2, %v3724_v42  ;;  %v3733_v63 = vshrl.u32 %v16914_v22, %v3724_v42 }
 0x331   : > { %v3578_v12 = vor.u32 %v3577_v0, %v3576_v20  ;;  %v3581_v34 = vshll.u32 %v3580_v3, 23  ;;  %v3462_v56 = vshrl.u32 %v3461_v60, 30  ;;  %v3736_v23 = vshrl.u32 %v16915_v13, %v3724_v42 }
 0x332   : > { %v3722_v51 = vshrl.u32 %v3721_v21, 5  ;;  %v3732_v31 = vshll.u32 %v16913_v2, %v3723_v18  ;;  %v3735_v54 = vshll.u32 %v16914_v22, %v3723_v18  ;;  %v3609_v62 = vand.u32 2139095040, %v14410_v24 }
 0x333   : > { %v3582_v8 = vor.u32 4788187, %v3581_v34  ;;  %v3463_v59 = vshll.u32 %v3462_v56, 30  ;;  %v3728_v17 = vor.u32 %v3727_v37, %v3726_v33  ;;  %v3731_v26 = vor.u32 %v3730_v39, %v3729_v46 }
 0x334   : > { %v3734_v48 = vor.u32 %v3733_v63, %v3732_v31  ;;  %v3737_v6 = vor.u32 %v3736_v23, %v3735_v54  ;;  %v3738_v53 = vshll.u32 %v16915_v13, %v3723_v18  ;;  %v3739_v20 = vshrl.u32 %v16903_v44, %v3724_v42 }
 0x335   : > { %v14470_v0 = vpop.eup %11678  ;;  %v3583_v3 = vand.u32 2147483647, %v3582_v8  ;;  %v3585_v21 = vcvt.s32.f32 %v3578_v12  ;;  %v14472_v60 = vsub.s32 %v3460_v61, %v3463_v59  ;;  %v17086_v29 = vand.u32 2147483647, %v14410_v24 }
 0x336   : > { %17085 = vst [vmem:[#allocation95_spill] sm:$0xff] %v14470_v0  ;;  %v14478_v34 = vpop.eup %11680  ;;  %vm3402_vm13 = vcmp.lt.s32.totalorder %v14211_v47, 0  ;;  %v3725_v33 = vshrl.u32 %v16905_v38, %v3724_v42  ;;  %v3740_v37 = vor.u32 %v3739_v20, %v3738_v53  ;;  %vm3741_vm4 = vcmp.lt.s32.totalorder %v3722_v51, 1 }
 0x337   : > { %v14476_v16 = vand.u32 8388607, %v17086_v29  ;;  %17087 = vst [vmem:[#allocation96_spill] sm:$0xff] %v14478_v34  ;;  %vm3742_vm3 = vcmp.lt.s32.totalorder %v3722_v51, 2  ;;  %v3586_v18 = vmul.f32 %v3585_v21, %v3583_v3  ;;  %v3466_v46 = vsub.s32 0, %v14472_v60  ;;  %v14497_v34 = vpop.f32.mrf.mxu0 }
 0x338   : > { %vm3744_vm12 = vcmp.lt.s32.totalorder %v3722_v51, 4  ;;  %v3749_v59 = vsel %vm3741_vm4, %v3728_v17, %v3731_v26  ;;  %vm3743_vm14 = vcmp.lt.s32.totalorder %v3722_v51, 3  ;;  %v3753_v29 = vsel %vm3741_vm4, %v3731_v26, %v3734_v48 }
 0x339   : > { %v3750_v61 = vsel %vm3744_vm12, %v3737_v6, 920167782  ;;  %v3754_v39 = vsel %vm3744_vm12, %v3740_v37, 1326507024  ;;  %v3587_v63 = vxor.u32 2147483648, %v3586_v18  ;;  %v10329_v12 = vmin.u32 %v3466_v46, %v14472_v60 }
 0x33a   : > { %v3746_v23 = vsel %vm3744_vm12, %v3734_v48, 2102212464  ;;  %v3751_v42 = vsel %vm3743_vm14, %v3734_v48, %v3750_v61  ;;  %v3755_v31 = vsel %vm3743_vm14, %v3737_v6, %v3754_v39  ;;  %v3757_v54 = vshll.u32 %v3717_v11, 8 }
 0x33b   : > { %v3752_v53 = vsel %vm3742_vm3, %v3749_v59, %v3751_v42  ;;  %v3610_v8 = vshrl.u32 %v3609_v62, 23  ;;  %v17088_v20 = vand.u32 2147483647, %v14211_v47  ;;  %v3468_v21 = vclz %v10329_v12 }
 0x33c   : > { %v3486_v37 = vsub.s32 4, %v3462_v56  ;;  %v3745_v0 = vsel %vm3741_vm4, %v3725_v33, %v3728_v17  ;;  %v3756_v46 = vsel %vm3742_vm3, %v3753_v29, %v3755_v31  ;;  %v3747_v48 = vsel %vm3743_vm14, %v3731_v26, %v3746_v23 }
 0x33d   : > { %vm14491_vm7 = vcmp.le.f32.partialorder %v17088_v20, 0.7853982  ;;  %v14500_v59 = vmul.u32.u64.low %v3757_v54, %v3756_v46  ;;  %v14501_v6 = vmul.u32.u64.high %v3757_v54, %v3756_v46, %v14500_v59  ;;  %v10336_v11 = vadd.s32 4294967169, %v3610_v8 }
 0x33e   : > { %v3588_v62 = vsel %vm3505_vm6, %v3587_v63, %v3586_v18  ;;  %v10330_v61 = vadd.s32 4294967294, %v3468_v21  ;;  %v14505_v39 = vmul.u32.u64.low %v3757_v54, %v3752_v53  ;;  %v14506_v42 = vmul.u32.u64.high %v3757_v54, %v3752_v53, %v14505_v39 }
 0x33f   : > { %11682 = vcosq.f32 %v14455_v32  ;;  %v3456_v17 = vadd.s32 %v14394_v15, %v14414_v19  ;;  %v3616_v33 = vadd.s32 1, %v10336_v11  ;;  %v16869_v26 = vand.u32 2147483647, %v14497_v34 }
 0x340   : > { %vm10331_vm0 = vcmp.lt.s32.totalorder %v10330_v61, 0  ;;  %v3487_v29 = vsel %vm3402_vm13, %v3486_v37, %v3462_v56  ;;  %v3748_v12 = vsel %vm3742_vm3, %v3745_v0, %v3747_v48  ;;  %v3614_v18 = vor.u32 8388608, %v14476_v16 }
 0x341   : > { %v14520_v63 = vsel %vm14387_vm2, %v14095_v55, %v3588_v62  ;;  %v3471_v23 = vsel %vm10331_vm0, 0, %v10330_v61  ;;  %vm3766_vm6 = vc.u32 %v14501_v6, %v14505_v39  ;;  %vm3617_vm4 = vcmp.gt.s32.totalorder %v3616_v33, 0 }
 0x342   : > { %v3472_v15 = vsub.s32 32, %v3471_v23  ;;  %v3476_v19 = vsub.s32 4294967266, %v3471_v23  ;;  %v3767_v53 = vadd.s32 1, %v14506_v42  ;;  %v3918_v56 = vand.u32 2139095040, %v14497_v34 }
 0x343   : > { %11684 = vsinq.f32 %v14455_v32  ;;  %v3764_v51 = vmul.u32 %v3757_v54, %v3748_v12  ;;  %v3618_v16 = vsel %vm3617_vm4, %v3616_v33, 0  ;;  %v14529_v43 = vand.u32 8388607, %v16869_v26 }
 0x344   : > { %v3473_v0 = vshll.u32 %v14472_v60, %v3471_v23  ;;  %v3474_v31 = vshrl.u32 %v3456_v17, %v3472_v15  ;;  %v3477_v8 = vadd.s32 127, %v3476_v19  ;;  %v3768_v20 = vsel %vm3766_vm6, %v3767_v53, %v14506_v42 }
 0x345   : > { %11686 = vcosq.f32 %v14520_v63  ;;  %v14536_v21 = vsel %vm14491_vm7, 0, %v3487_v29  ;;  %v3769_v37 = vadd.s32 %v3768_v20, %v3764_v51  ;;  %v3620_v32 = vand.u32 31, %v3618_v16 }
 0x346   : > { %17091 = vst [vmem:[#allocation97_spill] sm:$0xff] %v14536_v21  ;;  %v3475_v54 = vor.u32 %v3474_v31, %v3473_v0  ;;  %v3478_v46 = vshll.u32 %v3477_v8, 23  ;;  %v14538_v48 = vshll.u32 %v3614_v18, 8  ;;  %v3919_v59 = vshrl.u32 %v3918_v56, 23 }
 0x347   : > { %v3770_v11 = vadd.s32 536870912, %v3769_v37  ;;  %v14540_v62 = vshrl.u32 %v3618_v16, 5  ;;  %v3621_v60 = vsub.s32 32, %v3620_v32  ;;  %v3623_v33 = vshll.u32 %v16905_v38, %v3620_v32 }
 0x348   : > { %v3479_v42 = vor.u32 4788187, %v3478_v46  ;;  %v3482_v17 = vcvt.s32.f32 %v3475_v54  ;;  %v3626_v29 = vshll.u32 %v16912_v50, %v3620_v32  ;;  %v3629_v18 = vshll.u32 %v16913_v2, %v3620_v32 }
 0x349   : > { %v3771_v12 = vshrl.u32 %v3770_v11, 30  ;;  %v3624_v23 = vshrl.u32 %v16912_v50, %v3621_v60  ;;  %v3627_v15 = vshrl.u32 %v16913_v2, %v3621_v60  ;;  %vm3711_vm2 = vcmp.lt.s32.totalorder %v14309_v10, 0 }
 0x34a   : > { %v3480_v19 = vand.u32 2147483647, %v3479_v42  ;;  %v3630_v53 = vshrl.u32 %v16914_v22, %v3621_v60  ;;  %v3632_v56 = vshll.u32 %v16914_v22, %v3620_v32  ;;  %v3633_v51 = vshrl.u32 %v16915_v13, %v3621_v60 }
 0x34b   : > { %v3772_v16 = vshll.u32 %v3771_v12, 30  ;;  %v3625_v0 = vor.u32 %v3624_v23, %v3623_v33  ;;  %v3628_v31 = vor.u32 %v3627_v15, %v3626_v29  ;;  %v3635_v8 = vshll.u32 %v16915_v13, %v3620_v32 }
 0x34c   : > { %v14553_v20 = vpop.eup %11682  ;;  %v3483_v54 = vmul.f32 %v3482_v17, %v3480_v19  ;;  %v3631_v46 = vor.u32 %v3630_v53, %v3629_v18  ;;  %v3634_v11 = vor.u32 %v3633_v51, %v3632_v56  ;;  %v3636_v42 = vshrl.u32 %v16903_v44, %v3621_v60 }
 0x34d   : > { %17092 = vst [vmem:[#allocation98_spill] sm:$0xff] %v14553_v20  ;;  %v17093_v26 = vand.u32 2147483647, %v14309_v10  ;;  %v14562_v55 = vsub.s32 %v3769_v37, %v3772_v16  ;;  %v3795_v21 = vsub.s32 4, %v3771_v12  ;;  %v3622_v33 = vshrl.u32 %v16905_v38, %v3621_v60 }
 0x34e   : > { %vm3638_vm12 = vcmp.lt.s32.totalorder %v14540_v62, 1  ;;  %v3484_v32 = vxor.u32 2147483648, %v3483_v54  ;;  %v3637_v29 = vor.u32 %v3636_v42, %v3635_v8  ;;  %vm3640_vm14 = vcmp.lt.s32.totalorder %v14540_v62, 3  ;;  %v14589_v8 = vpop.f32.mrf.mxu0 }
 0x34f   : > { %vm14558_vm3 = vcmp.le.f32.partialorder %v17093_v26, 0.7853982  ;;  %vm3641_vm0 = vcmp.lt.s32.totalorder %v14540_v62, 4  ;;  %v3775_v17 = vsub.s32 0, %v14562_v55  ;;  %v3646_v37 = vsel %vm3638_vm12, %v3625_v0, %v3628_v31 }
 0x350   : > { %v3643_v26 = vsel %vm3641_vm0, %v3631_v46, 2102212464  ;;  %v3647_v23 = vsel %vm3641_vm0, %v3634_v11, 920167782  ;;  %v14575_v60 = vpop.eup %11684  ;;  %vm3639_vm6 = vcmp.lt.s32.totalorder %v14540_v62, 2  ;;  %v3642_v15 = vsel %vm3638_vm12, %v3622_v33, %v3625_v0 }
 0x351   : > { %v3648_v18 = vsel %vm3640_vm14, %v3631_v46, %v3647_v23  ;;  %v10348_v19 = vadd.s32 4294967169, %v3919_v59  ;;  %v3485_v53 = vsel %vm3402_vm13, %v3484_v32, %v3483_v54  ;;  %v10341_v56 = vmin.u32 %v3775_v17, %v14562_v55 }
 0x352   : > { %v3649_v51 = vsel %vm3639_vm6, %v3646_v37, %v3648_v18  ;;  %v3650_v16 = vsel %vm3638_vm12, %v3628_v31, %v3631_v46  ;;  %v14591_v42 = vpop.eup %11686  ;;  %v3644_v0 = vsel %vm3640_vm14, %v3628_v31, %v3643_v26  ;;  %v3651_v59 = vsel %vm3641_vm0, %v3637_v29, 1326507024 }
 0x353   : > { %17096 = vst [vmem:[#allocation99_spill] sm:$0xff] %v14591_v42  ;;  %v14598_v54 = vmul.u32.u64.low %v14538_v48, %v3649_v51  ;;  %v14599_v33 = vmul.u32.u64.high %v14538_v48, %v3649_v51, %v14598_v54  ;;  %11688 = vsinq.f32 %v14520_v63  ;;  %v3777_v32 = vclz %v10341_v56 }
 0x354   : > { %v3796_v46 = vsel %vm3711_vm2, %v3795_v21, %v3771_v12  ;;  %v3652_v17 = vsel %vm3640_vm14, %v3634_v11, %v3651_v59  ;;  %v3488_v31 = vsel %vm14491_vm7, %v14211_v47, %v3485_v53  ;;  %v3925_v26 = vadd.s32 1, %v10348_v19 }
 0x355   : > { %v3653_v29 = vsel %vm3639_vm6, %v3650_v16, %v3652_v17  ;;  %v16873_v37 = vand.u32 2147483647, %v14589_v8  ;;  %v10342_v23 = vadd.s32 4294967294, %v3777_v32  ;;  %v3645_v63 = vsel %vm3639_vm6, %v3642_v15, %v3644_v0 }
 0x356   : > { %v14616_v18 = vmul.u32.u64.low %v14538_v48, %v3653_v29  ;;  %v14617_v21 = vmul.u32.u64.high %v14538_v48, %v3653_v29, %v14616_v18  ;;  %v3765_v12 = vadd.s32 %v14505_v39, %v14501_v6  ;;  %v14623_v3 = vsel %vm14558_vm3, 0, %v3796_v46 }
 0x357   : > { %17097 = vst [vmem:[#allocation100_spill] sm:$0xff] %v14623_v3  ;;  %vm3926_vm13 = vcmp.gt.s32.totalorder %v3925_v26, 0  ;;  %v17098_v11 = vor.u32 8388608, %v14529_v43  ;;  %11690 = vcosq.f32 %v3488_v31  ;;  %vm10343_vm7 = vcmp.lt.s32.totalorder %v10342_v23, 0 }
 0x358   : > { %v3664_v62 = vadd.s32 1, %v14599_v33  ;;  %v3927_v15 = vsel %vm3926_vm13, %v3925_v26, 0  ;;  %11692 = vsinq.f32 %v3488_v31  ;;  %v3780_v53 = vsel %vm10343_vm7, 0, %v10342_v23 }
 0x359   : > { %v14627_v19 = vshll.u32 %v17098_v11, 8  ;;  %v3661_v56 = vmul.u32 %v14538_v48, %v3645_v63  ;;  %v3929_v51 = vand.u32 31, %v3927_v15  ;;  %v3781_v6 = vsub.s32 32, %v3780_v53 }
 0x35a   : > { %v3785_v39 = vsub.s32 4294967266, %v3780_v53  ;;  %v3815_v16 = vand.u32 2139095040, %v14589_v8  ;;  %v14634_v0 = vand.u32 8388607, %v16873_v37  ;;  %v3782_v43 = vshll.u32 %v14562_v55, %v3780_v53 }
 0x35b   : > { %vm3663_vm4 = vc.u32 %v14617_v21, %v14598_v54  ;;  %v14639_v59 = vshrl.u32 %v3927_v15, 5  ;;  %v3930_v32 = vsub.s32 32, %v3929_v51  ;;  %v3783_v46 = vshrl.u32 %v3765_v12, %v3781_v6 }
 0x35c   : > { %v3786_v17 = vadd.s32 127, %v3785_v39  ;;  %v3665_v48 = vsel %vm3663_vm4, %v3664_v62, %v14599_v33  ;;  %v3932_v31 = vshll.u32 %v16905_v38, %v3929_v51  ;;  %v3935_v23 = vshll.u32 %v16912_v50, %v3929_v51 }
 0x35d   : > { %v3666_v29 = vadd.s32 %v3665_v48, %v3661_v56  ;;  %v3933_v26 = vshrl.u32 %v16912_v50, %v3930_v32  ;;  %v3936_v63 = vshrl.u32 %v16913_v2, %v3930_v32  ;;  %v3784_v55 = vor.u32 %v3783_v46, %v3782_v43 }
 0x35e   : > { %v3787_v18 = vshll.u32 %v3786_v17, 23  ;;  %v3938_v11 = vshll.u32 %v16913_v2, %v3929_v51  ;;  %v3939_v15 = vshrl.u32 %v16914_v22, %v3930_v32  ;;  %v3941_v12 = vshll.u32 %v16914_v22, %v3929_v51 }
 0x35f   : > { %v3667_v53 = vadd.s32 536870912, %v3666_v29  ;;  %v3942_v33 = vshrl.u32 %v16915_v13, %v3930_v32  ;;  %v3816_v62 = vshrl.u32 %v3815_v16, 23  ;;  %v3934_v56 = vor.u32 %v3933_v26, %v3932_v31 }
 0x360   : > { %v3788_v6 = vor.u32 4788187, %v3787_v18  ;;  %v3937_v39 = vor.u32 %v3936_v63, %v3935_v23  ;;  %v3940_v48 = vor.u32 %v3939_v15, %v3938_v11  ;;  %v14650_v37 = vpop.eup %11688  ;;  %vm3608_vm12 = vcmp.lt.s32.totalorder %v14410_v24, 0 }
 0x361   : > { %17099 = vst [vmem:[#allocation101_spill] sm:$0xff] %v14650_v37  ;;  %v3668_v43 = vshrl.u32 %v3667_v53, 30  ;;  %v3943_v46 = vor.u32 %v3942_v33, %v3941_v12  ;;  %v3944_v17 = vshll.u32 %v16915_v13, %v3929_v51  ;;  %v3945_v3 = vshrl.u32 %v16903_v44, %v3930_v32 }
 0x362   : > { %v3789_v42 = vand.u32 2147483647, %v3788_v6  ;;  %v3791_v47 = vcvt.s32.f32 %v3784_v55  ;;  %v3931_v20 = vshrl.u32 %v16905_v38, %v3930_v32  ;;  %vm3947_vm14 = vcmp.lt.s32.totalorder %v14639_v59, 1 }
 0x363   : > { %v3669_v16 = vshll.u32 %v3668_v43, 30  ;;  %v3946_v31 = vor.u32 %v3945_v3, %v3944_v17  ;;  %vm3949_vm0 = vcmp.lt.s32.totalorder %v14639_v59, 3  ;;  %vm3950_vm6 = vcmp.lt.s32.totalorder %v14639_v59, 4 }
 0x364   : > { %v17100_v26 = vand.u32 2147483647, %v12034_v36  ;;  %v3792_v51 = vmul.f32 %v3791_v47, %v3789_v42  ;;  %v17103_v63 = vand.u32 2147483647, %v14410_v24  ;;  %v3952_v3 = vsel %vm3950_vm6, %v3940_v48, 2102212464  ;;  %v14677_v11 = vpop.eup %11690 }
 0x365   : > { %v3955_v32 = vsel %vm3947_vm14, %v3934_v56, %v3937_v39  ;;  %v3956_v18 = vsel %vm3950_vm6, %v3943_v46, 920167782  ;;  %v14679_v15 = vsub.s32 %v3666_v29, %v3669_v16  ;;  %vm3948_vm4 = vcmp.lt.s32.totalorder %v14639_v59, 2  ;;  %v14684_v53 = vpop.eup %11692 }
 0x366   : > { %vm14661_vm13 = vcmp.le.f32.partialorder %v17100_v26, 0.7853982  ;;  %vm14667_vm7 = vcmp.le.f32.partialorder %v17103_v63, 0.7853982  ;;  %v3957_v47 = vsel %vm3949_vm0, %v3940_v48, %v3956_v18  ;;  %v10344_v42 = vadd.s32 4294967169, %v3816_v62 }
 0x367   : > { %v3793_v12 = vxor.u32 2147483648, %v3792_v51  ;;  %v3692_v33 = vsub.s32 4, %v3668_v43  ;;  %v3951_v6 = vsel %vm3947_vm14, %v3931_v20, %v3934_v56  ;;  %v3958_v17 = vsel %vm3948_vm4, %v3955_v32, %v3957_v47 }
 0x368   : > { %v3672_v26 = vsub.s32 0, %v14679_v15  ;;  %v3953_v29 = vsel %vm3949_vm0, %v3937_v39, %v3952_v3  ;;  %v3959_v16 = vsel %vm3947_vm14, %v3937_v39, %v3940_v48  ;;  %v3960_v62 = vsel %vm3950_vm6, %v3946_v31, 1326507024 }
 0x369   : > { %v3794_v63 = vsel %vm3711_vm2, %v3793_v12, %v3792_v51  ;;  %v3961_v20 = vsel %vm3949_vm0, %v3943_v46, %v3960_v62  ;;  %v14702_v56 = vmul.u32.u64.low %v14627_v19, %v3958_v17  ;;  %v14703_v32 = vmul.u32.u64.high %v14627_v19, %v3958_v17, %v14702_v56 }
 0x36a   : > { %v10337_v18 = vmin.u32 %v3672_v26, %v14679_v15  ;;  %v3962_v3 = vsel %vm3948_vm4, %v3959_v16, %v3961_v20  ;;  %v3820_v39 = vor.u32 8388608, %v14634_v0  ;;  %v3822_v48 = vadd.s32 1, %v10344_v42 }
 0x36b   : > { %v14713_v31 = vsel %vm14558_vm3, %v14309_v10, %v3794_v63  ;;  %v3693_v46 = vsel %vm3608_vm12, %v3692_v33, %v3668_v43  ;;  %v14718_v51 = vmul.u32.u64.low %v14627_v19, %v3962_v3  ;;  %v14719_v47 = vmul.u32.u64.high %v14627_v19, %v3962_v3, %v14718_v51 }
 0x36c   : > { %v3674_v12 = vclz %v10337_v18  ;;  %v3954_v17 = vsel %vm3948_vm4, %v3951_v6, %v3953_v29  ;;  %vm3823_vm2 = vcmp.gt.s32.totalorder %v3822_v48, 0  ;;  %v808_v0 = vsub.s32 4, %v12164_v45 }
 0x36d   : > { %v3662_v42 = vadd.s32 %v14598_v54, %v14617_v21  ;;  %v3973_v61 = vadd.s32 1, %v14703_v32  ;;  %v3824_v26 = vsel %vm3823_vm2, %v3822_v48, 0  ;;  %v810_v43 = vsel %vm14661_vm13, %v12034_v36, %v12664_v14 }
 0x36e   : > { %11694 = vcosq.f32 %v14713_v31  ;;  %v10338_v33 = vadd.s32 4294967294, %v3674_v12  ;;  %v14734_v59 = vsel %vm14667_vm7, 0, %v3693_v46  ;;  %v3826_v6 = vand.u32 31, %v3824_v26 }
 0x36f   : > { %17106 = vst [vmem:[#allocation102_spill] sm:$0xff] %v14734_v59  ;;  %v3970_v29 = vmul.u32 %v14627_v19, %v3954_v17  ;;  %vm3972_vm3 = vc.u32 %v14719_v47, %v14702_v56  ;;  %v14739_v54 = vshll.u32 %v3820_v39, 8  ;;  %11696 = vsinq.f32 %v810_v43 }
 0x370   : > { %vm10339_vm14 = vcmp.lt.s32.totalorder %v10338_v33, 0  ;;  %v3974_v21 = vsel %vm3972_vm3, %v3973_v61, %v14703_v32  ;;  %v3827_v14 = vsub.s32 32, %v3826_v6  ;;  %11698 = vcosq.f32 %v810_v43 }
 0x371   : > { %v3677_v16 = vsel %vm10339_vm14, 0, %v10338_v33  ;;  %v3975_v62 = vadd.s32 %v3974_v21, %v3970_v29  ;;  %v3825_v63 = vshrl.u32 %v3824_v26, 5  ;;  %v3829_v20 = vshll.u32 %v16905_v38, %v3826_v6 }
 0x372   : > { %v3678_v18 = vsub.s32 32, %v3677_v16  ;;  %v3682_v3 = vsub.s32 4294967266, %v3677_v16  ;;  %v3832_v19 = vshll.u32 %v16912_v50, %v3826_v6  ;;  %v3835_v48 = vshll.u32 %v16913_v2, %v3826_v6 }
 0x373   : > { %v3976_v46 = vadd.s32 536870912, %v3975_v62  ;;  %v3830_v39 = vshrl.u32 %v16912_v50, %v3827_v14  ;;  %v3833_v51 = vshrl.u32 %v16913_v2, %v3827_v14  ;;  %v3836_v32 = vshrl.u32 %v16914_v22, %v3827_v14 }
 0x374   : > { %v3679_v12 = vshll.u32 %v14679_v15, %v3677_v16  ;;  %v3680_v17 = vshrl.u32 %v3662_v42, %v3678_v18  ;;  %v3683_v61 = vadd.s32 127, %v3682_v3  ;;  %v3839_v26 = vshrl.u32 %v16915_v13, %v3827_v14 }
 0x375   : > { %v14750_v43 = vshrl.u32 %v3976_v46, 30  ;;  %v3831_v33 = vor.u32 %v3830_v39, %v3829_v20  ;;  %v3838_v29 = vshll.u32 %v16914_v22, %v3826_v6  ;;  %vm17107_vm0 = vcmp.lt.s32.totalorder %v12034_v36, 0 }
 0x376   : > { %v809_v21 = vsel %vm17107_vm0, %v808_v0, %v12164_v45  ;;  %v3681_v50 = vor.u32 %v3680_v17, %v3679_v12  ;;  %v3684_v10 = vshll.u32 %v3683_v61, 23  ;;  %v3834_v2 = vor.u32 %v3833_v51, %v3832_v19 }
 0x377   : > { %v3837_v59 = vor.u32 %v3836_v32, %v3835_v48  ;;  %v3978_v37 = vshll.u32 %v14750_v43, 30  ;;  %v3840_v15 = vor.u32 %v3839_v26, %v3838_v29  ;;  %v3841_v42 = vshll.u32 %v16915_v13, %v3826_v6 }
 0x378   : > { %v3842_v16 = vshrl.u32 %v16903_v44, %v3827_v14  ;;  %v3685_v18 = vor.u32 4788187, %v3684_v10  ;;  %v3828_v20 = vshrl.u32 %v16905_v38, %v3827_v14  ;;  %vm3844_vm6 = vcmp.lt.s32.totalorder %v3825_v63, 1 }
 0x379   : > { %v811_v22 = vsel %vm14661_vm13, 0, %v809_v21  ;;  %v3688_v3 = vcvt.s32.f32 %v3681_v50  ;;  %v14762_v45 = vsub.s32 %v3975_v62, %v3978_v37  ;;  %vm3847_vm4 = vcmp.lt.s32.totalorder %v3825_v63, 4 }
 0x37a   : > { %v3843_v0 = vor.u32 %v3842_v16, %v3841_v42  ;;  %v3686_v19 = vand.u32 2147483647, %v3685_v18  ;;  %vm3846_vm2 = vcmp.lt.s32.totalorder %v3825_v63, 3  ;;  %v3848_v48 = vsel %vm3844_vm6, %v3828_v20, %v3831_v33 }
 0x37b   : > { %v3849_v13 = vsel %vm3847_vm4, %v3837_v59, 2102212464  ;;  %v14766_v6 = vpop.eup %11694  ;;  %v3981_v44 = vsub.s32 0, %v14762_v45  ;;  %v3852_v10 = vsel %vm3844_vm6, %v3831_v33, %v3834_v2  ;;  %v3853_v23 = vsel %vm3847_vm4, %v3840_v15, 920167782 }
 0x37c   : > { %v3850_v38 = vsel %vm3846_vm2, %v3834_v2, %v3849_v13  ;;  %v11697_v37 = vpop.eup %11696  ;;  %v3689_v14 = vmul.f32 %v3688_v3, %v3686_v19  ;;  %vm3845_vm13 = vcmp.lt.s32.totalorder %v3825_v63, 2  ;;  %v3854_v62 = vsel %vm3846_vm2, %v3837_v59, %v3853_v23 }
 0x37d   : > { %v3856_v46 = vsel %vm3844_vm6, %v3834_v2, %v3837_v59  ;;  %v11699_v39 = vpop.eup %11698  ;;  %11700 = vsinq.f32 %v14713_v31  ;;  %v10349_v51 = vmin.u32 %v3981_v44, %v14762_v45  ;;  %v3855_v32 = vsel %vm3845_vm13, %v3852_v10, %v3854_v62 }
 0x37e   : > { %v3857_v12 = vsel %vm3847_vm4, %v3843_v0, 1326507024  ;;  %v3851_v17 = vsel %vm3845_vm13, %v3848_v48, %v3850_v38  ;;  %v14780_v26 = vmul.u32.u64.low %v14739_v54, %v3855_v32  ;;  %v14781_v33 = vmul.u32.u64.high %v14739_v54, %v3855_v32, %v14780_v26 }
 0x37f   : > { %v3858_v61 = vsel %vm3846_vm2, %v3840_v15, %v3857_v12  ;;  %v3983_v29 = vclz %v10349_v51  ;;  %v815_v21 = vand.u32 3, %v811_v22  ;;  %v818_v50 = vxor.u32 2147483648, %v11697_v37 }
 0x380   : > { %v3859_v59 = vsel %vm3845_vm13, %v3856_v46, %v3858_v61  ;;  %v3690_v31 = vxor.u32 2147483648, %v3689_v14  ;;  %v821_v16 = vxor.u32 2147483648, %v11699_v39  ;;  %v17108_v18 = vand.u32 2147483647, %v14497_v34 }
 0x381   : > { %v14785_v2 = vmul.u32.u64.low %v14739_v54, %v3859_v59  ;;  %v14786_v42 = vmul.u32.u64.high %v14739_v54, %v3859_v59, %v14785_v2  ;;  %v3971_v15 = vadd.s32 %v14702_v56, %v14719_v47  ;;  %v10350_v20 = vadd.s32 4294967294, %v3983_v29 }
 0x382   : > { %vm14790_vm14 = vcmp.le.f32.partialorder %v17108_v18, 0.7853982  ;;  %v4001_v3 = vsub.s32 4, %v14750_v43  ;;  %vm817_vm0 = vcmp.eq.s32.totalorder %v815_v21, 0  ;;  %v3867_v0 = vmul.u32 %v14739_v54, %v3851_v17 }
 0x383   : > { %v3870_v19 = vadd.s32 1, %v14781_v33  ;;  %v819_v48 = vsel %vm817_vm0, %v11699_v39, %v818_v50  ;;  %vm820_vm6 = vcmp.eq.s32.totalorder %v815_v21, 2  ;;  %vm10351_vm4 = vcmp.lt.s32.totalorder %v10350_v20, 0 }
 0x384   : > { %vm816_vm2 = vcmp.lt.s32.totalorder %v815_v21, 2  ;;  %v822_v13 = vsel %vm820_vm6, %v821_v16, %v11697_v37  ;;  %v4111_v44 = vadd.s32 3, %v811_v22  ;;  %v3691_v38 = vsel %vm3608_vm12, %v3690_v31, %v3689_v14 }
 0x385   : > { %v3986_v10 = vsel %vm10351_vm4, 0, %v10350_v20  ;;  %vm3869_vm13 = vc.u32 %v14786_v42, %v14780_v26  ;;  %v823_v56 = vsel %vm816_vm2, %v819_v48, %v822_v13  ;;  %vm814_vm3 = vweird.f32 %v12034_v36 }
 0x386   : > { %v3987_v47 = vsub.s32 32, %v3986_v10  ;;  %v3991_v23 = vsub.s32 4294967266, %v3986_v10  ;;  %v3871_v54 = vsel %vm3869_vm13, %v3870_v19, %v14781_v33  ;;  %v824_v46 = vsel %vm814_vm3, nan, %v823_v56  ;;  %v17114_v19 = vld [vmem:[#allocation7_spill] sm:$0xff] }
 0x387   : > { %v3872_v62 = vadd.s32 %v3871_v54, %v3867_v0  ;;  %v4112_v51 = vand.u32 3, %v4111_v44  ;;  %vm16883_vm0 = vcmask 261120   ;;  %v3694_v22 = vsel %vm14667_vm7, %v14410_v24, %v3691_v38  ;;  %v17115_v38 = vld [vmem:[#allocation2_spill] sm:$0xff]  ;;  %v17116_v54 = vld [vmem:[#allocation4_spill] sm:$0xff] }
 0x388   : > { %v3989_v14 = vshrl.u32 %v3971_v15, %v3987_v47  ;;  %v3992_v32 = vadd.s32 127, %v3991_v23  ;;  %vm17111_vm12 = vcmp.lt.s32.totalorder %v14497_v34, 0  ;;  %11050 = vmatprep.mubr.msk.f32.mxu0 %vm16883_vm0, %v824_v46  ;;  %v3988_v17 = vshll.u32 %v14762_v45, %v3986_v10 }
 0x389   : > { %v4002_v12 = vsel %vm17111_vm12, %v4001_v3, %v14750_v43  ;;  %v3873_v61 = vadd.s32 536870912, %v3872_v62  ;;  %vm4114_vm6 = vcmp.eq.s32.totalorder %v4112_v51, 0  ;;  %vm4117_vm4 = vcmp.eq.s32.totalorder %v4112_v51, 2  ;;  %v17113_v3 = vld [vmem:[#allocation9_spill] sm:$0xff] }
 0x38a   : > { %v3993_v33 = vshll.u32 %v3992_v32, 23  ;;  %vm4113_vm2 = vcmp.lt.s32.totalorder %v4112_v51, 2  ;;  %v4116_v29 = vsel %vm4114_vm6, %v11699_v39, %v818_v50  ;;  %v4119_v59 = vsel %vm4117_vm4, %v821_v16, %v11697_v37  ;;  %v14815_v21 = vpop.eup %11700  ;;  %v17112_v39 = vld [vmem:[#allocation14_spill] sm:$0xff] }
 0x38b   : > { %v14819_v55 = vsel %vm14790_vm14, 0, %v4002_v12  ;;  %v14821_v31 = vshrl.u32 %v3873_v61, 30  ;;  %v4120_v43 = vsel %vm4113_vm2, %v4116_v29, %v4119_v59  ;;  %v921_v2 = vxor.u32 2147483648, %v12490_v28  ;;  %v17129_v12 = vld [vmem:[#allocation10_spill] sm:$0xff] }
 0x38c   : > { %v3990_v18 = vor.u32 %v3989_v14, %v3988_v17  ;;  %v3994_v45 = vor.u32 4788187, %v3993_v33  ;;  %v4121_v15 = vsel %vm814_vm3, nan, %v4120_v43  ;;  %vm920_vm7 = vcmp.eq.s32.totalorder %v12424_v4, 0  ;;  %v17120_v33 = vld [vmem:[#allocation21_spill] sm:$0xff] }
 0x38d   : > { %11702 = vcosq.f32 %v3694_v22  ;;  %v3875_v37 = vshll.u32 %v14821_v31, 30  ;;  %10994 = vmatprep.mubr.msk.f32.mxu1 %vm16883_vm0, %v4121_v15  ;;  %v922_v50 = vsel %vm920_vm7, %v17112_v39, %v921_v2  ;;  %v924_v16 = vxor.u32 2147483648, %v17112_v39 }
 0x38e   : > { %v3995_v20 = vand.u32 2147483647, %v3994_v45  ;;  %vm923_vm13 = vcmp.eq.s32.totalorder %v12424_v4, 2  ;;  %v4215_v0 = vadd.s32 3, %v17113_v3  ;;  %v1014_v48 = vsub.s32 4, %v17114_v19 }
 0x38f   : > { %11704 = vsinq.f32 %v3694_v22  ;;  %v14834_v36 = vsub.s32 %v3872_v62, %v3875_v37  ;;  %vm919_vm3 = vcmp.lt.s32.totalorder %v12424_v4, 2  ;;  %v925_v13 = vsel %vm923_vm13, %v924_v16, %v12490_v28  ;;  %v17118_v62 = vld [vmem:[#allocation23_spill] sm:$0xff] }
 0x390   : > { %v3997_v44 = vcvt.s32.f32 %v3990_v18  ;;  %vm917_vm12 = vweird.f32 %v17115_v38  ;;  %v926_v10 = vsel %vm919_vm3, %v922_v50, %v925_v13  ;;  %v4216_v56 = vand.u32 3, %v4215_v0 }
 0x391   : > { %v3878_v47 = vsub.s32 0, %v14834_v36  ;;  %v927_v23 = vsel %vm917_vm12, nan, %v926_v10  ;;  %vm17117_vm6 = vcmp.lt.s32.totalorder %v17116_v54, 0  ;;  %v1024_v51 = vxor.u32 2147483648, %v17118_v62  ;;  %v17124_v10 = vld [vmem:[#allocation17_spill] sm:$0xff] }
 0x392   : > { %v1015_v46 = vsel %vm17117_vm6, %v1014_v48, %v17114_v19  ;;  %v3998_v22 = vmul.f32 %v3997_v44, %v3995_v20  ;;  %vm4217_vm4 = vcmp.lt.s32.totalorder %v4216_v56, 2  ;;  %vm4218_vm2 = vcmp.eq.s32.totalorder %v4216_v56, 0  ;;  %11051 = vmatmul.mubr.msk.f32.vlgmr.msra.gmra.mxu0 %vm16883_vm0, %v927_v23  ;;  %v17126_v23 = vld [vmem:[#allocation3_spill] sm:$0xff] }
 0x393   : > { %vm4221_vm7 = vcmp.eq.s32.totalorder %v4216_v56, 2  ;;  %v10345_v4 = vmin.u32 %v3878_v47, %v14834_v36  ;;  %v4220_v14 = vsel %vm4218_vm2, %v17112_v39, %v921_v2  ;;  %v1017_v17 = vsel %vm12561_vm10, 0, %v1015_v46  ;;  %v17127_v46 = vld [vmem:[#allocation15_spill] sm:$0xff] }
 0x394   : > { %v4223_v32 = vsel %vm4221_vm7, %v924_v16, %v12490_v28  ;;  %v1027_v29 = vxor.u32 2147483648, %v17120_v33  ;;  %v4319_v59 = vadd.s32 3, %v1017_v17  ;;  %v1021_v43 = vand.u32 3, %v1017_v17 }
 0x395   : > { %v4224_v61 = vsel %vm4217_vm4, %v4220_v14, %v4223_v32  ;;  %v3868_v18 = vadd.s32 %v14780_v26, %v14786_v42  ;;  %v3880_v45 = vclz %v10345_v4  ;;  %v3898_v15 = vsub.s32 4, %v14821_v31 }
 0x396   : > { %v4225_v37 = vsel %vm917_vm12, nan, %v4224_v61  ;;  %v3999_v2 = vxor.u32 2147483648, %v3998_v22  ;;  %vm1020_vm13 = vweird.f32 %v17116_v54  ;;  %v4320_v28 = vand.u32 3, %v4319_v59 }
 0x397   : > { %10995 = vmatmul.mubr.msk.f32.vlgmr.msra.gmra.mxu1 %vm16883_vm0, %v4225_v37  ;;  %vm1023_vm10 = vcmp.eq.s32.totalorder %v1021_v43, 0  ;;  %v10346_v39 = vadd.s32 4294967294, %v3880_v45  ;;  %vm17121_vm3 = vcmask 1043456   ;;  %vm1022_vm6 = vcmp.lt.s32.totalorder %v1021_v43, 2  ;;  %v17130_v37 = vld [vmem:[#allocation29_spill] sm:$0xff] }
 0x398   : > { %11099 = vmatpush3.msk.msra.mxu1 %vm17121_vm3, %v14425_v7  ;;  %v1025_v26 = vsel %vm1023_vm10, %v17120_v33, %v1024_v51  ;;  %vm1026_vm4 = vcmp.eq.s32.totalorder %v1021_v43, 2  ;;  %vm4321_vm2 = vcmp.lt.s32.totalorder %v4320_v28, 2  ;;  %vm4322_vm7 = vcmp.eq.s32.totalorder %v4320_v28, 0 }
 0x399   : > { %vm4325_vm9 = vcmp.eq.s32.totalorder %v4320_v28, 2  ;;  %v1028_v42 = vsel %vm1026_vm4, %v1027_v29, %v17118_v62  ;;  %vm10347_vm12 = vcmp.lt.s32.totalorder %v10346_v39, 0  ;;  %v4324_v50 = vsel %vm4322_vm7, %v17120_v33, %v1024_v51  ;;  %v17128_v51 = vld [vmem:[#allocation13_spill] sm:$0xff] }
 0x39a   : > { %v4327_v16 = vsel %vm4325_vm9, %v1027_v29, %v17118_v62  ;;  %v1029_v20 = vsel %vm1022_vm6, %v1025_v26, %v1028_v42  ;;  %v14866_v3 = vpop.eup %11702  ;;  %vm17122_vm0 = vcmp.lt.s32.totalorder %v14497_v34, 0  ;;  %v3883_v0 = vsel %vm10347_vm12, 0, %v10346_v39 }
 0x39b   : > { %v4000_v7 = vsel %vm17122_vm0, %v3999_v2, %v3998_v22  ;;  %v4328_v19 = vsel %vm4321_vm2, %v4324_v50, %v4327_v16  ;;  %v1030_v48 = vsel %vm1020_vm13, nan, %v1029_v20  ;;  %v3884_v13 = vsub.s32 32, %v3883_v0  ;;  %v17131_v50 = vld [vmem:[#allocation6_spill] sm:$0xff] }
 0x39c   : > { %v3888_v44 = vsub.s32 4294967266, %v3883_v0  ;;  %v4329_v38 = vsel %vm1020_vm13, nan, %v4328_v19  ;;  %vm17123_vm10 = vcmask 261120   ;;  %v1127_v56 = vxor.u32 2147483648, %v17124_v10  ;;  %v14876_v47 = vpop.eup %11704 }
 0x39d   : > { %11053 = vmatprep.mubr.msk.f32.mxu0 %vm17123_vm10, %v1030_v48  ;;  %vm17125_vm9 = vmmov %vm17123_vm10  ;;  %vm1123_vm0 = vweird.f32 %v17126_v23  ;;  %v1130_v62 = vxor.u32 2147483648, %v17127_v46  ;;  %v4423_v22 = vadd.s32 3, %v17128_v51  ;;  %v1124_v4 = vand.u32 3, %v17128_v51  ;;  %v17137_v51 = vld [vmem:[#allocation26_spill] sm:$0xff] }
 0x39e   : > { %10997 = vmatprep.mubr.msk.f32.mxu1 %vm17125_vm9, %v4329_v38  ;;  %v3885_v14 = vshll.u32 %v14834_v36, %v3883_v0  ;;  %v3886_v54 = vshrl.u32 %v3868_v18, %v3884_v13  ;;  %v3889_v32 = vadd.s32 127, %v3888_v44  ;;  %v1220_v17 = vsub.s32 4, %v17129_v12  ;;  %v17134_v13 = vld [vmem:[#allocation28_spill] sm:$0xff] }
 0x39f   : > { %v4424_v61 = vand.u32 3, %v4423_v22  ;;  %vm1125_vm13 = vcmp.lt.s32.totalorder %v1124_v4, 2  ;;  %vm1126_vm3 = vcmp.eq.s32.totalorder %v1124_v4, 0  ;;  %vm1129_vm6 = vcmp.eq.s32.totalorder %v1124_v4, 2  ;;  %v17138_v4 = vld [vmem:[#allocation24_spill] sm:$0xff] }
 0x3a0   : > { %v3887_v33 = vor.u32 %v3886_v54, %v3885_v14  ;;  %v3890_v29 = vshll.u32 %v3889_v32, 23  ;;  %v1128_v59 = vsel %vm1126_vm3, %v17127_v46, %v1127_v56  ;;  %v1131_v43 = vsel %vm1129_vm6, %v1130_v62, %v17124_v10 }
 0x3a1   : > { %vm4426_vm4 = vcmp.eq.s32.totalorder %v4424_v61, 0  ;;  %vm4429_vm2 = vcmp.eq.s32.totalorder %v4424_v61, 2  ;;  %v1132_v45 = vsel %vm1125_vm13, %v1128_v59, %v1131_v43  ;;  %v1230_v2 = vxor.u32 2147483648, %v17130_v37  ;;  %vm17135_vm13 = vmmov %vm17125_vm9 }
 0x3a2   : > { %vm3814_vm7 = vcmp.lt.s32.totalorder %v14589_v8, 0  ;;  %v3891_v36 = vor.u32 4788187, %v3890_v29  ;;  %vm4425_vm12 = vcmp.lt.s32.totalorder %v4424_v61, 2  ;;  %v4428_v18 = vsel %vm4426_vm4, %v17127_v46, %v1127_v56  ;;  %v17136_v46 = vld [vmem:[#allocation27_spill] sm:$0xff]  ;;  %v17139_v61 = vld [vmem:[#allocation16_spill] sm:$0xff] }
 0x3a3   : > { %v4431_v28 = vsel %vm4429_vm2, %v1130_v62, %v17124_v10  ;;  %v3894_v39 = vcvt.s32.f32 %v3887_v33  ;;  %v1133_v42 = vsel %vm1123_vm0, nan, %v1132_v45  ;;  %vm17132_vm10 = vcmp.lt.s32.totalorder %v17131_v50, 0 }
 0x3a4   : > { %v4432_v26 = vsel %vm4425_vm12, %v4428_v18, %v4431_v28  ;;  %v1221_v16 = vsel %vm17132_vm10, %v1220_v17, %v17129_v12  ;;  %v3892_v20 = vand.u32 2147483647, %v3891_v36  ;;  %11054 = vmatmul.mubr.msk.f32.gmra.mxu0 %vm17125_vm9, %v1133_v42  ;;  %v1233_v44 = vxor.u32 2147483648, %v17134_v13  ;;  %vm17140_vm12 = vmmov %vm17125_vm9  ;;  %v17142_v28 = vld [vmem:[#allocation5_spill] sm:$0xff] }
 0x3a5   : > { %v4433_v0 = vsel %vm1123_vm0, nan, %v4432_v26  ;;  %v1223_v48 = vsel %vm12718_vm15, 0, %v1221_v16  ;;  %v14905_v38 = vsel %vm14790_vm14, %v14497_v34, %v4000_v7  ;;  %vm1226_vm3 = vweird.f32 %v17131_v50  ;;  %v17143_v26 = vld [vmem:[#allocation11_spill] sm:$0xff] }
 0x3a6   : > { %10998 = vmatmul.mubr.msk.f32.gmra.mxu1 %vm17135_vm13, %v4433_v0  ;;  %v4527_v10 = vadd.s32 3, %v1223_v48  ;;  %v1227_v56 = vand.u32 3, %v1223_v48  ;;  %v3895_v23 = vmul.f32 %v3894_v39, %v3892_v20  ;;  %v1333_v62 = vxor.u32 2147483648, %v17136_v46  ;;  %vm17141_vm13 = vmmov %vm17140_vm12 }
 0x3a7   : > { %v1336_v22 = vxor.u32 2147483648, %v17137_v51  ;;  %v4631_v14 = vadd.s32 3, %v17138_v4  ;;  %v1330_v63 = vand.u32 3, %v17138_v4  ;;  %v1426_v33 = vsub.s32 4, %v17139_v61 }
 0x3a8   : > { %v4528_v54 = vand.u32 3, %v4527_v10  ;;  %vm1229_vm15 = vcmp.eq.s32.totalorder %v1227_v56, 0  ;;  %vm1232_vm0 = vcmp.eq.s32.totalorder %v1227_v56, 2  ;;  %vm1228_vm14 = vcmp.lt.s32.totalorder %v1227_v56, 2 }
 0x3a9   : > { %v1231_v7 = vsel %vm1229_vm15, %v17134_v13, %v1230_v2  ;;  %v1234_v32 = vsel %vm1232_vm0, %v1233_v44, %v17130_v37  ;;  %v4632_v12 = vand.u32 3, %v4631_v14  ;;  %11706 = vcosq.f32 %v14905_v38 }
 0x3aa   : > { %vm4530_vm6 = vcmp.eq.s32.totalorder %v4528_v54, 0  ;;  %vm4533_vm4 = vcmp.eq.s32.totalorder %v4528_v54, 2  ;;  %v1235_v17 = vsel %vm1228_vm14, %v1231_v7, %v1234_v32  ;;  %vm4529_vm2 = vcmp.lt.s32.totalorder %v4528_v54, 2  ;;  %v17151_v54 = vld [vmem:[#allocation33_spill] sm:$0xff]  ;;  %v17152_v32 = vld [vmem:[#allocation20_spill] sm:$0xff] }
 0x3ab   : > { %v4532_v29 = vsel %vm4530_vm6, %v17134_v13, %v1230_v2  ;;  %v4535_v59 = vsel %vm4533_vm4, %v1233_v44, %v17130_v37  ;;  %v1236_v43 = vsel %vm1226_vm3, nan, %v1235_v17  ;;  %v14926_v45 = vsel %vm3814_vm7, %v3898_v15, %v14821_v31  ;;  %v17147_v13 = vld [vmem:[#allocation37_spill] sm:$0xff] }
 0x3ac   : > { %v4536_v36 = vsel %vm4529_vm2, %v4532_v29, %v4535_v59  ;;  %11056 = vmatprep.mubr.msk.f32.mxu0 %vm17140_vm12, %v1236_v43  ;;  %vm4634_vm10 = vcmp.eq.s32.totalorder %v4632_v12, 0  ;;  %v3896_v18 = vxor.u32 2147483648, %v3895_v23  ;;  %vm4637_vm9 = vcmp.eq.s32.totalorder %v4632_v12, 2  ;;  %vm17146_vm2 = vmmov %vm17140_vm12 }
 0x3ad   : > { %v4537_v37 = vsel %vm1226_vm3, nan, %v4536_v36  ;;  %v4636_v2 = vsel %vm4634_vm10, %v17137_v51, %v1333_v62  ;;  %vm1329_vm15 = vweird.f32 %v17142_v28  ;;  %vm4633_vm0 = vcmp.lt.s32.totalorder %v4632_v12, 2  ;;  %vm17150_vm12 = vmmov %vm17146_vm2 }
 0x3ae   : > { %11000 = vmatprep.mubr.msk.f32.mxu1 %vm17141_vm13, %v4537_v37  ;;  %v4639_v39 = vsel %vm4637_vm9, %v1336_v22, %v17136_v46  ;;  %vm1332_vm14 = vcmp.eq.s32.totalorder %v1330_v63, 0  ;;  %vm1335_vm6 = vcmp.eq.s32.totalorder %v1330_v63, 2  ;;  %vm17144_vm4 = vcmp.lt.s32.totalorder %v17143_v26, 0 }
 0x3af   : > { %v4640_v31 = vsel %vm4633_vm0, %v4636_v2, %v4639_v39  ;;  %v1334_v15 = vsel %vm1332_vm14, %v17137_v51, %v1333_v62  ;;  %v1427_v42 = vsel %vm17144_vm4, %v1426_v33, %v17139_v61  ;;  %vm1331_vm3 = vcmp.lt.s32.totalorder %v1330_v63, 2  ;;  %v17148_v62 = vld [vmem:[#allocation36_spill] sm:$0xff] }
 0x3b0   : > { %v4641_v50 = vsel %vm1329_vm15, nan, %v4640_v31  ;;  %v1337_v16 = vsel %vm1335_vm6, %v1336_v22, %v17136_v46  ;;  %v1429_v0 = vsel %vm12846_vm5, 0, %v1427_v42  ;;  %v14946_v19 = vsel %vm3814_vm7, %v3896_v18, %v3895_v23  ;;  %v17149_v46 = vld [vmem:[#allocation34_spill] sm:$0xff] }
 0x3b1   : > { %11001 = vmatmul.mubr.msk.f32.gmra.mxu1 %vm17146_vm2, %v4641_v50  ;;  %v1338_v48 = vsel %vm1331_vm3, %v1334_v15, %v1337_v16  ;;  %v1436_v44 = vxor.u32 2147483648, %v17147_v13  ;;  %v4735_v10 = vadd.s32 3, %v1429_v0  ;;  %v1439_v51 = vxor.u32 2147483648, %v17148_v62  ;;  %vm17153_vm3 = vmmov %vm17146_vm2 }
 0x3b2   : > { %v1339_v56 = vsel %vm1329_vm15, nan, %v1338_v48  ;;  %v1433_v4 = vand.u32 3, %v1429_v0  ;;  %v1539_v22 = vxor.u32 2147483648, %v17149_v46  ;;  %v1542_v23 = vxor.u32 2147483648, %v17151_v54 }
 0x3b3   : > { %11057 = vmatmul.mubr.msk.f32.gmra.mxu0 %vm17150_vm12, %v1339_v56  ;;  %v4736_v14 = vand.u32 3, %v4735_v10  ;;  %v4839_v63 = vadd.s32 3, %v13064_v1  ;;  %v1536_v7 = vand.u32 3, %v13064_v1  ;;  %v1632_v12 = vsub.s32 4, %v17152_v32  ;;  %v17160_v56 = vld [vmem:[#allocation44_spill] sm:$0xff] }
 0x3b4   : > { %vm1434_vm5 = vcmp.lt.s32.totalorder %v1433_v4, 2  ;;  %vm1435_vm7 = vcmp.eq.s32.totalorder %v1433_v4, 0  ;;  %vm1438_vm10 = vcmp.eq.s32.totalorder %v1433_v4, 2  ;;  %vm1432_vm0 = vweird.f32 %v17143_v26  ;;  %v17155_v26 = vld [vmem:[#allocation8_spill] sm:$0xff]  ;;  %v17161_v4 = vld [vmem:[#allocation43_spill] sm:$0xff] }
 0x3b5   : > { %vm4737_vm9 = vcmp.lt.s32.totalorder %v4736_v14, 2  ;;  %vm4738_vm13 = vcmp.eq.s32.totalorder %v4736_v14, 0  ;;  %vm4741_vm15 = vcmp.eq.s32.totalorder %v4736_v14, 2  ;;  %v1437_v17 = vsel %vm1435_vm7, %v17148_v62, %v1436_v44  ;;  %v17162_v14 = vld [vmem:[#allocation12_spill] sm:$0xff] }
 0x3b6   : > { %v4740_v61 = vsel %vm4738_vm13, %v17148_v62, %v1436_v44  ;;  %v4743_v33 = vsel %vm4741_vm15, %v1439_v51, %v17147_v13  ;;  %v1440_v29 = vsel %vm1438_vm10, %v1439_v51, %v17147_v13  ;;  %v4840_v59 = vand.u32 3, %v4839_v63  ;;  %v14964_v37 = vpop.eup %11706  ;;  %v17157_v13 = vld [vmem:[#allocation45_spill] sm:$0xff]  ;;  %vm17158_vm13 = vmmov %vm17146_vm2  ;;  %v17164_v63 = vld [vmem:[#allocation40_spill] sm:$0xff] }
 0x3b7   : > { %v4744_v1 = vsel %vm4737_vm9, %v4740_v61, %v4743_v33  ;;  %v1441_v43 = vsel %vm1434_vm5, %v1437_v17, %v1440_v29  ;;  %vm1537_vm14 = vcmp.lt.s32.totalorder %v1536_v7, 2  ;;  %vm1538_vm4 = vcmp.eq.s32.totalorder %v1536_v7, 0  ;;  %vm17159_vm15 = vmmov %vm17146_vm2 }
 0x3b8   : > { %v4745_v36 = vsel %vm1432_vm0, nan, %v4744_v1  ;;  %v1442_v18 = vsel %vm1432_vm0, nan, %v1441_v43  ;;  %vm4842_vm6 = vcmp.eq.s32.totalorder %v4840_v59, 0  ;;  %vm4845_vm12 = vcmp.eq.s32.totalorder %v4840_v59, 2 }
 0x3b9   : > { %11003 = vmatprep.mubr.msk.f32.mxu1 %vm17153_vm3, %v4745_v36  ;;  %11059 = vmatprep.mubr.msk.f32.mxu0 %vm17146_vm2, %v1442_v18  ;;  %v4844_v2 = vsel %vm4842_vm6, %v17151_v54, %v1539_v22  ;;  %v1540_v28 = vsel %vm1538_vm4, %v17151_v54, %v1539_v22  ;;  %vm1541_vm7 = vcmp.eq.s32.totalorder %v1536_v7, 2  ;;  %vm4841_vm10 = vcmp.lt.s32.totalorder %v4840_v59, 2  ;;  %v17163_v54 = vld [vmem:[#allocation42_spill] sm:$0xff] }
 0x3ba   : > { %v4847_v39 = vsel %vm4845_vm12, %v1542_v23, %v17149_v46  ;;  %v1543_v31 = vsel %vm1541_vm7, %v1542_v23, %v17149_v46  ;;  %vm17154_vm5 = vcmp.lt.s32.totalorder %v12522_v35, 0  ;;  %vm1535_vm9 = vweird.f32 %v17155_v26 }
 0x3bb   : > { %v1633_v15 = vsel %vm17154_vm5, %v1632_v12, %v17152_v32  ;;  %v4848_v42 = vsel %vm4841_vm10, %v4844_v2, %v4847_v39  ;;  %v1544_v50 = vsel %vm1537_vm14, %v1540_v28, %v1543_v31  ;;  %v1642_v44 = vxor.u32 2147483648, %v17157_v13  ;;  %v17165_v12 = vld [vmem:[#allocation32_spill] sm:$0xff] }
 0x3bc   : > { %v1635_v20 = vsel %vm13009_vm11, 0, %v1633_v15  ;;  %v4849_v0 = vsel %vm1535_vm9, nan, %v4848_v42  ;;  %v1545_v48 = vsel %vm1535_vm9, nan, %v1544_v50  ;;  %vm1638_vm0 = vweird.f32 %v12522_v35 }
 0x3bd   : > { %v4943_v10 = vadd.s32 3, %v1635_v20  ;;  %11004 = vmatmul.mubr.msk.f32.gmra.mxu1 %vm17158_vm13, %v4849_v0  ;;  %11060 = vmatmul.mubr.msk.f32.gmra.mxu0 %vm17159_vm15, %v1545_v48  ;;  %v1645_v62 = vxor.u32 2147483648, %v17160_v56  ;;  %v1639_v51 = vand.u32 3, %v1635_v20  ;;  %v1745_v46 = vxor.u32 2147483648, %v17161_v4  ;;  %vm17166_vm15 = vmmov %vm17158_vm13 }
 0x3be   : > { %vm1741_vm14 = vweird.f32 %v17162_v14  ;;  %v1748_v23 = vxor.u32 2147483648, %v17163_v54  ;;  %v5047_v7 = vadd.s32 3, %v17164_v63  ;;  %v1742_v32 = vand.u32 3, %v17164_v63 }
 0x3bf   : > { %v4944_v22 = vand.u32 3, %v4943_v10  ;;  %vm1640_vm11 = vcmp.lt.s32.totalorder %v1639_v51, 2  ;;  %vm1641_vm6 = vcmp.eq.s32.totalorder %v1639_v51, 0  ;;  %vm1644_vm4 = vcmp.eq.s32.totalorder %v1639_v51, 2  ;;  %v17174_v51 = vld [vmem:[#allocation52_spill] sm:$0xff] }
 0x3c0   : > { %v1838_v17 = vsub.s32 4, %v17165_v12  ;;  %v1643_v61 = vsel %vm1641_vm6, %v17160_v56, %v1642_v44  ;;  %v1646_v59 = vsel %vm1644_vm4, %v1645_v62, %v17157_v13  ;;  %v5048_v1 = vand.u32 3, %v5047_v7 }
 0x3c1   : > { %vm4945_vm3 = vcmp.lt.s32.totalorder %v4944_v22, 2  ;;  %vm4946_vm2 = vcmp.eq.s32.totalorder %v4944_v22, 0  ;;  %vm4949_vm12 = vcmp.eq.s32.totalorder %v4944_v22, 2  ;;  %v1647_v36 = vsel %vm1640_vm11, %v1643_v61, %v1646_v59 }
 0x3c2   : > { %v4948_v33 = vsel %vm4946_vm2, %v17160_v56, %v1642_v44  ;;  %v4951_v29 = vsel %vm4949_vm12, %v1645_v62, %v17157_v13  ;;  %vm1743_vm7 = vcmp.lt.s32.totalorder %v1742_v32, 2  ;;  %vm1744_vm10 = vcmp.eq.s32.totalorder %v1742_v32, 0  ;;  %v17272_v56 = vld [vmem:[#allocation88_spill] sm:$0xff] }
 0x3c3   : > { %v4952_v43 = vsel %vm4945_vm3, %v4948_v33, %v4951_v29  ;;  %v1648_v2 = vsel %vm1638_vm0, nan, %v1647_v36  ;;  %vm5049_vm5 = vcmp.lt.s32.totalorder %v5048_v1, 2  ;;  %vm5050_vm9 = vcmp.eq.s32.totalorder %v5048_v1, 0  ;;  %vm17171_vm3 = vmmov %vm17158_vm13  ;;  %v17178_v36 = vld [vmem:[#allocation41_spill] sm:$0xff] }
 0x3c4   : > { %v4953_v18 = vsel %vm1638_vm0, nan, %v4952_v43  ;;  %11062 = vmatprep.mubr.msk.f32.mxu0 %vm17166_vm15, %v1648_v2  ;;  %v5052_v28 = vsel %vm5050_vm9, %v17163_v54, %v1745_v46  ;;  %vm5053_vm6 = vcmp.eq.s32.totalorder %v5048_v1, 2  ;;  %v1746_v39 = vsel %vm1744_vm10, %v17163_v54, %v1745_v46  ;;  %vm17172_vm2 = vmmov %vm17171_vm3  ;;  %v17175_v46 = vld [vmem:[#allocation49_spill] sm:$0xff] }
 0x3c5   : > { %11006 = vmatprep.mubr.msk.f32.mxu1 %vm17158_vm13, %v4953_v18  ;;  %vm1747_vm11 = vcmp.eq.s32.totalorder %v1742_v32, 2  ;;  %v5055_v31 = vsel %vm5053_vm6, %v1748_v23, %v17161_v4  ;;  %vm17167_vm4 = vcmp.lt.s32.totalorder %v12693_v25, 0  ;;  %v1848_v26 = vxor.u32 2147483648, %v13399_v30  ;;  %vm17177_vm15 = vmmov %vm17172_vm2 }
 0x3c6   : > { %v1749_v15 = vsel %vm1747_vm11, %v1748_v23, %v17161_v4  ;;  %v1839_v35 = vsel %vm17167_vm4, %v1838_v17, %v17165_v12  ;;  %v5056_v42 = vsel %vm5049_vm5, %v5052_v28, %v5055_v31  ;;  %v1851_v20 = vxor.u32 2147483648, %v13395_v52  ;;  %v17176_v12 = vld [vmem:[#allocation19_spill] sm:$0xff] }
 0x3c7   : > { %v1750_v50 = vsel %vm1743_vm7, %v1746_v39, %v1749_v15  ;;  %v1841_v16 = vsel %vm13274_vm8, 0, %v1839_v35  ;;  %v5057_v0 = vsel %vm1741_vm14, nan, %v5056_v42  ;;  %v17168_v10 = vand.u32 2147483647, %v14589_v8  ;;  %v17180_v31 = vld [vmem:[#allocation31_spill] sm:$0xff]  ;;  %v17183_v42 = vld [vmem:[#allocation60_spill] sm:$0xff] }
 0x3c8   : > { %v1751_v48 = vsel %vm1741_vm14, nan, %v1750_v50  ;;  %v5151_v13 = vadd.s32 3, %v1841_v16  ;;  %v1845_v44 = vand.u32 3, %v1841_v16  ;;  %11007 = vmatmul.mubr.msk.f32.gmra.mxu1 %vm17171_vm3, %v5057_v0  ;;  %vm1844_vm8 = vweird.f32 %v12693_v25  ;;  %v17184_v16 = vld [vmem:[#allocation59_spill] sm:$0xff] }
 0x3c9   : > { %vm15018_vm0 = vcmp.le.f32.partialorder %v17168_v10, 0.7853982  ;;  %11063 = vmatmul.mubr.msk.f32.gmra.mxu0 %vm17172_vm2, %v1751_v48  ;;  %v1951_v62 = vxor.u32 2147483648, %v17173_v49  ;;  %v1954_v4 = vxor.u32 2147483648, %v17174_v51  ;;  %v5255_v22 = vadd.s32 3, %v17175_v46  ;;  %v17186_v48 = vld [vmem:[#allocation25_spill] sm:$0xff] }
 0x3ca   : > { %v5152_v14 = vand.u32 3, %v5151_v13  ;;  %vm1846_vm14 = vcmp.lt.s32.totalorder %v1845_v44, 2  ;;  %vm1847_vm12 = vcmp.eq.s32.totalorder %v1845_v44, 0  ;;  %vm1850_vm7 = vcmp.eq.s32.totalorder %v1845_v44, 2  ;;  %v17187_v13 = vld [vmem:[#allocation50_spill] sm:$0xff] }
 0x3cb   : > { %v1849_v54 = vsel %vm1847_vm12, %v13395_v52, %v1848_v26  ;;  %v1852_v23 = vsel %vm1850_vm7, %v1851_v20, %v13399_v30  ;;  %v5256_v63 = vand.u32 3, %v5255_v22  ;;  %v1948_v7 = vand.u32 3, %v17175_v46  ;;  %v17188_v10 = vld [vmem:[#allocation58_spill] sm:$0xff]  ;;  %v17190_v46 = vld [vmem:[#allocation48_spill] sm:$0xff] }
 0x3cc   : > { %vm5154_vm10 = vcmp.eq.s32.totalorder %v5152_v14, 0  ;;  %vm5157_vm5 = vcmp.eq.s32.totalorder %v5152_v14, 2  ;;  %v1853_v32 = vsel %vm1846_vm14, %v1849_v54, %v1852_v23  ;;  %vm1947_vm9 = vweird.f32 %v17176_v12 }
 0x3cd   : > { %vm5153_vm13 = vcmp.lt.s32.totalorder %v5152_v14, 2  ;;  %v5156_v17 = vsel %vm5154_vm10, %v13395_v52, %v1848_v26  ;;  %v5159_v61 = vsel %vm5157_vm5, %v1851_v20, %v13399_v30  ;;  %v1854_v33 = vsel %vm1844_vm8, nan, %v1853_v32  ;;  %vm17185_vm5 = vmmov %vm17172_vm2 }
 0x3ce   : > { %v5160_v29 = vsel %vm5153_vm13, %v5156_v17, %v5159_v61  ;;  %11065 = vmatprep.mubr.msk.f32.mxu0 %vm17177_vm15, %v1854_v33  ;;  %vm5257_vm6 = vcmp.lt.s32.totalorder %v5256_v63, 2  ;;  %vm5258_vm11 = vcmp.eq.s32.totalorder %v5256_v63, 0  ;;  %vm5261_vm4 = vcmp.eq.s32.totalorder %v5256_v63, 2 }
 0x3cf   : > { %v5161_v59 = vsel %vm1844_vm8, nan, %v5160_v29  ;;  %v5260_v1 = vsel %vm5258_vm11, %v17174_v51, %v1951_v62  ;;  %v5263_v43 = vsel %vm5261_vm4, %v1954_v4, %v17173_v49  ;;  %vm1950_vm3 = vcmp.eq.s32.totalorder %v1948_v7, 0  ;;  %vm17179_vm8 = vmmov %vm17172_vm2  ;;  %v17191_v29 = vld [vmem:[#allocation39_spill] sm:$0xff] }
 0x3d0   : > { %11009 = vmatprep.mubr.msk.f32.mxu1 %vm17172_vm2, %v5161_v59  ;;  %v5264_v30 = vsel %vm5257_vm6, %v5260_v1, %v5263_v43  ;;  %v1952_v52 = vsel %vm1950_vm3, %v17174_v51, %v1951_v62  ;;  %vm1953_vm14 = vcmp.eq.s32.totalorder %v1948_v7, 2  ;;  %v2044_v18 = vsub.s32 4, %v17178_v36  ;;  %v17189_v62 = vld [vmem:[#allocation57_spill] sm:$0xff] }
 0x3d1   : > { %11708 = vsinq.f32 %v14905_v38  ;;  %v5265_v2 = vsel %vm1947_vm9, nan, %v5264_v30  ;;  %vm1949_vm12 = vcmp.lt.s32.totalorder %v1948_v7, 2  ;;  %v1955_v25 = vsel %vm1953_vm14, %v1954_v4, %v17173_v49 }
 0x3d2   : > { %v15052_v28 = vsel %vm15018_vm0, %v14589_v8, %v14946_v19  ;;  %11010 = vmatmul.mubr.msk.f32.gmra.mxu1 %vm17179_vm8, %v5265_v2  ;;  %v1956_v39 = vsel %vm1949_vm12, %v1952_v52, %v1955_v25  ;;  %vm17181_vm7 = vcmp.lt.s32.totalorder %v17180_v31, 0  ;;  %vm2050_vm10 = vweird.f32 %v17180_v31 }
 0x3d3   : > { %v2045_v15 = vsel %vm17181_vm7, %v2044_v18, %v17178_v36  ;;  %v1957_v38 = vsel %vm1947_vm9, nan, %v1956_v39  ;;  %v2054_v50 = vxor.u32 2147483648, %v17183_v42  ;;  %v2057_v19 = vxor.u32 2147483648, %v17184_v16  ;;  %v17194_v39 = vld [vmem:[#allocation63_spill] sm:$0xff] }
 0x3d4   : > { %v2047_v26 = vsel %vm13374_vm1, 0, %v2045_v15  ;;  %11066 = vmatmul.mubr.msk.f32.gmra.mxu0 %vm17185_vm5, %v1957_v38  ;;  %vm2153_vm13 = vweird.f32 %v17186_v48  ;;  %v5463_v44 = vadd.s32 3, %v17187_v13  ;;  %v2157_v49 = vxor.u32 2147483648, %v17188_v10  ;;  %vm17192_vm5 = vmmov %vm17172_vm2 }
 0x3d5   : > { %v5359_v20 = vadd.s32 3, %v2047_v26  ;;  %v2051_v0 = vand.u32 3, %v2047_v26  ;;  %v2160_v51 = vxor.u32 2147483648, %v17189_v62  ;;  %v2154_v4 = vand.u32 3, %v17187_v13  ;;  %v17200_v13 = vld [vmem:[#allocation56_spill] sm:$0xff] }
 0x3d6   : > { %v2250_v22 = vsub.s32 4, %v17190_v46  ;;  %v2260_v54 = vxor.u32 2147483648, %v13688_v41  ;;  %v5464_v7 = vand.u32 3, %v5463_v44  ;;  %vm2256_vm7 = vweird.f32 %v17191_v29 }
 0x3d7   : > { %v5360_v14 = vand.u32 3, %v5359_v20  ;;  %vm2053_vm1 = vcmp.eq.s32.totalorder %v2051_v0, 0  ;;  %vm2056_vm9 = vcmp.eq.s32.totalorder %v2051_v0, 2  ;;  %vm2052_vm15 = vcmp.lt.s32.totalorder %v2051_v0, 2  ;;  %v17199_v20 = vld [vmem:[#allocation61_spill] sm:$0xff] }
 0x3d8   : > { %v2055_v23 = vsel %vm2053_vm1, %v17184_v16, %v2054_v50  ;;  %v2058_v63 = vsel %vm2056_vm9, %v2057_v19, %v17183_v42  ;;  %vm5465_vm3 = vcmp.lt.s32.totalorder %v5464_v7, 2  ;;  %vm5466_vm14 = vcmp.eq.s32.totalorder %v5464_v7, 0 }
 0x3d9   : > { %vm5361_vm6 = vcmp.lt.s32.totalorder %v5360_v14, 2  ;;  %vm5362_vm11 = vcmp.eq.s32.totalorder %v5360_v14, 0  ;;  %vm5365_vm4 = vcmp.eq.s32.totalorder %v5360_v14, 2  ;;  %v2059_v32 = vsel %vm2052_vm15, %v2055_v23, %v2058_v63 }
 0x3da   : > { %v5364_v12 = vsel %vm5362_vm11, %v17184_v16, %v2054_v50  ;;  %v5367_v17 = vsel %vm5365_vm4, %v2057_v19, %v17183_v42  ;;  %v2060_v61 = vsel %vm2050_vm10, nan, %v2059_v32  ;;  %vm5469_vm12 = vcmp.eq.s32.totalorder %v5464_v7, 2  ;;  %v17197_v42 = vld [vmem:[#allocation35_spill] sm:$0xff]  ;;  %v17198_v50 = vld [vmem:[#allocation66_spill] sm:$0xff]  ;;  %vm17201_vm4 = vmmov %vm17172_vm2 }
 0x3db   : > { %v5368_v33 = vsel %vm5361_vm6, %v5364_v12, %v5367_v17  ;;  %11068 = vmatprep.mubr.msk.f32.mxu0 %vm17172_vm2, %v2060_v61  ;;  %vm2156_vm8 = vcmp.eq.s32.totalorder %v2154_v4, 0  ;;  %v5468_v1 = vsel %vm5466_vm14, %v17189_v62, %v2157_v49  ;;  %v5471_v43 = vsel %vm5469_vm12, %v2160_v51, %v17188_v10  ;;  %vm17196_vm6 = vmmov %vm17172_vm2  ;;  %v17204_v17 = vld [vmem:[#allocation73_spill] sm:$0xff] }
 0x3dc   : > { %v5369_v59 = vsel %vm2050_vm10, nan, %v5368_v33  ;;  %v2158_v30 = vsel %vm2156_vm8, %v17189_v62, %v2157_v49  ;;  %v5472_v52 = vsel %vm5465_vm3, %v5468_v1, %v5471_v43  ;;  %vm2159_vm1 = vcmp.eq.s32.totalorder %v2154_v4, 2 }
 0x3dd   : > { %11012 = vmatprep.mubr.msk.f32.mxu1 %vm17192_vm5, %v5369_v59  ;;  %vm17193_vm9 = vcmp.lt.s32.totalorder %v17191_v29, 0  ;;  %v2263_v18 = vxor.u32 2147483648, %v13686_v40  ;;  %v5473_v2 = vsel %vm2153_vm13, nan, %v5472_v52  ;;  %vm2155_vm10 = vcmp.lt.s32.totalorder %v2154_v4, 2  ;;  %v17205_v59 = vld [vmem:[#allocation67_spill] sm:$0xff] }
 0x3de   : > { %v2251_v36 = vsel %vm17193_vm9, %v2250_v22, %v17190_v46  ;;  %v2161_v25 = vsel %vm2159_vm1, %v2160_v51, %v17188_v10  ;;  %vm17195_vm15 = vnez %v17194_v39  ;;  %v15096_v15 = vpop.eup %11708  ;;  %11013 = vmatmul.mubr.msk.f32.gmra.mxu1 %vm17196_vm6, %v5473_v2  ;;  %vm2359_vm11 = vweird.f32 %v17197_v42  ;;  %vm17202_vm9 = vmmov %vm17201_vm4  ;;  %v17207_v52 = vld [vmem:[#allocation47_spill] sm:$0xff] }
 0x3df   : > { %v2253_v31 = vsel %vm17195_vm15, 0, %v2251_v36  ;;  %v2162_v38 = vsel %vm2155_vm10, %v2158_v30, %v2161_v25  ;;  %v2363_v16 = vxor.u32 2147483648, %v17198_v50  ;;  %v2366_v0 = vxor.u32 2147483648, %v17199_v20  ;;  %v17208_v36 = vld [vmem:[#allocation72_spill] sm:$0xff]  ;;  %v17209_v2 = vld [vmem:[#allocation71_spill] sm:$0xff] }
 0x3e0   : > { %v5567_v35 = vadd.s32 3, %v2253_v31  ;;  %v2257_v26 = vand.u32 3, %v2253_v31  ;;  %v2163_v19 = vsel %vm2153_vm13, nan, %v2162_v38  ;;  %v5671_v44 = vadd.s32 3, %v17200_v13 }
 0x3e1   : > { %v2360_v10 = vand.u32 3, %v17200_v13  ;;  %11069 = vmatmul.mubr.msk.f32.gmra.mxu0 %vm17201_vm4, %v2163_v19  ;;  %v2469_v61 = vxor.u32 2147483648, %v17204_v17  ;;  %v5775_v1 = vadd.s32 3, %v17205_v59  ;;  %v2463_v43 = vand.u32 3, %v17205_v59 }
 0x3e2   : > { %v5568_v49 = vand.u32 3, %v5567_v35  ;;  %vm2258_vm3 = vcmp.lt.s32.totalorder %v2257_v26, 2  ;;  %vm2259_vm2 = vcmp.eq.s32.totalorder %v2257_v26, 0  ;;  %vm2262_vm14 = vcmp.eq.s32.totalorder %v2257_v26, 2  ;;  %v17211_v35 = vld [vmem:[#allocation65_spill] sm:$0xff] }
 0x3e3   : > { %v2261_v62 = vsel %vm2259_vm2, %v13686_v40, %v2260_v54  ;;  %v2264_v51 = vsel %vm2262_vm14, %v2263_v18, %v13688_v41  ;;  %v5672_v4 = vand.u32 3, %v5671_v44  ;;  %vm2361_vm12 = vcmp.lt.s32.totalorder %v2360_v10, 2 }
 0x3e4   : > { %vm5569_vm8 = vcmp.lt.s32.totalorder %v5568_v49, 2  ;;  %vm5570_vm13 = vcmp.eq.s32.totalorder %v5568_v49, 0  ;;  %vm5573_vm5 = vcmp.eq.s32.totalorder %v5568_v49, 2  ;;  %v2265_v48 = vsel %vm2258_vm3, %v2261_v62, %v2264_v51 }
 0x3e5   : > { %v5572_v46 = vsel %vm5570_vm13, %v13686_v40, %v2260_v54  ;;  %v5575_v22 = vsel %vm5573_vm5, %v2263_v18, %v13688_v41  ;;  %v2266_v14 = vsel %vm2256_vm7, nan, %v2265_v48  ;;  %vm5673_vm1 = vcmp.lt.s32.totalorder %v5672_v4, 2  ;;  %v17203_v54 = vld [vmem:[#allocation74_spill] sm:$0xff]  ;;  %vm17210_vm13 = vmmov %vm17201_vm4 }
 0x3e6   : > { %v5576_v23 = vsel %vm5569_vm8, %v5572_v46, %v5575_v22  ;;  %11071 = vmatprep.mubr.msk.f32.mxu0 %vm17202_vm9, %v2266_v14  ;;  %vm5674_vm10 = vcmp.eq.s32.totalorder %v5672_v4, 0  ;;  %vm5677_vm15 = vcmp.eq.s32.totalorder %v5672_v4, 2  ;;  %vm2362_vm6 = vcmp.eq.s32.totalorder %v2360_v10, 0  ;;  %v17214_v4 = vld [vmem:[#allocation46_spill] sm:$0xff] }
 0x3e7   : > { %v5577_v63 = vsel %vm2256_vm7, nan, %v5576_v23  ;;  %v5676_v7 = vsel %vm5674_vm10, %v17199_v20, %v2363_v16  ;;  %v5679_v32 = vsel %vm5677_vm15, %v2366_v0, %v17198_v50  ;;  %v2364_v40 = vsel %vm2362_vm6, %v17199_v20, %v2363_v16  ;;  %vm17206_vm7 = vmmov %vm17201_vm4 }
 0x3e8   : > { %11015 = vmatprep.mubr.msk.f32.mxu1 %vm17201_vm4, %v5577_v63  ;;  %v5680_v41 = vsel %vm5673_vm1, %v5676_v7, %v5679_v32  ;;  %vm2365_vm3 = vcmp.eq.s32.totalorder %v2360_v10, 2  ;;  %v2466_v12 = vxor.u32 2147483648, %v17203_v54  ;;  %vm2462_vm2 = vweird.f32 %v17207_v52  ;;  %vm17212_vm10 = vmmov %vm17201_vm4  ;;  %v17216_v32 = vld [vmem:[#allocation55_spill] sm:$0xff] }
 0x3e9   : > { %v5681_v33 = vsel %vm2359_vm11, nan, %v5680_v41  ;;  %v2367_v29 = vsel %vm2365_vm3, %v2366_v0, %v17198_v50  ;;  %v2569_v18 = vxor.u32 2147483648, %v17208_v36  ;;  %v2572_v25 = vxor.u32 2147483648, %v17209_v2  ;;  %vm17213_vm3 = vmmov %vm17206_vm7 }
 0x3ea   : > { %11016 = vmatmul.mubr.msk.f32.gmra.mxu1 %vm17206_vm7, %v5681_v33  ;;  %v2368_v30 = vsel %vm2361_vm12, %v2364_v40, %v2367_v29  ;;  %v5776_v31 = vand.u32 3, %v5775_v1  ;;  %vm2464_vm14 = vcmp.lt.s32.totalorder %v2463_v43, 2  ;;  %vm2465_vm8 = vcmp.eq.s32.totalorder %v2463_v43, 0  ;;  %v17220_v33 = vld [vmem:[#allocation70_spill] sm:$0xff]  ;;  %v17221_v1 = vld [vmem:[#allocation75_spill] sm:$0xff] }
 0x3eb   : > { %v2369_v39 = vsel %vm2359_vm11, nan, %v2368_v30  ;;  %v2467_v38 = vsel %vm2465_vm8, %v17204_v17, %v2466_v12  ;;  %vm2468_vm5 = vcmp.eq.s32.totalorder %v2463_v43, 2  ;;  %v5879_v26 = vadd.s32 3, %v17211_v35 }
 0x3ec   : > { %11072 = vmatmul.mubr.msk.f32.gmra.mxu0 %vm17210_vm13, %v2369_v39  ;;  %v2566_v50 = vand.u32 3, %v17211_v35  ;;  %vm5777_vm12 = vcmp.lt.s32.totalorder %v5776_v31, 2  ;;  %vm5778_vm1 = vcmp.eq.s32.totalorder %v5776_v31, 0  ;;  %vm5781_vm9 = vcmp.eq.s32.totalorder %v5776_v31, 2  ;;  %v15185_v35 = vld [vmem:[%s16703_s6 + $0x70] sm:$0xff] }
 0x3ed   : > { %v2470_v16 = vsel %vm2468_vm5, %v2469_v61, %v17203_v54  ;;  %v5780_v42 = vsel %vm5778_vm1, %v17204_v17, %v2466_v12  ;;  %v5783_v19 = vsel %vm5781_vm9, %v2469_v61, %v17203_v54  ;;  %v5880_v0 = vand.u32 3, %v5879_v26  ;;  %v17218_v12 = vld [vmem:[#allocation51_spill] sm:$0xff]  ;;  %v17219_v17 = vld [vmem:[#allocation76_spill] sm:$0xff] }
 0x3ee   : > { %v2471_v20 = vsel %vm2464_vm14, %v2467_v38, %v2470_v16  ;;  %11710 = vcosq.f32 %v15052_v28  ;;  %v5784_v13 = vsel %vm5777_vm12, %v5780_v42, %v5783_v19  ;;  %vm2568_vm11 = vcmp.eq.s32.totalorder %v2566_v50, 0  ;;  %v15180_v38 = vld [vmem:[%s16703_s6 + $0x78] sm:$0xff] }
 0x3ef   : > { %v2472_v44 = vsel %vm2462_vm2, nan, %v2471_v20  ;;  %v5785_v10 = vsel %vm2462_vm2, nan, %v5784_v13  ;;  %vm5881_vm15 = vcmp.lt.s32.totalorder %v5880_v0, 2  ;;  %vm5882_vm6 = vcmp.eq.s32.totalorder %v5880_v0, 0  ;;  %vm17215_vm2 = vmmov %vm17213_vm3  ;;  %11148 = vmatprep.subr.mxu0 %v15180_v38  ;;  %11228 = vmatprep.subr.mxu1 %v15180_v38  ;;  %v17223_v13 = vld [vmem:[#allocation79_spill] sm:$0xff] }
 0x3f0   : > { %11074 = vmatprep.mubr.msk.f32.mxu0 %vm17212_vm10, %v2472_v44  ;;  %vm5885_vm4 = vcmp.eq.s32.totalorder %v5880_v0, 2  ;;  %11018 = vmatprep.mubr.msk.f32.mxu1 %vm17213_vm3, %v5785_v10  ;;  %v5884_v49 = vsel %vm5882_vm6, %v17209_v2, %v2569_v18  ;;  %v2570_v51 = vsel %vm2568_vm11, %v17209_v2, %v2569_v18  ;;  %vm2571_vm7 = vcmp.eq.s32.totalorder %v2566_v50, 2  ;;  %vm17217_vm5 = vmmov %vm17215_vm2 }
 0x3f1   : > { %v5887_v62 = vsel %vm5885_vm4, %v2572_v25, %v17208_v36  ;;  %vm2565_vm14 = vweird.f32 %v17214_v4  ;;  %vm2567_vm8 = vcmp.lt.s32.totalorder %v2566_v50, 2  ;;  %v2573_v46 = vsel %vm2571_vm7, %v2572_v25, %v17208_v36  ;;  %11149 = vmatpush3.msra.mxu0 %v15180_v38  ;;  %v17225_v4 = vld [vmem:[#allocation85_spill] sm:$0xff] }
 0x3f2   : > { %v5888_v48 = vsel %vm5881_vm15, %v5884_v49, %v5887_v62  ;;  %v2574_v14 = vsel %vm2567_vm8, %v2570_v51, %v2573_v46  ;;  %v2672_v23 = vxor.u32 2147483648, %v14068_v27  ;;  %v5983_v63 = vadd.s32 3, %v14008_v9  ;;  %vm17222_vm8 = vmmov %vm17215_vm2  ;;  %v17224_v51 = vld [vmem:[#allocation64_spill] sm:$0xff]  ;;  %11150 = vmatprep.subr.mxu0 %v15185_v35 }
 0x3f3   : > { %v5889_v22 = vsel %vm2565_vm14, nan, %v5888_v48  ;;  %v2575_v7 = vsel %vm2565_vm14, nan, %v2574_v14  ;;  %vm2668_vm13 = vweird.f32 %v17216_v32  ;;  %v2675_v40 = vxor.u32 2147483648, %v14061_v5  ;;  %11151 = vmatpush3.msra.mxu0 %v15185_v35 }
 0x3f4   : > { %11019 = vmatmul.mubr.msk.f32.gmra.mxu1 %vm17215_vm2, %v5889_v22  ;;  %v2669_v41 = vand.u32 3, %v14008_v9  ;;  %11075 = vmatmul.mubr.msk.f32.gmra.mxu0 %vm17217_vm5, %v2575_v7  ;;  %v5984_v54 = vand.u32 3, %v5983_v63  ;;  %vm2771_vm12 = vweird.f32 %v17218_v12  ;;  %v2775_v61 = vxor.u32 2147483648, %v17219_v17  ;;  %v17229_v7 = vld [vmem:[#allocation78_spill] sm:$0xff] }
 0x3f5   : > { %v6087_v29 = vadd.s32 3, %v17220_v33  ;;  %v2772_v59 = vand.u32 3, %v17220_v33  ;;  %v2778_v43 = vxor.u32 2147483648, %v17221_v1  ;;  %v2878_v42 = vxor.u32 2147483648, %v14203_v58  ;;  %v17231_v33 = vld [vmem:[#allocation62_spill] sm:$0xff] }
 0x3f6   : > { %vm2670_vm1 = vcmp.lt.s32.totalorder %v2669_v41, 2  ;;  %vm2671_vm9 = vcmp.eq.s32.totalorder %v2669_v41, 0  ;;  %vm2674_vm11 = vcmp.eq.s32.totalorder %v2669_v41, 2  ;;  %vm5985_vm10 = vcmp.lt.s32.totalorder %v5984_v54, 2 }
 0x3f7   : > { %vm5986_vm15 = vcmp.eq.s32.totalorder %v5984_v54, 0  ;;  %vm5989_vm6 = vcmp.eq.s32.totalorder %v5984_v54, 2  ;;  %v2673_v9 = vsel %vm2671_vm9, %v14061_v5, %v2672_v23  ;;  %v2676_v36 = vsel %vm2674_vm11, %v2675_v40, %v14068_v27  ;;  %vm17226_vm9 = vmmov %vm17215_vm2 }
 0x3f8   : > { %v5988_v30 = vsel %vm5986_vm15, %v14061_v5, %v2672_v23  ;;  %v5991_v52 = vsel %vm5989_vm6, %v2675_v40, %v14068_v27  ;;  %v6088_v18 = vand.u32 3, %v6087_v29  ;;  %v2677_v25 = vsel %vm2670_vm1, %v2673_v9, %v2676_v36  ;;  %vm17227_vm11 = vmmov %vm17215_vm2  ;;  %v17228_v23 = vld [vmem:[#allocation84_spill] sm:$0xff]  ;;  %v17234_v36 = vld [vmem:[#allocation90_spill] sm:$0xff] }
 0x3f9   : > { %v5992_v2 = vsel %vm5985_vm10, %v5988_v30, %v5991_v52  ;;  %vm2773_vm4 = vcmp.lt.s32.totalorder %v2772_v59, 2  ;;  %vm2774_vm3 = vcmp.eq.s32.totalorder %v2772_v59, 0  ;;  %v2678_v31 = vsel %vm2668_vm13, nan, %v2677_v25 }
 0x3fa   : > { %v5993_v39 = vsel %vm2668_vm13, nan, %v5992_v2  ;;  %vm6089_vm7 = vcmp.lt.s32.totalorder %v6088_v18, 2  ;;  %vm6090_vm14 = vcmp.eq.s32.totalorder %v6088_v18, 0  ;;  %11077 = vmatprep.mubr.msk.f32.mxu0 %vm17215_vm2, %v2678_v31  ;;  %vm6093_vm5 = vcmp.eq.s32.totalorder %v6088_v18, 2 }
 0x3fb   : > { %11021 = vmatprep.mubr.msk.f32.mxu1 %vm17222_vm8, %v5993_v39  ;;  %v6092_v5 = vsel %vm6090_vm14, %v17221_v1, %v2775_v61  ;;  %v2776_v27 = vsel %vm2774_vm3, %v17221_v1, %v2775_v61  ;;  %vm2777_vm1 = vcmp.eq.s32.totalorder %v2772_v59, 2  ;;  %v15187_v26 = vpop.eup %11710  ;;  %v6095_v50 = vsel %vm6093_vm5, %v2778_v43, %v17219_v17  ;;  %v17232_v59 = vld [vmem:[#allocation91_spill] sm:$0xff] }
 0x3fc   : > { %v2779_v16 = vsel %vm2777_vm1, %v2778_v43, %v17219_v17  ;;  %v2881_v19 = vxor.u32 2147483648, %v14188_v57  ;;  %v6096_v20 = vsel %vm6089_vm7, %v6092_v5, %v6095_v50  ;;  %v6191_v44 = vadd.s32 3, %v17223_v13  ;;  %vm17230_vm7 = vmmov %vm17215_vm2  ;;  %v15225_v43 = vld [vmem:[%s16703_s6 + $0x68] sm:$0xff]  ;;  %v17237_v50 = vld [vmem:[#allocation69_spill] sm:$0xff] }
 0x3fd   : > { %v2780_v0 = vsel %vm2773_vm4, %v2776_v27, %v2779_v16  ;;  %v2875_v10 = vand.u32 3, %v17223_v13  ;;  %v6097_v49 = vsel %vm2771_vm12, nan, %v6096_v20  ;;  %vm2874_vm13 = vweird.f32 %v17224_v51  ;;  %11152 = vmatprep.subr.mxu0 %v15225_v43  ;;  %vm17233_vm1 = vmmov %vm17230_vm7  ;;  %v17235_v39 = vld [vmem:[#allocation83_spill] sm:$0xff]  ;;  %v17238_v16 = vld [vmem:[#allocation89_spill] sm:$0xff] }
 0x3fe   : > { %v2781_v62 = vsel %vm2771_vm12, nan, %v2780_v0  ;;  %v2981_v48 = vxor.u32 2147483648, %v17225_v4  ;;  %11022 = vmatmul.mubr.msk.f32.gmra.mxu1 %vm17226_vm9, %v6097_v49  ;;  %v6192_v46 = vand.u32 3, %v6191_v44  ;;  %v2984_v63 = vxor.u32 2147483648, %v17228_v23  ;;  %11153 = vmatpush3.msra.mxu0 %v15225_v43 }
 0x3ff   : > { %11078 = vmatmul.mubr.msk.f32.gmra.mxu0 %vm17227_vm11, %v2781_v62  ;;  %vm2876_vm10 = vcmp.lt.s32.totalorder %v2875_v10, 2  ;;  %vm2877_vm15 = vcmp.eq.s32.totalorder %v2875_v10, 0  ;;  %vm2880_vm6 = vcmp.eq.s32.totalorder %v2875_v10, 2  ;;  %v6295_v32 = vadd.s32 3, %v17229_v7  ;;  %v17241_v10 = vld [vmem:[#allocation82_spill] sm:$0xff] }
 0x400   : > { %v2879_v22 = vsel %vm2877_vm15, %v14188_v57, %v2878_v42  ;;  %v2882_v14 = vsel %vm2880_vm6, %v2881_v19, %v14203_v58  ;;  %vm6193_vm12 = vcmp.lt.s32.totalorder %v6192_v46, 2  ;;  %vm6194_vm4 = vcmp.eq.s32.totalorder %v6192_v46, 0 }
 0x401   : > { %vm6197_vm3 = vcmp.eq.s32.totalorder %v6192_v46, 2  ;;  %v2883_v40 = vsel %vm2876_vm10, %v2879_v22, %v2882_v14  ;;  %v6196_v41 = vsel %vm6194_vm4, %v14188_v57, %v2878_v42  ;;  %v6296_v17 = vand.u32 3, %v6295_v32  ;;  %vm17240_vm4 = vmmov %vm17233_vm1 }
 0x402   : > { %v6199_v54 = vsel %vm6197_vm3, %v2881_v19, %v14203_v58  ;;  %v2884_v12 = vsel %vm2874_vm13, nan, %v2883_v40  ;;  %vm2977_vm14 = vweird.f32 %v17231_v33  ;;  %v2978_v29 = vand.u32 3, %v17229_v7  ;;  %v17239_v19 = vld [vmem:[#allocation87_spill] sm:$0xff]  ;;  %v15263_v7 = vld [vmem:[%s16703_s6 + $0x60] sm:$0xff] }
 0x403   : > { %v6200_v61 = vsel %vm6193_vm12, %v6196_v41, %v6199_v54  ;;  %11080 = vmatprep.mubr.msk.f32.mxu0 %vm17230_vm7, %v2884_v12  ;;  %v3084_v1 = vxor.u32 2147483648, %v17232_v59  ;;  %vm6297_vm8 = vcmp.lt.s32.totalorder %v6296_v17, 2  ;;  %vm6298_vm2 = vcmp.eq.s32.totalorder %v6296_v17, 0  ;;  %11154 = vmatprep.subr.mxu0 %v15263_v7  ;;  %v17244_v41 = vld [vmem:[#allocation68_spill] sm:$0xff] }
 0x404   : > { %v6201_v58 = vsel %vm2874_vm13, nan, %v6200_v61  ;;  %vm6301_vm5 = vcmp.eq.s32.totalorder %v6296_v17, 2  ;;  %v6300_v57 = vsel %vm6298_vm2, %v17228_v23, %v2981_v48  ;;  %vm2979_vm9 = vcmp.lt.s32.totalorder %v2978_v29, 2  ;;  %vm17236_vm13 = vmmov %vm17233_vm1  ;;  %11155 = vmatpush3.msra.mxu0 %v15263_v7 }
 0x405   : > { %11024 = vmatprep.mubr.msk.f32.mxu1 %vm17233_vm1, %v6201_v58  ;;  %v6303_v9 = vsel %vm6301_vm5, %v2984_v63, %v17225_v4  ;;  %vm2980_vm11 = vcmp.eq.s32.totalorder %v2978_v29, 0  ;;  %vm2983_vm10 = vcmp.eq.s32.totalorder %v2978_v29, 2  ;;  %v3087_v18 = vxor.u32 2147483648, %v17234_v36  ;;  %vm17242_vm5 = vmmov %vm17233_vm1  ;;  %v17245_v29 = vld [vmem:[#allocation93_spill] sm:$0xff]  ;;  %v17247_v58 = vld [vmem:[#allocation80_spill] sm:$0xff] }
 0x406   : > { %v6304_v30 = vsel %vm6297_vm8, %v6300_v57, %v6303_v9  ;;  %v2982_v52 = vsel %vm2980_vm11, %v17228_v23, %v2981_v48  ;;  %v2985_v25 = vsel %vm2983_vm10, %v2984_v63, %v17225_v4  ;;  %v6399_v31 = vadd.s32 3, %v17235_v39  ;;  %vm17243_vm10 = vmmov %vm17240_vm4  ;;  %v17248_v57 = vld [vmem:[#allocation98_spill] sm:$0xff] }
 0x407   : > { %v6305_v2 = vsel %vm2977_vm14, nan, %v6304_v30  ;;  %v3081_v5 = vand.u32 3, %v17235_v39  ;;  %v2986_v27 = vsel %vm2979_vm9, %v2982_v52, %v2985_v25  ;;  %vm3080_vm15 = vweird.f32 %v17237_v50  ;;  %v17252_v25 = vld [vmem:[#allocation92_spill] sm:$0xff] }
 0x408   : > { %11025 = vmatmul.mubr.msk.f32.gmra.mxu1 %vm17236_vm13, %v6305_v2  ;;  %v3187_v42 = vxor.u32 2147483648, %v17238_v16  ;;  %v3190_v20 = vxor.u32 2147483648, %v17239_v19  ;;  %v2987_v0 = vsel %vm2977_vm14, nan, %v2986_v27  ;;  %v6400_v13 = vand.u32 3, %v6399_v31 }
 0x409   : > { %vm3082_vm6 = vcmp.lt.s32.totalorder %v3081_v5, 2  ;;  %vm3083_vm12 = vcmp.eq.s32.totalorder %v3081_v5, 0  ;;  %11081 = vmatmul.mubr.msk.f32.gmra.mxu0 %vm17240_vm4, %v2987_v0  ;;  %vm3086_vm3 = vcmp.eq.s32.totalorder %v3081_v5, 2  ;;  %v6503_v49 = vadd.s32 3, %v17241_v10  ;;  %v17253_v5 = vld [vmem:[#allocation95_spill] sm:$0xff] }
 0x40a   : > { %v3085_v44 = vsel %vm3083_vm12, %v17234_v36, %v3084_v1  ;;  %v3184_v62 = vand.u32 3, %v17241_v10  ;;  %vm6401_vm7 = vcmp.lt.s32.totalorder %v6400_v13, 2  ;;  %vm6402_vm8 = vcmp.eq.s32.totalorder %v6400_v13, 0  ;;  %vm17246_vm12 = vmmov %vm17240_vm4 }
 0x40b   : > { %vm6405_vm2 = vcmp.eq.s32.totalorder %v6400_v13, 2  ;;  %v3088_v51 = vsel %vm3086_vm3, %v3087_v18, %v17232_v59  ;;  %v6404_v4 = vsel %vm6402_vm8, %v17234_v36, %v3084_v1  ;;  %v6504_v22 = vand.u32 3, %v6503_v49  ;;  %vm17249_vm3 = vmmov %vm17242_vm5  ;;  %v17250_v36 = vld [vmem:[#allocation77_spill] sm:$0xff] }
 0x40c   : > { %v6407_v48 = vsel %vm6405_vm2, %v3087_v18, %v17232_v59  ;;  %v3089_v46 = vsel %vm3082_vm6, %v3085_v44, %v3088_v51  ;;  %11712 = vsinq.f32 %v15052_v28  ;;  %vm3186_vm14 = vcmp.eq.s32.totalorder %v3184_v62, 0  ;;  %v17251_v18 = vld [vmem:[#allocation96_spill] sm:$0xff] }
 0x40d   : > { %v6408_v14 = vsel %vm6401_vm7, %v6404_v4, %v6407_v48  ;;  %v3090_v23 = vsel %vm3080_vm15, nan, %v3089_v46  ;;  %vm6505_vm1 = vcmp.lt.s32.totalorder %v6504_v22, 2  ;;  %vm6506_vm9 = vcmp.eq.s32.totalorder %v6504_v22, 0 }
 0x40e   : > { %v6409_v63 = vsel %vm3080_vm15, nan, %v6408_v14  ;;  %11083 = vmatprep.mubr.msk.f32.mxu0 %vm17242_vm5, %v3090_v23  ;;  %vm6509_vm11 = vcmp.eq.s32.totalorder %v6504_v22, 2  ;;  %v6508_v28 = vsel %vm6506_vm9, %v17239_v19, %v3187_v42  ;;  %v3188_v40 = vsel %vm3186_vm14, %v17239_v19, %v3187_v42 }
 0x40f   : > { %11027 = vmatprep.mubr.msk.f32.mxu1 %vm17243_vm10, %v6409_v63  ;;  %v6511_v32 = vsel %vm6509_vm11, %v3190_v20, %v17238_v16  ;;  %vm3189_vm13 = vcmp.eq.s32.totalorder %v3184_v62, 2  ;;  %vm3183_vm15 = vweird.f32 %v17244_v41  ;;  %vm3185_vm6 = vcmp.lt.s32.totalorder %v3184_v62, 2  ;;  %v15300_v62 = vld [vmem:[%s16703_s6 + $0x58] sm:$0xff] }
 0x410   : > { %v6512_v54 = vsel %vm6505_vm1, %v6508_v28, %v6511_v32  ;;  %v3191_v12 = vsel %vm3189_vm13, %v3190_v20, %v17238_v16  ;;  %v3290_v33 = vxor.u32 2147483648, %v14575_v60  ;;  %v6607_v59 = vadd.s32 3, %v17245_v29  ;;  %11156 = vmatprep.subr.mxu0 %v15300_v62  ;;  %v17256_v63 = vld [vmem:[#allocation97_spill] sm:$0xff] }
 0x411   : > { %v6513_v17 = vsel %vm3183_vm15, nan, %v6512_v54  ;;  %v3192_v61 = vsel %vm3185_vm6, %v3188_v40, %v3191_v12  ;;  %vm3286_vm4 = vweird.f32 %v17247_v58  ;;  %v3293_v9 = vxor.u32 2147483648, %v17248_v57  ;;  %vm17254_vm6 = vmmov %vm17249_vm3  ;;  %11157 = vmatpush3.msra.mxu0 %v15300_v62  ;;  %v17257_v54 = vld [vmem:[#allocation86_spill] sm:$0xff]  ;;  %v17258_v12 = vld [vmem:[#allocation101_spill] sm:$0xff] }
 0x412   : > { %11028 = vmatmul.mubr.msk.f32.gmra.mxu1 %vm17246_vm12, %v6513_v17  ;;  %v3193_v1 = vsel %vm3183_vm15, nan, %v3192_v61  ;;  %v3287_v30 = vand.u32 3, %v17245_v29  ;;  %v6608_v52 = vand.u32 3, %v6607_v59  ;;  %vm3389_vm7 = vweird.f32 %v17250_v36  ;;  %vm17255_vm12 = vmmov %vm17249_vm3  ;;  %v17261_v59 = vld [vmem:[#allocation99_spill] sm:$0xff]  ;;  %v17262_v58 = vld [vmem:[#allocation94_spill] sm:$0xff] }
 0x413   : > { %11084 = vmatmul.mubr.msk.f32.gmra.mxu0 %vm17249_vm3, %v3193_v1  ;;  %v3393_v2 = vxor.u32 2147483648, %v17251_v18  ;;  %v6711_v39 = vadd.s32 3, %v17252_v25  ;;  %v3390_v31 = vand.u32 3, %v17252_v25  ;;  %v3396_v27 = vxor.u32 2147483648, %v17253_v5  ;;  %v17264_v25 = vld [vmem:[#allocation81_spill] sm:$0xff] }
 0x414   : > { %vm3288_vm8 = vcmp.lt.s32.totalorder %v3287_v30, 2  ;;  %vm3289_vm2 = vcmp.eq.s32.totalorder %v3287_v30, 0  ;;  %vm3292_vm14 = vcmp.eq.s32.totalorder %v3287_v30, 2  ;;  %vm6609_vm5 = vcmp.lt.s32.totalorder %v6608_v52, 2 }
 0x415   : > { %vm6610_vm1 = vcmp.eq.s32.totalorder %v6608_v52, 0  ;;  %vm6613_vm9 = vcmp.eq.s32.totalorder %v6608_v52, 2  ;;  %v3291_v50 = vsel %vm3289_vm2, %v17248_v57, %v3290_v33  ;;  %v3294_v19 = vsel %vm3292_vm14, %v3293_v9, %v14575_v60  ;;  %vm17259_vm2 = vmmov %vm17254_vm6 }
 0x416   : > { %v6612_v16 = vsel %vm6610_vm1, %v17248_v57, %v3290_v33  ;;  %v6615_v42 = vsel %vm6613_vm9, %v3293_v9, %v14575_v60  ;;  %v6712_v20 = vand.u32 3, %v6711_v39  ;;  %v3295_v13 = vsel %vm3288_vm8, %v3291_v50, %v3294_v19  ;;  %vm17260_vm14 = vmmov %vm17259_vm2 }
 0x417   : > { %v6616_v0 = vsel %vm6609_vm5, %v6612_v16, %v6615_v42  ;;  %vm3391_vm11 = vcmp.lt.s32.totalorder %v3390_v31, 2  ;;  %vm3392_vm10 = vcmp.eq.s32.totalorder %v3390_v31, 0  ;;  %v3296_v10 = vsel %vm3286_vm4, nan, %v3295_v13 }
 0x418   : > { %v6617_v44 = vsel %vm3286_vm4, nan, %v6616_v0  ;;  %vm6713_vm13 = vcmp.lt.s32.totalorder %v6712_v20, 2  ;;  %vm6714_vm15 = vcmp.eq.s32.totalorder %v6712_v20, 0  ;;  %11086 = vmatprep.mubr.msk.f32.mxu0 %vm17255_vm12, %v3296_v10  ;;  %vm6717_vm3 = vcmp.eq.s32.totalorder %v6712_v20, 2  ;;  %v17266_v20 = vld [vmem:[#allocation102_spill] sm:$0xff] }
 0x419   : > { %11030 = vmatprep.mubr.msk.f32.mxu1 %vm17254_vm6, %v6617_v44  ;;  %v6716_v49 = vsel %vm6714_vm15, %v17253_v5, %v3393_v2  ;;  %v3394_v60 = vsel %vm3392_vm10, %v17253_v5, %v3393_v2  ;;  %vm3395_vm8 = vcmp.eq.s32.totalorder %v3390_v31, 2  ;;  %v15302_v51 = vpop.eup %11712  ;;  %v6719_v4 = vsel %vm6717_vm3, %v3396_v27, %v17251_v18  ;;  %v15348_v44 = vld [vmem:[%s16703_s6 + $0x50] sm:$0xff] }
 0x41a   : > { %v3397_v48 = vsel %vm3395_vm8, %v3396_v27, %v17251_v18  ;;  %v3496_v46 = vxor.u32 2147483648, %v14684_v53  ;;  %v3499_v22 = vxor.u32 2147483648, %v14677_v11  ;;  %v6720_v14 = vsel %vm6713_vm13, %v6716_v49, %v6719_v4  ;;  %vm17263_vm13 = vmmov %vm17259_vm2  ;;  %11158 = vmatprep.subr.mxu0 %v15348_v44 }
 0x41b   : > { %v3398_v23 = vsel %vm3391_vm11, %v3394_v60, %v3397_v48  ;;  %v6815_v28 = vadd.s32 3, %v17256_v63  ;;  %v3493_v32 = vand.u32 3, %v17256_v63  ;;  %v6721_v40 = vsel %vm3389_vm7, nan, %v6720_v14  ;;  %vm17265_vm8 = vmmov %vm17259_vm2  ;;  %11159 = vmatpush3.msra.mxu0 %v15348_v44 }
 0x41c   : > { %v3399_v41 = vsel %vm3389_vm7, nan, %v3398_v23  ;;  %vm3492_vm4 = vweird.f32 %v17257_v54  ;;  %v3599_v17 = vxor.u32 2147483648, %v17258_v12  ;;  %11031 = vmatmul.mubr.msk.f32.gmra.mxu1 %vm17259_vm2, %v6721_v40  ;;  %v3602_v1 = vxor.u32 2147483648, %v17261_v59 }
 0x41d   : > { %11087 = vmatmul.mubr.msk.f32.gmra.mxu0 %vm17260_vm14, %v3399_v41  ;;  %v6816_v61 = vand.u32 3, %v6815_v28  ;;  %vm3494_vm5 = vcmp.lt.s32.totalorder %v3493_v32, 2  ;;  %vm3495_vm1 = vcmp.eq.s32.totalorder %v3493_v32, 0  ;;  %vm3498_vm9 = vcmp.eq.s32.totalorder %v3493_v32, 2 }
 0x41e   : > { %v3497_v33 = vsel %vm3495_vm1, %v14677_v11, %v3496_v46  ;;  %v3500_v29 = vsel %vm3498_vm9, %v3499_v22, %v14684_v53  ;;  %v6919_v57 = vadd.s32 3, %v17262_v58  ;;  %vm3595_vm15 = vweird.f32 %v17264_v25 }
 0x41f   : > { %vm6817_vm7 = vcmp.lt.s32.totalorder %v6816_v61, 2  ;;  %vm6818_vm11 = vcmp.eq.s32.totalorder %v6816_v61, 0  ;;  %vm6821_vm10 = vcmp.eq.s32.totalorder %v6816_v61, 2  ;;  %v3501_v9 = vsel %vm3494_vm5, %v3497_v33, %v3500_v29 }
 0x420   : > { %v6820_v30 = vsel %vm6818_vm11, %v14677_v11, %v3496_v46  ;;  %v6823_v52 = vsel %vm6821_vm10, %v3499_v22, %v14684_v53  ;;  %v3502_v36 = vsel %vm3492_vm4, nan, %v3501_v9  ;;  %v6920_v18 = vand.u32 3, %v6919_v57  ;;  %v17269_v22 = vld [vmem:[#allocation100_spill] sm:$0xff]  ;;  %v15383_v57 = vld [vmem:[%s16703_s6 + $0x48] sm:$0xff] }
 0x421   : > { %v6824_v2 = vsel %vm6817_vm7, %v6820_v30, %v6823_v52  ;;  %11089 = vmatprep.mubr.msk.f32.mxu0 %vm17263_vm13, %v3502_v36  ;;  %v3596_v39 = vand.u32 3, %v17262_v58  ;;  %v3702_v31 = vxor.u32 2147483648, %v14876_v47  ;;  %v3705_v16 = vxor.u32 2147483648, %v14866_v3  ;;  %11160 = vmatprep.subr.mxu0 %v15383_v57 }
 0x422   : > { %v6825_v5 = vsel %vm3492_vm4, nan, %v6824_v2  ;;  %vm6921_vm6 = vcmp.lt.s32.totalorder %v6920_v18, 2  ;;  %vm6922_vm12 = vcmp.eq.s32.totalorder %v6920_v18, 0  ;;  %vm6925_vm3 = vcmp.eq.s32.totalorder %v6920_v18, 2  ;;  %vm17267_vm4 = vmmov %vm17265_vm8  ;;  %11161 = vmatpush3.msra.mxu0 %v15383_v57 }
 0x423   : > { %11033 = vmatprep.mubr.msk.f32.mxu1 %vm17265_vm8, %v6825_v5  ;;  %v6924_v11 = vsel %vm6922_vm12, %v17261_v59, %v3599_v17  ;;  %v6927_v53 = vsel %vm6925_vm3, %v3602_v1, %v17258_v12  ;;  %vm3597_vm2 = vcmp.lt.s32.totalorder %v3596_v39, 2  ;;  %vm3598_vm14 = vcmp.eq.s32.totalorder %v3596_v39, 0  ;;  %vm17268_vm11 = vmmov %vm17267_vm4 }
 0x424   : > { %v6928_v27 = vsel %vm6921_vm6, %v6924_v11, %v6927_v53  ;;  %v3600_v50 = vsel %vm3598_vm14, %v17261_v59, %v3599_v17  ;;  %vm3601_vm5 = vcmp.eq.s32.totalorder %v3596_v39, 2  ;;  %v7023_v0 = vadd.s32 3, %v17266_v20  ;;  %vm17270_vm3 = vmmov %vm17267_vm4 }
 0x425   : > { %v6929_v42 = vsel %vm3595_vm15, nan, %v6928_v27  ;;  %v3603_v19 = vsel %vm3601_vm5, %v3602_v1, %v17258_v12  ;;  %v3699_v13 = vand.u32 3, %v17266_v20  ;;  %vm3698_vm1 = vweird.f32 %v14410_v24  ;;  %vm17271_vm5 = vmmov %vm17270_vm3 }
 0x426   : > { %11034 = vmatmul.mubr.msk.f32.gmra.mxu1 %vm17267_vm4, %v6929_v42  ;;  %v3604_v10 = vsel %vm3597_vm2, %v3600_v50, %v3603_v19  ;;  %v3805_v49 = vxor.u32 2147483648, %v14815_v21  ;;  %v3808_v60 = vxor.u32 2147483648, %v14766_v6  ;;  %v7024_v48 = vand.u32 3, %v7023_v0  ;;  %v8303_v42 = vld [vmem:[%s16703_s6 + $0x40] sm:$0xff] }
 0x427   : > { %v3605_v4 = vsel %vm3595_vm15, nan, %v3604_v10  ;;  %vm3700_vm9 = vcmp.lt.s32.totalorder %v3699_v13, 2  ;;  %vm3701_vm7 = vcmp.eq.s32.totalorder %v3699_v13, 0  ;;  %vm3704_vm10 = vcmp.eq.s32.totalorder %v3699_v13, 2  ;;  %11162 = vmatprep.subr.mxu0 %v8303_v42  ;;  %v11842_v13 = vld [vmem:[%s11964_s21] sm:$0xff]  ;;  %v8302_v10 = vld [vmem:[%s16703_s6 + $0x38] sm:$0xff] }
 0x428   : > { %11090 = vmatmul.mubr.msk.f32.gmra.mxu0 %vm17268_vm11, %v3605_v4  ;;  %v3703_v46 = vsel %vm3701_vm7, %v14866_v3, %v3702_v31  ;;  %v7127_v14 = vadd.s32 3, %v17269_v22  ;;  %v3802_v23 = vand.u32 3, %v17269_v22  ;;  %vm7025_vm13 = vcmp.lt.s32.totalorder %v7024_v48, 2  ;;  %v11849_v4 = vld [vmem:[%s11964_s21 + $0x38] sm:$0xff]  ;;  %v8300_v22 = vld [vmem:[%s16703_s6 + $0x28] sm:$0xff] }
 0x429   : > { %vm7026_vm6 = vcmp.eq.s32.totalorder %v7024_v48, 0  ;;  %vm7029_vm12 = vcmp.eq.s32.totalorder %v7024_v48, 2  ;;  %v3706_v63 = vsel %vm3704_vm10, %v3705_v16, %v14876_v47  ;;  %v3901_v54 = vsel %vm15018_vm0, 0, %v14926_v45  ;;  %11163 = vmatpush3.msra.mxu0 %v8303_v42  ;;  %v11852_v48 = vld [vmem:[%s11964_s21 + $0x50] sm:$0xff] }
 0x42a   : > { %v7028_v28 = vsel %vm7026_vm6, %v14866_v3, %v3702_v31  ;;  %v7031_v32 = vsel %vm7029_vm12, %v3705_v16, %v14876_v47  ;;  %v3707_v40 = vsel %vm3700_vm9, %v3703_v46, %v3706_v63  ;;  %v7128_v41 = vand.u32 3, %v7127_v14  ;;  %11164 = vmatprep.subr.mxu0 %v8302_v10  ;;  %v11854_v46 = vld [vmem:[%s11964_s21 + $0x60] sm:$0xff]  ;;  %v11855_v14 = vld [vmem:[%s11964_s21 + $0x68] sm:$0xff]  ;;  %v11857_v63 = vld [vmem:[%s11964_s21 + $0x78] sm:$0xff] }
 0x42b   : > { %v7032_v12 = vsel %vm7025_vm13, %v7028_v28, %v7031_v32  ;;  %v3708_v17 = vsel %vm3698_vm1, nan, %v3707_v40  ;;  %vm3804_vm15 = vcmp.eq.s32.totalorder %v3802_v23, 0  ;;  %vm3807_vm0 = vcmp.eq.s32.totalorder %v3802_v23, 2  ;;  %11165 = vmatpush3.msra.mxu0 %v8302_v10  ;;  %v11858_v28 = vld [vmem:[%s11964_s21 + $0x80] sm:$0xff]  ;;  %v11859_v32 = vld [vmem:[%s11964_s21 + $0x88] sm:$0xff]  ;;  %v11860_v40 = vld [vmem:[%s11964_s21 + $0x90] sm:$0xff] }
 0x42c   : > { %v7033_v61 = vsel %vm3698_vm1, nan, %v7032_v12  ;;  %11092 = vmatprep.mubr.msk.f32.mxu0 %vm17270_vm3, %v3708_v17  ;;  %vm7129_vm8 = vcmp.lt.s32.totalorder %v7128_v41, 2  ;;  %vm7130_vm2 = vcmp.eq.s32.totalorder %v7128_v41, 0  ;;  %vm7133_vm14 = vcmp.eq.s32.totalorder %v7128_v41, 2  ;;  %vm17273_vm1 = vmmov %vm17270_vm3  ;;  %v8299_v41 = vld [vmem:[%s16703_s6 + $0x20] sm:$0xff]  ;;  %v11863_v17 = vld [vmem:[%s11964_s21 + $0xa8] sm:$0xff] }
 0x42d   : > { %11036 = vmatprep.mubr.msk.f32.mxu1 %vm17271_vm5, %v7033_v61  ;;  %v7132_v3 = vsel %vm7130_vm2, %v14766_v6, %v3805_v49  ;;  %v7135_v47 = vsel %vm7133_vm14, %v3808_v60, %v14815_v21  ;;  %v3806_v45 = vsel %vm3804_vm15, %v14766_v6, %v3805_v49  ;;  %vm3801_vm4 = vweird.f32 %v17272_v56  ;;  %vm17274_vm7 = vmmov %vm17273_vm1  ;;  %v11845_v49 = vld [vmem:[%s11964_s21 + $0x18] sm:$0xff]  ;;  %v11862_v12 = vld [vmem:[%s11964_s21 + $0xa0] sm:$0xff] }
 0x42e   : > { %v7136_v33 = vsel %vm7129_vm8, %v7132_v3, %v7135_v47  ;;  %vm3803_vm9 = vcmp.lt.s32.totalorder %v3802_v23, 2  ;;  %v3809_v24 = vsel %vm3807_vm0, %v3808_v60, %v14815_v21  ;;  %v3908_v1 = vxor.u32 2147483648, %v15302_v51  ;;  %vm17275_vm14 = vmmov %vm17273_vm1  ;;  %v11846_v60 = vld [vmem:[%s11964_s21 + $0x20] sm:$0xff]  ;;  %v11856_v23 = vld [vmem:[%s11964_s21 + $0x70] sm:$0xff] }
 0x42f   : > { %v7137_v29 = vsel %vm3801_vm4, nan, %v7136_v33  ;;  %v3810_v59 = vsel %vm3803_vm9, %v3806_v45, %v3809_v24  ;;  %v7231_v58 = vadd.s32 3, %v3901_v54  ;;  %v3911_v9 = vxor.u32 2147483648, %v15187_v26  ;;  %vm17276_vm5 = vmmov %vm17273_vm1  ;;  %v11864_v61 = vld [vmem:[%s11964_s21 + $0xb0] sm:$0xff]  ;;  %v11865_v3 = vld [vmem:[%s11964_s21 + $0xb8] sm:$0xff] }
 0x430   : > { %11037 = vmatmul.mubr.msk.f32.gmra.mxu1 %vm17273_vm1, %v7137_v29  ;;  %v3811_v6 = vsel %vm3801_vm4, nan, %v3810_v59  ;;  %v3905_v30 = vand.u32 3, %v3901_v54  ;;  %v4011_v52 = vxor.u32 2147483648, %v15096_v15  ;;  %v4014_v36 = vxor.u32 2147483648, %v14964_v37  ;;  %v11861_v54 = vld [vmem:[%s11964_s21 + $0x98] sm:$0xff]  ;;  %v11866_v45 = vld [vmem:[%s11964_s21 + $0xc0] sm:$0xff] }
 0x431   : > { %11093 = vmatmul.mubr.msk.f32.gmra.mxu0 %vm17274_vm7, %v3811_v6  ;;  %v7232_v21 = vand.u32 3, %v7231_v58  ;;  %v7335_v18 = vadd.s32 3, %v14819_v55  ;;  %v4008_v2 = vand.u32 3, %v14819_v55  ;;  %vm3904_vm3 = vweird.f32 %v14589_v8  ;;  %v8298_v47 = vld [vmem:[%s16703_s6 + $0x18] sm:$0xff]  ;;  %v11867_v56 = vld [vmem:[%s11964_s21 + $0xc8] sm:$0xff]  ;;  %v11868_v33 = vld [vmem:[%s11964_s21 + $0xd0] sm:$0xff] }
 0x432   : > { %vm3906_vm11 = vcmp.lt.s32.totalorder %v3905_v30, 2  ;;  %vm3907_vm10 = vcmp.eq.s32.totalorder %v3905_v30, 0  ;;  %vm3910_vm13 = vcmp.eq.s32.totalorder %v3905_v30, 2  ;;  %vm4007_vm7 = vweird.f32 %v14497_v34  ;;  %v11844_v34 = vld [vmem:[%s11964_s21 + $0x10] sm:$0xff]  ;;  %v11869_v24 = vld [vmem:[%s11964_s21 + $0xd8] sm:$0xff]  ;;  %v11870_v29 = vld [vmem:[%s11964_s21 + $0xe0] sm:$0xff] }
 0x433   : > { %vm7233_vm6 = vcmp.lt.s32.totalorder %v7232_v21, 2  ;;  %vm7234_vm12 = vcmp.eq.s32.totalorder %v7232_v21, 0  ;;  %vm7237_vm15 = vcmp.eq.s32.totalorder %v7232_v21, 2  ;;  %v3909_v25 = vsel %vm3907_vm10, %v15187_v26, %v3908_v1  ;;  %vm17278_vm10 = vmmov %vm17276_vm5  ;;  %v8297_v59 = vld [vmem:[%s16703_s6 + $0x10] sm:$0xff]  ;;  %v8296_v6 = vld [vmem:[%s16703_s6 + $0x8] sm:$0xff] }
 0x434   : > { %v7236_v39 = vsel %vm7234_vm12, %v15187_v26, %v3908_v1  ;;  %v7239_v31 = vsel %vm7237_vm15, %v3911_v9, %v15302_v51  ;;  %v3912_v5 = vsel %vm3910_vm13, %v3911_v9, %v15302_v51  ;;  %v7336_v11 = vand.u32 3, %v7335_v18  ;;  %v11871_v1 = vld [vmem:[%s11964_s21 + $0xe8] sm:$0xff]  ;;  %v11872_v58 = vld [vmem:[%s11964_s21 + $0xf0] sm:$0xff]  ;;  %v8295_v30 = vld [vmem:[%s16703_s6] sm:$0xff] }
 0x435   : > { %v7240_v53 = vsel %vm7233_vm6, %v7236_v39, %v7239_v31  ;;  %v3913_v27 = vsel %vm3906_vm11, %v3909_v25, %v3912_v5  ;;  %vm4010_vm2 = vcmp.eq.s32.totalorder %v4008_v2, 0  ;;  %vm4013_vm4 = vcmp.eq.s32.totalorder %v4008_v2, 2  ;;  %vm17277_vm11 = vmmov %vm17276_vm5 }
 0x436   : > { %v7241_v50 = vsel %vm3904_vm3, nan, %v7240_v53  ;;  %v3914_v55 = vsel %vm3904_vm3, nan, %v3913_v27  ;;  %vm7338_vm8 = vcmp.eq.s32.totalorder %v7336_v11, 0  ;;  %vm7341_vm0 = vcmp.eq.s32.totalorder %v7336_v11, 2 }
 0x437   : > { %11039 = vmatprep.mubr.msk.f32.mxu1 %vm17275_vm14, %v7241_v50  ;;  %11095 = vmatprep.mubr.msk.f32.mxu0 %vm17276_vm5, %v3914_v55  ;;  %v7340_v16 = vsel %vm7338_vm8, %v14964_v37, %v4011_v52  ;;  %v4012_v26 = vsel %vm4010_vm2, %v14964_v37, %v4011_v52  ;;  %vm7337_vm9 = vcmp.lt.s32.totalorder %v7336_v11, 2  ;;  %v7343_v8 = vsel %vm7341_vm0, %v4014_v36, %v15096_v15 }
 0x438   : > { %vm4009_vm1 = vcmp.lt.s32.totalorder %v4008_v2, 2  ;;  %v4015_v51 = vsel %vm4013_vm4, %v4014_v36, %v15096_v15  ;;  %v7344_v19 = vsel %vm7337_vm9, %v7340_v16, %v7343_v8  ;;  %vm17279_vm13 = vcmask 31744   ;;  %v11843_v15 = vld [vmem:[%s11964_s21 + $0x8] sm:$0xff] }
 0x439   : > { %v4016_v20 = vsel %vm4009_vm1, %v4012_v26, %v4015_v51  ;;  %v7345_v37 = vsel %vm4007_vm7, nan, %v7344_v19  ;;  %vm17280_vm6 = vmmov %vm17279_vm13 }
 0x43a   : > { %v4017_v0 = vsel %vm4007_vm7, nan, %v4016_v20  ;;  %11040 = vmatmul.mubr.msk.f32.gmra.mxu1 %vm17277_vm11, %v7345_v37  ;;  %vm17281_vm12 = vmmov %vm17280_vm6 }
 0x43b   : > { %11096 = vmatmul.mubr.msk.f32.gmra.mxu0 %vm17278_vm10, %v4017_v0  ;;  %11100 = vmatprep.mubr.msk.f32.mxu1 %vm17279_vm13, %v11842_v13  ;;  %vm17282_vm15 = vmmov %vm17280_vm6 }
 0x43c   : > { %vm17283_vm3 = vmmov %vm17280_vm6 }
 0x43d   : > { %vm17284_vm8 = vmmov %vm17283_vm3 }
 0x43e   : > { %11101 = vmatmul.mubr.msk.f32.vlgmr.msra.gmra.mxu1 %vm17280_vm6, %v11843_v15  ;;  %vm17285_vm2 = vmmov %vm17283_vm3 }
 0x43f   : > { %11103 = vmatprep.mubr.msk.f32.mxu1 %vm17281_vm12, %v11844_v34  ;;  %11229 = vmatpush3.msra.mxu1 %v15180_v38  ;;  %v11847_v38 = vld [vmem:[%s11964_s21 + $0x28] sm:$0xff]  ;;  %vm17286_vm14 = vmmov %vm17285_vm2 }
 0x440   : > { %11230 = vmatprep.subr.mxu1 %v15185_v35  ;;  %vm17287_vm5 = vmmov %vm17285_vm2 }
 0x441   : > { %11231 = vmatpush3.msra.mxu1 %v15185_v35  ;;  %v11848_v35 = vld [vmem:[%s11964_s21 + $0x30] sm:$0xff]  ;;  %vm17288_vm0 = vmmov %vm17285_vm2 }
 0x442   : > { %11104 = vmatmul.mubr.msk.f32.gmra.mxu1 %vm17282_vm15, %v11845_v49  ;;  %11232 = vmatprep.subr.mxu1 %v15225_v43  ;;  %vm17289_vm4 = vmmov %vm17288_vm0 }
 0x443   : > { %11106 = vmatprep.mubr.msk.f32.mxu1 %vm17283_vm3, %v11846_v60  ;;  %11233 = vmatpush3.msra.mxu1 %v15225_v43  ;;  %v11850_v43 = vld [vmem:[%s11964_s21 + $0x40] sm:$0xff]  ;;  %vm17290_vm9 = vmmov %vm17288_vm0 }
 0x444   : > { %11234 = vmatprep.subr.mxu1 %v15263_v7  ;;  %vm17291_vm1 = vmmov %vm17288_vm0 }
 0x445   : > { %11235 = vmatpush3.msra.mxu1 %v15263_v7  ;;  %v8301_v7 = vld [vmem:[%s16703_s6 + $0x30] sm:$0xff]  ;;  %vm17292_vm7 = vmmov %vm17288_vm0 }
 0x446   : > { %11107 = vmatmul.mubr.msk.f32.gmra.mxu1 %vm17284_vm8, %v11847_v38  ;;  %11236 = vmatprep.subr.mxu1 %v15300_v62  ;;  %vm17293_vm11 = vmmov %vm17288_vm0 }
 0x447   : > { %11109 = vmatprep.mubr.msk.f32.mxu1 %vm17285_vm2, %v11848_v35  ;;  %11237 = vmatpush3.msra.mxu1 %v15300_v62  ;;  %v11851_v62 = vld [vmem:[%s11964_s21 + $0x48] sm:$0xff]  ;;  %vm17294_vm10 = vmmov %vm17288_vm0 }
 0x448   : > { %11238 = vmatprep.subr.mxu1 %v15348_v44  ;;  %11166 = vmatprep.subr.mxu0 %v8301_v7  ;;  %vm17295_vm13 = vmmov %vm17288_vm0 }
 0x449   : > { %11239 = vmatpush3.msra.mxu1 %v15348_v44  ;;  %11167 = vmatpush3.msra.mxu0 %v8301_v7  ;;  %v11853_v44 = vld [vmem:[%s11964_s21 + $0x58] sm:$0xff]  ;;  %vm17296_vm6 = vmmov %vm17288_vm0 }
 0x44a   : > { %11110 = vmatmul.mubr.msk.f32.gmra.mxu1 %vm17286_vm14, %v11849_v4  ;;  %11240 = vmatprep.subr.mxu1 %v15383_v57  ;;  %vm17297_vm12 = vmmov %vm17288_vm0 }
 0x44b   : > { %11112 = vmatprep.mubr.msk.f32.mxu1 %vm17287_vm5, %v11850_v43  ;;  %11241 = vmatpush3.msra.mxu1 %v15383_v57  ;;  %vm17298_vm15 = vmmov %vm17288_vm0  ;;  %v11873_v57 = vld [vmem:[%s11964_s21 + $0xf8] sm:$0xff] }
 0x44c   : > { %11242 = vmatprep.subr.mxu1 %v8303_v42  ;;  %11168 = vmatprep.subr.mxu0 %v8300_v22  ;;  %vm17299_vm3 = vmmov %vm17288_vm0 }
 0x44d   : > { %11243 = vmatpush3.msra.mxu1 %v8303_v42  ;;  %11169 = vmatpush3.msra.mxu0 %v8300_v22  ;;  %vm17300_vm8 = vmmov %vm17288_vm0 }
 0x44e   : > { %11113 = vmatmul.mubr.msk.f32.gmra.mxu1 %vm17288_vm0, %v11851_v62  ;;  %11244 = vmatprep.subr.mxu1 %v8302_v10  ;;  %vm17301_vm2 = vmmov %vm17288_vm0 }
 0x44f   : > { %11115 = vmatprep.mubr.msk.f32.mxu1 %vm17289_vm4, %v11852_v48  ;;  %11245 = vmatpush3.msra.mxu1 %v8302_v10  ;;  %vm17302_vm14 = vmmov %vm17288_vm0 }
 0x450   : > { %11246 = vmatprep.subr.mxu1 %v8301_v7  ;;  %11170 = vmatprep.subr.mxu0 %v8299_v41  ;;  %vm17303_vm5 = vmmov %vm17288_vm0 }
 0x451   : > { %11247 = vmatpush3.msra.mxu1 %v8301_v7  ;;  %11171 = vmatpush3.msra.mxu0 %v8299_v41  ;;  %vm17304_vm4 = vmmov %vm17288_vm0 }
 0x452   : > { %11116 = vmatmul.mubr.msk.f32.gmra.mxu1 %vm17290_vm9, %v11853_v44  ;;  %11248 = vmatprep.subr.mxu1 %v8300_v22  ;;  %vm17305_vm9 = vmmov %vm17288_vm0  ;;  %v11052_v16 = vpop.f32.mrf.mxu0 }
 0x453   : > { %11118 = vmatprep.mubr.msk.f32.mxu1 %vm17291_vm1, %v11854_v46  ;;  %11249 = vmatpush3.msra.mxu1 %v8300_v22  ;;  %vm17306_vm1 = vmmov %vm17288_vm0 }
 0x454   : > { %11250 = vmatprep.subr.mxu1 %v8299_v41  ;;  %11172 = vmatprep.subr.mxu0 %v8298_v47  ;;  %v7838_v8 = vpop.f32.mrf.mxu0 }
 0x455   : > { %11251 = vmatpush3.msra.mxu1 %v8299_v41  ;;  %11173 = vmatpush3.msra.mxu0 %v8298_v47 }
 0x456   : > { %11119 = vmatmul.mubr.msk.f32.gmra.mxu1 %vm17292_vm7, %v11855_v14  ;;  %11252 = vmatprep.subr.mxu1 %v8298_v47  ;;  %vm17307_vm7 = vmmov %vm17288_vm0 }
 0x457   : > { %11121 = vmatprep.mubr.msk.f32.mxu1 %vm17293_vm11, %v11856_v23  ;;  %11253 = vmatpush3.msra.mxu1 %v8298_v47  ;;  %vm17308_vm11 = vmmov %vm17288_vm0  ;;  %v10996_v9 = vpop.f32.mrf.mxu1 }
 0x458   : > { %11174 = vmatprep.subr.mxu0 %v8297_v59  ;;  %11254 = vmatprep.subr.mxu1 %v8297_v59 }
 0x459   : > { %11175 = vmatpush3.msra.mxu0 %v8297_v59  ;;  %11255 = vmatpush3.msra.mxu1 %v8297_v59  ;;  %v7517_v21 = vpop.f32.mrf.mxu1 }
 0x45a   : > { %11122 = vmatmul.mubr.msk.f32.gmra.mxu1 %vm17294_vm10, %v11857_v63  ;;  %vm17309_vm10 = vmmov %vm17288_vm0  ;;  %11176 = vmatprep.subr.mxu0 %v8296_v6 }
 0x45b   : > { %11124 = vmatprep.mubr.msk.f32.mxu1 %vm17295_vm13, %v11858_v28  ;;  %11256 = vmatprep.subr.mxu1 %v8296_v6  ;;  %vm17310_vm13 = vcmask 261120  }
 0x45c   : > { %11177 = vmatpush3.msra.mxu0 %v8296_v6  ;;  %11257 = vmatpush3.msra.mxu1 %v8296_v6 }
 0x45d   : > { %11178 = vmatprep.subr.mxu0 %v8295_v30  ;;  %11258 = vmatprep.subr.mxu1 %v8295_v30 }
 0x45e   : > { %11125 = vmatmul.mubr.msk.f32.gmra.mxu1 %vm17296_vm6, %v11859_v32  ;;  %11179 = vmatpush3.msra.mxu0 %v8295_v30  ;;  %vm17311_vm6 = vmmov %vm17310_vm13 }
 0x45f   : > { %11127 = vmatprep.mubr.msk.f32.mxu1 %vm17297_vm12, %v11860_v40  ;;  %11259 = vmatpush3.msra.mxu1 %v8295_v30  ;;  %vm17312_vm12 = vmmov %vm17311_vm6 }
 0x462   : > { %11128 = vmatmul.mubr.msk.f32.gmra.mxu1 %vm17298_vm15, %v11861_v54  ;;  %vm17313_vm15 = vmmov %vm17311_vm6 }
 0x463   : > { %11130 = vmatprep.mubr.msk.f32.mxu1 %vm17299_vm3, %v11862_v12  ;;  %vm17314_vm3 = vmmov %vm17311_vm6 }
 0x464   : > { %v11055_v42 = vpop.f32.mrf.mxu0 }
 0x466   : > { %11131 = vmatmul.mubr.msk.f32.gmra.mxu1 %vm17300_vm8, %v11863_v17  ;;  %v10999_v52 = vpop.f32.mrf.mxu1  ;;  %v7848_v20 = vpop.f32.mrf.mxu0  ;;  %v7844_v17 = vadd.f32 %v11052_v16, %v10996_v9  ;;  %vm17315_vm8 = vmmov %vm17314_vm3 }
 0x467   : > { %11133 = vmatprep.mubr.msk.f32.mxu1 %vm17301_vm2, %v11864_v61  ;;  %vm17316_vm2 = vmmov %vm17314_vm3 }
 0x468   : > { %v7527_v36 = vpop.f32.mrf.mxu1 }
 0x46a   : > { %11134 = vmatmul.mubr.msk.f32.gmra.mxu1 %vm17302_vm14, %v11865_v3  ;;  %v7839_v3 = vadd.f32 %v7838_v8, %v7517_v21  ;;  %vm17317_vm14 = vmmov %vm17316_vm2 }
 0x46b   : > { %11136 = vmatprep.mubr.msk.f32.mxu1 %vm17303_vm5, %v11866_v45  ;;  %vm17318_vm5 = vmmov %vm17316_vm2 }
 0x46e   : > { %11137 = vmatmul.mubr.msk.f32.gmra.mxu1 %vm17288_vm0, %v11867_v56  ;;  %vm17319_vm0 = vmmov %vm17316_vm2 }
 0x46f   : > { %11139 = vmatprep.mubr.msk.f32.mxu1 %vm17304_vm4, %v11868_v33  ;;  %v15587_v33 = vld [vmem:[%s16702_s5] ss:$0 sm:$0xff]  ;;  %vm17320_vm4 = vmmov %vm17319_vm0 }
 0x471   : > { %v15512_v18 = vpop.f32.mrf.mxu1 }
 0x472   : > { %11140 = vmatmul.mubr.msk.f32.gmra.mxu1 %vm17305_vm9, %v11869_v24  ;;  %vm17321_vm9 = vmmov %vm17319_vm0 }
 0x473   : > { %11142 = vmatprep.mubr.msk.f32.mxu1 %vm17306_vm1, %v11870_v29  ;;  %v15514_v2 = vpop.f32.mrf.mxu1  ;;  %v11058_v0 = vpop.f32.mrf.mxu0  ;;  %v7854_v29 = vadd.f32 %v11055_v42, %v10999_v52  ;;  %vm17322_vm1 = vmmov %vm17319_vm0 }
 0x474   : > { %v7864_v16 = vadd.f32 %v11058_v0, %v15512_v18 }
 0x475   : > { %v7858_v15 = vpop.f32.mrf.mxu0 }
 0x476   : > { %11143 = vmatmul.mubr.msk.f32.gmra.mxu1 %vm17307_vm7, %v11871_v1  ;;  %v7849_v1 = vadd.f32 %v7848_v20, %v7527_v36  ;;  %v7859_v52 = vadd.f32 %v7858_v15, %v15514_v2  ;;  %vm17323_vm7 = vmmov %vm17319_vm0 }
 0x477   : > { %11145 = vmatprep.mubr.msk.f32.mxu1 %vm17308_vm11, %v11872_v58  ;;  %vm17324_vm11 = vmmov %vm17319_vm0 }
 0x47a   : > { %11146 = vmatmul.mubr.msk.f32.gmra.mxu1 %vm17309_vm10, %v11873_v57  ;;  %vm17325_vm10 = vmmov %vm17319_vm0 }
 0x47d   : > { %v15516_v25 = vpop.f32.mrf.mxu1  ;;  %v11061_v10 = vpop.f32.mrf.mxu0 }
 0x47e   : > { %v7874_v18 = vadd.f32 %v11061_v10, %v15516_v25 }
 0x47f   : > { %v15518_v39 = vpop.f32.mrf.mxu1  ;;  %v7868_v60 = vpop.f32.mrf.mxu0 }
 0x480   : > { %v7869_v2 = vadd.f32 %v7868_v60, %v15518_v39 }
 0x488   : > { %v15520_v31 = vpop.f32.mrf.mxu1 }
 0x489   : > { %v11064_v35 = vpop.f32.mrf.mxu0 }
 0x48a   : > { %v15522_v5 = vpop.f32.mrf.mxu1  ;;  %v7884_v25 = vadd.f32 %v11064_v35, %v15520_v31 }
 0x48b   : > { %v7878_v43 = vpop.f32.mrf.mxu0 }
 0x48c   : > { %v7879_v39 = vadd.f32 %v7878_v43, %v15522_v5 }
 0x492   : > { %v15524_v11 = vpop.f32.mrf.mxu1 }
 0x494   : > { %v15526_v53 = vpop.f32.mrf.mxu1  ;;  %v15554_v62 = vpop.f32.mrf.mxu0 }
 0x495   : > { %v7894_v31 = vadd.f32 %v15554_v62, %v15524_v11 }
 0x496   : > { %v15558_v44 = vpop.f32.mrf.mxu0 }
 0x497   : > { %v7889_v5 = vadd.f32 %v15558_v44, %v15526_v53 }
 0x49e   : > { %v15528_v27 = vpop.f32.mrf.mxu1 }
 0x4a0   : > { %v15530_v50 = vpop.f32.mrf.mxu1 }
 0x4a1   : > { %v15562_v22 = vpop.f32.mrf.mxu0 }
 0x4a2   : > { %v7904_v11 = vadd.f32 %v15562_v22, %v15528_v27 }
 0x4a3   : > { %v15566_v23 = vpop.f32.mrf.mxu0 }
 0x4a4   : > { %v7899_v53 = vadd.f32 %v15566_v23, %v15530_v50 }
 0x4aa   : > { %v15532_v55 = vpop.f32.mrf.mxu1 }
 0x4ac   : > { %v15534_v26 = vpop.f32.mrf.mxu1  ;;  %v15570_v28 = vpop.f32.mrf.mxu0 }
 0x4ad   : > { %v7914_v27 = vadd.f32 %v15570_v28, %v15532_v55 }
 0x4ae   : > { %v15574_v40 = vpop.f32.mrf.mxu0 }
 0x4af   : > { %v7909_v50 = vadd.f32 %v15574_v40, %v15534_v26 }
 0x4b4   : > { %v15536_v51 = vpop.f32.mrf.mxu1  ;;  %v15578_v54 = vpop.f32.mrf.mxu0 }
 0x4b5   : > { %v7924_v55 = vadd.f32 %v15578_v54, %v15536_v51 }
 0x4b6   : > { %v15538_v19 = vpop.f32.mrf.mxu1  ;;  %v15582_v47 = vpop.f32.mrf.mxu0 }
 0x4b7   : > { %v7919_v26 = vadd.f32 %v15582_v47, %v15538_v19 }
 0x4be   : > { %v15540_v37 = vpop.f32.mrf.mxu1 }
 0x4bf   : > { %v15592_v57 = vpop.f32.mrf.mxu0 }
 0x4c0   : > { %v15542_v13 = vpop.f32.mrf.mxu1  ;;  %v7934_v51 = vadd.f32 %v15592_v57, %v15540_v37 }
 0x4c1   : > { %v15604_v42 = vpop.f32.mrf.mxu0 }
 0x4c2   : > { %v7929_v19 = vadd.f32 %v15604_v42, %v15542_v13 }
 0x4c8   : > { %v15544_v34 = vpop.f32.mrf.mxu1 }
 0x4ca   : > { %v15546_v49 = vpop.f32.mrf.mxu1 }
 0x4d2   : > { %v15548_v38 = vpop.f32.mrf.mxu1 }
 0x4d4   : > { %v15550_v4 = vpop.f32.mrf.mxu1 }
 0x4dc   : > { %v15552_v7 = vpop.f32.mrf.mxu1 }
 0x4de   : > { %v15556_v48 = vpop.f32.mrf.mxu1 }
 0x4e6   : > { %v15560_v46 = vpop.f32.mrf.mxu1 }
 0x4e8   : > { %v15564_v14 = vpop.f32.mrf.mxu1 }
 0x4f0   : > { %v15568_v63 = vpop.f32.mrf.mxu1 }
 0x4f2   : > { %v15572_v32 = vpop.f32.mrf.mxu1 }
 0x4fa   : > { %v15576_v41 = vpop.f32.mrf.mxu1 }
 0x4fc   : > { %v15580_v12 = vpop.f32.mrf.mxu1 }
 0x4fe   : > { %v11102_v61 = vpop.f32.mrf.mxu1 }
 0x4ff   : > { %v8227_v45 = vadd.f32 %v11102_v61, %v7844_v17 }
 0x500   : > { %v8067_v56 = vpop.f32.mrf.mxu1 }
 0x501   : > { %v8226_v24 = vadd.f32 %v8067_v56, %v7839_v3  ;;  %v15595_v6 = vadd.f32 %v15587_v33, %v8227_v45  ;;  %v15616_v45 = vpop.f32.mrf.mxu0 }
 0x502   : > { %v11105_v59 = vpop.f32.mrf.mxu1  ;;  %v7944_v37 = vadd.f32 %v15616_v45, %v15544_v34 }
 0x503   : > { %v15590_v58 = vadd.f32 %v15587_v33, %v8226_v24  ;;  %v8229_v9 = vadd.f32 %v11105_v59, %v7854_v29 }
 0x504   : > { %v8077_v30 = vpop.f32.mrf.mxu1 }
 0x505   : > { %v8228_v21 = vadd.f32 %v8077_v30, %v7849_v1  ;;  %11180 = vmatprep.mubr.f32.mxu0 %v15590_v58  ;;  %v15607_v20 = vadd.f32 %v15587_v33, %v8229_v9  ;;  %v15628_v1 = vpop.f32.mrf.mxu0 }
 0x506   : > { %v11108_v8 = vpop.f32.mrf.mxu1  ;;  %11181 = vmatmul.mubr.f32.vlgmr.msra.gmra.mxu0 %v15595_v6  ;;  %v7939_v13 = vadd.f32 %v15628_v1, %v15546_v49 }
 0x507   : > { %v15602_v36 = vadd.f32 %v15587_v33, %v8228_v21  ;;  %v8231_v17 = vadd.f32 %v11108_v8, %v7864_v16  ;;  %v11085_v8 = vpop.f32.mrf.mxu0 }
 0x508   : > { %v8087_v61 = vpop.f32.mrf.mxu1  ;;  %v7954_v34 = vadd.f32 %v11085_v8, %v15548_v38 }
 0x509   : > { %v8230_v3 = vadd.f32 %v8087_v61, %v7859_v52  ;;  %11183 = vmatprep.mubr.f32.mxu0 %v15602_v36  ;;  %v15619_v56 = vadd.f32 %v15587_v33, %v8231_v17 }
 0x50a   : > { %v11111_v0 = vpop.f32.mrf.mxu1  ;;  %11184 = vmatmul.mubr.f32.gmra.mxu0 %v15607_v20 }
 0x50b   : > { %v15614_v15 = vadd.f32 %v15587_v33, %v8230_v3  ;;  %v8233_v24 = vadd.f32 %v11111_v0, %v7874_v18  ;;  %v7948_v18 = vpop.f32.mrf.mxu0 }
 0x50c   : > { %v8097_v29 = vpop.f32.mrf.mxu1 }
 0x50d   : > { %v8232_v59 = vadd.f32 %v8097_v29, %v7869_v2  ;;  %11186 = vmatprep.mubr.f32.mxu0 %v15614_v15  ;;  %v15631_v9 = vadd.f32 %v15587_v33, %v8233_v24 }
 0x50e   : > { %v11114_v10 = vpop.f32.mrf.mxu1  ;;  %11187 = vmatmul.mubr.f32.gmra.mxu0 %v15619_v56 }
 0x50f   : > { %v15626_v60 = vadd.f32 %v15587_v33, %v8232_v59  ;;  %v8235_v30 = vadd.f32 %v11114_v10, %v7884_v25  ;;  %v11088_v59 = vpop.f32.mrf.mxu0 }
 0x510   : > { %v8107_v21 = vpop.f32.mrf.mxu1 }
 0x511   : > { %v8234_v16 = vadd.f32 %v8107_v21, %v7879_v39  ;;  %11189 = vmatprep.mubr.f32.mxu0 %v15626_v60  ;;  %v15643_v52 = vadd.f32 %v15587_v33, %v8235_v30  ;;  %v7958_v21 = vpop.f32.mrf.mxu0 }
 0x512   : > { %v11117_v35 = vpop.f32.mrf.mxu1  ;;  %11190 = vmatmul.mubr.f32.gmra.mxu0 %v15631_v9  ;;  %v7959_v8 = vadd.f32 %v7958_v21, %v15556_v48 }
 0x513   : > { %v15640_v43 = vadd.f32 %v15587_v33, %v8234_v16  ;;  %v8237_v17 = vadd.f32 %v11117_v35, %v7894_v31 }
 0x514   : > { %v8117_v61 = vpop.f32.mrf.mxu1 }
 0x515   : > { %v8236_v3 = vadd.f32 %v8117_v61, %v7889_v5  ;;  %11192 = vmatprep.mubr.f32.mxu0 %v15640_v43  ;;  %v15655_v0 = vadd.f32 %v15587_v33, %v8237_v17  ;;  %v11091_v17 = vpop.f32.mrf.mxu0 }
 0x516   : > { %v11120_v62 = vpop.f32.mrf.mxu1  ;;  %11193 = vmatmul.mubr.f32.gmra.mxu0 %v15643_v52 }
 0x517   : > { %v15652_v44 = vadd.f32 %v15587_v33, %v8236_v3  ;;  %v8239_v2 = vadd.f32 %v11120_v62, %v7904_v11 }
 0x518   : > { %v8127_v24 = vpop.f32.mrf.mxu1 }
 0x519   : > { %v8238_v29 = vadd.f32 %v8127_v24, %v7899_v53  ;;  %11195 = vmatprep.mubr.f32.mxu0 %v15652_v44  ;;  %v15667_v25 = vadd.f32 %v15587_v33, %v8239_v2  ;;  %v7968_v53 = vpop.f32.mrf.mxu0 }
 0x51a   : > { %v11123_v22 = vpop.f32.mrf.mxu1  ;;  %11196 = vmatmul.mubr.f32.gmra.mxu0 %v15655_v0 }
 0x51b   : > { %v15664_v23 = vadd.f32 %v15587_v33, %v8238_v29  ;;  %v8241_v10 = vadd.f32 %v11123_v22, %v7914_v27  ;;  %v7949_v22 = vadd.f32 %v7948_v18, %v15550_v4  ;;  %v11094_v1 = vpop.f32.mrf.mxu0 }
 0x51c   : > { %v8137_v39 = vpop.f32.mrf.mxu1 }
 0x51d   : > { %v8240_v30 = vadd.f32 %v8137_v39, %v7909_v50  ;;  %11198 = vmatprep.mubr.f32.mxu0 %v15664_v23  ;;  %v15679_v16 = vadd.f32 %v15587_v33, %v8241_v10  ;;  %v7978_v18 = vpop.f32.mrf.mxu0 }
 0x51e   : > { %v11126_v28 = vpop.f32.mrf.mxu1  ;;  %11199 = vmatmul.mubr.f32.gmra.mxu0 %v15667_v25 }
 0x51f   : > { %v15676_v40 = vadd.f32 %v15587_v33, %v8240_v30  ;;  %v8243_v31 = vadd.f32 %v11126_v28, %v7924_v55  ;;  %v7964_v55 = vadd.f32 %v11088_v59, %v15552_v7  ;;  %v7969_v59 = vadd.f32 %v7968_v53, %v15564_v14  ;;  %v11097_v21 = vpop.f32.mrf.mxu0 }
 0x520   : > { %v8147_v35 = vpop.f32.mrf.mxu1 }
 0x521   : > { %v8242_v5 = vadd.f32 %v8147_v35, %v7919_v26  ;;  %11201 = vmatprep.mubr.f32.mxu0 %v15676_v40  ;;  %v15691_v61 = vadd.f32 %v15587_v33, %v8243_v31 }
 0x522   : > { %v11129_v54 = vpop.f32.mrf.mxu1  ;;  %11202 = vmatmul.mubr.f32.gmra.mxu0 %v15679_v16 }
 0x523   : > { %v15688_v47 = vadd.f32 %v15587_v33, %v8242_v5  ;;  %v8245_v3 = vadd.f32 %v11129_v54, %v7934_v51  ;;  %v7974_v5 = vadd.f32 %v11091_v17, %v15560_v46  ;;  %v7979_v17 = vadd.f32 %v7978_v18, %v15572_v32  ;;  %v9002_v18 = vld [vmem:[%s16704_s7 + $0x38] sm:$0xff] }
 0x524   : > { %v8157_v11 = vpop.f32.mrf.mxu1 }
 0x525   : > { %v8244_v62 = vadd.f32 %v8157_v11, %v7929_v19  ;;  %11204 = vmatprep.mubr.f32.mxu0 %v15688_v47  ;;  %v15703_v2 = vadd.f32 %v15587_v33, %v8245_v3  ;;  %v7984_v11 = vadd.f32 %v11094_v1, %v15568_v63 }
 0x526   : > { %v11132_v57 = vpop.f32.mrf.mxu1  ;;  %11205 = vmatmul.mubr.f32.gmra.mxu0 %v15691_v61 }
 0x527   : > { %v15700_v42 = vadd.f32 %v15587_v33, %v8244_v62  ;;  %v8247_v24 = vadd.f32 %v11132_v57, %v7944_v37  ;;  %v7988_v62 = vpop.f32.mrf.mxu0 }
 0x528   : > { %v8167_v29 = vpop.f32.mrf.mxu1 }
 0x529   : > { %v8246_v27 = vadd.f32 %v8167_v29, %v7939_v13  ;;  %11207 = vmatprep.mubr.f32.mxu0 %v15700_v42  ;;  %v15713_v50 = vadd.f32 %v15587_v33, %v8247_v24  ;;  %v7994_v24 = vadd.f32 %v11097_v21, %v15576_v41  ;;  %v7989_v29 = vadd.f32 %v7988_v62, %v15580_v12  ;;  %v9010_v12 = vld [vmem:[%s16704_s7 + $0x78] sm:$0xff] }
 0x52a   : > { %v11135_v45 = vpop.f32.mrf.mxu1  ;;  %11208 = vmatmul.mubr.f32.gmra.mxu0 %v15703_v2  ;;  %11308 = vmatprep.subr.mxu0 %v9010_v12 }
 0x52b   : > { %v15710_v49 = vadd.f32 %v15587_v33, %v8246_v27  ;;  %v8249_v10 = vadd.f32 %v11135_v45, %v7954_v34  ;;  %11309 = vmatpush3.msra.mxu0 %v9010_v12 }
 0x52c   : > { %v8177_v39 = vpop.f32.mrf.mxu1 }
 0x52d   : > { %v8248_v30 = vadd.f32 %v8177_v39, %v7949_v22  ;;  %11210 = vmatprep.mubr.f32.mxu0 %v15710_v49  ;;  %v15723_v28 = vadd.f32 %v15587_v33, %v8249_v10  ;;  %v9009_v10 = vld [vmem:[%s16704_s7 + $0x70] sm:$0xff]  ;;  %v9008_v39 = vld [vmem:[%s16704_s7 + $0x68] sm:$0xff] }
 0x52e   : > { %v11138_v38 = vpop.f32.mrf.mxu1  ;;  %11211 = vmatmul.mubr.f32.gmra.mxu0 %v15713_v50  ;;  %11310 = vmatprep.subr.mxu0 %v9009_v10 }
 0x52f   : > { %v15720_v4 = vadd.f32 %v15587_v33, %v8248_v30  ;;  %v8251_v26 = vadd.f32 %v11138_v38, %v7964_v55  ;;  %11311 = vmatpush3.msra.mxu0 %v9009_v10  ;;  %v9006_v30 = vld [vmem:[%s16704_s7 + $0x58] sm:$0xff]  ;;  %v9005_v55 = vld [vmem:[%s16704_s7 + $0x50] sm:$0xff]  ;;  %v9004_v38 = vld [vmem:[%s16704_s7 + $0x48] sm:$0xff] }
 0x530   : > { %v8187_v31 = vpop.f32.mrf.mxu1  ;;  %11312 = vmatprep.subr.mxu0 %v9008_v39 }
 0x531   : > { %v8250_v35 = vadd.f32 %v8187_v31, %v7959_v8  ;;  %11213 = vmatprep.mubr.f32.mxu0 %v15720_v4  ;;  %v15733_v51 = vadd.f32 %v15587_v33, %v8251_v26  ;;  %11313 = vmatpush3.msra.mxu0 %v9008_v39  ;;  %v9003_v8 = vld [vmem:[%s16704_s7 + $0x40] sm:$0xff]  ;;  %v9001_v26 = vld [vmem:[%s16704_s7 + $0x30] sm:$0xff] }
 0x532   : > { %v11141_v7 = vpop.f32.mrf.mxu1  ;;  %11214 = vmatmul.mubr.f32.gmra.mxu0 %v15723_v28 }
 0x533   : > { %v15730_v48 = vadd.f32 %v15587_v33, %v8250_v35  ;;  %v8253_v54 = vadd.f32 %v11141_v7, %v7974_v5 }
 0x534   : > { %v8197_v19 = vpop.f32.mrf.mxu1 }
 0x535   : > { %v8252_v3 = vadd.f32 %v8197_v19, %v7969_v59  ;;  %11216 = vmatprep.mubr.f32.mxu0 %v15730_v48  ;;  %v15743_v37 = vadd.f32 %v15587_v33, %v8253_v54 }
 0x536   : > { %v11144_v46 = vpop.f32.mrf.mxu1  ;;  %11217 = vmatmul.mubr.f32.gmra.mxu0 %v15733_v51 }
 0x537   : > { %v15740_v14 = vadd.f32 %v15587_v33, %v8252_v3  ;;  %v8255_v57 = vadd.f32 %v11144_v46, %v7984_v11 }
 0x538   : > { %v8207_v13 = vpop.f32.mrf.mxu1 }
 0x539   : > { %v8254_v53 = vadd.f32 %v8207_v13, %v7979_v17  ;;  %11219 = vmatprep.mubr.f32.mxu0 %v15740_v14  ;;  %v15753_v27 = vadd.f32 %v15587_v33, %v8255_v57 }
 0x53a   : > { %v11147_v63 = vpop.f32.mrf.mxu1  ;;  %11220 = vmatmul.mubr.f32.gmra.mxu0 %v15743_v37 }
 0x53b   : > { %v15750_v32 = vadd.f32 %v15587_v33, %v8254_v53  ;;  %v8257_v34 = vadd.f32 %v11147_v63, %v7994_v24 }
 0x53c   : > { %v8217_v45 = vpop.f32.mrf.mxu1 }
 0x53d   : > { %v8256_v22 = vadd.f32 %v8217_v45, %v7989_v29  ;;  %11222 = vmatprep.mubr.f32.mxu0 %v15750_v32  ;;  %v15761_v1 = vadd.f32 %v15587_v33, %v8257_v34 }
 0x53e   : > { %11223 = vmatmul.mubr.f32.gmra.mxu0 %v15753_v27 }
 0x53f   : > { %v15758_v41 = vadd.f32 %v15587_v33, %v8256_v22  ;;  %v9007_v33 = vld [vmem:[%s16704_s7 + $0x60] sm:$0xff] }
 0x540   : > { %11314 = vmatprep.subr.mxu0 %v9007_v33 }
 0x541   : > { %11225 = vmatprep.mubr.f32.mxu0 %v15758_v41  ;;  %11315 = vmatpush3.msra.mxu0 %v9007_v33 }
 0x542   : > { %11226 = vmatmul.mubr.f32.gmra.mxu0 %v15761_v1  ;;  %11316 = vmatprep.subr.mxu0 %v9006_v30 }
 0x543   : > { %11317 = vmatpush3.msra.mxu0 %v9006_v30 }
 0x544   : > { %11318 = vmatprep.subr.mxu0 %v9005_v55 }
 0x545   : > { %11319 = vmatpush3.msra.mxu0 %v9005_v55 }
 0x546   : > { %11320 = vmatprep.subr.mxu0 %v9004_v38 }
 0x547   : > { %11321 = vmatpush3.msra.mxu0 %v9004_v38 }
 0x548   : > { %11322 = vmatprep.subr.mxu0 %v9003_v8 }
 0x549   : > { %11323 = vmatpush3.msra.mxu0 %v9003_v8 }
 0x54a   : > { %11324 = vmatprep.subr.mxu0 %v9002_v18 }
 0x54b   : > { %11325 = vmatpush3.msra.mxu0 %v9002_v18 }
 0x54c   : > { %11326 = vmatprep.subr.mxu0 %v9001_v26 }
 0x54d   : > { %11327 = vmatpush3.msra.mxu0 %v9001_v26 }
 0x5c6   : > { %v11182_v31 = vpop.f32.mrf.mxu0 }
 0x5c7   : > { %v15796_v35 = vsub.f32 %v15595_v6, %v11182_v31 }
 0x5c8   : > { %v8377_v5 = vpop.f32.mrf.mxu0 }
 0x5c9   : > { %v15799_v7 = vsub.f32 %v15590_v58, %v8377_v5  ;;  %v8569_v54 = vmul.f32 %v15796_v35, %v15796_v35 }
 0x5ca   : > { %v11185_v59 = vpop.f32.mrf.mxu0 }
 0x5cb   : > { %v8568_v21 = vmul.f32 %v15799_v7, %v15799_v7  ;;  %v15806_v19 = vsub.f32 %v15607_v20, %v11185_v59 }
 0x5cc   : > { %v8387_v3 = vpop.f32.mrf.mxu0 }
 0x5cd   : > { %v15809_v11 = vsub.f32 %v15602_v36, %v8387_v3  ;;  %11260 = vmatprep.mubr.f32.mxu1 %v8568_v21  ;;  %v8571_v46 = vmul.f32 %v15806_v19, %v15806_v19 }
 0x5ce   : > { %v11188_v6 = vpop.f32.mrf.mxu0  ;;  %11261 = vmatmul.mubr.f32.vlgmr.msra.gmra.mxu1 %v8569_v54 }
 0x5cf   : > { %v8570_v58 = vmul.f32 %v15809_v11, %v15809_v11  ;;  %v15816_v17 = vsub.f32 %v15619_v56, %v11188_v6 }
 0x5d0   : > { %v8397_v62 = vpop.f32.mrf.mxu0 }
 0x5d1   : > { %v15819_v20 = vsub.f32 %v15614_v15, %v8397_v62  ;;  %11263 = vmatprep.mubr.f32.mxu1 %v8570_v58  ;;  %v8573_v13 = vmul.f32 %v15816_v17, %v15816_v17 }
 0x5d2   : > { %v11191_v57 = vpop.f32.mrf.mxu0  ;;  %11264 = vmatmul.mubr.f32.gmra.mxu1 %v8571_v46 }
 0x5d3   : > { %v8572_v36 = vmul.f32 %v15819_v20, %v15819_v20  ;;  %v15826_v53 = vsub.f32 %v15631_v9, %v11191_v57 }
 0x5d4   : > { %v8407_v24 = vpop.f32.mrf.mxu0 }
 0x5d5   : > { %v15829_v56 = vsub.f32 %v15626_v60, %v8407_v24  ;;  %11266 = vmatprep.mubr.f32.mxu1 %v8572_v36  ;;  %v8575_v29 = vmul.f32 %v15826_v53, %v15826_v53 }
 0x5d6   : > { %v11194_v63 = vpop.f32.mrf.mxu0  ;;  %11267 = vmatmul.mubr.f32.gmra.mxu1 %v8573_v13 }
 0x5d7   : > { %v8574_v15 = vmul.f32 %v15829_v56, %v15829_v56  ;;  %v15836_v34 = vsub.f32 %v15643_v52, %v11194_v63 }
 0x5d8   : > { %v8417_v45 = vpop.f32.mrf.mxu0 }
 0x5d9   : > { %v15839_v9 = vsub.f32 %v15640_v43, %v8417_v45  ;;  %11269 = vmatprep.mubr.f32.mxu1 %v8574_v15  ;;  %v8577_v12 = vmul.f32 %v15836_v34, %v15836_v34 }
 0x5da   : > { %v11197_v22 = vpop.f32.mrf.mxu0  ;;  %11270 = vmatmul.mubr.f32.gmra.mxu1 %v8575_v29 }
 0x5db   : > { %v8576_v60 = vmul.f32 %v15839_v9, %v15839_v9  ;;  %v15846_v10 = vsub.f32 %v15655_v0, %v11197_v22 }
 0x5dc   : > { %v8427_v39 = vpop.f32.mrf.mxu0 }
 0x5dd   : > { %v15849_v52 = vsub.f32 %v15652_v44, %v8427_v39  ;;  %11272 = vmatprep.mubr.f32.mxu1 %v8576_v60  ;;  %v8579_v30 = vmul.f32 %v15846_v10, %v15846_v10 }
 0x5de   : > { %v11200_v33 = vpop.f32.mrf.mxu0  ;;  %11273 = vmatmul.mubr.f32.gmra.mxu1 %v8577_v12 }
 0x5df   : > { %v8578_v43 = vmul.f32 %v15849_v52, %v15849_v52  ;;  %v15856_v55 = vsub.f32 %v15667_v25, %v11200_v33 }
 0x5e0   : > { %v8437_v38 = vpop.f32.mrf.mxu0 }
 0x5e1   : > { %v15859_v0 = vsub.f32 %v15664_v23, %v8437_v38  ;;  %11275 = vmatprep.mubr.f32.mxu1 %v8578_v43  ;;  %v8581_v18 = vmul.f32 %v15856_v55, %v15856_v55 }
 0x5e2   : > { %v11203_v8 = vpop.f32.mrf.mxu0  ;;  %11276 = vmatmul.mubr.f32.gmra.mxu1 %v8579_v30 }
 0x5e3   : > { %v8580_v44 = vmul.f32 %v15859_v0, %v15859_v0  ;;  %v15866_v26 = vsub.f32 %v15679_v16, %v11203_v8 }
 0x5e4   : > { %v8447_v31 = vpop.f32.mrf.mxu0 }
 0x5e5   : > { %v15869_v25 = vsub.f32 %v15676_v40, %v8447_v31  ;;  %11278 = vmatprep.mubr.f32.mxu1 %v8580_v44  ;;  %v8583_v59 = vmul.f32 %v15866_v26, %v15866_v26 }
 0x5e6   : > { %v11206_v5 = vpop.f32.mrf.mxu0  ;;  %11279 = vmatmul.mubr.f32.gmra.mxu1 %v8581_v18 }
 0x5e7   : > { %v8582_v23 = vmul.f32 %v15869_v25, %v15869_v25  ;;  %v15876_v21 = vsub.f32 %v15691_v61, %v11206_v5 }
 0x5e8   : > { %v8457_v54 = vpop.f32.mrf.mxu0 }
 0x5e9   : > { %v15879_v16 = vsub.f32 %v15688_v47, %v8457_v54  ;;  %11281 = vmatprep.mubr.f32.mxu1 %v8582_v23  ;;  %v8585_v6 = vmul.f32 %v15876_v21, %v15876_v21 }
 0x5ea   : > { %v11209_v3 = vpop.f32.mrf.mxu0  ;;  %11282 = vmatmul.mubr.f32.gmra.mxu1 %v8583_v59 }
 0x5eb   : > { %v8584_v40 = vmul.f32 %v15879_v16, %v15879_v16  ;;  %v15886_v58 = vsub.f32 %v15703_v2, %v11209_v3  ;;  %v9000_v3 = vld [vmem:[%s16704_s7 + $0x28] sm:$0xff] }
 0x5ec   : > { %v8467_v46 = vpop.f32.mrf.mxu0  ;;  %11328 = vmatprep.subr.mxu0 %v9000_v3 }
 0x5ed   : > { %v15889_v61 = vsub.f32 %v15700_v42, %v8467_v46  ;;  %11284 = vmatprep.mubr.f32.mxu1 %v8584_v40  ;;  %v8587_v57 = vmul.f32 %v15886_v58, %v15886_v58  ;;  %11329 = vmatpush3.msra.mxu0 %v9000_v3  ;;  %v8997_v40 = vld [vmem:[%s16704_s7 + $0x10] sm:$0xff]  ;;  %v8995_v46 = vld [vmem:[%s16704_s7] sm:$0xff] }
 0x5ee   : > { %v11212_v62 = vpop.f32.mrf.mxu0  ;;  %11285 = vmatmul.mubr.f32.gmra.mxu1 %v8585_v6  ;;  %v8996_v6 = vld [vmem:[%s16704_s7 + $0x8] sm:$0xff] }
 0x5ef   : > { %v8586_v47 = vmul.f32 %v15889_v61, %v15889_v61  ;;  %v15896_v36 = vsub.f32 %v15713_v50, %v11212_v62 }
 0x5f0   : > { %v8477_v13 = vpop.f32.mrf.mxu0 }
 0x5f1   : > { %v15899_v2 = vsub.f32 %v15710_v49, %v8477_v13  ;;  %11287 = vmatprep.mubr.f32.mxu1 %v8586_v47  ;;  %v8589_v63 = vmul.f32 %v15896_v36, %v15896_v36 }
 0x5f2   : > { %v11215_v24 = vpop.f32.mrf.mxu0  ;;  %11288 = vmatmul.mubr.f32.gmra.mxu1 %v8587_v57 }
 0x5f3   : > { %v8588_v42 = vmul.f32 %v15899_v2, %v15899_v2  ;;  %v15906_v15 = vsub.f32 %v15723_v28, %v11215_v24 }
 0x5f4   : > { %v8487_v29 = vpop.f32.mrf.mxu0 }
 0x5f5   : > { %v15909_v50 = vsub.f32 %v15720_v4, %v8487_v29  ;;  %11290 = vmatprep.mubr.f32.mxu1 %v8588_v42  ;;  %v8591_v22 = vmul.f32 %v15906_v15, %v15906_v15 }
 0x5f6   : > { %v11218_v45 = vpop.f32.mrf.mxu0  ;;  %11291 = vmatmul.mubr.f32.gmra.mxu1 %v8589_v63 }
 0x5f7   : > { %v8590_v49 = vmul.f32 %v15909_v50, %v15909_v50  ;;  %v15916_v60 = vsub.f32 %v15733_v51, %v11218_v45 }
 0x5f8   : > { %v8497_v12 = vpop.f32.mrf.mxu0 }
 0x5f9   : > { %v15919_v28 = vsub.f32 %v15730_v48, %v8497_v12  ;;  %11293 = vmatprep.mubr.f32.mxu1 %v8590_v49  ;;  %v8593_v33 = vmul.f32 %v15916_v60, %v15916_v60 }
 0x5fa   : > { %v11221_v39 = vpop.f32.mrf.mxu0  ;;  %11294 = vmatmul.mubr.f32.gmra.mxu1 %v8591_v22 }
 0x5fb   : > { %v8592_v4 = vmul.f32 %v15919_v28, %v15919_v28  ;;  %v15926_v43 = vsub.f32 %v15743_v37, %v11221_v39 }
 0x5fc   : > { %v8507_v30 = vpop.f32.mrf.mxu0 }
 0x5fd   : > { %v15929_v51 = vsub.f32 %v15740_v14, %v8507_v30  ;;  %11296 = vmatprep.mubr.f32.mxu1 %v8592_v4  ;;  %v8595_v8 = vmul.f32 %v15926_v43, %v15926_v43 }
 0x5fe   : > { %v11224_v38 = vpop.f32.mrf.mxu0  ;;  %11297 = vmatmul.mubr.f32.gmra.mxu1 %v8593_v33 }
 0x5ff   : > { %v8594_v48 = vmul.f32 %v15929_v51, %v15929_v51  ;;  %v15936_v44 = vsub.f32 %v15753_v27, %v11224_v38 }
 0x600   : > { %v8517_v18 = vpop.f32.mrf.mxu0 }
 0x601   : > { %v15939_v37 = vsub.f32 %v15750_v32, %v8517_v18  ;;  %11299 = vmatprep.mubr.f32.mxu1 %v8594_v48  ;;  %v8597_v5 = vmul.f32 %v15936_v44, %v15936_v44 }
 0x602   : > { %v11227_v31 = vpop.f32.mrf.mxu0  ;;  %11300 = vmatmul.mubr.f32.gmra.mxu1 %v8595_v8  ;;  %v15976_v8 = vld [vmem:[%s16702_s5 + $0x1] ss:$0 sm:$0xff] }
 0x603   : > { %v8596_v14 = vmul.f32 %v15939_v37, %v15939_v37  ;;  %v15946_v23 = vsub.f32 %v15761_v1, %v11227_v31  ;;  %v8999_v1 = vld [vmem:[%s16704_s7 + $0x20] sm:$0xff] }
 0x604   : > { %v8527_v59 = vpop.f32.mrf.mxu0  ;;  %11330 = vmatprep.subr.mxu0 %v8999_v1 }
 0x605   : > { %v15949_v27 = vsub.f32 %v15758_v41, %v8527_v59  ;;  %11302 = vmatprep.mubr.f32.mxu1 %v8596_v14  ;;  %v8599_v54 = vmul.f32 %v15946_v23, %v15946_v23  ;;  %v8998_v41 = vld [vmem:[%s16704_s7 + $0x18] sm:$0xff]  ;;  %11331 = vmatpush3.msra.mxu0 %v8999_v1 }
 0x606   : > { %11303 = vmatmul.mubr.f32.gmra.mxu1 %v8597_v5  ;;  %11332 = vmatprep.subr.mxu0 %v8998_v41 }
 0x607   : > { %v8598_v32 = vmul.f32 %v15949_v27, %v15949_v27  ;;  %11333 = vmatpush3.msra.mxu0 %v8998_v41 }
 0x608   : > { %11334 = vmatprep.subr.mxu0 %v8997_v40 }
 0x609   : > { %11305 = vmatprep.mubr.f32.mxu1 %v8598_v32  ;;  %11335 = vmatpush3.msra.mxu0 %v8997_v40 }
 0x60a   : > { %11306 = vmatmul.mubr.f32.gmra.mxu1 %v8599_v54  ;;  %11336 = vmatprep.subr.mxu0 %v8996_v6  ;;  %v15983_v54 = vld [vmem:[%s16702_s5 + $0x2] ss:$0 sm:$0xff] }
 0x60b   : > { %11337 = vmatpush3.msra.mxu0 %v8996_v6 }
 0x60c   : > { %11338 = vmatprep.subr.mxu0 %v8995_v46 }
 0x60d   : > { %11339 = vmatpush3.msra.mxu0 %v8995_v46 }
 0x68e   : > { %v11262_v62 = vpop.f32.mrf.mxu1 }
 0x68f   : > { %v8672_v47 = vadd.f32 1e-05, %v11262_v62 }
 0x690   : > { %v8666_v57 = vpop.f32.mrf.mxu1 }
 0x691   : > { %11714 = vrsqrt.f32 %v8672_v47  ;;  %v8667_v13 = vadd.f32 1e-05, %v8666_v57 }
 0x692   : > { %v11265_v24 = vpop.f32.mrf.mxu1 }
 0x693   : > { %11716 = vrsqrt.f32 %v8667_v13  ;;  %v8682_v42 = vadd.f32 1e-05, %v11265_v24 }
 0x694   : > { %v8676_v63 = vpop.f32.mrf.mxu1 }
 0x695   : > { %11718 = vrsqrt.f32 %v8682_v42  ;;  %v8677_v29 = vadd.f32 1e-05, %v8676_v63 }
 0x696   : > { %v11268_v45 = vpop.f32.mrf.mxu1 }
 0x697   : > { %11720 = vrsqrt.f32 %v8677_v29  ;;  %v8692_v49 = vadd.f32 1e-05, %v11268_v45 }
 0x698   : > { %v8686_v22 = vpop.f32.mrf.mxu1 }
 0x699   : > { %11722 = vrsqrt.f32 %v8692_v49  ;;  %v8687_v12 = vadd.f32 1e-05, %v8686_v22 }
 0x69a   : > { %v11271_v39 = vpop.f32.mrf.mxu1 }
 0x69b   : > { %11724 = vrsqrt.f32 %v8687_v12  ;;  %v8702_v4 = vadd.f32 1e-05, %v11271_v39 }
 0x69c   : > { %v8696_v33 = vpop.f32.mrf.mxu1 }
 0x69d   : > { %11726 = vrsqrt.f32 %v8702_v4  ;;  %v8697_v30 = vadd.f32 1e-05, %v8696_v33 }
 0x69e   : > { %v11715_v38 = vpop.eup %11714  ;;  %v11274_v48 = vpop.f32.mrf.mxu1 }
 0x69f   : > { %v8858_v18 = vmul.f32 %v11715_v38, %v15796_v35  ;;  %11728 = vrsqrt.f32 %v8697_v30  ;;  %v8712_v31 = vadd.f32 1e-05, %v11274_v48 }
 0x6a0   : > { %v11717_v14 = vpop.eup %11716  ;;  %v8706_v5 = vpop.f32.mrf.mxu1 }
 0x6a1   : > { %11730 = vrsqrt.f32 %v8712_v31  ;;  %v8707_v59 = vadd.f32 1e-05, %v8706_v5  ;;  %v8857_v32 = vmul.f32 %v11717_v14, %v15799_v7  ;;  %v8895_v3 = vmul.f32 %v15976_v8, %v8858_v18 }
 0x6a2   : > { %v11719_v1 = vpop.eup %11718  ;;  %v11277_v41 = vpop.f32.mrf.mxu1 }
 0x6a3   : > { %11732 = vrsqrt.f32 %v8707_v59  ;;  %v8722_v40 = vadd.f32 1e-05, %v11277_v41  ;;  %v8894_v35 = vmul.f32 %v15976_v8, %v8857_v32  ;;  %v8932_v62 = vadd.f32 %v15983_v54, %v8895_v3 }
 0x6a4   : > { %v11721_v6 = vpop.eup %11720  ;;  %v8716_v46 = vpop.f32.mrf.mxu1  ;;  %v8860_v47 = vmul.f32 %v11719_v1, %v15806_v19 }
 0x6a5   : > { %11734 = vrsqrt.f32 %v8722_v40  ;;  %v8717_v7 = vadd.f32 1e-05, %v8716_v46  ;;  %v8931_v57 = vadd.f32 %v15983_v54, %v8894_v35  ;;  %v8859_v42 = vmul.f32 %v11721_v6, %v15809_v11 }
 0x6a6   : > { %v11723_v13 = vpop.eup %11722  ;;  %v11280_v24 = vpop.f32.mrf.mxu1  ;;  %v8897_v63 = vmul.f32 %v15976_v8, %v8860_v47  ;;  %v8964_v39 = vmax.f32 %v8932_v62, 0.0 }
 0x6a7   : > { %11736 = vrsqrt.f32 %v8717_v7  ;;  %v8732_v29 = vadd.f32 1e-05, %v11280_v24  ;;  %v8963_v45 = vmax.f32 %v8931_v57, 0.0  ;;  %v8862_v49 = vmul.f32 %v11723_v13, %v15816_v17 }
 0x6a8   : > { %v11725_v22 = vpop.eup %11724  ;;  %v8726_v12 = vpop.f32.mrf.mxu1  ;;  %v8896_v19 = vmul.f32 %v15976_v8, %v8859_v42  ;;  %v8934_v4 = vadd.f32 %v15983_v54, %v8897_v63 }
 0x6a9   : > { %11738 = vrsqrt.f32 %v8732_v29  ;;  %v8727_v33 = vadd.f32 1e-05, %v8726_v12  ;;  %11340 = vmatprep.mubr.f32.mxu0 %v8963_v45  ;;  %v8861_v30 = vmul.f32 %v11725_v22, %v15819_v20  ;;  %v8899_v11 = vmul.f32 %v15976_v8, %v8862_v49 }
 0x6aa   : > { %v11727_v38 = vpop.eup %11726  ;;  %v11283_v48 = vpop.f32.mrf.mxu1  ;;  %11341 = vmatmul.mubr.f32.vlgmr.msra.gmra.mxu0 %v8964_v39  ;;  %v8933_v18 = vadd.f32 %v15983_v54, %v8896_v19  ;;  %v8966_v1 = vmax.f32 %v8934_v4, 0.0 }
 0x6ab   : > { %11740 = vrsqrt.f32 %v8727_v33  ;;  %v8742_v17 = vadd.f32 1e-05, %v11283_v48  ;;  %v8898_v31 = vmul.f32 %v15976_v8, %v8861_v30  ;;  %v8936_v32 = vadd.f32 %v15983_v54, %v8899_v11 }
 0x6ac   : > { %v11729_v14 = vpop.eup %11728  ;;  %v8736_v5 = vpop.f32.mrf.mxu1  ;;  %v8965_v59 = vmax.f32 %v8933_v18, 0.0  ;;  %v8864_v3 = vmul.f32 %v11727_v38, %v15826_v53 }
 0x6ad   : > { %11742 = vrsqrt.f32 %v8742_v17  ;;  %v8737_v20 = vadd.f32 1e-05, %v8736_v5  ;;  %v8935_v41 = vadd.f32 %v15983_v54, %v8898_v31  ;;  %v8863_v6 = vmul.f32 %v11729_v14, %v15829_v56 }
 0x6ae   : > { %v11731_v40 = vpop.eup %11730  ;;  %11343 = vmatprep.mubr.f32.mxu0 %v8965_v59  ;;  %v11286_v35 = vpop.f32.mrf.mxu1  ;;  %v8901_v46 = vmul.f32 %v15976_v8, %v8864_v3  ;;  %v8968_v13 = vmax.f32 %v8936_v32, 0.0 }
 0x6af   : > { %11744 = vrsqrt.f32 %v8737_v20  ;;  %v8752_v62 = vadd.f32 1e-05, %v11286_v35  ;;  %11344 = vmatmul.mubr.f32.gmra.mxu0 %v8966_v1  ;;  %v8967_v47 = vmax.f32 %v8935_v41, 0.0  ;;  %v8866_v7 = vmul.f32 %v11731_v40, %v15836_v34 }
 0x6b0   : > { %v11733_v57 = vpop.eup %11732  ;;  %v8746_v53 = vpop.f32.mrf.mxu1  ;;  %v8900_v24 = vmul.f32 %v15976_v8, %v8863_v6  ;;  %v8938_v42 = vadd.f32 %v15983_v54, %v8901_v46 }
 0x6b1   : > { %11746 = vrsqrt.f32 %v8752_v62  ;;  %v8747_v63 = vadd.f32 1e-05, %v8746_v53  ;;  %11346 = vmatprep.mubr.f32.mxu0 %v8967_v47  ;;  %v8865_v56 = vmul.f32 %v11733_v57, %v15839_v9  ;;  %v8903_v29 = vmul.f32 %v15976_v8, %v8866_v7 }
 0x6b2   : > { %v11735_v45 = vpop.eup %11734  ;;  %v11289_v49 = vpop.f32.mrf.mxu1  ;;  %v8937_v22 = vadd.f32 %v15983_v54, %v8900_v24  ;;  %v8970_v11 = vmax.f32 %v8938_v42, 0.0 }
 0x6b3   : > { %11748 = vrsqrt.f32 %v8747_v63  ;;  %v8762_v34 = vadd.f32 1e-05, %v11289_v49  ;;  %11347 = vmatmul.mubr.f32.gmra.mxu0 %v8968_v13  ;;  %v8902_v12 = vmul.f32 %v15976_v8, %v8865_v56  ;;  %v8940_v33 = vadd.f32 %v15983_v54, %v8903_v29 }
 0x6b4   : > { %v11737_v39 = vpop.eup %11736  ;;  %v8756_v19 = vpop.f32.mrf.mxu1  ;;  %v8969_v4 = vmax.f32 %v8937_v22, 0.0  ;;  %v8868_v30 = vmul.f32 %v11735_v45, %v15846_v10 }
 0x6b5   : > { %11750 = vrsqrt.f32 %v8762_v34  ;;  %v8757_v9 = vadd.f32 1e-05, %v8756_v19  ;;  %v8939_v38 = vadd.f32 %v15983_v54, %v8902_v12  ;;  %v8867_v17 = vmul.f32 %v11737_v39, %v15849_v52 }
 0x6b6   : > { %v11739_v48 = vpop.eup %11738  ;;  %11349 = vmatprep.mubr.f32.mxu0 %v8969_v4  ;;  %v11292_v18 = vpop.f32.mrf.mxu1  ;;  %v8905_v31 = vmul.f32 %v15976_v8, %v8868_v30  ;;  %v8972_v3 = vmax.f32 %v8940_v33, 0.0 }
 0x6b7   : > { %11752 = vrsqrt.f32 %v8757_v9  ;;  %v8772_v14 = vadd.f32 1e-05, %v11292_v18  ;;  %11350 = vmatmul.mubr.f32.gmra.mxu0 %v8970_v11  ;;  %v8971_v5 = vmax.f32 %v8939_v38, 0.0  ;;  %v8870_v59 = vmul.f32 %v11739_v48, %v15856_v55 }
 0x6b8   : > { %v11741_v32 = vpop.eup %11740  ;;  %v8766_v10 = vpop.f32.mrf.mxu1  ;;  %v8904_v20 = vmul.f32 %v15976_v8, %v8867_v17  ;;  %v8942_v1 = vadd.f32 %v15983_v54, %v8905_v31 }
 0x6b9   : > { %11754 = vrsqrt.f32 %v8772_v14  ;;  %v8767_v41 = vadd.f32 1e-05, %v8766_v10  ;;  %11352 = vmatprep.mubr.f32.mxu0 %v8971_v5  ;;  %v8869_v52 = vmul.f32 %v11741_v32, %v15859_v0  ;;  %v8907_v40 = vmul.f32 %v15976_v8, %v8870_v59 }
 0x6ba   : > { %v11743_v35 = vpop.eup %11742  ;;  %v11295_v6 = vpop.f32.mrf.mxu1  ;;  %v8941_v46 = vadd.f32 %v15983_v54, %v8904_v20  ;;  %v8974_v24 = vmax.f32 %v8942_v1, 0.0 }
 0x6bb   : > { %11756 = vrsqrt.f32 %v8767_v41  ;;  %v8782_v55 = vadd.f32 1e-05, %v11295_v6  ;;  %11353 = vmatmul.mubr.f32.gmra.mxu0 %v8972_v3  ;;  %v8906_v62 = vmul.f32 %v15976_v8, %v8869_v52  ;;  %v8944_v53 = vadd.f32 %v15983_v54, %v8907_v40 }
 0x6bc   : > { %v11745_v47 = vpop.eup %11744  ;;  %v8776_v7 = vpop.f32.mrf.mxu1  ;;  %v8973_v57 = vmax.f32 %v8941_v46, 0.0  ;;  %v8872_v13 = vmul.f32 %v11743_v35, %v15866_v26 }
 0x6bd   : > { %11758 = vrsqrt.f32 %v8782_v55  ;;  %v8777_v0 = vadd.f32 1e-05, %v8776_v7  ;;  %v8943_v42 = vadd.f32 %v15983_v54, %v8906_v62  ;;  %v8871_v29 = vmul.f32 %v11745_v47, %v15869_v25 }
 0x6be   : > { %v11747_v63 = vpop.eup %11746  ;;  %11355 = vmatprep.mubr.f32.mxu0 %v8973_v57  ;;  %v11298_v56 = vpop.f32.mrf.mxu1  ;;  %v8909_v45 = vmul.f32 %v15976_v8, %v8872_v13  ;;  %v8976_v39 = vmax.f32 %v8944_v53, 0.0 }
 0x6bf   : > { %11760 = vrsqrt.f32 %v8777_v0  ;;  %v8792_v49 = vadd.f32 1e-05, %v11298_v56  ;;  %11356 = vmatmul.mubr.f32.gmra.mxu0 %v8974_v24  ;;  %v8975_v22 = vmax.f32 %v8943_v42, 0.0  ;;  %v8874_v34 = vmul.f32 %v11747_v63, %v15876_v21 }
 0x6c0   : > { %v11749_v12 = vpop.eup %11748  ;;  %v8786_v26 = vpop.f32.mrf.mxu1  ;;  %v8908_v19 = vmul.f32 %v15976_v8, %v8871_v29  ;;  %v8946_v4 = vadd.f32 %v15983_v54, %v8909_v45 }
 0x6c1   : > { %11762 = vrsqrt.f32 %v8792_v49  ;;  %v8787_v33 = vadd.f32 1e-05, %v8786_v26  ;;  %11358 = vmatprep.mubr.f32.mxu0 %v8975_v22  ;;  %v8873_v25 = vmul.f32 %v11749_v12, %v15879_v16  ;;  %v8911_v30 = vmul.f32 %v15976_v8, %v8874_v34 }
 0x6c2   : > { %v11751_v9 = vpop.eup %11750  ;;  %v11301_v11 = vpop.f32.mrf.mxu1  ;;  %v8945_v38 = vadd.f32 %v15983_v54, %v8908_v19  ;;  %v8978_v59 = vmax.f32 %v8946_v4, 0.0 }
 0x6c3   : > { %11764 = vrsqrt.f32 %v8787_v33  ;;  %v8802_v21 = vadd.f32 1e-05, %v11301_v11  ;;  %11359 = vmatmul.mubr.f32.gmra.mxu0 %v8976_v39  ;;  %v8910_v48 = vmul.f32 %v15976_v8, %v8873_v25  ;;  %v8948_v14 = vadd.f32 %v15983_v54, %v8911_v30 }
 0x6c4   : > { %v11753_v18 = vpop.eup %11752  ;;  %v8796_v17 = vpop.f32.mrf.mxu1  ;;  %v8977_v31 = vmax.f32 %v8945_v38, 0.0  ;;  %v8876_v5 = vmul.f32 %v11751_v9, %v15886_v58 }
 0x6c5   : > { %11766 = vrsqrt.f32 %v8802_v21  ;;  %v8797_v16 = vadd.f32 1e-05, %v8796_v17  ;;  %v8947_v32 = vadd.f32 %v15983_v54, %v8910_v48  ;;  %v8875_v20 = vmul.f32 %v11753_v18, %v15889_v61 }
 0x6c6   : > { %v11755_v10 = vpop.eup %11754  ;;  %11361 = vmatprep.mubr.f32.mxu0 %v8977_v31  ;;  %v11304_v3 = vpop.f32.mrf.mxu1  ;;  %v8913_v1 = vmul.f32 %v15976_v8, %v8876_v5  ;;  %v8980_v6 = vmax.f32 %v8948_v14, 0.0 }
 0x6c7   : > { %11768 = vrsqrt.f32 %v8797_v16  ;;  %v8812_v41 = vadd.f32 1e-05, %v11304_v3  ;;  %11362 = vmatmul.mubr.f32.gmra.mxu0 %v8978_v59  ;;  %v8979_v52 = vmax.f32 %v8947_v32, 0.0  ;;  %v8878_v40 = vmul.f32 %v11755_v10, %v15896_v36 }
 0x6c8   : > { %v11757_v35 = vpop.eup %11756  ;;  %v8806_v58 = vpop.f32.mrf.mxu1  ;;  %v8912_v46 = vmul.f32 %v15976_v8, %v8875_v20  ;;  %v8950_v55 = vadd.f32 %v15983_v54, %v8913_v1 }
 0x6c9   : > { %11770 = vrsqrt.f32 %v8812_v41  ;;  %v8807_v62 = vadd.f32 1e-05, %v8806_v58  ;;  %11364 = vmatprep.mubr.f32.mxu0 %v8979_v52  ;;  %v8877_v61 = vmul.f32 %v11757_v35, %v15899_v2  ;;  %v8915_v47 = vmul.f32 %v15976_v8, %v8878_v40 }
 0x6ca   : > { %v11759_v7 = vpop.eup %11758  ;;  %v11307_v57 = vpop.f32.mrf.mxu1  ;;  %v8949_v53 = vadd.f32 %v15983_v54, %v8912_v46  ;;  %v8982_v63 = vmax.f32 %v8950_v55, 0.0 }
 0x6cb   : > { %11772 = vrsqrt.f32 %v8807_v62  ;;  %v8822_v36 = vadd.f32 1e-05, %v11307_v57  ;;  %11365 = vmatmul.mubr.f32.gmra.mxu0 %v8980_v6  ;;  %v8914_v13 = vmul.f32 %v15976_v8, %v8877_v61  ;;  %v8880_v56 = vmul.f32 %v11759_v7, %v15906_v15 }
 0x6cc   : > { %v11761_v0 = vpop.eup %11760  ;;  %v8816_v24 = vpop.f32.mrf.mxu1  ;;  %v8981_v42 = vmax.f32 %v8949_v53, 0.0  ;;  %v8952_v45 = vadd.f32 %v15983_v54, %v8915_v47 }
 0x6cd   : > { %11774 = vrsqrt.f32 %v8822_v36  ;;  %v8817_v29 = vadd.f32 1e-05, %v8816_v24  ;;  %v8951_v2 = vadd.f32 %v15983_v54, %v8914_v13  ;;  %v8879_v22 = vmul.f32 %v11761_v0, %v15909_v50 }
 0x6ce   : > { %v11763_v49 = vpop.eup %11762  ;;  %11367 = vmatprep.mubr.f32.mxu0 %v8981_v42  ;;  %v8917_v34 = vmul.f32 %v15976_v8, %v8880_v56  ;;  %v8984_v4 = vmax.f32 %v8952_v45, 0.0 }
 0x6cf   : > { %11776 = vrsqrt.f32 %v8817_v29  ;;  %11368 = vmatmul.mubr.f32.gmra.mxu0 %v8982_v63  ;;  %v8983_v12 = vmax.f32 %v8951_v2, 0.0  ;;  %v8882_v26 = vmul.f32 %v11763_v49, %v15916_v60  ;;  %v8916_v15 = vmul.f32 %v15976_v8, %v8879_v22 }
 0x6d0   : > { %v11765_v39 = vpop.eup %11764  ;;  %v8954_v19 = vadd.f32 %v15983_v54, %v8917_v34 }
 0x6d1   : > { %11370 = vmatprep.mubr.f32.mxu0 %v8983_v12  ;;  %v8881_v33 = vmul.f32 %v11765_v39, %v15919_v28  ;;  %v8919_v25 = vmul.f32 %v15976_v8, %v8882_v26  ;;  %v8953_v50 = vadd.f32 %v15983_v54, %v8916_v15 }
 0x6d2   : > { %v11767_v30 = vpop.eup %11766  ;;  %v8986_v21 = vmax.f32 %v8954_v19, 0.0 }
 0x6d3   : > { %11371 = vmatmul.mubr.f32.gmra.mxu0 %v8984_v4  ;;  %v8918_v9 = vmul.f32 %v15976_v8, %v8881_v33  ;;  %v8884_v11 = vmul.f32 %v11767_v30, %v15926_v43  ;;  %v8985_v38 = vmax.f32 %v8953_v50, 0.0  ;;  %v8956_v18 = vadd.f32 %v15983_v54, %v8919_v25 }
 0x6d4   : > { %v11769_v60 = vpop.eup %11768 }
 0x6d5   : > { %v8955_v48 = vadd.f32 %v15983_v54, %v8918_v9  ;;  %v8883_v17 = vmul.f32 %v11769_v60, %v15929_v51  ;;  %v8921_v28 = vmul.f32 %v15976_v8, %v8884_v11  ;;  %11373 = vmatprep.mubr.f32.mxu0 %v8985_v38  ;;  %v8988_v32 = vmax.f32 %v8956_v18, 0.0 }
 0x6d6   : > { %v11771_v31 = vpop.eup %11770 }
 0x6d7   : > { %11374 = vmatmul.mubr.f32.gmra.mxu0 %v8986_v21  ;;  %v8987_v14 = vmax.f32 %v8955_v48, 0.0  ;;  %v8920_v5 = vmul.f32 %v15976_v8, %v8883_v17  ;;  %v8886_v16 = vmul.f32 %v11771_v31, %v15936_v44  ;;  %v8958_v59 = vadd.f32 %v15983_v54, %v8921_v28 }
 0x6d8   : > { %v11773_v43 = vpop.eup %11772 }
 0x6d9   : > { %11376 = vmatprep.mubr.f32.mxu0 %v8987_v14  ;;  %v8957_v10 = vadd.f32 %v15983_v54, %v8920_v5  ;;  %v8885_v3 = vmul.f32 %v11773_v43, %v15939_v37  ;;  %v8923_v51 = vmul.f32 %v15976_v8, %v8886_v16  ;;  %v8990_v44 = vmax.f32 %v8958_v59, 0.0 }
 0x6da   : > { %v11775_v20 = vpop.eup %11774 }
 0x6db   : > { %11377 = vmatmul.mubr.f32.gmra.mxu0 %v8988_v32  ;;  %v8989_v1 = vmax.f32 %v8957_v10, 0.0  ;;  %v8922_v41 = vmul.f32 %v15976_v8, %v8885_v3  ;;  %v8888_v52 = vmul.f32 %v11775_v20, %v15946_v23  ;;  %v8960_v58 = vadd.f32 %v15983_v54, %v8923_v51 }
 0x6dc   : > { %v11777_v40 = vpop.eup %11776 }
 0x6dd   : > { %11379 = vmatprep.mubr.f32.mxu0 %v8989_v1  ;;  %v8959_v35 = vadd.f32 %v15983_v54, %v8922_v41  ;;  %v8887_v6 = vmul.f32 %v11777_v40, %v15949_v27  ;;  %v8925_v37 = vmul.f32 %v15976_v8, %v8888_v52  ;;  %v8992_v62 = vmax.f32 %v8960_v58, 0.0  ;;  %v16082_v27 = vld [vmem:[%s16705_s8] ss:$0 sm:$0xff] }
 0x6df   : > { %11380 = vmatmul.mubr.f32.gmra.mxu0 %v8990_v44  ;;  %v8991_v46 = vmax.f32 %v8959_v35, 0.0  ;;  %v8924_v55 = vmul.f32 %v15976_v8, %v8887_v6  ;;  %v8962_v23 = vadd.f32 %v15983_v54, %v8925_v37 }
 0x6e1   : > { %11382 = vmatprep.mubr.f32.mxu0 %v8991_v46  ;;  %v8961_v61 = vadd.f32 %v15983_v54, %v8924_v55  ;;  %v8994_v7 = vmax.f32 %v8962_v23, 0.0 }
 0x6e3   : > { %11383 = vmatmul.mubr.f32.gmra.mxu0 %v8992_v62  ;;  %v8993_v47 = vmax.f32 %v8961_v61, 0.0 }
 0x6e5   : > { %11385 = vmatprep.mubr.f32.mxu0 %v8993_v47 }
 0x6e7   : > { %11386 = vmatmul.mubr.f32.gmra.mxu0 %v8994_v7 }
 0x76a   : > { %v11342_v57 = vpop.f32.mrf.mxu0 }
 0x76b   : > { %v16088_v36 = vadd.f32 %v11342_v57, %v16082_v27 }
 0x76c   : > { %v9082_v53 = vpop.f32.mrf.mxu0 }
 0x76d   : > { %v16085_v8 = vadd.f32 %v16082_v27, %v9082_v53  ;;  %v9244_v63 = vsel %vm17311_vm6, %v16088_v36, 0.0  ;;  %vm17327_vm6 = vmmov %vm17319_vm0 }
 0x76f   : > { %v11345_v13 = vpop.f32.mrf.mxu0  ;;  %v9241_v54 = vsel %vm17310_vm13, %v16085_v8, 0.0  ;;  %vm17326_vm13 = vmmov %vm17319_vm0 }
 0x770   : > { %9242 = vadd.xlane.f32.xlu0 %v9241_v54  ;;  %v16098_v56 = vadd.f32 %v11345_v13, %v16082_v27 }
 0x771   : > { %v9092_v0 = vpop.f32.mrf.mxu0 }
 0x772   : > { %v16093_v24 = vadd.f32 %v16082_v27, %v9092_v0  ;;  %v9250_v34 = vsel %vm17313_vm15, %v16098_v56, 0.0  ;;  %vm17329_vm15 = vmmov %vm17319_vm0 }
 0x773   : > { %v11348_v42 = vpop.f32.mrf.mxu0 }
 0x774   : > { %v9247_v29 = vsel %vm17312_vm12, %v16093_v24, 0.0  ;;  %9245 = vadd.xlane.f32.xlu0 %v9244_v63  ;;  %v16106_v22 = vadd.f32 %v11348_v42, %v16082_v27  ;;  %vm17328_vm12 = vmmov %vm17319_vm0 }
 0x775   : > { %v9102_v2 = vpop.f32.mrf.mxu0  ;;  %9248 = vadd.xlane.f32.xlu1 %v9247_v29 }
 0x776   : > { %v16103_v45 = vadd.f32 %v16082_v27, %v9102_v2  ;;  %v9256_v4 = vsel %vm17315_vm8, %v16106_v22, 0.0  ;;  %vm17331_vm8 = vmmov %vm17319_vm0 }
 0x777   : > { %v11351_v49 = vpop.f32.mrf.mxu0 }
 0x778   : > { %v9253_v12 = vsel %vm17314_vm3, %v16103_v45, 0.0  ;;  %v16116_v19 = vadd.f32 %v11351_v49, %v16082_v27  ;;  %vm17330_vm3 = vmmov %vm17319_vm0 }
 0x779   : > { %v9112_v26 = vpop.f32.mrf.mxu0  ;;  %9251 = vadd.xlane.f32.xlu1 %v9250_v34  ;;  %9254 = vadd.xlane.f32.xlu0 %v9253_v12 }
 0x77a   : > { %v16113_v39 = vadd.f32 %v16082_v27, %v9112_v26  ;;  %v9262_v11 = vsel %vm17317_vm14, %v16116_v19, 0.0  ;;  %vm17333_vm14 = vmmov %vm17319_vm0 }
 0x77b   : > { %v11354_v15 = vpop.f32.mrf.mxu0 }
 0x77c   : > { %v9259_v33 = vsel %vm17316_vm2, %v16113_v39, 0.0  ;;  %v16126_v9 = vadd.f32 %v11354_v15, %v16082_v27  ;;  %vm17332_vm2 = vmmov %vm17319_vm0 }
 0x77d   : > { %v9122_v25 = vpop.f32.mrf.mxu0  ;;  %9257 = vadd.xlane.f32.xlu1 %v9256_v4  ;;  %9260 = vadd.xlane.f32.xlu0 %v9259_v33 }
 0x77e   : > { %v16123_v30 = vadd.f32 %v16082_v27, %v9122_v25  ;;  %v9268_v17 = vsel %vm17319_vm0, %v16126_v9, 0.0 }
 0x77f   : > { %v11357_v50 = vpop.f32.mrf.mxu0 }
 0x780   : > { %v9265_v60 = vsel %vm17318_vm5, %v16123_v30, 0.0  ;;  %v16136_v18 = vadd.f32 %v11357_v50, %v16082_v27  ;;  %vm17334_vm5 = vmmov %vm17319_vm0 }
 0x781   : > { %v9132_v38 = vpop.f32.mrf.mxu0  ;;  %9263 = vadd.xlane.f32.xlu1 %v9262_v11  ;;  %9266 = vadd.xlane.f32.xlu0 %v9265_v60 }
 0x782   : > { %v16133_v21 = vadd.f32 %v16082_v27, %v9132_v38  ;;  %v9274_v43 = vsel %vm17321_vm9, %v16136_v18, 0.0  ;;  %vm17336_vm9 = vmmov %vm17319_vm0 }
 0x783   : > { %v11360_v48 = vpop.f32.mrf.mxu0 }
 0x784   : > { %v9271_v28 = vsel %vm17320_vm4, %v16133_v21, 0.0  ;;  %v16146_v16 = vadd.f32 %v11360_v48, %v16082_v27  ;;  %vm17335_vm4 = vmmov %vm17319_vm0 }
 0x785   : > { %v9142_v31 = vpop.f32.mrf.mxu0  ;;  %9269 = vadd.xlane.f32.xlu1 %v9268_v17  ;;  %9272 = vadd.xlane.f32.xlu0 %v9271_v28 }
 0x786   : > { %v16143_v14 = vadd.f32 %v16082_v27, %v9142_v31  ;;  %v9280_v20 = vsel %vm17323_vm7, %v16146_v16, 0.0  ;;  %vm17338_vm7 = vmmov %vm17319_vm0 }
 0x787   : > { %v11363_v5 = vpop.f32.mrf.mxu0 }
 0x788   : > { %v9277_v59 = vsel %vm17322_vm1, %v16143_v14, 0.0  ;;  %v16156_v51 = vadd.f32 %v11363_v5, %v16082_v27  ;;  %vm17337_vm1 = vmmov %vm17319_vm0 }
 0x789   : > { %v9152_v32 = vpop.f32.mrf.mxu0  ;;  %9275 = vadd.xlane.f32.xlu1 %v9274_v43  ;;  %9278 = vadd.xlane.f32.xlu0 %v9277_v59 }
 0x78a   : > { %v16153_v10 = vadd.f32 %v16082_v27, %v9152_v32  ;;  %v9286_v35 = vsel %vm17325_vm10, %v16156_v51, 0.0  ;;  %vm17340_vm10 = vmmov %vm17319_vm0 }
 0x78b   : > { %v11366_v3 = vpop.f32.mrf.mxu0 }
 0x78c   : > { %v9283_v1 = vsel %vm17324_vm11, %v16153_v10, 0.0  ;;  %v16166_v44 = vadd.f32 %v11366_v3, %v16082_v27  ;;  %vm17339_vm11 = vmmov %vm17319_vm0 }
 0x78d   : > { %v9162_v41 = vpop.f32.mrf.mxu0  ;;  %9281 = vadd.xlane.f32.xlu1 %v9280_v20  ;;  %9284 = vadd.xlane.f32.xlu0 %v9283_v1 }
 0x78e   : > { %v16163_v52 = vadd.f32 %v16082_v27, %v9162_v41  ;;  %v9292_v62 = vsel %vm17327_vm6, %v16166_v44, 0.0  ;;  %vm17342_vm6 = vmmov %vm17319_vm0 }
 0x78f   : > { %v11369_v40 = vpop.f32.mrf.mxu0 }
 0x790   : > { %v9289_v58 = vsel %vm17326_vm13, %v16163_v52, 0.0  ;;  %v16176_v55 = vadd.f32 %v11369_v40, %v16082_v27  ;;  %v9767_v40 = vld [vmem:[%s16706_s9 + $0x18] sm:$0xff]  ;;  %vm17341_vm13 = vmmov %vm17319_vm0 }
 0x791   : > { %v9172_v6 = vpop.f32.mrf.mxu0  ;;  %9287 = vadd.xlane.f32.xlu1 %v9286_v35  ;;  %9290 = vadd.xlane.f32.xlu0 %v9289_v58  ;;  %v9765_v35 = vld [vmem:[%s16706_s9 + $0x8] sm:$0xff] }
 0x792   : > { %v16173_v37 = vadd.f32 %v16082_v27, %v9172_v6  ;;  %v9298_v53 = vsel %vm17329_vm15, %v16176_v55, 0.0  ;;  %11388 = vmatprep.subr.mxu1 %v9767_v40  ;;  %vm17344_vm15 = vmmov %vm17319_vm0 }
 0x793   : > { %v11372_v46 = vpop.f32.mrf.mxu0  ;;  %11389 = vmatpush3.msra.mxu1 %v9767_v40 }
 0x794   : > { %v9295_v61 = vsel %vm17328_vm12, %v16173_v37, 0.0  ;;  %v16186_v57 = vadd.f32 %v11372_v46, %v16082_v27  ;;  %vm17343_vm12 = vmmov %vm17319_vm0 }
 0x795   : > { %v9182_v23 = vpop.f32.mrf.mxu0  ;;  %9293 = vadd.xlane.f32.xlu1 %v9292_v62  ;;  %9296 = vadd.xlane.f32.xlu0 %v9295_v61 }
 0x796   : > { %v16183_v47 = vadd.f32 %v16082_v27, %v9182_v23  ;;  %v9304_v29 = vsel %vm17331_vm8, %v16186_v57, 0.0  ;;  %vm17346_vm8 = vmmov %vm17319_vm0 }
 0x797   : > { %v11375_v7 = vpop.f32.mrf.mxu0 }
 0x798   : > { %v9301_v13 = vsel %vm17330_vm3, %v16183_v47, 0.0  ;;  %v16196_v63 = vadd.f32 %v11375_v7, %v16082_v27  ;;  %vm17345_vm3 = vmmov %vm17319_vm0 }
 0x799   : > { %v9192_v54 = vpop.f32.mrf.mxu0  ;;  %9299 = vadd.xlane.f32.xlu1 %v9298_v53  ;;  %9302 = vadd.xlane.f32.xlu0 %v9301_v13 }
 0x79a   : > { %v16193_v0 = vadd.f32 %v16082_v27, %v9192_v54  ;;  %v9310_v15 = vsel %vm17333_vm14, %v16196_v63, 0.0  ;;  %vm17348_vm14 = vmmov %vm17319_vm0 }
 0x79b   : > { %v11378_v42 = vpop.f32.mrf.mxu0 }
 0x79c   : > { %v9307_v2 = vsel %vm17332_vm2, %v16193_v0, 0.0  ;;  %v16206_v26 = vadd.f32 %v11378_v42, %v16082_v27  ;;  %vm17347_vm2 = vmmov %vm17319_vm0 }
 0x79d   : > { %v9202_v49 = vpop.f32.mrf.mxu0  ;;  %9305 = vadd.xlane.f32.xlu1 %v9304_v29  ;;  %9308 = vadd.xlane.f32.xlu0 %v9307_v2 }
 0x79e   : > { %v16203_v34 = vadd.f32 %v16082_v27, %v9202_v49  ;;  %v9316_v60 = vsel %vm17319_vm0, %v16206_v26, 0.0 }
 0x79f   : > { %v11381_v12 = vpop.f32.mrf.mxu0 }
 0x7a0   : > { %v9313_v4 = vsel %vm17334_vm5, %v16203_v34, 0.0  ;;  %v16216_v11 = vadd.f32 %v11381_v12, %v16082_v27  ;;  %vm17349_vm5 = vmmov %vm17319_vm0 }
 0x7a1   : > { %v9212_v33 = vpop.f32.mrf.mxu0  ;;  %9311 = vadd.xlane.f32.xlu1 %v9310_v15  ;;  %9314 = vadd.xlane.f32.xlu0 %v9313_v4 }
 0x7a2   : > { %v16213_v25 = vadd.f32 %v16082_v27, %v9212_v33  ;;  %v9322_v5 = vsel %vm17336_vm9, %v16216_v11, 0.0  ;;  %vm17351_vm9 = vmmov %vm17319_vm0 }
 0x7a3   : > { %v11384_v50 = vpop.f32.mrf.mxu0 }
 0x7a4   : > { %v9319_v38 = vsel %vm17335_vm4, %v16213_v25, 0.0  ;;  %v16226_v31 = vadd.f32 %v11384_v50, %v16082_v27  ;;  %vm17350_vm4 = vmmov %vm17319_vm0 }
 0x7a5   : > { %v9222_v48 = vpop.f32.mrf.mxu0  ;;  %9317 = vadd.xlane.f32.xlu1 %v9316_v60  ;;  %9320 = vadd.xlane.f32.xlu0 %v9319_v38 }
 0x7a6   : > { %v16223_v17 = vadd.f32 %v16082_v27, %v9222_v48  ;;  %v9328_v20 = vsel %vm17338_vm7, %v16226_v31, 0.0  ;;  %vm17353_vm7 = vmmov %vm17319_vm0 }
 0x7a7   : > { %v11387_v28 = vpop.f32.mrf.mxu0 }
 0x7a8   : > { %v9325_v43 = vsel %vm17337_vm1, %v16223_v17, 0.0  ;;  %v16236_v3 = vadd.f32 %v11387_v28, %v16082_v27  ;;  %vm17352_vm1 = vmmov %vm17319_vm0 }
 0x7a9   : > { %9323 = vadd.xlane.f32.xlu1 %v9322_v5  ;;  %9326 = vadd.xlane.f32.xlu0 %v9325_v43  ;;  %v9232_v59 = vpop.f32.mrf.mxu0 }
 0x7aa   : > { %v16233_v32 = vadd.f32 %v16082_v27, %v9232_v59  ;;  %v9334_v41 = vsel %vm17340_vm10, %v16236_v3, 0.0  ;;  %v9766_v27 = vld [vmem:[%s16706_s9 + $0x10] sm:$0xff]  ;;  %vm17355_vm10 = vmmov %vm17319_vm0 }
 0x7ab   : > { %11390 = vmatprep.subr.mxu1 %v9766_v27 }
 0x7ac   : > { %v9331_v1 = vsel %vm17339_vm11, %v16233_v32, 0.0  ;;  %11391 = vmatpush3.msra.mxu1 %v9766_v27  ;;  %vm17354_vm11 = vmmov %vm17319_vm0 }
 0x7ad   : > { %9329 = vadd.xlane.f32.xlu1 %v9328_v20  ;;  %9332 = vadd.xlane.f32.xlu0 %v9331_v1 }
 0x7ae   : > { %11392 = vmatprep.subr.mxu1 %v9765_v35 }
 0x7af   : > { %11393 = vmatpush3.msra.mxu1 %v9765_v35 }
 0x7b1   : > { %9335 = vadd.xlane.f32.xlu1 %v9334_v41 }
 0x7f9   : > { %v9243_v58 = vpop.xlane.xlu0 %9242 }
 0x7fa   : > { %v9338_v6 = vmul.f32 0.03125, %v9243_v58 }
 0x7fc   : > { %v16254_v46 = vsub.f32 %v16085_v8, %v9338_v6 }
 0x7fd   : > { %v9246_v62 = vpop.xlane.xlu0 %9245 }
 0x7fe   : > { %v9249_v61 = vpop.xlane.xlu1 %9248  ;;  %v9339_v23 = vmul.f32 0.03125, %v9246_v62  ;;  %v9402_v7 = vmul.f32 %v16254_v46, %v16254_v46 }
 0x7ff   : > { %v9340_v53 = vmul.f32 0.03125, %v9249_v61 }
 0x800   : > { %v16259_v13 = vsub.f32 %v16088_v36, %v9339_v23  ;;  %v9434_v54 = vsel %vm17341_vm13, %v9402_v7, 0.0  ;;  %vm17356_vm13 = vmmov %vm17319_vm0 }
 0x801   : > { %v16263_v42 = vsub.f32 %v16093_v24, %v9340_v53  ;;  %9435 = vadd.xlane.f32.xlu0 %v9434_v54 }
 0x802   : > { %v9252_v29 = vpop.xlane.xlu1 %9251  ;;  %v9255_v2 = vpop.xlane.xlu0 %9254  ;;  %v9403_v8 = vmul.f32 %v16259_v13, %v16259_v13 }
 0x803   : > { %v9341_v49 = vmul.f32 0.03125, %v9252_v29  ;;  %v9342_v12 = vmul.f32 0.03125, %v9255_v2  ;;  %v9404_v15 = vmul.f32 %v16263_v42, %v16263_v42 }
 0x804   : > { %v9437_v4 = vsel %vm17342_vm6, %v9403_v8, 0.0  ;;  %vm17357_vm6 = vmmov %vm17319_vm0 }
 0x805   : > { %v16271_v36 = vsub.f32 %v16098_v56, %v9341_v49  ;;  %v16274_v33 = vsub.f32 %v16103_v45, %v9342_v12  ;;  %9438 = vadd.xlane.f32.xlu1 %v9437_v4  ;;  %v9440_v24 = vsel %vm17343_vm12, %v9404_v15, 0.0  ;;  %vm17358_vm12 = vmmov %vm17319_vm0 }
 0x806   : > { %v9258_v50 = vpop.xlane.xlu1 %9257  ;;  %v9261_v60 = vpop.xlane.xlu0 %9260  ;;  %9441 = vadd.xlane.f32.xlu0 %v9440_v24 }
 0x807   : > { %v9343_v38 = vmul.f32 0.03125, %v9258_v50  ;;  %v9344_v48 = vmul.f32 0.03125, %v9261_v60  ;;  %v9405_v28 = vmul.f32 %v16271_v36, %v16271_v36  ;;  %v9406_v5 = vmul.f32 %v16274_v33, %v16274_v33 }
 0x809   : > { %v16282_v56 = vsub.f32 %v16106_v22, %v9343_v38  ;;  %v16285_v45 = vsub.f32 %v16113_v39, %v9344_v48  ;;  %v9443_v43 = vsel %vm17344_vm15, %v9405_v28, 0.0  ;;  %v9446_v59 = vsel %vm17345_vm3, %v9406_v5, 0.0  ;;  %vm17359_vm15 = vmmov %vm17319_vm0 }
 0x80a   : > { %v9264_v20 = vpop.xlane.xlu1 %9263  ;;  %v9267_v1 = vpop.xlane.xlu0 %9266  ;;  %9444 = vadd.xlane.f32.xlu1 %v9443_v43  ;;  %9447 = vadd.xlane.f32.xlu0 %v9446_v59  ;;  %vm17360_vm3 = vmmov %vm17319_vm0 }
 0x80b   : > { %v9345_v41 = vmul.f32 0.03125, %v9264_v20  ;;  %v9346_v40 = vmul.f32 0.03125, %v9267_v1  ;;  %v9407_v27 = vmul.f32 %v16282_v56, %v16282_v56  ;;  %v9408_v22 = vmul.f32 %v16285_v45, %v16285_v45 }
 0x80d   : > { %v16294_v35 = vsub.f32 %v16116_v19, %v9345_v41  ;;  %v16297_v39 = vsub.f32 %v16123_v30, %v9346_v40  ;;  %v9449_v58 = vsel %vm17346_vm8, %v9407_v27, 0.0  ;;  %v9452_v6 = vsel %vm17347_vm2, %v9408_v22, 0.0  ;;  %vm17361_vm8 = vmmov %vm17319_vm0 }
 0x80e   : > { %v9270_v62 = vpop.xlane.xlu1 %9269  ;;  %v9273_v61 = vpop.xlane.xlu0 %9272  ;;  %9450 = vadd.xlane.f32.xlu1 %v9449_v58  ;;  %9453 = vadd.xlane.f32.xlu0 %v9452_v6  ;;  %vm17362_vm2 = vmmov %vm17319_vm0 }
 0x80f   : > { %v9347_v23 = vmul.f32 0.03125, %v9270_v62  ;;  %v9348_v7 = vmul.f32 0.03125, %v9273_v61  ;;  %v9409_v53 = vmul.f32 %v16294_v35, %v16294_v35  ;;  %v9410_v19 = vmul.f32 %v16297_v39, %v16297_v39 }
 0x811   : > { %v16306_v54 = vsub.f32 %v16126_v9, %v9347_v23  ;;  %v16309_v30 = vsub.f32 %v16133_v21, %v9348_v7  ;;  %v9455_v29 = vsel %vm17348_vm14, %v9409_v53, 0.0  ;;  %v9458_v2 = vsel %vm17349_vm5, %v9410_v19, 0.0  ;;  %vm17363_vm14 = vmmov %vm17319_vm0 }
 0x812   : > { %v9276_v8 = vpop.xlane.xlu1 %9275  ;;  %v9279_v49 = vpop.xlane.xlu0 %9278  ;;  %9456 = vadd.xlane.f32.xlu1 %v9455_v29  ;;  %9459 = vadd.xlane.f32.xlu0 %v9458_v2  ;;  %vm17364_vm5 = vmmov %vm17319_vm0 }
 0x813   : > { %v9349_v12 = vmul.f32 0.03125, %v9276_v8  ;;  %v9350_v15 = vmul.f32 0.03125, %v9279_v49  ;;  %v9411_v4 = vmul.f32 %v16306_v54, %v16306_v54  ;;  %v9412_v9 = vmul.f32 %v16309_v30, %v16309_v30 }
 0x815   : > { %v16318_v24 = vsub.f32 %v16136_v18, %v9349_v12  ;;  %v16321_v21 = vsub.f32 %v16143_v14, %v9350_v15  ;;  %v9461_v50 = vsel %vm17319_vm0, %v9411_v4, 0.0  ;;  %v9464_v60 = vsel %vm17350_vm4, %v9412_v9, 0.0  ;;  %vm17365_vm4 = vmmov %vm17319_vm0 }
 0x816   : > { %v9282_v38 = vpop.xlane.xlu1 %9281  ;;  %v9285_v48 = vpop.xlane.xlu0 %9284  ;;  %9462 = vadd.xlane.f32.xlu1 %v9461_v50  ;;  %9465 = vadd.xlane.f32.xlu0 %v9464_v60 }
 0x817   : > { %v9351_v28 = vmul.f32 0.03125, %v9282_v38  ;;  %v9352_v5 = vmul.f32 0.03125, %v9285_v48  ;;  %v9413_v43 = vmul.f32 %v16318_v24, %v16318_v24  ;;  %v9414_v18 = vmul.f32 %v16321_v21, %v16321_v21 }
 0x819   : > { %v16330_v59 = vsub.f32 %v16146_v16, %v9351_v28  ;;  %v16333_v14 = vsub.f32 %v16153_v10, %v9352_v5  ;;  %v9467_v20 = vsel %vm17351_vm9, %v9413_v43, 0.0  ;;  %v9470_v1 = vsel %vm17352_vm1, %v9414_v18, 0.0  ;;  %vm17366_vm9 = vmmov %vm17319_vm0 }
 0x81a   : > { %v9288_v41 = vpop.xlane.xlu1 %9287  ;;  %v9291_v40 = vpop.xlane.xlu0 %9290  ;;  %9468 = vadd.xlane.f32.xlu1 %v9467_v20  ;;  %9471 = vadd.xlane.f32.xlu0 %v9470_v1  ;;  %vm17367_vm1 = vmmov %vm17319_vm0 }
 0x81b   : > { %v9353_v27 = vmul.f32 0.03125, %v9288_v41  ;;  %v9354_v22 = vmul.f32 0.03125, %v9291_v40  ;;  %v9415_v58 = vmul.f32 %v16330_v59, %v16330_v59  ;;  %v9416_v16 = vmul.f32 %v16333_v14, %v16333_v14 }
 0x81d   : > { %v16342_v6 = vsub.f32 %v16156_v51, %v9353_v27  ;;  %v16345_v10 = vsub.f32 %v16163_v52, %v9354_v22  ;;  %v9473_v62 = vsel %vm17353_vm7, %v9415_v58, 0.0  ;;  %v9476_v61 = vsel %vm17354_vm11, %v9416_v16, 0.0  ;;  %vm17368_vm7 = vmmov %vm17319_vm0 }
 0x81e   : > { %v9294_v23 = vpop.xlane.xlu1 %9293  ;;  %v9297_v7 = vpop.xlane.xlu0 %9296  ;;  %9474 = vadd.xlane.f32.xlu1 %v9473_v62  ;;  %9477 = vadd.xlane.f32.xlu0 %v9476_v61  ;;  %vm17369_vm11 = vmmov %vm17319_vm0 }
 0x81f   : > { %v9355_v53 = vmul.f32 0.03125, %v9294_v23  ;;  %v9356_v19 = vmul.f32 0.03125, %v9297_v7  ;;  %v9417_v29 = vmul.f32 %v16342_v6, %v16342_v6  ;;  %v9418_v51 = vmul.f32 %v16345_v10, %v16345_v10 }
 0x821   : > { %v16354_v2 = vsub.f32 %v16166_v44, %v9355_v53  ;;  %v16357_v52 = vsub.f32 %v16173_v37, %v9356_v19  ;;  %v9479_v8 = vsel %vm17355_vm10, %v9417_v29, 0.0  ;;  %v9482_v49 = vsel %vm17356_vm13, %v9418_v51, 0.0  ;;  %v9764_v37 = vld [vmem:[%s16706_s9] sm:$0xff]  ;;  %vm17370_vm10 = vmmov %vm17319_vm0 }
 0x822   : > { %v9300_v12 = vpop.xlane.xlu1 %9299  ;;  %v9303_v15 = vpop.xlane.xlu0 %9302  ;;  %9480 = vadd.xlane.f32.xlu1 %v9479_v8  ;;  %9483 = vadd.xlane.f32.xlu0 %v9482_v49  ;;  %vm17371_vm13 = vmmov %vm17319_vm0 }
 0x823   : > { %v9357_v4 = vmul.f32 0.03125, %v9300_v12  ;;  %v9358_v9 = vmul.f32 0.03125, %v9303_v15  ;;  %v9419_v50 = vmul.f32 %v16354_v2, %v16354_v2  ;;  %v9420_v44 = vmul.f32 %v16357_v52, %v16357_v52  ;;  %11394 = vmatprep.subr.mxu1 %v9764_v37 }
 0x824   : > { %11395 = vmatpush3.msra.mxu1 %v9764_v37 }
 0x825   : > { %v16369_v60 = vsub.f32 %v16176_v55, %v9357_v4  ;;  %v16372_v38 = vsub.f32 %v16183_v47, %v9358_v9  ;;  %v9485_v48 = vsel %vm17357_vm6, %v9419_v50, 0.0  ;;  %v9488_v28 = vsel %vm17358_vm12, %v9420_v44, 0.0  ;;  %vm17372_vm6 = vmmov %vm17319_vm0 }
 0x826   : > { %v9306_v5 = vpop.xlane.xlu1 %9305  ;;  %v9309_v43 = vpop.xlane.xlu0 %9308  ;;  %9486 = vadd.xlane.f32.xlu1 %v9485_v48  ;;  %9489 = vadd.xlane.f32.xlu0 %v9488_v28  ;;  %vm17373_vm12 = vmmov %vm17319_vm0 }
 0x827   : > { %v9359_v18 = vmul.f32 0.03125, %v9306_v5  ;;  %v9360_v20 = vmul.f32 0.03125, %v9309_v43  ;;  %v9421_v1 = vmul.f32 %v16369_v60, %v16369_v60  ;;  %v9422_v55 = vmul.f32 %v16372_v38, %v16372_v38 }
 0x829   : > { %v16381_v47 = vsub.f32 %v16186_v57, %v9359_v18  ;;  %v16384_v41 = vsub.f32 %v16193_v0, %v9360_v20  ;;  %v9491_v40 = vsel %vm17359_vm15, %v9421_v1, 0.0  ;;  %v9494_v27 = vsel %vm17360_vm3, %v9422_v55, 0.0  ;;  %vm17374_vm15 = vmmov %vm17319_vm0 }
 0x82a   : > { %v9312_v22 = vpop.xlane.xlu1 %9311  ;;  %v9315_v58 = vpop.xlane.xlu0 %9314  ;;  %9492 = vadd.xlane.f32.xlu1 %v9491_v40  ;;  %9495 = vadd.xlane.f32.xlu0 %v9494_v27  ;;  %vm17375_vm3 = vmmov %vm17319_vm0 }
 0x82b   : > { %v9361_v16 = vmul.f32 0.03125, %v9312_v22  ;;  %v9362_v62 = vmul.f32 0.03125, %v9315_v58  ;;  %v9423_v61 = vmul.f32 %v16381_v47, %v16381_v47  ;;  %v9424_v57 = vmul.f32 %v16384_v41, %v16384_v41 }
 0x82d   : > { %v16393_v23 = vsub.f32 %v16196_v63, %v9361_v16  ;;  %v16396_v0 = vsub.f32 %v16203_v34, %v9362_v62  ;;  %v9497_v7 = vsel %vm17361_vm8, %v9423_v61, 0.0  ;;  %v9500_v53 = vsel %vm17362_vm2, %v9424_v57, 0.0  ;;  %vm17376_vm8 = vmmov %vm17319_vm0 }
 0x82e   : > { %v9318_v19 = vpop.xlane.xlu1 %9317  ;;  %v9321_v29 = vpop.xlane.xlu0 %9320  ;;  %9498 = vadd.xlane.f32.xlu1 %v9497_v7  ;;  %9501 = vadd.xlane.f32.xlu0 %v9500_v53  ;;  %vm17377_vm2 = vmmov %vm17319_vm0 }
 0x82f   : > { %v9363_v51 = vmul.f32 0.03125, %v9318_v19  ;;  %v9364_v8 = vmul.f32 0.03125, %v9321_v29  ;;  %v9425_v49 = vmul.f32 %v16393_v23, %v16393_v23  ;;  %v9426_v63 = vmul.f32 %v16396_v0, %v16396_v0 }
 0x831   : > { %v16405_v12 = vsub.f32 %v16206_v26, %v9363_v51  ;;  %v16408_v34 = vsub.f32 %v16213_v25, %v9364_v8  ;;  %v9503_v15 = vsel %vm17363_vm14, %v9425_v49, 0.0  ;;  %v9506_v4 = vsel %vm17364_vm5, %v9426_v63, 0.0  ;;  %vm17378_vm14 = vmmov %vm17319_vm0 }
 0x832   : > { %v9324_v9 = vpop.xlane.xlu1 %9323  ;;  %v9327_v50 = vpop.xlane.xlu0 %9326  ;;  %9504 = vadd.xlane.f32.xlu1 %v9503_v15  ;;  %9507 = vadd.xlane.f32.xlu0 %v9506_v4  ;;  %vm17379_vm5 = vmmov %vm17319_vm0 }
 0x833   : > { %v9365_v44 = vmul.f32 0.03125, %v9324_v9  ;;  %v9366_v37 = vmul.f32 0.03125, %v9327_v50  ;;  %v9427_v48 = vmul.f32 %v16405_v12, %v16405_v12  ;;  %v9428_v26 = vmul.f32 %v16408_v34, %v16408_v34 }
 0x835   : > { %v16417_v28 = vsub.f32 %v16216_v11, %v9365_v44  ;;  %v16420_v25 = vsub.f32 %v16223_v17, %v9366_v37  ;;  %v9509_v5 = vsel %vm17319_vm0, %v9427_v48, 0.0  ;;  %v9512_v43 = vsel %vm17365_vm4, %v9428_v26, 0.0  ;;  %vm17380_vm4 = vmmov %vm17319_vm0 }
 0x836   : > { %v9330_v18 = vpop.xlane.xlu1 %9329  ;;  %9510 = vadd.xlane.f32.xlu1 %v9509_v5  ;;  %9513 = vadd.xlane.f32.xlu0 %v9512_v43  ;;  %v9333_v20 = vpop.xlane.xlu0 %9332 }
 0x837   : > { %v9367_v1 = vmul.f32 0.03125, %v9330_v18  ;;  %v9368_v55 = vmul.f32 0.03125, %v9333_v20  ;;  %v9429_v40 = vmul.f32 %v16417_v28, %v16417_v28  ;;  %v9430_v11 = vmul.f32 %v16420_v25, %v16420_v25 }
 0x839   : > { %v16429_v27 = vsub.f32 %v16226_v31, %v9367_v1  ;;  %v16432_v17 = vsub.f32 %v16233_v32, %v9368_v55  ;;  %v9515_v22 = vsel %vm17366_vm9, %v9429_v40, 0.0  ;;  %v9518_v58 = vsel %vm17367_vm1, %v9430_v11, 0.0  ;;  %vm17381_vm9 = vmmov %vm17319_vm0 }
 0x83a   : > { %9516 = vadd.xlane.f32.xlu1 %v9515_v22  ;;  %v9336_v16 = vpop.xlane.xlu1 %9335  ;;  %9519 = vadd.xlane.f32.xlu0 %v9518_v58  ;;  %vm17382_vm1 = vmmov %vm17319_vm0 }
 0x83b   : > { %v9369_v62 = vmul.f32 0.03125, %v9336_v16  ;;  %v9431_v61 = vmul.f32 %v16429_v27, %v16429_v27  ;;  %v9432_v57 = vmul.f32 %v16432_v17, %v16432_v17  ;;  %v16451_v16 = vld [vmem:[%s16705_s8 + $0x1] ss:$0 sm:$0xff] }
 0x83d   : > { %v16441_v31 = vsub.f32 %v16236_v3, %v9369_v62  ;;  %v9521_v32 = vsel %vm17368_vm7, %v9431_v61, 0.0  ;;  %v9524_v7 = vsel %vm17369_vm11, %v9432_v57, 0.0  ;;  %vm17383_vm7 = vmmov %vm17319_vm0 }
 0x83e   : > { %9522 = vadd.xlane.f32.xlu1 %v9521_v32  ;;  %9525 = vadd.xlane.f32.xlu0 %v9524_v7  ;;  %vm17384_vm11 = vmmov %vm17319_vm0 }
 0x83f   : > { %v9433_v53 = vmul.f32 %v16441_v31, %v16441_v31 }
 0x841   : > { %v9527_v19 = vsel %vm17370_vm10, %v9433_v53, 0.0  ;;  %v16457_v53 = vld [vmem:[%s16705_s8 + $0x2] ss:$0 sm:$0xff]  ;;  %vm17385_vm10 = vmmov %vm17319_vm0 }
 0x842   : > { %9528 = vadd.xlane.f32.xlu1 %v9527_v19 }
 0x88a   : > { %v9436_v29 = vpop.xlane.xlu0 %9435 }
 0x88b   : > { %v9530_v51 = vmul.f32 0.03125, %v9436_v29 }
 0x88d   : > { %v9562_v8 = vadd.f32 1e-05, %v9530_v51 }
 0x88e   : > { %v9439_v49 = vpop.xlane.xlu1 %9438 }
 0x88f   : > { %11778 = vrsqrt.f32 %v9562_v8  ;;  %v9531_v63 = vmul.f32 0.03125, %v9439_v49  ;;  %v9442_v3 = vpop.xlane.xlu0 %9441 }
 0x890   : > { %v9532_v15 = vmul.f32 0.03125, %v9442_v3 }
 0x891   : > { %v9563_v4 = vadd.f32 1e-05, %v9531_v63 }
 0x892   : > { %v9564_v9 = vadd.f32 1e-05, %v9532_v15 }
 0x893   : > { %11780 = vrsqrt.f32 %v9563_v4  ;;  %v9445_v50 = vpop.xlane.xlu1 %9444  ;;  %v9448_v44 = vpop.xlane.xlu0 %9447 }
 0x894   : > { %11782 = vrsqrt.f32 %v9564_v9  ;;  %v9533_v37 = vmul.f32 0.03125, %v9445_v50  ;;  %v9534_v48 = vmul.f32 0.03125, %v9448_v44 }
 0x896   : > { %v9565_v26 = vadd.f32 1e-05, %v9533_v37  ;;  %v9566_v5 = vadd.f32 1e-05, %v9534_v48 }
 0x897   : > { %v9451_v43 = vpop.xlane.xlu1 %9450  ;;  %v9454_v18 = vpop.xlane.xlu0 %9453 }
 0x898   : > { %11784 = vrsqrt.f32 %v9565_v26  ;;  %v9535_v20 = vmul.f32 0.03125, %v9451_v43  ;;  %v9536_v1 = vmul.f32 0.03125, %v9454_v18 }
 0x899   : > { %11786 = vrsqrt.f32 %v9566_v5 }
 0x89a   : > { %v9567_v55 = vadd.f32 1e-05, %v9535_v20  ;;  %v9568_v40 = vadd.f32 1e-05, %v9536_v1 }
 0x89b   : > { %v9457_v11 = vpop.xlane.xlu1 %9456  ;;  %v9460_v22 = vpop.xlane.xlu0 %9459 }
 0x89c   : > { %v11779_v58 = vpop.eup %11778  ;;  %11788 = vrsqrt.f32 %v9567_v55  ;;  %v9537_v62 = vmul.f32 0.03125, %v9457_v11  ;;  %v9538_v61 = vmul.f32 0.03125, %v9460_v22 }
 0x89d   : > { %11790 = vrsqrt.f32 %v9568_v40  ;;  %v9626_v57 = vmul.f32 %v11779_v58, %v16254_v46 }
 0x89e   : > { %v9569_v32 = vadd.f32 1e-05, %v9537_v62  ;;  %v9570_v7 = vadd.f32 1e-05, %v9538_v61 }
 0x89f   : > { %v9463_v19 = vpop.xlane.xlu1 %9462  ;;  %v9466_v29 = vpop.xlane.xlu0 %9465  ;;  %v9663_v51 = vmul.f32 %v16451_v16, %v9626_v57 }
 0x8a0   : > { %v11781_v8 = vpop.eup %11780  ;;  %11792 = vrsqrt.f32 %v9569_v32  ;;  %v9539_v49 = vmul.f32 0.03125, %v9463_v19  ;;  %v9540_v63 = vmul.f32 0.03125, %v9466_v29 }
 0x8a1   : > { %v11783_v3 = vpop.eup %11782  ;;  %v9627_v15 = vmul.f32 %v11781_v8, %v16259_v13  ;;  %11794 = vrsqrt.f32 %v9570_v7  ;;  %v9700_v46 = vadd.f32 %v16457_v53, %v9663_v51 }
 0x8a2   : > { %v9571_v4 = vadd.f32 1e-05, %v9539_v49  ;;  %v9572_v9 = vadd.f32 1e-05, %v9540_v63  ;;  %v9628_v50 = vmul.f32 %v11783_v3, %v16263_v42 }
 0x8a3   : > { %v9664_v44 = vmul.f32 %v16451_v16, %v9627_v15  ;;  %v9469_v37 = vpop.xlane.xlu1 %9468  ;;  %v9472_v48 = vpop.xlane.xlu0 %9471  ;;  %v9732_v26 = vmax.f32 %v9700_v46, 0.0 }
 0x8a4   : > { %11796 = vrsqrt.f32 %v9571_v4  ;;  %v9541_v5 = vmul.f32 0.03125, %v9469_v37  ;;  %v9542_v43 = vmul.f32 0.03125, %v9472_v48  ;;  %v9665_v18 = vmul.f32 %v16451_v16, %v9628_v50 }
 0x8a5   : > { %v11785_v20 = vpop.eup %11784  ;;  %11798 = vrsqrt.f32 %v9572_v9  ;;  %11396 = vmatprep.mubr.msk.f32.mxu1 %vm17371_vm13, %v9732_v26  ;;  %v9701_v13 = vadd.f32 %v16457_v53, %v9664_v44  ;;  %vm17386_vm13 = vmmov %vm17319_vm0 }
 0x8a6   : > { %v11787_v1 = vpop.eup %11786  ;;  %v9573_v55 = vadd.f32 1e-05, %v9541_v5  ;;  %v9574_v40 = vadd.f32 1e-05, %v9542_v43  ;;  %v9702_v42 = vadd.f32 %v16457_v53, %v9665_v18  ;;  %v9629_v11 = vmul.f32 %v11785_v20, %v16271_v36 }
 0x8a7   : > { %v9475_v22 = vpop.xlane.xlu1 %9474  ;;  %v9478_v58 = vpop.xlane.xlu0 %9477  ;;  %v9733_v62 = vmax.f32 %v9701_v13, 0.0  ;;  %v9630_v61 = vmul.f32 %v11787_v1, %v16274_v33 }
 0x8a8   : > { %11800 = vrsqrt.f32 %v9573_v55  ;;  %v9543_v57 = vmul.f32 0.03125, %v9475_v22  ;;  %v9544_v32 = vmul.f32 0.03125, %v9478_v58  ;;  %v9734_v7 = vmax.f32 %v9702_v42, 0.0 }
 0x8a9   : > { %v11789_v19 = vpop.eup %11788  ;;  %11802 = vrsqrt.f32 %v9574_v40  ;;  %11397 = vmatmul.mubr.msk.f32.vlgmr.msra.gmra.mxu1 %vm17372_vm6, %v9733_v62  ;;  %v9666_v29 = vmul.f32 %v16451_v16, %v9629_v11  ;;  %v9667_v51 = vmul.f32 %v16451_v16, %v9630_v61  ;;  %vm17387_vm6 = vmmov %vm17319_vm0 }
 0x8aa   : > { %v11791_v8 = vpop.eup %11790  ;;  %v9575_v49 = vadd.f32 1e-05, %v9543_v57  ;;  %v9576_v36 = vadd.f32 1e-05, %v9544_v32  ;;  %11399 = vmatprep.mubr.msk.f32.mxu1 %vm17373_vm12, %v9734_v7  ;;  %v9631_v63 = vmul.f32 %v11789_v19, %v16282_v56  ;;  %vm17388_vm12 = vmmov %vm17319_vm0 }
 0x8ab   : > { %v9481_v33 = vpop.xlane.xlu1 %9480  ;;  %v9484_v3 = vpop.xlane.xlu0 %9483  ;;  %v9703_v15 = vadd.f32 %v16457_v53, %v9666_v29  ;;  %v9704_v46 = vadd.f32 %v16457_v53, %v9667_v51  ;;  %v9632_v4 = vmul.f32 %v11791_v8, %v16285_v45 }
 0x8ac   : > { %11804 = vrsqrt.f32 %v9575_v49  ;;  %v9545_v9 = vmul.f32 0.03125, %v9481_v33  ;;  %v9546_v50 = vmul.f32 0.03125, %v9484_v3  ;;  %v9668_v44 = vmul.f32 %v16451_v16, %v9631_v63 }
 0x8ad   : > { %v11793_v37 = vpop.eup %11792  ;;  %11806 = vrsqrt.f32 %v9576_v36  ;;  %v9735_v48 = vmax.f32 %v9703_v15, 0.0  ;;  %v9736_v26 = vmax.f32 %v9704_v46, 0.0  ;;  %v9669_v5 = vmul.f32 %v16451_v16, %v9632_v4 }
 0x8ae   : > { %v11795_v56 = vpop.eup %11794  ;;  %v9577_v43 = vadd.f32 1e-05, %v9545_v9  ;;  %v9578_v18 = vadd.f32 1e-05, %v9546_v50  ;;  %v9705_v20 = vadd.f32 %v16457_v53, %v9668_v44  ;;  %v9633_v13 = vmul.f32 %v11793_v37, %v16294_v35 }
 0x8af   : > { %11400 = vmatmul.mubr.msk.f32.gmra.mxu1 %vm17374_vm15, %v9735_v48  ;;  %v9487_v45 = vpop.xlane.xlu1 %9486  ;;  %v9490_v1 = vpop.xlane.xlu0 %9489  ;;  %v9706_v55 = vadd.f32 %v16457_v53, %v9669_v5  ;;  %v9634_v40 = vmul.f32 %v11795_v56, %v16297_v39  ;;  %vm17389_vm15 = vmmov %vm17319_vm0 }
 0x8b0   : > { %11808 = vrsqrt.f32 %v9577_v43  ;;  %v9547_v42 = vmul.f32 0.03125, %v9487_v45  ;;  %11402 = vmatprep.mubr.msk.f32.mxu1 %vm17375_vm3, %v9736_v26  ;;  %v9548_v11 = vmul.f32 0.03125, %v9490_v1  ;;  %v9737_v22 = vmax.f32 %v9705_v20, 0.0  ;;  %vm17390_vm3 = vmmov %vm17319_vm0 }
 0x8b1   : > { %v11797_v58 = vpop.eup %11796  ;;  %11810 = vrsqrt.f32 %v9578_v18  ;;  %v9738_v62 = vmax.f32 %v9706_v55, 0.0  ;;  %v9670_v61 = vmul.f32 %v16451_v16, %v9633_v13  ;;  %v9671_v35 = vmul.f32 %v16451_v16, %v9634_v40 }
 0x8b2   : > { %v11799_v57 = vpop.eup %11798  ;;  %v9579_v32 = vadd.f32 1e-05, %v9547_v42  ;;  %v9580_v7 = vadd.f32 1e-05, %v9548_v11  ;;  %v9635_v19 = vmul.f32 %v11797_v58, %v16306_v54 }
 0x8b3   : > { %11403 = vmatmul.mubr.msk.f32.gmra.mxu1 %vm17376_vm8, %v9737_v22  ;;  %v9493_v39 = vpop.xlane.xlu1 %9492  ;;  %v9496_v29 = vpop.xlane.xlu0 %9495  ;;  %v9707_v51 = vadd.f32 %v16457_v53, %v9670_v61  ;;  %v9708_v8 = vadd.f32 %v16457_v53, %v9671_v35  ;;  %v9636_v49 = vmul.f32 %v11799_v57, %v16309_v30  ;;  %vm17391_vm8 = vmmov %vm17319_vm0 }
 0x8b4   : > { %11812 = vrsqrt.f32 %v9579_v32  ;;  %v9549_v36 = vmul.f32 0.03125, %v9493_v39  ;;  %11405 = vmatprep.mubr.msk.f32.mxu1 %vm17377_vm2, %v9738_v62  ;;  %v9550_v63 = vmul.f32 0.03125, %v9496_v29  ;;  %v9672_v33 = vmul.f32 %v16451_v16, %v9635_v19  ;;  %vm17392_vm2 = vmmov %vm17319_vm0 }
 0x8b5   : > { %v11801_v3 = vpop.eup %11800  ;;  %11814 = vrsqrt.f32 %v9580_v7  ;;  %v9739_v54 = vmax.f32 %v9707_v51, 0.0  ;;  %v9740_v15 = vmax.f32 %v9708_v8, 0.0  ;;  %v9673_v46 = vmul.f32 %v16451_v16, %v9636_v49 }
 0x8b6   : > { %v11803_v4 = vpop.eup %11802  ;;  %v9581_v9 = vadd.f32 1e-05, %v9549_v36  ;;  %v9582_v50 = vadd.f32 1e-05, %v9550_v63  ;;  %v9709_v44 = vadd.f32 %v16457_v53, %v9672_v33  ;;  %v9637_v30 = vmul.f32 %v11801_v3, %v16318_v24 }
 0x8b7   : > { %11406 = vmatmul.mubr.msk.f32.gmra.mxu1 %vm17378_vm14, %v9739_v54  ;;  %v9499_v37 = vpop.xlane.xlu1 %9498  ;;  %v9502_v48 = vpop.xlane.xlu0 %9501  ;;  %v9710_v26 = vadd.f32 %v16457_v53, %v9673_v46  ;;  %v9638_v5 = vmul.f32 %v11803_v4, %v16321_v21  ;;  %vm17393_vm14 = vmmov %vm17319_vm0 }
 0x8b8   : > { %11816 = vrsqrt.f32 %v9581_v9  ;;  %v9551_v56 = vmul.f32 0.03125, %v9499_v37  ;;  %11408 = vmatprep.mubr.msk.f32.mxu1 %vm17379_vm5, %v9740_v15  ;;  %v9552_v43 = vmul.f32 0.03125, %v9502_v48  ;;  %v9741_v18 = vmax.f32 %v9709_v44, 0.0  ;;  %vm17394_vm5 = vmmov %vm17319_vm0 }
 0x8b9   : > { %v11805_v20 = vpop.eup %11804  ;;  %11818 = vrsqrt.f32 %v9582_v50  ;;  %v9742_v13 = vmax.f32 %v9710_v26, 0.0  ;;  %v9674_v45 = vmul.f32 %v16451_v16, %v9637_v30  ;;  %v9675_v24 = vmul.f32 %v16451_v16, %v9638_v5 }
 0x8ba   : > { %v11807_v1 = vpop.eup %11806  ;;  %v9583_v55 = vadd.f32 1e-05, %v9551_v56  ;;  %v9584_v40 = vadd.f32 1e-05, %v9552_v43  ;;  %v9639_v42 = vmul.f32 %v11805_v20, %v16330_v59 }
 0x8bb   : > { %11409 = vmatmul.mubr.msk.f32.gmra.mxu1 %vm17319_vm0, %v9741_v18  ;;  %v9505_v21 = vpop.xlane.xlu1 %9504  ;;  %v9508_v11 = vpop.xlane.xlu0 %9507  ;;  %v9711_v22 = vadd.f32 %v16457_v53, %v9674_v45  ;;  %v9712_v58 = vadd.f32 %v16457_v53, %v9675_v24  ;;  %v9640_v62 = vmul.f32 %v11807_v1, %v16333_v14 }
 0x8bc   : > { %11820 = vrsqrt.f32 %v9583_v55  ;;  %v9553_v61 = vmul.f32 0.03125, %v9505_v21  ;;  %11411 = vmatprep.mubr.msk.f32.mxu1 %vm17380_vm4, %v9742_v13  ;;  %v9554_v35 = vmul.f32 0.03125, %v9508_v11  ;;  %v9676_v57 = vmul.f32 %v16451_v16, %v9639_v42  ;;  %vm17395_vm4 = vmmov %vm17319_vm0 }
 0x8bd   : > { %v11809_v32 = vpop.eup %11808  ;;  %11822 = vrsqrt.f32 %v9584_v40  ;;  %v9743_v59 = vmax.f32 %v9711_v22, 0.0  ;;  %v9744_v7 = vmax.f32 %v9712_v58, 0.0  ;;  %v9677_v19 = vmul.f32 %v16451_v16, %v9640_v62 }
 0x8be   : > { %v11811_v39 = vpop.eup %11810  ;;  %v9585_v29 = vadd.f32 1e-05, %v9553_v61  ;;  %v9586_v51 = vadd.f32 1e-05, %v9554_v35  ;;  %v9713_v8 = vadd.f32 %v16457_v53, %v9676_v57  ;;  %v9641_v14 = vmul.f32 %v11809_v32, %v16342_v6 }
 0x8bf   : > { %11412 = vmatmul.mubr.msk.f32.gmra.mxu1 %vm17381_vm9, %v9743_v59  ;;  %v9511_v49 = vpop.xlane.xlu1 %9510  ;;  %v9514_v36 = vpop.xlane.xlu0 %9513  ;;  %v9714_v63 = vadd.f32 %v16457_v53, %v9677_v19  ;;  %v9642_v33 = vmul.f32 %v11811_v39, %v16345_v10  ;;  %vm17396_vm9 = vmmov %vm17319_vm0 }
 0x8c0   : > { %11824 = vrsqrt.f32 %v9585_v29  ;;  %v9555_v3 = vmul.f32 0.03125, %v9511_v49  ;;  %11414 = vmatprep.mubr.msk.f32.mxu1 %vm17382_vm1, %v9744_v7  ;;  %v9556_v54 = vmul.f32 0.03125, %v9514_v36  ;;  %v9745_v15 = vmax.f32 %v9713_v8, 0.0  ;;  %vm17397_vm1 = vmmov %vm17319_vm0 }
 0x8c1   : > { %v11813_v46 = vpop.eup %11812  ;;  %11826 = vrsqrt.f32 %v9586_v51  ;;  %v9746_v4 = vmax.f32 %v9714_v63, 0.0  ;;  %v9678_v9 = vmul.f32 %v16451_v16, %v9641_v14  ;;  %v9679_v6 = vmul.f32 %v16451_v16, %v9642_v33 }
 0x8c2   : > { %v11815_v50 = vpop.eup %11814  ;;  %v9643_v44 = vmul.f32 %v11813_v46, %v16354_v2  ;;  %v9587_v30 = vadd.f32 1e-05, %v9555_v3  ;;  %v9588_v37 = vadd.f32 1e-05, %v9556_v54 }
 0x8c3   : > { %11415 = vmatmul.mubr.msk.f32.gmra.mxu1 %vm17383_vm7, %v9745_v15  ;;  %v9517_v10 = vpop.xlane.xlu1 %9516  ;;  %v9520_v48 = vpop.xlane.xlu0 %9519  ;;  %v9715_v26 = vadd.f32 %v16457_v53, %v9678_v9  ;;  %v9716_v5 = vadd.f32 %v16457_v53, %v9679_v6  ;;  %v9644_v56 = vmul.f32 %v11815_v50, %v16357_v52  ;;  %vm17398_vm7 = vmmov %vm17319_vm0 }
 0x8c4   : > { %11828 = vrsqrt.f32 %v9587_v30  ;;  %v9557_v43 = vmul.f32 0.03125, %v9517_v10  ;;  %11417 = vmatprep.mubr.msk.f32.mxu1 %vm17384_vm11, %v9746_v4  ;;  %v9558_v18 = vmul.f32 0.03125, %v9520_v48  ;;  %v9680_v20 = vmul.f32 %v16451_v16, %v9643_v44  ;;  %vm17399_vm11 = vmmov %vm17319_vm0 }
 0x8c5   : > { %v11817_v2 = vpop.eup %11816  ;;  %11830 = vrsqrt.f32 %v9588_v37  ;;  %v9747_v13 = vmax.f32 %v9715_v26, 0.0  ;;  %v9748_v45 = vmax.f32 %v9716_v5, 0.0  ;;  %v9681_v24 = vmul.f32 %v16451_v16, %v9644_v56 }
 0x8c6   : > { %v11819_v1 = vpop.eup %11818  ;;  %v9645_v55 = vmul.f32 %v11817_v2, %v16369_v60  ;;  %v9589_v40 = vadd.f32 1e-05, %v9557_v43  ;;  %v9590_v42 = vadd.f32 1e-05, %v9558_v18  ;;  %v9717_v52 = vadd.f32 %v16457_v53, %v9680_v20 }
 0x8c7   : > { %11418 = vmatmul.mubr.msk.f32.gmra.mxu1 %vm17385_vm10, %v9747_v13  ;;  %v9523_v21 = vpop.xlane.xlu1 %9522  ;;  %v9526_v11 = vpop.xlane.xlu0 %9525  ;;  %v9718_v22 = vadd.f32 %v16457_v53, %v9681_v24  ;;  %v9646_v58 = vmul.f32 %v11819_v1, %v16372_v38  ;;  %vm17400_vm10 = vmmov %vm17319_vm0 }
 0x8c8   : > { %11832 = vrsqrt.f32 %v9589_v40  ;;  %v9559_v62 = vmul.f32 0.03125, %v9523_v21  ;;  %11420 = vmatprep.mubr.msk.f32.mxu1 %vm17386_vm13, %v9748_v45  ;;  %v9560_v61 = vmul.f32 0.03125, %v9526_v11  ;;  %v9749_v35 = vmax.f32 %v9717_v52, 0.0  ;;  %vm17401_vm13 = vmmov %vm17319_vm0 }
 0x8c9   : > { %v11821_v57 = vpop.eup %11820  ;;  %11834 = vrsqrt.f32 %v9590_v42  ;;  %v9750_v60 = vmax.f32 %v9718_v22, 0.0  ;;  %v9682_v32 = vmul.f32 %v16451_v16, %v9645_v55  ;;  %v9683_v59 = vmul.f32 %v16451_v16, %v9646_v58 }
 0x8ca   : > { %v11823_v7 = vpop.eup %11822  ;;  %v9647_v19 = vmul.f32 %v11821_v57, %v16381_v47  ;;  %v9591_v39 = vadd.f32 1e-05, %v9559_v62  ;;  %v9592_v29 = vadd.f32 1e-05, %v9560_v61 }
 0x8cb   : > { %11421 = vmatmul.mubr.msk.f32.gmra.mxu1 %vm17387_vm6, %v9749_v35  ;;  %v9529_v38 = vpop.xlane.xlu1 %9528  ;;  %v9719_v51 = vadd.f32 %v16457_v53, %v9682_v32  ;;  %v9720_v8 = vadd.f32 %v16457_v53, %v9683_v59  ;;  %v9648_v14 = vmul.f32 %v11823_v7, %v16384_v41  ;;  %vm17402_vm6 = vmmov %vm17319_vm0 }
 0x8cc   : > { %11836 = vrsqrt.f32 %v9591_v39  ;;  %v9561_v49 = vmul.f32 0.03125, %v9529_v38  ;;  %11423 = vmatprep.mubr.msk.f32.mxu1 %vm17388_vm12, %v9750_v60  ;;  %v9684_v36 = vmul.f32 %v16451_v16, %v9647_v19  ;;  %vm17403_vm12 = vmmov %vm17319_vm0 }
 0x8cd   : > { %v11825_v63 = vpop.eup %11824  ;;  %11838 = vrsqrt.f32 %v9592_v29  ;;  %v9751_v47 = vmax.f32 %v9719_v51, 0.0  ;;  %v9752_v33 = vmax.f32 %v9720_v8, 0.0  ;;  %v9685_v3 = vmul.f32 %v16451_v16, %v9648_v14 }
 0x8ce   : > { %v11827_v54 = vpop.eup %11826  ;;  %v9649_v15 = vmul.f32 %v11825_v63, %v16393_v23  ;;  %v9593_v46 = vadd.f32 1e-05, %v9561_v49  ;;  %v9721_v4 = vadd.f32 %v16457_v53, %v9684_v36 }
 0x8cf   : > { %11424 = vmatmul.mubr.msk.f32.gmra.mxu1 %vm17389_vm15, %v9751_v47  ;;  %v9722_v41 = vadd.f32 %v16457_v53, %v9685_v3  ;;  %v9650_v9 = vmul.f32 %v11827_v54, %v16396_v0  ;;  %vm17404_vm15 = vmmov %vm17319_vm0 }
 0x8d0   : > { %11840 = vrsqrt.f32 %v9593_v46  ;;  %11426 = vmatprep.mubr.msk.f32.mxu1 %vm17390_vm3, %v9752_v33  ;;  %v9753_v6 = vmax.f32 %v9721_v4, 0.0  ;;  %v9686_v50 = vmul.f32 %v16451_v16, %v9649_v15  ;;  %vm17405_vm3 = vmmov %vm17319_vm0 }
 0x8d1   : > { %v11829_v44 = vpop.eup %11828  ;;  %v9754_v30 = vmax.f32 %v9722_v41, 0.0  ;;  %v9687_v37 = vmul.f32 %v16451_v16, %v9650_v9 }
 0x8d2   : > { %v11831_v23 = vpop.eup %11830  ;;  %v9651_v10 = vmul.f32 %v11829_v44, %v16405_v12  ;;  %v9723_v48 = vadd.f32 %v16457_v53, %v9686_v50 }
 0x8d3   : > { %11427 = vmatmul.mubr.msk.f32.gmra.mxu1 %vm17391_vm8, %v9753_v6  ;;  %v9724_v26 = vadd.f32 %v16457_v53, %v9687_v37  ;;  %v9652_v0 = vmul.f32 %v11831_v23, %v16408_v34  ;;  %vm17406_vm8 = vmmov %vm17319_vm0 }
 0x8d4   : > { %11429 = vmatprep.mubr.msk.f32.mxu1 %vm17392_vm2, %v9754_v30  ;;  %v9755_v5 = vmax.f32 %v9723_v48, 0.0  ;;  %v9688_v56 = vmul.f32 %v16451_v16, %v9651_v10  ;;  %vm17407_vm2 = vmmov %vm17319_vm0 }
 0x8d5   : > { %v11833_v43 = vpop.eup %11832  ;;  %v9756_v18 = vmax.f32 %v9724_v26, 0.0  ;;  %v9689_v20 = vmul.f32 %v16451_v16, %v9652_v0 }
 0x8d6   : > { %v11835_v2 = vpop.eup %11834  ;;  %v9653_v12 = vmul.f32 %v11833_v43, %v16417_v28  ;;  %v9725_v13 = vadd.f32 %v16457_v53, %v9688_v56 }
 0x8d7   : > { %11430 = vmatmul.mubr.msk.f32.gmra.mxu1 %vm17393_vm14, %v9755_v5  ;;  %v9726_v45 = vadd.f32 %v16457_v53, %v9689_v20  ;;  %v9654_v34 = vmul.f32 %v11835_v2, %v16420_v25  ;;  %vm17408_vm14 = vmmov %vm17319_vm0 }
 0x8d8   : > { %11432 = vmatprep.mubr.msk.f32.mxu1 %vm17394_vm5, %v9756_v18  ;;  %v9757_v24 = vmax.f32 %v9725_v13, 0.0  ;;  %v9690_v1 = vmul.f32 %v16451_v16, %v9653_v12  ;;  %vm17409_vm5 = vmmov %vm17319_vm0 }
 0x8d9   : > { %v11837_v55 = vpop.eup %11836  ;;  %v9758_v40 = vmax.f32 %v9726_v45, 0.0  ;;  %v9691_v42 = vmul.f32 %v16451_v16, %v9654_v34 }
 0x8da   : > { %v11839_v52 = vpop.eup %11838  ;;  %v9655_v28 = vmul.f32 %v11837_v55, %v16429_v27  ;;  %v9727_v21 = vadd.f32 %v16457_v53, %v9690_v1 }
 0x8db   : > { %11433 = vmatmul.mubr.msk.f32.gmra.mxu1 %vm17319_vm0, %v9757_v24  ;;  %v9728_v11 = vadd.f32 %v16457_v53, %v9691_v42  ;;  %v9656_v25 = vmul.f32 %v11839_v52, %v16432_v17 }
 0x8dc   : > { %11435 = vmatprep.mubr.msk.f32.mxu1 %vm17395_vm4, %v9758_v40  ;;  %v9759_v22 = vmax.f32 %v9727_v21, 0.0  ;;  %v9692_v58 = vmul.f32 %v16451_v16, %v9655_v28  ;;  %vm17410_vm4 = vmmov %vm17319_vm0 }
 0x8dd   : > { %v11841_v62 = vpop.eup %11840  ;;  %v9760_v61 = vmax.f32 %v9728_v11, 0.0  ;;  %v9693_v35 = vmul.f32 %v16451_v16, %v9656_v25 }
 0x8de   : > { %v9657_v27 = vmul.f32 %v11841_v62, %v16441_v31  ;;  %v9729_v57 = vadd.f32 %v16457_v53, %v9692_v58  ;;  %v16589_v31 = vld [vmem:[%s16705_s8 + $0x3] ss:$0 sm:$0xff] }
 0x8df   : > { %11436 = vmatmul.mubr.msk.f32.gmra.mxu1 %vm17396_vm9, %v9759_v22  ;;  %v9730_v60 = vadd.f32 %v16457_v53, %v9693_v35  ;;  %vm17411_vm9 = vmmov %vm17319_vm0 }
 0x8e0   : > { %11438 = vmatprep.mubr.msk.f32.mxu1 %vm17397_vm1, %v9760_v61  ;;  %v9761_v17 = vmax.f32 %v9729_v57, 0.0  ;;  %v9694_v32 = vmul.f32 %v16451_v16, %v9657_v27  ;;  %vm17412_vm1 = vmmov %vm17319_vm0 }
 0x8e1   : > { %v9762_v59 = vmax.f32 %v9730_v60, 0.0 }
 0x8e2   : > { %v9731_v7 = vadd.f32 %v16457_v53, %v9694_v32 }
 0x8e3   : > { %11439 = vmatmul.mubr.msk.f32.gmra.mxu1 %vm17398_vm7, %v9761_v17  ;;  %vm17413_vm7 = vmmov %vm17319_vm0 }
 0x8e4   : > { %11441 = vmatprep.mubr.msk.f32.mxu1 %vm17399_vm11, %v9762_v59  ;;  %v9763_v19 = vmax.f32 %v9731_v7, 0.0  ;;  %vm17414_vm11 = vmmov %vm17319_vm0 }
 0x8e7   : > { %11442 = vmatmul.mubr.msk.f32.gmra.mxu1 %vm17400_vm10, %v9763_v19  ;;  %vm17415_vm10 = vmmov %vm17319_vm0 }
 0x969   : > { %v11398_v16 = vpop.f32.mrf.mxu1 }
 0x96a   : > { %v9941_v53 = vadd.f32 %v11398_v16, %v16589_v31 }
 0x96b   : > { %v9935_v39 = vpop.f32.mrf.mxu1 }
 0x96c   : > { %10095 = vst.msk [vmem:[%s16596_s28 + $0x8] sm:$0xff] %vm17401_vm13, %v9941_v53  ;;  %v9936_v29 = vadd.f32 %v16589_v31, %v9935_v39  ;;  %vm17416_vm13 = vmmov %vm17319_vm0 }
 0x96e   : > { %10094 = vst.msk [vmem:[%s16596_s28] sm:$0xff] %vm17402_vm6, %v9936_v29  ;;  %vm17417_vm6 = vmmov %vm17319_vm0 }
 0x96f   : > { %v11401_v38 = vpop.f32.mrf.mxu1 }
 0x970   : > { %v9951_v51 = vadd.f32 %v11401_v38, %v16589_v31 }
 0x971   : > { %v9945_v8 = vpop.f32.mrf.mxu1 }
 0x972   : > { %10097 = vst.msk [vmem:[%s16596_s28 + $0x18] sm:$0xff] %vm17403_vm12, %v9951_v51  ;;  %v9946_v14 = vadd.f32 %v16589_v31, %v9945_v8  ;;  %vm17418_vm12 = vmmov %vm17319_vm0 }
 0x973   : > { %v11404_v49 = vpop.f32.mrf.mxu1 }
 0x974   : > { %10096 = vst.msk [vmem:[%s16596_s28 + $0x10] sm:$0xff] %vm17404_vm15, %v9946_v14  ;;  %v9961_v36 = vadd.f32 %v11404_v49, %v16589_v31  ;;  %vm17419_vm15 = vmmov %vm17319_vm0 }
 0x975   : > { %v9955_v63 = vpop.f32.mrf.mxu1 }
 0x976   : > { %10099 = vst.msk [vmem:[%s16596_s28 + $0x28] sm:$0xff] %vm17405_vm3, %v9961_v36  ;;  %v9956_v47 = vadd.f32 %v16589_v31, %v9955_v63  ;;  %vm17420_vm3 = vmmov %vm17319_vm0 }
 0x977   : > { %v11407_v33 = vpop.f32.mrf.mxu1 }
 0x978   : > { %10098 = vst.msk [vmem:[%s16596_s28 + $0x20] sm:$0xff] %vm17406_vm8, %v9956_v47  ;;  %v9971_v3 = vadd.f32 %v11407_v33, %v16589_v31  ;;  %vm17421_vm8 = vmmov %vm17319_vm0 }
 0x979   : > { %v9965_v54 = vpop.f32.mrf.mxu1 }
 0x97a   : > { %10101 = vst.msk [vmem:[%s16596_s28 + $0x38] sm:$0xff] %vm17407_vm2, %v9971_v3  ;;  %v9966_v15 = vadd.f32 %v16589_v31, %v9965_v54  ;;  %vm17422_vm2 = vmmov %vm17319_vm0 }
 0x97b   : > { %v11410_v46 = vpop.f32.mrf.mxu1 }
 0x97c   : > { %10100 = vst.msk [vmem:[%s16596_s28 + $0x30] sm:$0xff] %vm17408_vm14, %v9966_v15  ;;  %v9981_v4 = vadd.f32 %v11410_v46, %v16589_v31  ;;  %vm17423_vm14 = vmmov %vm17319_vm0 }
 0x97d   : > { %v9975_v41 = vpop.f32.mrf.mxu1 }
 0x97e   : > { %10103 = vst.msk [vmem:[%s16596_s28 + $0x48] sm:$0xff] %vm17409_vm5, %v9981_v4  ;;  %v9976_v9 = vadd.f32 %v16589_v31, %v9975_v41  ;;  %vm17424_vm5 = vmmov %vm17319_vm0 }
 0x97f   : > { %v11413_v6 = vpop.f32.mrf.mxu1 }
 0x980   : > { %10102 = vst.msk [vmem:[%s16596_s28 + $0x40] sm:$0xff] %vm17319_vm0, %v9976_v9  ;;  %v9991_v50 = vadd.f32 %v11413_v6, %v16589_v31 }
 0x981   : > { %v9985_v44 = vpop.f32.mrf.mxu1 }
 0x982   : > { %10105 = vst.msk [vmem:[%s16596_s28 + $0x58] sm:$0xff] %vm17410_vm4, %v9991_v50  ;;  %v9986_v30 = vadd.f32 %v16589_v31, %v9985_v44  ;;  %vm17425_vm4 = vmmov %vm17319_vm0 }
 0x983   : > { %v11416_v37 = vpop.f32.mrf.mxu1 }
 0x984   : > { %10104 = vst.msk [vmem:[%s16596_s28 + $0x50] sm:$0xff] %vm17411_vm9, %v9986_v30  ;;  %v10001_v23 = vadd.f32 %v11416_v37, %v16589_v31  ;;  %vm17426_vm9 = vmmov %vm17319_vm0 }
 0x985   : > { %v9995_v10 = vpop.f32.mrf.mxu1 }
 0x986   : > { %10107 = vst.msk [vmem:[%s16596_s28 + $0x68] sm:$0xff] %vm17412_vm1, %v10001_v23  ;;  %v9996_v48 = vadd.f32 %v16589_v31, %v9995_v10  ;;  %vm17427_vm1 = vmmov %vm17319_vm0 }
 0x987   : > { %v11419_v26 = vpop.f32.mrf.mxu1 }
 0x988   : > { %10106 = vst.msk [vmem:[%s16596_s28 + $0x60] sm:$0xff] %vm17413_vm7, %v9996_v48  ;;  %v10011_v0 = vadd.f32 %v11419_v26, %v16589_v31  ;;  %vm17428_vm7 = vmmov %vm17319_vm0 }
 0x989   : > { %v10005_v5 = vpop.f32.mrf.mxu1 }
 0x98a   : > { %10109 = vst.msk [vmem:[%s16596_s28 + $0x78] sm:$0xff] %vm17414_vm11, %v10011_v0  ;;  %v10006_v56 = vadd.f32 %v16589_v31, %v10005_v5  ;;  %vm17429_vm11 = vmmov %vm17319_vm0 }
 0x98b   : > { %v11422_v43 = vpop.f32.mrf.mxu1 }
 0x98c   : > { %10108 = vst.msk [vmem:[%s16596_s28 + $0x70] sm:$0xff] %vm17415_vm10, %v10006_v56  ;;  %v10021_v18 = vadd.f32 %v11422_v43, %v16589_v31  ;;  %vm17430_vm10 = vmmov %vm17319_vm0 }
 0x98d   : > { %v10015_v20 = vpop.f32.mrf.mxu1 }
 0x98e   : > { %10111 = vst.msk [vmem:[%s16596_s28 + $0x88] sm:$0xff] %vm17416_vm13, %v10021_v18  ;;  %v10016_v2 = vadd.f32 %v16589_v31, %v10015_v20 }
 0x98f   : > { %v11425_v12 = vpop.f32.mrf.mxu1 }
 0x990   : > { %10110 = vst.msk [vmem:[%s16596_s28 + $0x80] sm:$0xff] %vm17417_vm6, %v10016_v2  ;;  %v10031_v13 = vadd.f32 %v11425_v12, %v16589_v31 }
 0x991   : > { %v10025_v45 = vpop.f32.mrf.mxu1 }
 0x992   : > { %10113 = vst.msk [vmem:[%s16596_s28 + $0x98] sm:$0xff] %vm17418_vm12, %v10031_v13  ;;  %v10026_v34 = vadd.f32 %v16589_v31, %v10025_v45 }
 0x993   : > { %v11428_v24 = vpop.f32.mrf.mxu1 }
 0x994   : > { %10112 = vst.msk [vmem:[%s16596_s28 + $0x90] sm:$0xff] %vm17419_vm15, %v10026_v34  ;;  %v10041_v1 = vadd.f32 %v11428_v24, %v16589_v31 }
 0x995   : > { %v10035_v55 = vpop.f32.mrf.mxu1 }
 0x996   : > { %10115 = vst.msk [vmem:[%s16596_s28 + $0xa8] sm:$0xff] %vm17420_vm3, %v10041_v1  ;;  %v10036_v40 = vadd.f32 %v16589_v31, %v10035_v55 }
 0x997   : > { %v11431_v42 = vpop.f32.mrf.mxu1 }
 0x998   : > { %10114 = vst.msk [vmem:[%s16596_s28 + $0xa0] sm:$0xff] %vm17421_vm8, %v10036_v40  ;;  %v10051_v52 = vadd.f32 %v11431_v42, %v16589_v31 }
 0x999   : > { %v10045_v28 = vpop.f32.mrf.mxu1 }
 0x99a   : > { %10117 = vst.msk [vmem:[%s16596_s28 + $0xb8] sm:$0xff] %vm17422_vm2, %v10051_v52  ;;  %v10046_v21 = vadd.f32 %v16589_v31, %v10045_v28 }
 0x99b   : > { %v11434_v11 = vpop.f32.mrf.mxu1 }
 0x99c   : > { %10116 = vst.msk [vmem:[%s16596_s28 + $0xb0] sm:$0xff] %vm17423_vm14, %v10046_v21  ;;  %v10061_v25 = vadd.f32 %v11434_v11, %v16589_v31 }
 0x99d   : > { %v10055_v22 = vpop.f32.mrf.mxu1 }
 0x99e   : > { %10119 = vst.msk [vmem:[%s16596_s28 + $0xc8] sm:$0xff] %vm17424_vm5, %v10061_v25  ;;  %v10056_v58 = vadd.f32 %v16589_v31, %v10055_v22 }
 0x99f   : > { %v11437_v62 = vpop.f32.mrf.mxu1 }
 0x9a0   : > { %10118 = vst.msk [vmem:[%s16596_s28 + $0xc0] sm:$0xff] %vm17319_vm0, %v10056_v58  ;;  %v10071_v61 = vadd.f32 %v11437_v62, %v16589_v31 }
 0x9a1   : > { %v10065_v35 = vpop.f32.mrf.mxu1 }
 0x9a2   : > { %10121 = vst.msk [vmem:[%s16596_s28 + $0xd8] sm:$0xff] %vm17425_vm4, %v10071_v61  ;;  %v10066_v27 = vadd.f32 %v16589_v31, %v10065_v35 }
 0x9a3   : > { %v11440_v57 = vpop.f32.mrf.mxu1 }
 0x9a4   : > { %10120 = vst.msk [vmem:[%s16596_s28 + $0xd0] sm:$0xff] %vm17426_vm9, %v10066_v27  ;;  %v10081_v60 = vadd.f32 %v11440_v57, %v16589_v31 }
 0x9a5   : > { %v10075_v17 = vpop.f32.mrf.mxu1 }
 0x9a6   : > { %10123 = vst.msk [vmem:[%s16596_s28 + $0xe8] sm:$0xff] %vm17427_vm1, %v10081_v60  ;;  %v10076_v32 = vadd.f32 %v16589_v31, %v10075_v17 }
 0x9a7   : > { %v11443_v59 = vpop.f32.mrf.mxu1 }
 0x9a8   : > { %10122 = vst.msk [vmem:[%s16596_s28 + $0xe0] sm:$0xff] %vm17428_vm7, %v10076_v32  ;;  %v10091_v7 = vadd.f32 %v11443_v59, %v16589_v31 }
 0x9a9   : > { %v10085_v19 = vpop.f32.mrf.mxu1 }
 0x9aa   : > { %10125 = vst.msk [vmem:[%s16596_s28 + $0xf8] sm:$0xff] %vm17429_vm11, %v10091_v7  ;;  %v10086_v16 = vadd.f32 %v16589_v31, %v10085_v19 }
 0x9ac   : > { %10124 = vst.msk [vmem:[%s16596_s28 + $0xf0] sm:$0xff] %vm17430_vm10, %v10086_v16 }
 0x9ad PF: > { %s20_s13 = sadd.s32 1, %s11880_s13  }
 0x9ae   : > { %p17_p4 = scmp.ge.s32.totalorder %s20_s13, 4  }
 0x9b0   :  { %19 = sbr.rel (!%p17_p4) target bundleno = 1 (0x1), region = 90 }

</bundles_post_ra>
